<compile_context>
chip_gen: v7x
topology: tpu7x:2x2x1
jax: 0.10.0
libtpu: 0.0.40
codegen_flags: <defaults>
</compile_context>

<pallas_src>
import functools

import jax
import jax.numpy as jnp
from jax.experimental import pallas as pl
from jax.experimental.pallas import tpu as pltpu

LANE = 128
SUBLANE = 8


def _round_up(x, m):
    return (x + m - 1) // m * m


@functools.lru_cache(maxsize=None)
def _roll_matches_jnp():
    """Probe pltpu.roll's rotate-direction convention once (version robustness).

    Returns True  if pltpu.roll(x, s, axis)[i] == x[(i - s) % n]  (jnp.roll),
            False for the opposite convention,
            None  if pltpu.roll is unusable (fallback to jnp.roll in-kernel).
    Must be called outside of jit (it executes a tiny eager pallas_call).
    """
    def probe(x_ref, o_ref):
        o_ref[...] = pltpu.roll(x_ref[...], 1, axis=0)

    try:
        x = jax.lax.broadcasted_iota(jnp.float32, (SUBLANE, LANE), 0)
        y = pl.pallas_call(
            probe, out_shape=jax.ShapeDtypeStruct((SUBLANE, LANE), jnp.float32))(x)
        return bool(jax.device_get(y)[1, 0] == 0.0)
    except Exception:  # pragma: no cover - extremely defensive fallback
        return None


def _make_row_shift(roll_jnp):
    """Returns shift(v, d): u with u[i] = v[(i + d) % n] along axis 0 (d = +-1)."""
    if roll_jnp is None:
        return lambda v, d: jnp.roll(v, -d, axis=0)

    def shift(v, d):
        n = v.shape[0]
        s = (-d) % n if roll_jnp else d % n
        return pltpu.roll(v, s, axis=0)

    return shift


# ----------------------------- kernel-native entry -----------------------------
def basic_block_pallas_padded(x_flat, w1_cat, w2_cat, bn_params, *, height, width):
    """Fused BasicBlock on the kernel-native activation layout (chainable).

    x_flat   : [N, (H+2)*Wp, Cp] bf16 -- NHWC image, zero-padded by 1 spatially,
               width padded to Wp = round_up(W+2, 8), channels padded to Cp
               (multiple of 128), flattened over (row, col).  The output has the
               identical layout/zero-halos, so blocks can be chained directly.
    w?_cat   : [3, Cp, 3*Cp] bf16 -- per kh, the three kw weight matrices
               concatenated along the output-channel axis.
    bn_params: [4, Cp] f32 -- rows = (scale1, shift1, scale2, shift2), folded BN.
    """
    N, HpWp, Cp = x_flat.shape
    H, W = height, width
    Wp = _round_up(W + 2, SUBLANE)
    Hp = H + 2
    assert HpWp == Hp * Wp and Cp % LANE == 0
    assert w1_cat.shape == (3, Cp, 3 * Cp) and w2_cat.shape == (3, Cp, 3 * Cp)
    assert bn_params.shape == (4, Cp)

    # Row-band size: largest divisor of H that is <= 8 (bounds vreg/VMEM pressure
    # while keeping every band store sublane aligned).
    BH = max(d for d in range(1, min(H, SUBLANE) + 1) if H % d == 0)
    n_band = BH * Wp
    n_bands = H // BH

    shift_rows = _make_row_shift(_roll_matches_jnp())

    def kernel(x_ref, w1_ref, w2_ref, bn_ref, o_ref, mid_ref):
        # Valid-output-column mask (cols 1..W of every Wp-wide row). Band periodic,
        # hoisted out of the band loops.
        col = jax.lax.broadcasted_iota(jnp.int32, (n_band, Cp), 0) % Wp
        col_mask = (col >= 1) & (col <= W)
        halo_zero = jnp.zeros((Wp, Cp), jnp.float32)

        s1 = bn_ref[0:1, :]
        b1 = bn_ref[1:2, :]
        s2 = bn_ref[2:3, :]
        b2 = bn_ref[3:4, :]

        # Zero only the halo rows; the interior is fully overwritten each step and
        # halo columns are handled by col_mask.  (Per-step, not program_id-gated:
        # scratch is per-core under megacore sharding.)
        mid_ref[0:Wp, :] = halo_zero.astype(mid_ref.dtype)
        mid_ref[(H + 1) * Wp:(H + 2) * Wp, :] = halo_zero.astype(mid_ref.dtype)
        o_ref[0, 0:Wp, :] = halo_zero.astype(o_ref.dtype)
        o_ref[0, (H + 1) * Wp:(H + 2) * Wp, :] = halo_zero.astype(o_ref.dtype)

        def conv_band(load_rows, w_ref, band):
            """3x3 conv for one band of output rows, f32 accumulation on the MXU."""
            base = band * n_band
            r = None
            for kh in range(3):                           # aligned row slices only
                patch = load_rows(base + kh * Wp)         # (n_band, Cp) bf16 view
                part = jnp.dot(patch, w_ref[kh],          # (Cp, 3*Cp): kw concat
                               preferred_element_type=jnp.float32)
                r = part if r is None else r + part
            # Resolve the kw=0 / kw=2 horizontal shifts on the f32 partial sums
            # (XLU rotate) instead of via sublane-misaligned loads.  Wraparound only
            # touches halo columns, which are masked / sliced away.
            return (shift_rows(r[:, :Cp], -1)
                    + r[:, Cp:2 * Cp]
                    + shift_rows(r[:, 2 * Cp:], +1))

        load_x = lambda s: x_ref[0, s:s + n_band, :]
        load_mid = lambda s: mid_ref[s:s + n_band, :]

        # conv1 -> BN1 -> ReLU -> mid (VMEM resident, no HBM round trip).
        for band in range(n_bands):
            y1 = conv_band(load_x, w1_ref, band)
            h1 = jnp.maximum(y1 * s1 + b1, 0.0)
            h1 = jnp.where(col_mask, h1, 0.0)             # zero halo cols for conv2
            mid_ref[Wp + band * n_band:Wp + (band + 1) * n_band, :] = (
                h1.astype(mid_ref.dtype))

        # conv2 -> BN2 -> +identity -> ReLU -> out (same padded layout as input).
        for band in range(n_bands):
            y2 = conv_band(load_mid, w2_ref, band)
            ident = x_ref[0, Wp + band * n_band:Wp + (band + 1) * n_band, :]
            out = jnp.maximum(y2 * s2 + b2 + ident.astype(jnp.float32), 0.0)
            out = jnp.where(col_mask, out, 0.0)           # keep halo columns zero
            o_ref[0, Wp + band * n_band:Wp + (band + 1) * n_band, :] = (
                out.astype(o_ref.dtype))

    flops = 2 * 2 * 9 * N * H * Wp * Cp * Cp              # two 3x3 convs, padded W
    bytes_accessed = (2 * x_flat.size + 2 * (w1_cat.size + w2_cat.size)
                      + 4 * bn_params.size + 2 * N * Hp * Wp * Cp)

    return pl.pallas_call(
        kernel,
        out_shape=jax.ShapeDtypeStruct((N, Hp * Wp, Cp), jnp.bfloat16),
        grid=(N,),
        in_specs=[
            pl.BlockSpec((1, Hp * Wp, Cp), lambda n: (n, 0, 0)),
            # Constant index maps: weights / BN constants stay VMEM resident.
            # TODO(synk): for C >= 512 add pipeline_mode=pl.Buffered(1) here and/or
            # raise vmem_limit_bytes so double-buffered weights fit scoped VMEM on
            # v5e (16 MiB default) and v7x (64 MiB physical).
            pl.BlockSpec((3, Cp, 3 * Cp), lambda n: (0, 0, 0)),
            pl.BlockSpec((3, Cp, 3 * Cp), lambda n: (0, 0, 0)),
            pl.BlockSpec((4, Cp), lambda n: (0, 0)),
        ],
        out_specs=pl.BlockSpec((1, Hp * Wp, Cp), lambda n: (n, 0, 0)),
        scratch_shapes=[pltpu.VMEM((Hp * Wp, Cp), jnp.bfloat16)],
        compiler_params=pltpu.CompilerParams(
            dimension_semantics=("parallel",)),
        cost_estimate=pl.CostEstimate(
            flops=flops, transcendentals=0, bytes_accessed=bytes_accessed),
    )(x_flat, w1_cat, w2_cat, bn_params)


# --------------------------- PyTorch-layout wrappers ---------------------------
def prepare_basic_block_inputs(x_nchw, w1_oihw, bn1, w2_oihw, bn2, *, eps=1e-5):
    """PyTorch layouts -> kernel-native padded layouts (done once per block)."""
    N, C, H, W = x_nchw.shape
    Cout = w1_oihw.shape[0]
    assert C == Cout, "BasicBlock without downsample requires inplanes == planes"
    assert w1_oihw.shape == (Cout, C, 3, 3) and w2_oihw.shape == (Cout, Cout, 3, 3)

    Cp = _round_up(C, LANE)
    Wp = _round_up(W + 2, SUBLANE)

    x_nhwc = jnp.transpose(x_nchw, (0, 2, 3, 1))
    x_pad = jnp.pad(x_nhwc, ((0, 0), (1, 1), (1, Wp - W - 1), (0, Cp - C)))
    x_flat = x_pad.reshape(N, (H + 2) * Wp, Cp).astype(jnp.bfloat16)

    def prep_w(w):
        ci, co = w.shape[1], w.shape[0]
        t = jnp.transpose(w, (2, 3, 1, 0))                          # (kh, kw, Ci, Co)
        t = jnp.pad(t, ((0, 0), (0, 0), (0, Cp - ci), (0, Cp - co)))
        t = jnp.transpose(t, (0, 2, 1, 3)).reshape(3, Cp, 3 * Cp)   # kw concat on N
        return t.astype(jnp.bfloat16)

    def fold_bn(bn):
        gamma, beta, mean, var = bn
        scale = gamma / jnp.sqrt(var + eps)
        shift = beta - mean * scale
        pad = (0, Cp - scale.shape[0])
        return jnp.pad(scale, pad), jnp.pad(shift, pad)

    s1, b1 = fold_bn(bn1)
    s2, b2 = fold_bn(bn2)
    bn_params = jnp.stack([s1, b1, s2, b2]).astype(jnp.float32)     # (4, Cp)

    return x_flat, prep_w(w1_oihw), prep_w(w2_oihw), bn_params


def basic_block_pallas(x_nchw, w1, bn1, w2, bn2, *, eps=1e-5):
    """Convenience wrapper with PyTorch NCHW f32 in / out.

    For chained blocks, prefer feeding the previous block's output straight into
    basic_block_pallas_padded (identical padded bf16 layout; no transpose / pad /
    slice HBM round trips in between).
    """
    N, C, H, W = x_nchw.shape
    Wp = _round_up(W + 2, SUBLANE)
    x_flat, w1c, w2c, bnp = prepare_basic_block_inputs(
        x_nchw, w1, bn1, w2, bn2, eps=eps)
    out_flat = basic_block_pallas_padded(x_flat, w1c, w2c, bnp, height=H, width=W)
    out = out_flat.reshape(N, H + 2, Wp, -1)[:, 1:1 + H, 1:1 + W, :C]
    return jnp.transpose(out, (0, 3, 1, 2)).astype(jnp.float32)


# ----------------------------- pure-JAX reference -----------------------------
def _conv3x3_ref(x_nchw, w_oihw):
    return jax.lax.conv_general_dilated(
        x_nchw, w_oihw, window_strides=(1, 1), padding=((1, 1), (1, 1)),
        dimension_numbers=("NCHW", "OIHW", "NCHW"))


def basic_block_reference(x, w1, bn1, w2, bn2, *, eps=1e-5):
    """Mirrors the kernel's precision choices (bf16 conv inputs / intermediate /
    output, f32 accumulation, BN, residual and ReLU)."""
    def bn_apply(h, bn):
        gamma, beta, mean, var = bn
        inv = (gamma / jnp.sqrt(var + eps))[None, :, None, None]
        return (h - mean[None, :, None, None]) * inv + beta[None, :, None, None]

    f32 = lambda a: a.astype(jnp.float32)
    bf = lambda a: a.astype(jnp.bfloat16)

    xb, w1b, w2b = f32(bf(x)), f32(bf(w1)), f32(bf(w2))
    h = jnp.maximum(bn_apply(_conv3x3_ref(xb, w1b), bn1), 0.0)
    h = f32(bf(h))
    o = jnp.maximum(bn_apply(_conv3x3_ref(h, w2b), bn2) + xb, 0.0)
    return f32(bf(o))


if __name__ == "__main__":
    key = jax.random.PRNGKey(0)
    (k_x, k_w1, k_w2, k_g1, k_b1, k_g2, k_b2,
     k_m1, k_v1, k_m2, k_v2) = jax.random.split(key, 11)

    # BasicBlock(inplanes=64, planes=64, stride=1, downsample=None), eval mode.
    N, C, H, W = 2, 64, 16, 16
    x = jax.random.normal(k_x, (N, C, H, W), jnp.float32)

    std = (2.0 / (9 * C)) ** 0.5  # kaiming-ish init for 3x3 convs, bias=False
    w1 = std * jax.random.normal(k_w1, (C, C, 3, 3), jnp.float32)
    w2 = std * jax.random.normal(k_w2, (C, C, 3, 3), jnp.float32)

    # BatchNorm2d (eval): (gamma, beta, running_mean, running_var)
    bn1 = (1.0 + 0.1 * jax.random.normal(k_g1, (C,), jnp.float32),
           0.1 * jax.random.normal(k_b1, (C,), jnp.float32),
           0.1 * jax.random.normal(k_m1, (C,), jnp.float32),
           1.0 + 0.1 * jax.random.uniform(k_v1, (C,), jnp.float32))
    bn2 = (1.0 + 0.1 * jax.random.normal(k_g2, (C,), jnp.float32),
           0.1 * jax.random.normal(k_b2, (C,), jnp.float32),
           0.1 * jax.random.normal(k_m2, (C,), jnp.float32),
           1.0 + 0.1 * jax.random.uniform(k_v2, (C,), jnp.float32))

    out = basic_block_pallas(x, w1, bn1, w2, bn2)
    out = jax.block_until_ready(out)

    ref = basic_block_reference(x, w1, bn1, w2, bn2)
    assert out.shape == (N, C, H, W)
    max_err = float(jnp.max(jnp.abs(out - ref)))
    # Tolerance covers bf16 rounding of the conv inputs, intermediate and the
    # bf16 kernel output (documented divergence from PyTorch's all-f32 block).
    assert jnp.allclose(out, ref, atol=2e-2, rtol=2e-2), \
        f"mismatch vs reference (max abs err {max_err})"

    print("KERNEL_OK")
</pallas_src>

<mosaic_0001>
module attributes {stable_mosaic.version = 11 : i64} {
  func.func @probe(%arg0: memref<8x128xf32, #tpu.memory_space<vmem>>, %arg1: memref<8x128xf32, #tpu.memory_space<vmem>>) attributes {dimension_semantics = [], scalar_prefetch = 0 : i64, scratch_operands = 0 : i64, tpu.core_type = #tpu.core_type<tc>} {
    %c0 = arith.constant 0 : index
    %c0_0 = arith.constant 0 : index
    %0 = vector.load %arg0[%c0, %c0_0] : memref<8x128xf32, #tpu.memory_space<vmem>>, vector<8x128xf32>
    %c1_i32 = arith.constant 1 : i32
    %1 = tpu.dynamic_rotate %0 by %c1_i32 dim 0 : vector<8x128xf32>, i32 -> vector<8x128xf32>
    %c0_1 = arith.constant 0 : index
    %c0_2 = arith.constant 0 : index
    %2 = vector.load %arg1[%c0_1, %c0_2] : memref<8x128xf32, #tpu.memory_space<vmem>>, vector<8x128xf32>
    tpu.vector_store %arg1[%c0_1, %c0_2], %1 {strides = array<i32>} : memref<8x128xf32, #tpu.memory_space<vmem>>, vector<8x128xf32>,
    return
  }
}

module attributes {stable_mosaic.version = 11 : i64} {
  func.func @kernel(%arg0: i32, %arg1: memref<1x432x128xbf16, #tpu.memory_space<vmem>>, %arg2: memref<3x128x384xbf16, #tpu.memory_space<vmem>>, %arg3: memref<3x128x384xbf16, #tpu.memory_space<vmem>>, %arg4: memref<4x128xf32, #tpu.memory_space<vmem>>, %arg5: memref<1x432x128xbf16, #tpu.memory_space<vmem>>, %arg6: memref<432x128xbf16, #tpu.memory_space<vmem>>) attributes {dimension_semantics = [#tpu.dimension_semantics<parallel>], iteration_bounds = array<i64: 2>, scalar_prefetch = 0 : i64, scratch_operands = 1 : i64, tpu.core_type = #tpu.core_type<tc>, window_params = [{transform_indices = @transform_0, window_bounds = array<i64: 1, 432, 128>}, {pipeline_mode = #tpu.pipeline_mode<synchronous>, transform_indices = @transform_1, window_bounds = array<i64: 3, 128, 384>}, {pipeline_mode = #tpu.pipeline_mode<synchronous>, transform_indices = @transform_2, window_bounds = array<i64: 3, 128, 384>}, {pipeline_mode = #tpu.pipeline_mode<synchronous>, transform_indices = @transform_3, window_bounds = array<i64: 4, 128>}, {transform_indices = @transform_4, window_bounds = array<i64: 1, 432, 128>}]} {
    %0 = tpu.iota {dimensions = array<i32: 0>} : vector<192x128xi32>
    %c24_i32 = arith.constant 24 : i32
    %c0_i32 = arith.constant 0 : i32
    %1 = arith.cmpi eq, %c24_i32, %c0_i32 : i32
    %c1_i32 = arith.constant 1 : i32
    %2 = arith.select %1, %c1_i32, %c24_i32 : i32
    %3 = vector.broadcast %2 : i32 to vector<192x128xi32>
    %4 = arith.remsi %0, %3 : vector<192x128xi32>
    %c0_i32_0 = arith.constant 0 : i32
    %5 = vector.broadcast %c0_i32_0 : i32 to vector<192x128xi32>
    %6 = arith.cmpi ne, %4, %5 : vector<192x128xi32>
    %c0_i32_1 = arith.constant 0 : i32
    %7 = vector.broadcast %c0_i32_1 : i32 to vector<192x128xi32>
    %8 = arith.cmpi slt, %4, %7 : vector<192x128xi32>
    %c0_i32_2 = arith.constant 0 : i32
    %9 = arith.cmpi slt, %2, %c0_i32_2 : i32
    %10 = vector.broadcast %9 : i1 to vector<192x128xi1>
    %11 = vector.broadcast %10 : vector<192x128xi1> to vector<192x128xi1>
    %12 = arith.xori %8, %11 : vector<192x128xi1>
    %13 = arith.andi %12, %6 : vector<192x128xi1>
    %14 = vector.broadcast %2 : i32 to vector<192x128xi32>
    %15 = arith.addi %4, %14 : vector<192x128xi32>
    %16 = arith.select %13, %15, %4 : vector<192x128xi1>, vector<192x128xi32>
    %c1_i32_3 = arith.constant 1 : i32
    %17 = vector.broadcast %c1_i32_3 : i32 to vector<192x128xi32>
    %18 = arith.cmpi sge, %16, %17 : vector<192x128xi32>
    %c16_i32 = arith.constant 16 : i32
    %19 = vector.broadcast %c16_i32 : i32 to vector<192x128xi32>
    %20 = arith.cmpi sle, %16, %19 : vector<192x128xi32>
    %21 = arith.andi %18, %20 : vector<192x128xi1>
    %cst = arith.constant 0.000000e+00 : f32
    %22 = vector.broadcast %cst : f32 to vector<24x128xf32>
    %c0 = arith.constant 0 : index
    %c0_4 = arith.constant 0 : index
    %23 = vector.load %arg4[%c0, %c0_4] : memref<4x128xf32, #tpu.memory_space<vmem>>, vector<1x128xf32>
    %c1 = arith.constant 1 : index
    %c0_5 = arith.constant 0 : index
    %24 = vector.load %arg4[%c1, %c0_5] : memref<4x128xf32, #tpu.memory_space<vmem>>, vector<1x128xf32>
    %c2 = arith.constant 2 : index
    %c0_6 = arith.constant 0 : index
    %25 = vector.load %arg4[%c2, %c0_6] : memref<4x128xf32, #tpu.memory_space<vmem>>, vector<1x128xf32>
    %c3 = arith.constant 3 : index
    %c0_7 = arith.constant 0 : index
    %26 = vector.load %arg4[%c3, %c0_7] : memref<4x128xf32, #tpu.memory_space<vmem>>, vector<1x128xf32>
    %27 = arith.truncf %22 : vector<24x128xf32> to vector<24x128xbf16>
    %c0_8 = arith.constant 0 : index
    %c0_9 = arith.constant 0 : index
    %28 = vector.load %arg6[%c0_8, %c0_9] : memref<432x128xbf16, #tpu.memory_space<vmem>>, vector<24x128xbf16>
    tpu.vector_store %arg6[%c0_8, %c0_9], %27 {strides = array<i32>} : memref<432x128xbf16, #tpu.memory_space<vmem>>, vector<24x128xbf16>,
    %29 = arith.truncf %22 : vector<24x128xf32> to vector<24x128xbf16>
    %c408 = arith.constant 408 : index
    %c0_10 = arith.constant 0 : index
    %30 = vector.load %arg6[%c408, %c0_10] : memref<432x128xbf16, #tpu.memory_space<vmem>>, vector<24x128xbf16>
    tpu.vector_store %arg6[%c408, %c0_10], %29 {strides = array<i32>} : memref<432x128xbf16, #tpu.memory_space<vmem>>, vector<24x128xbf16>,
    %31 = arith.truncf %22 : vector<24x128xf32> to vector<24x128xbf16>
    %c0_11 = arith.constant 0 : index
    %c0_12 = arith.constant 0 : index
    %c0_13 = arith.constant 0 : index
    %32 = vector.load %arg5[%c0_11, %c0_12, %c0_13] : memref<1x432x128xbf16, #tpu.memory_space<vmem>>, vector<1x24x128xbf16>
    %33 = vector.shape_cast %32 : vector<1x24x128xbf16> to vector<24x128xbf16>
    %34 = vector.shape_cast %31 : vector<24x128xbf16> to vector<1x24x128xbf16>
    tpu.vector_store %arg5[%c0_11, %c0_12, %c0_13], %34 {strides = array<i32>} : memref<1x432x128xbf16, #tpu.memory_space<vmem>>, vector<1x24x128xbf16>,
    %35 = arith.truncf %22 : vector<24x128xf32> to vector<24x128xbf16>
    %c0_14 = arith.constant 0 : index
    %c408_15 = arith.constant 408 : index
    %c0_16 = arith.constant 0 : index
    %36 = vector.load %arg5[%c0_14, %c408_15, %c0_16] : memref<1x432x128xbf16, #tpu.memory_space<vmem>>, vector<1x24x128xbf16>
    %37 = vector.shape_cast %36 : vector<1x24x128xbf16> to vector<24x128xbf16>
    %38 = vector.shape_cast %35 : vector<24x128xbf16> to vector<1x24x128xbf16>
    tpu.vector_store %arg5[%c0_14, %c408_15, %c0_16], %38 {strides = array<i32>} : memref<1x432x128xbf16, #tpu.memory_space<vmem>>, vector<1x24x128xbf16>,
    %c0_17 = arith.constant 0 : index
    %c0_18 = arith.constant 0 : index
    %c0_19 = arith.constant 0 : index
    %39 = vector.load %arg1[%c0_17, %c0_18, %c0_19] : memref<1x432x128xbf16, #tpu.memory_space<vmem>>, vector<1x192x128xbf16>
    %40 = vector.shape_cast %39 : vector<1x192x128xbf16> to vector<192x128xbf16>
    %c0_20 = arith.constant 0 : index
    %c0_21 = arith.constant 0 : index
    %c0_22 = arith.constant 0 : index
    %41 = vector.load %arg2[%c0_20, %c0_21, %c0_22] : memref<3x128x384xbf16, #tpu.memory_space<vmem>>, vector<1x128x384xbf16>
    %42 = vector.shape_cast %41 : vector<1x128x384xbf16> to vector<128x384xbf16>
    %cst_23 = arith.constant dense<0.000000e+00> : vector<192x384xf32>
    %43 = tpu.matmul %40, %42, %cst_23 {dimension_numbers = #tpu.dot_dimension_numbers<[1], [0], [0], [1], [0, 0, 1, 1], [], []>} : vector<192x128xbf16>, vector<128x384xbf16>, vector<192x384xf32> -> vector<192x384xf32>
    %c0_24 = arith.constant 0 : index
    %c24 = arith.constant 24 : index
    %c0_25 = arith.constant 0 : index
    %44 = vector.load %arg1[%c0_24, %c24, %c0_25] : memref<1x432x128xbf16, #tpu.memory_space<vmem>>, vector<1x192x128xbf16>
    %45 = vector.shape_cast %44 : vector<1x192x128xbf16> to vector<192x128xbf16>
    %c1_26 = arith.constant 1 : index
    %c0_27 = arith.constant 0 : index
    %c0_28 = arith.constant 0 : index
    %46 = vector.load %arg2[%c1_26, %c0_27, %c0_28] : memref<3x128x384xbf16, #tpu.memory_space<vmem>>, vector<1x128x384xbf16>
    %47 = vector.shape_cast %46 : vector<1x128x384xbf16> to vector<128x384xbf16>
    %cst_29 = arith.constant dense<0.000000e+00> : vector<192x384xf32>
    %48 = tpu.matmul %45, %47, %cst_29 {dimension_numbers = #tpu.dot_dimension_numbers<[1], [0], [0], [1], [0, 0, 1, 1], [], []>} : vector<192x128xbf16>, vector<128x384xbf16>, vector<192x384xf32> -> vector<192x384xf32>
    %49 = arith.addf %43, %48 : vector<192x384xf32>
    %c0_30 = arith.constant 0 : index
    %c48 = arith.constant 48 : index
    %c0_31 = arith.constant 0 : index
    %50 = vector.load %arg1[%c0_30, %c48, %c0_31] : memref<1x432x128xbf16, #tpu.memory_space<vmem>>, vector<1x192x128xbf16>
    %51 = vector.shape_cast %50 : vector<1x192x128xbf16> to vector<192x128xbf16>
    %c2_32 = arith.constant 2 : index
    %c0_33 = arith.constant 0 : index
    %c0_34 = arith.constant 0 : index
    %52 = vector.load %arg2[%c2_32, %c0_33, %c0_34] : memref<3x128x384xbf16, #tpu.memory_space<vmem>>, vector<1x128x384xbf16>
    %53 = vector.shape_cast %52 : vector<1x128x384xbf16> to vector<128x384xbf16>
    %cst_35 = arith.constant dense<0.000000e+00> : vector<192x384xf32>
    %54 = tpu.matmul %51, %53, %cst_35 {dimension_numbers = #tpu.dot_dimension_numbers<[1], [0], [0], [1], [0, 0, 1, 1], [], []>} : vector<192x128xbf16>, vector<128x384xbf16>, vector<192x384xf32> -> vector<192x384xf32>
    %55 = arith.addf %49, %54 : vector<192x384xf32>
    %56 = vector.extract_strided_slice %55 {offsets = [0, 0], sizes = [192, 128], strides = [1, 1]} : vector<192x384xf32> to vector<192x128xf32>
    %57 = vector.extract_strided_slice %56 {offsets = [191, 0], sizes = [1, 128], strides = [1, 1]} : vector<192x128xf32> to vector<1x128xf32>
    %58 = vector.extract_strided_slice %56 {offsets = [0, 0], sizes = [191, 128], strides = [1, 1]} : vector<192x128xf32> to vector<191x128xf32>
    %59 = tpu.concatenate %57, %58 in 0 : vector<1x128xf32>, vector<191x128xf32> -> vector<192x128xf32>
    %60 = vector.extract_strided_slice %55 {offsets = [0, 128], sizes = [192, 128], strides = [1, 1]} : vector<192x384xf32> to vector<192x128xf32>
    %61 = arith.addf %59, %60 : vector<192x128xf32>
    %62 = vector.extract_strided_slice %55 {offsets = [0, 256], sizes = [192, 128], strides = [1, 1]} : vector<192x384xf32> to vector<192x128xf32>
    %63 = vector.extract_strided_slice %62 {offsets = [1, 0], sizes = [191, 128], strides = [1, 1]} : vector<192x128xf32> to vector<191x128xf32>
    %64 = vector.extract_strided_slice %62 {offsets = [0, 0], sizes = [1, 128], strides = [1, 1]} : vector<192x128xf32> to vector<1x128xf32>
    %65 = tpu.concatenate %63, %64 in 0 : vector<191x128xf32>, vector<1x128xf32> -> vector<192x128xf32>
    %66 = arith.addf %61, %65 : vector<192x128xf32>
    %67 = vector.broadcast %23 : vector<1x128xf32> to vector<192x128xf32>
    %68 = arith.mulf %66, %67 : vector<192x128xf32>
    %69 = vector.broadcast %24 : vector<1x128xf32> to vector<192x128xf32>
    %70 = arith.addf %68, %69 : vector<192x128xf32>
    %cst_36 = arith.constant 0.000000e+00 : f32
    %71 = vector.broadcast %cst_36 : f32 to vector<192x128xf32>
    %72 = arith.maximumf %70, %71 : vector<192x128xf32>
    %cst_37 = arith.constant 0.000000e+00 : f32
    %73 = vector.broadcast %cst_37 : f32 to vector<192x128xf32>
    %74 = arith.select %21, %72, %73 : vector<192x128xi1>, vector<192x128xf32>
    %75 = arith.truncf %74 : vector<192x128xf32> to vector<192x128xbf16>
    %c24_38 = arith.constant 24 : index
    %c0_39 = arith.constant 0 : index
    %76 = vector.load %arg6[%c24_38, %c0_39] : memref<432x128xbf16, #tpu.memory_space<vmem>>, vector<192x128xbf16>
    tpu.vector_store %arg6[%c24_38, %c0_39], %75 {strides = array<i32>} : memref<432x128xbf16, #tpu.memory_space<vmem>>, vector<192x128xbf16>,
    %c0_40 = arith.constant 0 : index
    %c192 = arith.constant 192 : index
    %c0_41 = arith.constant 0 : index
    %77 = vector.load %arg1[%c0_40, %c192, %c0_41] : memref<1x432x128xbf16, #tpu.memory_space<vmem>>, vector<1x192x128xbf16>
    %78 = vector.shape_cast %77 : vector<1x192x128xbf16> to vector<192x128xbf16>
    %c0_42 = arith.constant 0 : index
    %c0_43 = arith.constant 0 : index
    %c0_44 = arith.constant 0 : index
    %79 = vector.load %arg2[%c0_42, %c0_43, %c0_44] : memref<3x128x384xbf16, #tpu.memory_space<vmem>>, vector<1x128x384xbf16>
    %80 = vector.shape_cast %79 : vector<1x128x384xbf16> to vector<128x384xbf16>
    %cst_45 = arith.constant dense<0.000000e+00> : vector<192x384xf32>
    %81 = tpu.matmul %78, %80, %cst_45 {dimension_numbers = #tpu.dot_dimension_numbers<[1], [0], [0], [1], [0, 0, 1, 1], [], []>} : vector<192x128xbf16>, vector<128x384xbf16>, vector<192x384xf32> -> vector<192x384xf32>
    %c0_46 = arith.constant 0 : index
    %c216 = arith.constant 216 : index
    %c0_47 = arith.constant 0 : index
    %82 = vector.load %arg1[%c0_46, %c216, %c0_47] : memref<1x432x128xbf16, #tpu.memory_space<vmem>>, vector<1x192x128xbf16>
    %83 = vector.shape_cast %82 : vector<1x192x128xbf16> to vector<192x128xbf16>
    %c1_48 = arith.constant 1 : index
    %c0_49 = arith.constant 0 : index
    %c0_50 = arith.constant 0 : index
    %84 = vector.load %arg2[%c1_48, %c0_49, %c0_50] : memref<3x128x384xbf16, #tpu.memory_space<vmem>>, vector<1x128x384xbf16>
    %85 = vector.shape_cast %84 : vector<1x128x384xbf16> to vector<128x384xbf16>
    %cst_51 = arith.constant dense<0.000000e+00> : vector<192x384xf32>
    %86 = tpu.matmul %83, %85, %cst_51 {dimension_numbers = #tpu.dot_dimension_numbers<[1], [0], [0], [1], [0, 0, 1, 1], [], []>} : vector<192x128xbf16>, vector<128x384xbf16>, vector<192x384xf32> -> vector<192x384xf32>
    %87 = arith.addf %81, %86 : vector<192x384xf32>
    %c0_52 = arith.constant 0 : index
    %c240 = arith.constant 240 : index
    %c0_53 = arith.constant 0 : index
    %88 = vector.load %arg1[%c0_52, %c240, %c0_53] : memref<1x432x128xbf16, #tpu.memory_space<vmem>>, vector<1x192x128xbf16>
    %89 = vector.shape_cast %88 : vector<1x192x128xbf16> to vector<192x128xbf16>
    %c2_54 = arith.constant 2 : index
    %c0_55 = arith.constant 0 : index
    %c0_56 = arith.constant 0 : index
    %90 = vector.load %arg2[%c2_54, %c0_55, %c0_56] : memref<3x128x384xbf16, #tpu.memory_space<vmem>>, vector<1x128x384xbf16>
    %91 = vector.shape_cast %90 : vector<1x128x384xbf16> to vector<128x384xbf16>
    %cst_57 = arith.constant dense<0.000000e+00> : vector<192x384xf32>
    %92 = tpu.matmul %89, %91, %cst_57 {dimension_numbers = #tpu.dot_dimension_numbers<[1], [0], [0], [1], [0, 0, 1, 1], [], []>} : vector<192x128xbf16>, vector<128x384xbf16>, vector<192x384xf32> -> vector<192x384xf32>
    %93 = arith.addf %87, %92 : vector<192x384xf32>
    %94 = vector.extract_strided_slice %93 {offsets = [0, 0], sizes = [192, 128], strides = [1, 1]} : vector<192x384xf32> to vector<192x128xf32>
    %95 = vector.extract_strided_slice %94 {offsets = [191, 0], sizes = [1, 128], strides = [1, 1]} : vector<192x128xf32> to vector<1x128xf32>
    %96 = vector.extract_strided_slice %94 {offsets = [0, 0], sizes = [191, 128], strides = [1, 1]} : vector<192x128xf32> to vector<191x128xf32>
    %97 = tpu.concatenate %95, %96 in 0 : vector<1x128xf32>, vector<191x128xf32> -> vector<192x128xf32>
    %98 = vector.extract_strided_slice %93 {offsets = [0, 128], sizes = [192, 128], strides = [1, 1]} : vector<192x384xf32> to vector<192x128xf32>
    %99 = arith.addf %97, %98 : vector<192x128xf32>
    %100 = vector.extract_strided_slice %93 {offsets = [0, 256], sizes = [192, 128], strides = [1, 1]} : vector<192x384xf32> to vector<192x128xf32>
    %101 = vector.extract_strided_slice %100 {offsets = [1, 0], sizes = [191, 128], strides = [1, 1]} : vector<192x128xf32> to vector<191x128xf32>
    %102 = vector.extract_strided_slice %100 {offsets = [0, 0], sizes = [1, 128], strides = [1, 1]} : vector<192x128xf32> to vector<1x128xf32>
    %103 = tpu.concatenate %101, %102 in 0 : vector<191x128xf32>, vector<1x128xf32> -> vector<192x128xf32>
    %104 = arith.addf %99, %103 : vector<192x128xf32>
    %105 = vector.broadcast %23 : vector<1x128xf32> to vector<192x128xf32>
    %106 = arith.mulf %104, %105 : vector<192x128xf32>
    %107 = vector.broadcast %24 : vector<1x128xf32> to vector<192x128xf32>
    %108 = arith.addf %106, %107 : vector<192x128xf32>
    %cst_58 = arith.constant 0.000000e+00 : f32
    %109 = vector.broadcast %cst_58 : f32 to vector<192x128xf32>
    %110 = arith.maximumf %108, %109 : vector<192x128xf32>
    %cst_59 = arith.constant 0.000000e+00 : f32
    %111 = vector.broadcast %cst_59 : f32 to vector<192x128xf32>
    %112 = arith.select %21, %110, %111 : vector<192x128xi1>, vector<192x128xf32>
    %113 = arith.truncf %112 : vector<192x128xf32> to vector<192x128xbf16>
    %c216_60 = arith.constant 216 : index
    %c0_61 = arith.constant 0 : index
    %114 = vector.load %arg6[%c216_60, %c0_61] : memref<432x128xbf16, #tpu.memory_space<vmem>>, vector<192x128xbf16>
    tpu.vector_store %arg6[%c216_60, %c0_61], %113 {strides = array<i32>} : memref<432x128xbf16, #tpu.memory_space<vmem>>, vector<192x128xbf16>,
    %c0_62 = arith.constant 0 : index
    %c0_63 = arith.constant 0 : index
    %115 = vector.load %arg6[%c0_62, %c0_63] : memref<432x128xbf16, #tpu.memory_space<vmem>>, vector<192x128xbf16>
    %c0_64 = arith.constant 0 : index
    %c0_65 = arith.constant 0 : index
    %c0_66 = arith.constant 0 : index
    %116 = vector.load %arg3[%c0_64, %c0_65, %c0_66] : memref<3x128x384xbf16, #tpu.memory_space<vmem>>, vector<1x128x384xbf16>
    %117 = vector.shape_cast %116 : vector<1x128x384xbf16> to vector<128x384xbf16>
    %cst_67 = arith.constant dense<0.000000e+00> : vector<192x384xf32>
    %118 = tpu.matmul %115, %117, %cst_67 {dimension_numbers = #tpu.dot_dimension_numbers<[1], [0], [0], [1], [0, 0, 1, 1], [], []>} : vector<192x128xbf16>, vector<128x384xbf16>, vector<192x384xf32> -> vector<192x384xf32>
    %c24_68 = arith.constant 24 : index
    %c0_69 = arith.constant 0 : index
    %119 = vector.load %arg6[%c24_68, %c0_69] : memref<432x128xbf16, #tpu.memory_space<vmem>>, vector<192x128xbf16>
    %c1_70 = arith.constant 1 : index
    %c0_71 = arith.constant 0 : index
    %c0_72 = arith.constant 0 : index
    %120 = vector.load %arg3[%c1_70, %c0_71, %c0_72] : memref<3x128x384xbf16, #tpu.memory_space<vmem>>, vector<1x128x384xbf16>
    %121 = vector.shape_cast %120 : vector<1x128x384xbf16> to vector<128x384xbf16>
    %cst_73 = arith.constant dense<0.000000e+00> : vector<192x384xf32>
    %122 = tpu.matmul %119, %121, %cst_73 {dimension_numbers = #tpu.dot_dimension_numbers<[1], [0], [0], [1], [0, 0, 1, 1], [], []>} : vector<192x128xbf16>, vector<128x384xbf16>, vector<192x384xf32> -> vector<192x384xf32>
    %123 = arith.addf %118, %122 : vector<192x384xf32>
    %c48_74 = arith.constant 48 : index
    %c0_75 = arith.constant 0 : index
    %124 = vector.load %arg6[%c48_74, %c0_75] : memref<432x128xbf16, #tpu.memory_space<vmem>>, vector<192x128xbf16>
    %c2_76 = arith.constant 2 : index
    %c0_77 = arith.constant 0 : index
    %c0_78 = arith.constant 0 : index
    %125 = vector.load %arg3[%c2_76, %c0_77, %c0_78] : memref<3x128x384xbf16, #tpu.memory_space<vmem>>, vector<1x128x384xbf16>
    %126 = vector.shape_cast %125 : vector<1x128x384xbf16> to vector<128x384xbf16>
    %cst_79 = arith.constant dense<0.000000e+00> : vector<192x384xf32>
    %127 = tpu.matmul %124, %126, %cst_79 {dimension_numbers = #tpu.dot_dimension_numbers<[1], [0], [0], [1], [0, 0, 1, 1], [], []>} : vector<192x128xbf16>, vector<128x384xbf16>, vector<192x384xf32> -> vector<192x384xf32>
    %128 = arith.addf %123, %127 : vector<192x384xf32>
    %129 = vector.extract_strided_slice %128 {offsets = [0, 0], sizes = [192, 128], strides = [1, 1]} : vector<192x384xf32> to vector<192x128xf32>
    %130 = vector.extract_strided_slice %129 {offsets = [191, 0], sizes = [1, 128], strides = [1, 1]} : vector<192x128xf32> to vector<1x128xf32>
    %131 = vector.extract_strided_slice %129 {offsets = [0, 0], sizes = [191, 128], strides = [1, 1]} : vector<192x128xf32> to vector<191x128xf32>
    %132 = tpu.concatenate %130, %131 in 0 : vector<1x128xf32>, vector<191x128xf32> -> vector<192x128xf32>
    %133 = vector.extract_strided_slice %128 {offsets = [0, 128], sizes = [192, 128], strides = [1, 1]} : vector<192x384xf32> to vector<192x128xf32>
    %134 = arith.addf %132, %133 : vector<192x128xf32>
    %135 = vector.extract_strided_slice %128 {offsets = [0, 256], sizes = [192, 128], strides = [1, 1]} : vector<192x384xf32> to vector<192x128xf32>
    %136 = vector.extract_strided_slice %135 {offsets = [1, 0], sizes = [191, 128], strides = [1, 1]} : vector<192x128xf32> to vector<191x128xf32>
    %137 = vector.extract_strided_slice %135 {offsets = [0, 0], sizes = [1, 128], strides = [1, 1]} : vector<192x128xf32> to vector<1x128xf32>
    %138 = tpu.concatenate %136, %137 in 0 : vector<191x128xf32>, vector<1x128xf32> -> vector<192x128xf32>
    %139 = arith.addf %134, %138 : vector<192x128xf32>
    %c0_80 = arith.constant 0 : index
    %c24_81 = arith.constant 24 : index
    %c0_82 = arith.constant 0 : index
    %140 = vector.load %arg1[%c0_80, %c24_81, %c0_82] : memref<1x432x128xbf16, #tpu.memory_space<vmem>>, vector<1x192x128xbf16>
    %141 = vector.shape_cast %140 : vector<1x192x128xbf16> to vector<192x128xbf16>
    %142 = vector.broadcast %25 : vector<1x128xf32> to vector<192x128xf32>
    %143 = arith.mulf %139, %142 : vector<192x128xf32>
    %144 = vector.broadcast %26 : vector<1x128xf32> to vector<192x128xf32>
    %145 = arith.addf %143, %144 : vector<192x128xf32>
    %146 = arith.extf %141 : vector<192x128xbf16> to vector<192x128xf32>
    %147 = arith.addf %145, %146 : vector<192x128xf32>
    %cst_83 = arith.constant 0.000000e+00 : f32
    %148 = vector.broadcast %cst_83 : f32 to vector<192x128xf32>
    %149 = arith.maximumf %147, %148 : vector<192x128xf32>
    %cst_84 = arith.constant 0.000000e+00 : f32
    %150 = vector.broadcast %cst_84 : f32 to vector<192x128xf32>
    %151 = arith.select %21, %149, %150 : vector<192x128xi1>, vector<192x128xf32>
    %152 = arith.truncf %151 : vector<192x128xf32> to vector<192x128xbf16>
    %c0_85 = arith.constant 0 : index
    %c24_86 = arith.constant 24 : index
    %c0_87 = arith.constant 0 : index
    %153 = vector.load %arg5[%c0_85, %c24_86, %c0_87] : memref<1x432x128xbf16, #tpu.memory_space<vmem>>, vector<1x192x128xbf16>
    %154 = vector.shape_cast %153 : vector<1x192x128xbf16> to vector<192x128xbf16>
    %155 = vector.shape_cast %152 : vector<192x128xbf16> to vector<1x192x128xbf16>
    tpu.vector_store %arg5[%c0_85, %c24_86, %c0_87], %155 {strides = array<i32>} : memref<1x432x128xbf16, #tpu.memory_space<vmem>>, vector<1x192x128xbf16>,
    %c192_88 = arith.constant 192 : index
    %c0_89 = arith.constant 0 : index
    %156 = vector.load %arg6[%c192_88, %c0_89] : memref<432x128xbf16, #tpu.memory_space<vmem>>, vector<192x128xbf16>
    %c0_90 = arith.constant 0 : index
    %c0_91 = arith.constant 0 : index
    %c0_92 = arith.constant 0 : index
    %157 = vector.load %arg3[%c0_90, %c0_91, %c0_92] : memref<3x128x384xbf16, #tpu.memory_space<vmem>>, vector<1x128x384xbf16>
    %158 = vector.shape_cast %157 : vector<1x128x384xbf16> to vector<128x384xbf16>
    %cst_93 = arith.constant dense<0.000000e+00> : vector<192x384xf32>
    %159 = tpu.matmul %156, %158, %cst_93 {dimension_numbers = #tpu.dot_dimension_numbers<[1], [0], [0], [1], [0, 0, 1, 1], [], []>} : vector<192x128xbf16>, vector<128x384xbf16>, vector<192x384xf32> -> vector<192x384xf32>
    %c216_94 = arith.constant 216 : index
    %c0_95 = arith.constant 0 : index
    %160 = vector.load %arg6[%c216_94, %c0_95] : memref<432x128xbf16, #tpu.memory_space<vmem>>, vector<192x128xbf16>
    %c1_96 = arith.constant 1 : index
    %c0_97 = arith.constant 0 : index
    %c0_98 = arith.constant 0 : index
    %161 = vector.load %arg3[%c1_96, %c0_97, %c0_98] : memref<3x128x384xbf16, #tpu.memory_space<vmem>>, vector<1x128x384xbf16>
    %162 = vector.shape_cast %161 : vector<1x128x384xbf16> to vector<128x384xbf16>
    %cst_99 = arith.constant dense<0.000000e+00> : vector<192x384xf32>
    %163 = tpu.matmul %160, %162, %cst_99 {dimension_numbers = #tpu.dot_dimension_numbers<[1], [0], [0], [1], [0, 0, 1, 1], [], []>} : vector<192x128xbf16>, vector<128x384xbf16>, vector<192x384xf32> -> vector<192x384xf32>
    %164 = arith.addf %159, %163 : vector<192x384xf32>
    %c240_100 = arith.constant 240 : index
    %c0_101 = arith.constant 0 : index
    %165 = vector.load %arg6[%c240_100, %c0_101] : memref<432x128xbf16, #tpu.memory_space<vmem>>, vector<192x128xbf16>
    %c2_102 = arith.constant 2 : index
    %c0_103 = arith.constant 0 : index
    %c0_104 = arith.constant 0 : index
    %166 = vector.load %arg3[%c2_102, %c0_103, %c0_104] : memref<3x128x384xbf16, #tpu.memory_space<vmem>>, vector<1x128x384xbf16>
    %167 = vector.shape_cast %166 : vector<1x128x384xbf16> to vector<128x384xbf16>
    %cst_105 = arith.constant dense<0.000000e+00> : vector<192x384xf32>
    %168 = tpu.matmul %165, %167, %cst_105 {dimension_numbers = #tpu.dot_dimension_numbers<[1], [0], [0], [1], [0, 0, 1, 1], [], []>} : vector<192x128xbf16>, vector<128x384xbf16>, vector<192x384xf32> -> vector<192x384xf32>
    %169 = arith.addf %164, %168 : vector<192x384xf32>
    %170 = vector.extract_strided_slice %169 {offsets = [0, 0], sizes = [192, 128], strides = [1, 1]} : vector<192x384xf32> to vector<192x128xf32>
    %171 = vector.extract_strided_slice %170 {offsets = [191, 0], sizes = [1, 128], strides = [1, 1]} : vector<192x128xf32> to vector<1x128xf32>
    %172 = vector.extract_strided_slice %170 {offsets = [0, 0], sizes = [191, 128], strides = [1, 1]} : vector<192x128xf32> to vector<191x128xf32>
    %173 = tpu.concatenate %171, %172 in 0 : vector<1x128xf32>, vector<191x128xf32> -> vector<192x128xf32>
    %174 = vector.extract_strided_slice %169 {offsets = [0, 128], sizes = [192, 128], strides = [1, 1]} : vector<192x384xf32> to vector<192x128xf32>
    %175 = arith.addf %173, %174 : vector<192x128xf32>
    %176 = vector.extract_strided_slice %169 {offsets = [0, 256], sizes = [192, 128], strides = [1, 1]} : vector<192x384xf32> to vector<192x128xf32>
    %177 = vector.extract_strided_slice %176 {offsets = [1, 0], sizes = [191, 128], strides = [1, 1]} : vector<192x128xf32> to vector<191x128xf32>
    %178 = vector.extract_strided_slice %176 {offsets = [0, 0], sizes = [1, 128], strides = [1, 1]} : vector<192x128xf32> to vector<1x128xf32>
    %179 = tpu.concatenate %177, %178 in 0 : vector<191x128xf32>, vector<1x128xf32> -> vector<192x128xf32>
    %180 = arith.addf %175, %179 : vector<192x128xf32>
    %c0_106 = arith.constant 0 : index
    %c216_107 = arith.constant 216 : index
    %c0_108 = arith.constant 0 : index
    %181 = vector.load %arg1[%c0_106, %c216_107, %c0_108] : memref<1x432x128xbf16, #tpu.memory_space<vmem>>, vector<1x192x128xbf16>
    %182 = vector.shape_cast %181 : vector<1x192x128xbf16> to vector<192x128xbf16>
    %183 = vector.broadcast %25 : vector<1x128xf32> to vector<192x128xf32>
    %184 = arith.mulf %180, %183 : vector<192x128xf32>
    %185 = vector.broadcast %26 : vector<1x128xf32> to vector<192x128xf32>
    %186 = arith.addf %184, %185 : vector<192x128xf32>
    %187 = arith.extf %182 : vector<192x128xbf16> to vector<192x128xf32>
    %188 = arith.addf %186, %187 : vector<192x128xf32>
    %cst_109 = arith.constant 0.000000e+00 : f32
    %189 = vector.broadcast %cst_109 : f32 to vector<192x128xf32>
    %190 = arith.maximumf %188, %189 : vector<192x128xf32>
    %cst_110 = arith.constant 0.000000e+00 : f32
    %191 = vector.broadcast %cst_110 : f32 to vector<192x128xf32>
    %192 = arith.select %21, %190, %191 : vector<192x128xi1>, vector<192x128xf32>
    %193 = arith.truncf %192 : vector<192x128xf32> to vector<192x128xbf16>
    %c0_111 = arith.constant 0 : index
    %c216_112 = arith.constant 216 : index
    %c0_113 = arith.constant 0 : index
    %194 = vector.load %arg5[%c0_111, %c216_112, %c0_113] : memref<1x432x128xbf16, #tpu.memory_space<vmem>>, vector<1x192x128xbf16>
    %195 = vector.shape_cast %194 : vector<1x192x128xbf16> to vector<192x128xbf16>
    %196 = vector.shape_cast %193 : vector<192x128xbf16> to vector<1x192x128xbf16>
    tpu.vector_store %arg5[%c0_111, %c216_112, %c0_113], %196 {strides = array<i32>} : memref<1x432x128xbf16, #tpu.memory_space<vmem>>, vector<1x192x128xbf16>,
    return
  }
  func.func @transform_0(%arg0: i32) -> (i32, i32, i32) {
    %c0_i32 = arith.constant 0 : i32
    %c0_i32_0 = arith.constant 0 : i32
    %c0_i32_1 = arith.constant 0 : i32
    return %arg0, %c0_i32, %c0_i32_0 : i32, i32, i32
  }
  func.func @transform_1(%arg0: i32) -> (i32, i32, i32) {
    %c0_i32 = arith.constant 0 : i32
    %c0_i32_0 = arith.constant 0 : i32
    %c0_i32_1 = arith.constant 0 : i32
    %c0_i32_2 = arith.constant 0 : i32
    return %c0_i32, %c0_i32_0, %c0_i32_1 : i32, i32, i32
  }
  func.func @transform_2(%arg0: i32) -> (i32, i32, i32) {
    %c0_i32 = arith.constant 0 : i32
    %c0_i32_0 = arith.constant 0 : i32
    %c0_i32_1 = arith.constant 0 : i32
    %c0_i32_2 = arith.constant 0 : i32
    return %c0_i32, %c0_i32_0, %c0_i32_1 : i32, i32, i32
  }
  func.func @transform_3(%arg0: i32) -> (i32, i32) {
    %c0_i32 = arith.constant 0 : i32
    %c0_i32_0 = arith.constant 0 : i32
    %c0_i32_1 = arith.constant 0 : i32
    return %c0_i32, %c0_i32_0 : i32, i32
  }
  func.func @transform_4(%arg0: i32) -> (i32, i32, i32) {
    %c0_i32 = arith.constant 0 : i32
    %c0_i32_0 = arith.constant 0 : i32
    %c0_i32_1 = arith.constant 0 : i32
    return %arg0, %c0_i32, %c0_i32_0 : i32, i32, i32
  }
}

</mosaic_0001>

<bundles_post_ra>
// kernel: tpu_custom_call.1
= control target key start
LH: loop header
LB: loop body
LE: loop exit
PB: predicated region body
PF: predicated region fallthrough
CT: control target
= control target key end

     0   :  { %6 = vsyncpa [#allocation3], 0  ;;  %s125_s0 = inlined_call_operand.hbm [shape: f32[8,128], index: 0, kind: input, shape index: {}]   ;;  %s126_s1 = inlined_call_operand.hbm [shape: f32[8,128], index: 1, kind: output, shape index: {}]  }
   0x1   :  { %7 = vsyncpa [#allocation4], 0  ;;  %s89_s6 = smov [#allocation2]   ;;  %s41_s10 = scalar_lea.hbm %s125_s0, 128 }
   0x2   :  { %s14_s7 = sshll.u32 %s89_s6, 4  ;;  %p42_p0 = scmp.ne.s32.totalorder %s125_s0, %s41_s10  ;;  %s15_s7 = int_to_ptr.vmem [resolvable:$true] %s14_s7 }
   0x3   :  { %p45_p1 = scmp.lt.u32.totalorder %s41_s10, %s125_s0 }
   0x5   :  { %p47_p2 = pnand %p45_p1, %p42_p0 }
   0x7   :  { %50 = shalt.err (!%p47_p2)
}
   0x8   :  { %s51_s15 = scalar_lea.vmem %s15_s7, 128  ;;  %p56_p4 = scmp.lt.s32.totalorder %s15_s7, %s15_s7 }
   0x9   :  { %p52_p3 = scmp.ne.s32.totalorder %s15_s7, %s51_s15  ;;  %p57_p5 = scmp.lt.s32.totalorder %s51_s15, %s51_s15 }
   0xb   :  { %p58_p6 = por %p57_p5, %p56_p4 }
   0xd   :  { %p59_p7 = pnand %p58_p6, %p52_p3 }
   0xf   :  { %62 = shalt.err (!%p59_p7)
}
  0x10   :  { %17 = dma.hbm_to_vmem [thread:$0]  %s125_s0, 128, %s15_s7, [#allocation3]  }
  0x11   :  { %85 = dma.done.wait [#allocation3], 128  }
  0x12   :  { %86 = vsyncadd [#allocation3], 4294967168  ;;  %s90_s18 = smov [#allocation5]   ;;  %v21_v0 = vld [vmem:[#allocation2] sm:$0xff] }
  0x13   :  { %s30_s19 = sshll.u32 %s90_s18, 4  ;;  %v22_v1 = vrot.slane %v21_v0, 7  ;;  %s31_s19 = int_to_ptr.vmem [resolvable:$true] %s30_s19 }
  0x14   :  { %s63_s20 = scalar_lea.vmem %s31_s19, 128  ;;  %p68_p9 = scmp.lt.s32.totalorder %s31_s19, %s31_s19 }
  0x15   :  { %23 = vst [vmem:[#allocation5] sm:$0xff] %v22_v1  ;;  %p64_p8 = scmp.ne.s32.totalorder %s31_s19, %s63_s20  ;;  %p69_p10 = scmp.lt.s32.totalorder %s63_s20, %s63_s20 }
  0x17   :  { %p70_p11 = por %p69_p10, %p68_p9 }
  0x19   :  { %p71_p12 = pnand %p70_p11, %p64_p8 }
  0x1b   :  { %74 = shalt.err (!%p71_p12)
}
  0x1c   :  { %s75_s23 = scalar_lea.hbm %s126_s1, 128 }
  0x1d   :  { %p76_p13 = scmp.ne.s32.totalorder %s126_s1, %s75_s23  ;;  %p79_p0 = scmp.lt.u32.totalorder %s75_s23, %s126_s1 }
  0x1f   :  { %p81_p1 = pnand %p79_p0, %p76_p13 }
  0x21   :  { %84 = shalt.err (!%p81_p1)
}
  0x22   :  { %33 = dma.vmem_to_hbm [thread:$0]  %s31_s19, 128, %s126_s1, [#allocation4]  }
  0x23   :  { %87 = dma.done.wait [#allocation4], 128  }
  0x24   :  { %88 = vsyncadd [#allocation4], 4294967168 }
  0x25   :  { %37 = vsyncpa [#allocation3], 1 }
  0x26   :  { %38 = vsyncpa [#allocation4], 1 }

// kernel: tpu_custom_call.1
= control target key start
LH: loop header
LB: loop body
LE: loop exit
PB: predicated region body
PF: predicated region fallthrough
CT: control target
= control target key end

     0   :  { %9 = vsyncpa [#allocation4], 0  ;;  %s15254_s0 = inlined_call_operand.hbm [shape: bf16[2,432,128], index: 0, kind: input, shape index: {}]   ;;  %s15255_s1 = inlined_call_operand.hbm [shape: bf16[3,128,384], index: 1, kind: input, shape index: {}]   ;;  %s15256_s2 = inlined_call_operand.hbm [shape: bf16[3,128,384], index: 2, kind: input, shape index: {}]   ;;  %s15257_s3 = inlined_call_operand.vmem [shape: f32[4,128], index: 3, kind: input, shape index: {}]   ;;  %s15258_s4 = inlined_call_operand.hbm [shape: bf16[2,432,128], index: 4, kind: output, shape index: {}]  }
   0x1   :  { %11 = vsyncpa [#allocation4 + $0x1], 0 }
   0x2   :  { %12 = vsyncpa [#allocation7], 0 }
   0x3   :  { %13 = vsyncpa [#allocation5], 0 }
   0x4   :  { %15 = vsyncpa [#allocation5 + $0x1], 0  ;;  %s11663_s15 = smov 0   ;;  %s11665_s16 = smov 0  }
   0x5   :  { %s11667_s17 = smov 0   ;;  %s11669_s18 = smov 0  }
   0x6 LB: > { %s11684_s19 = sadd.s32 4294967295, %s11625_s18   ;;  %s8948_s20 = sadd.s32 4294967294, %s11625_s18   ;;  %s11625_s18 = sphi %s11669_s18, %s15874_s18   ;;  %s11621_s17 = sphi %s11667_s17, %s15873_s17   ;;  %s11617_s16 = sphi %s11665_s16, %s15872_s16   ;;  %s11613_s15 = sphi %s11663_s15, %s15871_s15  }
   0x7   : > { %p41_p0 = scmp.ne.s32.totalorder %s11617_s16, %s11613_s15  ;;  %p15259_p1 = scmp.eq.s32.totalorder %s11684_s19, 0 }
   0x8   : > { %p134_p3 = scmp.eq.s32.totalorder %s8948_s20, 1  ;;  %p8949_p5 = scmp.ge.s32.totalorder %s11625_s18, 1 }
   0x9   : > { %p11693_p4 = por %p15259_p1, %p41_p0  ;;  %p141_p7 = scmp.lt.s32.totalorder %s11625_s18, 3 }
   0xa   : > { %p11698_p6 = por %p134_p3, %p41_p0  ;;  %s11627_s24 = smov [#allocation6]  }
   0xb   : > { %s15360_s21 = scalar_select %p11693_p4, 1, 0 }
   0xc   : > { %s15361_s22 = scalar_select %p11698_p6, 1, 0 }
   0xd   : > { %p11703_p8 = pnand %p8949_p5, %p141_p7  ;;  %s153_s25 = sshll.u32 %s11627_s24, 4  ;;  %s11707_s25 = int_to_ptr.vmem [resolvable:$true] %s153_s25 }
   0xe   : > { %s11628_s27 = smov [#allocation8]   ;;  %s11469_s5 = scalar_lea.hbm %s15255_s1, 9216 }
   0xf   : > { %p11022_p9 = pneg %p11703_p8  ;;  %s166_s28 = sshll.u32 %s11628_s27, 4  ;;  %s11718_s28 = int_to_ptr.vmem [resolvable:$true] %s166_s28 }
  0x10   : > { %p11470_p12 = scmp.ne.s32.totalorder %s15255_s1, %s11469_s5  ;;  %p11476_p5 = scmp.lt.u32.totalorder %s11469_s5, %s15255_s1 }
  0x11   : > { %p11714_p11 = pnand %p11022_p9, %p15259_p1 }
  0x13   : > { %p11471_p13 = pneg %p11714_p11 }
  0x15   : > { %p11472_p0 = pnand %p11471_p13, %p11470_p12 }
  0x17   : > { %p11473_p3 = pneg %p11472_p0 }
  0x19   : > { %p11478_p7 = pnand %p11476_p5, %p11473_p3 }
  0x1b   : > { %11481 = shalt.err (!%p11478_p7)
}
  0x1c   : > { %s11482_s10 = scalar_lea.vmem %s11707_s25, 9216  ;;  %p11490_p2 = scmp.lt.s32.totalorder %s11707_s25, %s11707_s25 }
  0x1d   : > { %p11483_p9 = scmp.ne.s32.totalorder %s11707_s25, %s11482_s10  ;;  %p11491_p12 = scmp.lt.s32.totalorder %s11482_s10, %s11482_s10 }
  0x1f   : > { %p11485_p10 = pnand %p11483_p9, %p11471_p13  ;;  %p11492_p0 = por %p11491_p12, %p11490_p2 }
  0x21   : > { %p11486_p1 = pneg %p11485_p10 }
  0x23   : > { %p11493_p6 = pnand %p11492_p0, %p11486_p1 }
  0x25   : > { %11496 = shalt.err (!%p11493_p6)
}
  0x26   : > { %s11629_s11 = smov 192   ;;  %s11630_s12 = smov 12  }
  0x27   : > { %11025 = dma.hbm_to_vmem [thread:$0]  (!%p11714_p11), %s15255_s1, 9216, %s11707_s25, [#allocation7], %s11629_s11, %s11629_s11, %s11630_s12  }
  0x28   : > { %s11497_s27 = scalar_lea.hbm %s15256_s2, 9216 }
  0x29   : > { %p11498_p2 = scmp.ne.s32.totalorder %s15256_s2, %s11497_s27  ;;  %p11504_p10 = scmp.lt.u32.totalorder %s11497_s27, %s15256_s2 }
  0x2b   : > { %p11500_p1 = pnand %p11498_p2, %p11471_p13 }
  0x2d   : > { %p11501_p6 = pneg %p11500_p1 }
  0x2f   : > { %p11506_p3 = pnand %p11504_p10, %p11501_p6 }
  0x31   : > { %11509 = shalt.err (!%p11506_p3)
}
  0x32   : > { %s11510_s25 = scalar_lea.vmem %s11718_s28, 9216  ;;  %p11518_p12 = scmp.lt.s32.totalorder %s11718_s28, %s11718_s28 }
  0x33   : > { %p11511_p5 = scmp.ne.s32.totalorder %s11718_s28, %s11510_s25  ;;  %p11519_p0 = scmp.lt.s32.totalorder %s11510_s25, %s11510_s25 }
  0x35   : > { %p11513_p7 = pnand %p11511_p5, %p11471_p13  ;;  %p11520_p2 = por %p11519_p0, %p11518_p12 }
  0x37   : > { %p11514_p9 = pneg %p11513_p7 }
  0x39   : > { %p11521_p1 = pnand %p11520_p2, %p11514_p9 }
  0x3b   : > { %11524 = shalt.err (!%p11521_p1)
}
  0x3c   : > { %11028 = dma.hbm_to_vmem [thread:$0]  (!%p11714_p11), %s15256_s2, 9216, %s11718_s28, [#allocation7], %s11629_s11, %s11629_s11, %s11630_s12  }
  0x3d   : > { %s11773_s9 = sadd.s32 1, %s11625_s18   ;;  %s28_s26 = sadd.s32 1, %s11621_s17 }
  0x3e   : > { %s25_s10 = ssub.s32 %s11625_s18, %s11773_s9  ;;  %p35_p13 = scmp.ne.s32.totalorder %s11621_s17, %s11617_s16 }
  0x3f   : > { %p26_p6 = scmp.eq.s32.totalorder %s25_s10, 0  ;;  %p36_p10 = scmp.eq.s32.totalorder %s11625_s18, 0 }
  0x40   : > { %p15364_p3 = scmp.eq.s32.totalorder %s11684_s19, 1  ;;  %p11039_p7 = scmp.lt.s32.totalorder %s11625_s18, 2 }
  0x41   : > { %s11789_s14 = scalar_select %p26_p6, %s11621_s17, %s28_s26  }
  0x42   : > { %p11783_p5 = por %p15364_p3, %p35_p13  ;;  %p37_p9 = por %p36_p10, %p35_p13 }
  0x43   : > { %s183_s20 = sand.u32 1, %s11621_s17   ;;  %s10959_s28 = smul.u32 3456, %s11625_s18 }
  0x44   : > { %s15365_s13 = scalar_select %p11783_p5, 1, 0 }
  0x45   : > { %s10958_s24 = smul.u32 216, %s183_s20  ;;  %p11793_p11 = pnand %p11039_p7, %p37_p9 }
  0x46   : > { %s11800_s29 = scalar_lea.hbm %s15254_s0, %s10959_s28  ;;  %s11804_s6 = scalar_lea.sflag [#allocation4], %s183_s20 }
  0x47   : > { %s187_s30 = scalar_lea.vmem [#allocation3], %s10958_s24  ;;  %s11525_s25 = scalar_lea.hbm %s11800_s29, 3456 }
  0x48   : > { %s194_s5 = sshll.u32 %s187_s30, 4  ;;  %p11526_p12 = scmp.ne.s32.totalorder %s11800_s29, %s11525_s25  ;;  %s11802_s5 = int_to_ptr.vmem [resolvable:$true] %s194_s5 }
  0x49   : > { %p11527_p0 = pneg %p11793_p11  ;;  %s11530_s26 = scalar_lea.hbm %s15254_s0, 6912 }
  0x4a   : > { %p11531_p13 = scmp.lt.u32.totalorder %s11800_s29, %s15254_s0  ;;  %p11532_p6 = scmp.lt.u32.totalorder %s11530_s26, %s11525_s25 }
  0x4b   : > { %p11528_p2 = pnand %p11527_p0, %p11526_p12  ;;  %p11534_p3 = scmp.lt.u32.totalorder %s11525_s25, %s11800_s29 }
  0x4c   : > { %p11533_p10 = por %p11532_p6, %p11531_p13 }
  0x4d   : > { %p11529_p1 = pneg %p11528_p2 }
  0x4e   : > { %p11535_p7 = por %p11534_p3, %p11533_p10 }
  0x50   : > { %p11536_p9 = pnand %p11535_p7, %p11529_p1 }
  0x52   : > { %11539 = shalt.err (!%p11536_p9)
}
  0x53   : > { %s11540_s20 = scalar_lea.vmem %s11802_s5, 3456  ;;  %s11631_s24 = smov [#allocation3]  }
  0x54   : > { %p11541_p12 = scmp.ne.s32.totalorder %s11802_s5, %s11540_s20  ;;  %s11545_s12 = sshll.u32 %s11631_s24, 4  ;;  %s11546_s12 = int_to_ptr.vmem [resolvable:$false] %s11545_s12 }
  0x55   : > { %s11547_s27 = scalar_lea.vmem %s11546_s12, 6912  ;;  %p11548_p4 = scmp.lt.s32.totalorder %s11802_s5, %s11546_s12 }
  0x56   : > { %p11543_p2 = pnand %p11541_p12, %p11527_p0  ;;  %p11549_p13 = scmp.lt.s32.totalorder %s11547_s27, %s11540_s20 }
  0x58   : > { %p11544_p5 = pneg %p11543_p2  ;;  %p11550_p6 = por %p11549_p13, %p11548_p4 }
  0x5a   : > { %p11551_p10 = pnand %p11550_p6, %p11544_p5 }
  0x5c   : > { %11554 = shalt.err (!%p11551_p10)
}
  0x5d   : > { %s11632_s30 = smov 64   ;;  %s11633_s25 = smov 4  }
  0x5e   : > { %11032 = dma.hbm_to_vmem [thread:$0]  (!%p11793_p11), %s11800_s29, 3456, %s11802_s5, %s11804_s6, %s11632_s30, %s11632_s30, %s11633_s25  }
  0x5f   : > { %206 = sbr.rel (%p11703_p8) target bundleno = 1524 (0x5f4), region = 36 }
  0x66   : > { %s11835_s7 = sand.u32 1, %s11617_s16   ;;  %p15367_p4 = scmp.ne.s32.totalorder %s15360_s21, 0 }
  0x67   : > { %s10960_s8 = smul.u32 216, %s11835_s7  ;;  %s209_s26 = scalar_lea.sflag [#allocation4], %s11835_s7 }
  0x69   : > { %s11841_s10 = scalar_lea.vmem [#allocation3], %s10960_s8 }
  0x6a   : > { %11600 = dma.done.wait (%p15367_p4), %s209_s26, 3456  }
  0x6b   : > { %11602 = vsyncadd (%p15367_p4), %s209_s26, 4294963840  ;;  %p15368_p5 = scmp.eq.s32.totalorder %s11684_s19, 0 }
  0x6d   : > { %11604 = dma.done.wait (%p15368_p5), [#allocation7], 18432   ;;  %p15369_p8 = pmov %p15368_p5 }
  0x6e   : > { %v11634_v0 = vmov 0   ;;  %v11084_v1 = vld [vmem:[#allocation6 + $0xc4] ss:$12 sps:$4 sm:$0xff]   ;;  %v11086_v2 = vld [vmem:[#allocation6 + $0x8] ss:$12 sps:$4 sm:$0xff]   ;;  %vm15263_vm0 = vcmask 1046528  }
  0x6f   : > { %11606 = vsyncadd (%p15369_p8), [#allocation7], 4294948864  ;;  %1065 = vmatprep.mubr.bf16.mxu0 %v11634_v0  ;;  %731 = vst [vmem:[#allocation2] sm:$0xff] %v11634_v0  ;;  %1033 = vmatprep.subr.bf16.mxu0 %v11084_v1  ;;  %v11087_v3 = vld [vmem:[#allocation6 + $0xc0] ss:$12 sps:$4 sm:$0xff]   ;;  %vm15271_vm5 = vcmask 1040384  }
  0x70   : > { %732 = vst [vmem:[#allocation2 + $0x8] sm:$0xf] %v11634_v0  ;;  %733 = vst [vmem:[#allocation2 + $0xc8] sm:$0xf0] %v11634_v0  ;;  %9942 = vmatprep.subr.bf16.mxu1 %v11086_v2  ;;  %v11088_v4 = vld [vmem:[#allocation6 + $0xdc] ss:$12 sps:$4 sm:$0xff]   ;;  %1034 = vmatpush1.bf16.msra.mxu0 %v11087_v3 }
  0x71   : > { %9943 = vmatpush3.bf16.msra.mxu1 %v11086_v2  ;;  %v11090_v5 = vld [vmem:[#allocation6 + $0x20] ss:$12 sps:$4 sm:$0xff]   ;;  %v11091_v6 = vld [vmem:[#allocation6 + $0xd8] ss:$12 sps:$4 sm:$0xff]   ;;  %1035 = vmatprep.subr.bf16.mxu0 %v11088_v4  ;;  %v11095_v9 = vld [vmem:[#allocation6 + $0xf0] ss:$12 sps:$4 sm:$0xff]  }
  0x72   : > { %v11092_v7 = vld [vmem:[#allocation6 + $0xf4] ss:$12 sps:$4 sm:$0xff]   ;;  %9944 = vmatprep.subr.bf16.mxu1 %v11090_v5  ;;  %v11094_v8 = vld [vmem:[#allocation6 + $0x38] ss:$12 sps:$4 sm:$0xff]   ;;  %v11098_v11 = vld [vmem:[#allocation6 + $0x50] ss:$12 sps:$4 sm:$0xff]  }
  0x73   : > { %v11096_v10 = vld [vmem:[#allocation6 + $0x10c] ss:$12 sps:$4 sm:$0xff]   ;;  %v11099_v12 = vld [vmem:[#allocation6 + $0x108] ss:$12 sps:$4 sm:$0xff]   ;;  %v11100_v13 = vld [vmem:[#allocation6 + $0x124] ss:$12 sps:$4 sm:$0xff]  }
  0x74   : > { %1036 = vmatpush1.bf16.msra.mxu0 %v11091_v6  ;;  %v11102_v14 = vld [vmem:[#allocation6 + $0x68] ss:$12 sps:$4 sm:$0xff]   ;;  %v11103_v15 = vld [vmem:[#allocation6 + $0x120] ss:$12 sps:$4 sm:$0xff]   ;;  %v11107_v19 = vld [vmem:[#allocation6 + $0x138] ss:$12 sps:$4 sm:$0xff]  }
  0x75   : > { %9945 = vmatpush3.bf16.msra.mxu1 %v11090_v5  ;;  %1037 = vmatprep.subr.bf16.mxu0 %v11092_v7  ;;  %v11104_v16 = vld [vmem:[#allocation6 + $0x13c] ss:$12 sps:$4 sm:$0xff]   ;;  %v11106_v17 = vld [vmem:[#allocation6 + $0x80] ss:$12 sps:$4 sm:$0xff]   ;;  %v11110_v21 = vld [vmem:[#allocation6 + $0x98] ss:$12 sps:$4 sm:$0xff]  }
  0x76   : > { %9946 = vmatprep.subr.bf16.mxu1 %v11094_v8  ;;  %v11116_v18 = vld [vmem:[%s11841_s10] sm:$0xff]   ;;  %v744_v26 = vld [vmem:[%s11841_s10 + $0xc] sm:$0xf]  ;;  %v745_v27 = vld [vmem:[%s11841_s10 + $0x10] sm:$0xf]  ;;  %s14449_s24 = scalar_lea.vmem [#allocation9], %s10960_s8 }
  0x77   : > { %v11108_v20 = vld [vmem:[#allocation6 + $0x154] ss:$12 sps:$4 sm:$0xff]   ;;  %9958 = vmatprep.mubr.bf16.mxu1 %v11116_v18  ;;  %v11111_v22 = vld [vmem:[#allocation6 + $0x150] ss:$12 sps:$4 sm:$0xff]   ;;  %v11112_v23 = vld [vmem:[#allocation6 + $0x16c] ss:$12 sps:$4 sm:$0xff]   ;;  %v11860_v32 = vcombine.low %v744_v26, %v745_v27 }
  0x78   : > { %1038 = vmatpush1.bf16.msra.mxu0 %v11095_v9  ;;  %v11114_v24 = vld [vmem:[#allocation6 + $0xb0] ss:$12 sps:$4 sm:$0xff]   ;;  %v11115_v25 = vld [vmem:[#allocation6 + $0x168] ss:$12 sps:$4 sm:$0xff]   ;;  %v11123_v35 = vld [vmem:[#allocation6 + $0xe0] ss:$12 sps:$4 sm:$0xff]  }
  0x79   : > { %9947 = vmatpush3.bf16.msra.mxu1 %v11094_v8  ;;  %1039 = vmatprep.subr.bf16.mxu0 %v11096_v10  ;;  %v11118_v28 = vld [vmem:[#allocation6 + $0xc8] ss:$12 sps:$4 sm:$0xff]   ;;  %v743_v29 = vld [vmem:[%s11841_s10 + $0x8] sm:$0xf]  ;;  %v746_v31 = vld [vmem:[%s11841_s10 + $0x14] sm:$0xf] }
  0x7a   : > { %9948 = vmatprep.subr.bf16.mxu1 %v11098_v11  ;;  %v11127_v30 = vld [vmem:[#allocation6 + $0x188] ss:$12 sps:$4 sm:$0xff]   ;;  %v11862_v33 = vcombine.low %v743_v29, %v744_v26  ;;  %v11864_v34 = vcombine.low %v745_v27, %v746_v31  ;;  %v11128_v37 = vld [vmem:[#allocation6 + $0x1a0] ss:$12 sps:$4 sm:$0xff]   ;;  %v11131_v41 = vld [vmem:[#allocation6 + $0xf8] ss:$12 sps:$4 sm:$0xff]  }
  0x7b   : > { %v747_v36 = vld [vmem:[%s11841_s10 + $0x18] sm:$0xf]  ;;  %v748_v38 = vld [vmem:[%s11841_s10 + $0x1c] sm:$0xf]  ;;  %v749_v39 = vld [vmem:[%s11841_s10 + $0x20] sm:$0xf] }
  0x7c   : > { %1040 = vmatpush1.bf16.msra.mxu0 %v11099_v12  ;;  %v750_v40 = vld [vmem:[%s11841_s10 + $0x24] sm:$0xf]  ;;  %v11874_v42 = vcombine.low %v746_v31, %v747_v36  ;;  %v11876_v43 = vcombine.low %v747_v36, %v748_v38  ;;  %v11133_v45 = vld [vmem:[#allocation6 + $0x1b8] ss:$12 sps:$4 sm:$0xff]   ;;  %v752_v47 = vld [vmem:[%s11841_s10 + $0x2c] sm:$0xf]  ;;  %v11890_v53 = vcombine.low %v748_v38, %v749_v39 }
  0x7d   : > { %9949 = vmatpush3.bf16.msra.mxu1 %v11098_v11  ;;  %1041 = vmatprep.subr.bf16.mxu0 %v11100_v13  ;;  %v11878_v44 = vcombine.low %v749_v39, %v750_v40  ;;  %v751_v46 = vld [vmem:[%s11841_s10 + $0x28] sm:$0xf]  ;;  %v753_v50 = vld [vmem:[%s11841_s10 + $0x30] sm:$0xf]  ;;  %v11888_v51 = vld [vmem:[%s11841_s10 + $0x34] sm:$0xf] }
  0x7e   : > { %9950 = vmatprep.subr.bf16.mxu1 %v11102_v14  ;;  %v11139_v48 = vld [vmem:[#allocation6 + $0x110] ss:$12 sps:$4 sm:$0xff]   ;;  %v11148_v52 = vld [vmem:[#allocation6 + $0x128] ss:$12 sps:$4 sm:$0xff]   ;;  %v11892_v54 = vcombine.low %v751_v46, %v752_v47  ;;  %v11895_v55 = vcombine.low %v753_v50, %v11888_v51  ;;  %v11899_v58 = vld [vmem:[%s11841_s10 + $0x3c] sm:$0xf]  ;;  %v11909_v1 = vcombine.low %v750_v40, %v751_v46  ;;  %v11931_v11 = vcombine.low %v752_v47, %v753_v50 }
  0x7f   : > { %v11134_v49 = vld [vmem:[#allocation6 + $0x1d0] ss:$12 sps:$4 sm:$0xff]   ;;  %v11138_v56 = vld [vmem:[#allocation6 + $0x1e8] ss:$12 sps:$4 sm:$0xff]   ;;  %v11153_v59 = vld [vmem:[#allocation6 + $0x140] ss:$12 sps:$4 sm:$0xff]  }
  0x80   : > { %1042 = vmatpush1.bf16.msra.mxu0 %v11103_v15  ;;  %v755_v57 = vld [vmem:[%s11841_s10 + $0x38] sm:$0xf]  ;;  %v757_v61 = vld [vmem:[%s11841_s10 + $0x40] sm:$0xf]  ;;  %v11907_v62 = vld [vmem:[%s11841_s10 + $0x44] sm:$0xf] }
  0x81   : > { %9951 = vmatpush3.bf16.msra.mxu1 %v11102_v14  ;;  %1043 = vmatprep.subr.bf16.mxu0 %v11104_v16  ;;  %v11140_v60 = vld [vmem:[#allocation6 + $0x200] ss:$12 sps:$4 sm:$0xff]   ;;  %v11161_v63 = vld [vmem:[#allocation6 + $0x158] ss:$12 sps:$4 sm:$0xff]   ;;  %v11912_v2 = vcombine.low %v755_v57, %v11899_v58  ;;  %v11915_v3 = vcombine.low %v757_v61, %v11907_v62  ;;  %v11919_v6 = vld [vmem:[%s11841_s10 + $0x4c] sm:$0xf]  ;;  %v11985_v27 = vcombine.low %v11899_v58, %v757_v61 }
  0x82   : > { %9952 = vmatprep.subr.bf16.mxu1 %v11106_v17  ;;  %v11144_v4 = vld [vmem:[#allocation6 + $0x218] ss:$12 sps:$4 sm:$0xff]   ;;  %v11169_v7 = vld [vmem:[#allocation6 + $0x170] ss:$12 sps:$4 sm:$0xff]   ;;  %v11157_v14 = vld [vmem:[#allocation6 + $0xc8] ss:$12 sps:$4 sm:$0xff]  }
  0x83   : > { %v759_v5 = vld [vmem:[%s11841_s10 + $0x48] sm:$0xf]  ;;  %v11926_v9 = vld [vmem:[%s11841_s10 + $0x50] sm:$0xf]  ;;  %v11929_v10 = vld [vmem:[%s11841_s10 + $0x54] sm:$0xf] }
  0x84   : > { %1044 = vmatpush1.bf16.msra.mxu0 %v11107_v19  ;;  %v11145_v8 = vld [vmem:[#allocation6 + $0x230] ss:$12 sps:$4 sm:$0xff]   ;;  %v11934_v12 = vcombine.low %v759_v5, %v11919_v6  ;;  %v11938_v13 = vcombine.low %v11926_v9, %v11929_v10  ;;  %v11941_v15 = vld [vmem:[%s11841_s10 + $0x70] sm:$0xf]  ;;  %v11957_v19 = vld [vmem:[%s11841_s10 + $0x58] sm:$0xf]  ;;  %v12003_v39 = vcombine.low %v11907_v62, %v759_v5 }
  0x85   : > { %9953 = vmatpush3.bf16.msra.mxu1 %v11106_v17  ;;  %1045 = vmatprep.subr.bf16.mxu0 %v11108_v20  ;;  %v11943_v16 = vld [vmem:[#allocation6 + $0x4] ss:$12 sps:$4 sm:$0xff]   ;;  %v11993_v31 = vld [vmem:[%s11841_s10 + $0x84] sm:$0xf]  ;;  %v12039_v62 = vld [vmem:[%s11841_s10 + $0x98] sm:$0xf] }
  0x86   : > { %9954 = vmatprep.subr.bf16.mxu1 %v11110_v21  ;;  %v11946_v17 = vld [vmem:[%s11841_s10 + $0x74] sm:$0xf]  ;;  %v11960_v20 = vld [vmem:[%s11841_s10 + $0x5c] sm:$0xf]  ;;  %v11150_v29 = vld [vmem:[%s11841_s10 + $0x28] sm:$0xff]   ;;  %s8856_s11 = sshll.u32 %s14449_s24, 4  ;;  %s15208_s11 = int_to_ptr.vmem [resolvable:$true] %s8856_s11 }
  0x87   : > { %v11952_v18 = vcombine.low %v11941_v15, %v11946_v17  ;;  %v11158_v36 = vld [vmem:[#allocation6 + $0xe0] ss:$12 sps:$4 sm:$0xff]   ;;  %v11163_v38 = vld [vmem:[#allocation6 + $0xf8] ss:$12 sps:$4 sm:$0xff]   ;;  %v11164_v47 = vld [vmem:[#allocation6 + $0x110] ss:$12 sps:$4 sm:$0xff]  }
  0x88   : > { %1046 = vmatpush1.bf16.msra.mxu0 %v11111_v22  ;;  %v11968_v22 = vcombine.low %v11957_v19, %v11960_v20  ;;  %v11154_v40 = vld [vmem:[%s11841_s10 + $0x38] sm:$0xff]   ;;  %v11159_v50 = vld [vmem:[%s11841_s10 + $0x48] sm:$0xff]   ;;  %s8843_s6 = scalar_lea.sflag [#allocation5], %s11835_s7  ;;  %s11555_s28 = scalar_lea.vmem %s15208_s11, 3456 }
  0x89   : > { %9955 = vmatpush3.bf16.msra.mxu1 %v11110_v21  ;;  %1047 = vmatprep.subr.bf16.mxu0 %v11112_v23  ;;  %v11964_v21 = vcombine.low %v11888_v51, %v755_v57  ;;  %v11146_v23 = vld [vmem:[%s11841_s10 + $0x18] sm:$0xff]   ;;  %v12021_v51 = vld [vmem:[%s11841_s10 + $0x90] sm:$0xf]  ;;  %v11175_v5 = vld [vmem:[#allocation6 + $0x170] ss:$12 sps:$4 sm:$0xff]   ;;  %p11556_p11 = scmp.ne.s32.totalorder %s15208_s11, %s11555_s28  ;;  %p15868_p0 = scmp.ne.s32.totalorder %s15365_s13, 0 }
  0x8a   : > { %9956 = vmatprep.subr.bf16.mxu1 %v11114_v24  ;;  %v11170_v57 = vld [vmem:[#allocation6 + $0x140] ss:$12 sps:$4 sm:$0xff]   ;;  %s11635_s20 = smov [#allocation9]  }
  0x8b   : > { %v11165_v61 = vld [vmem:[%s11841_s10 + $0x58] sm:$0xff]   ;;  %p11557_p1 = pnand %p11556_p11, %p15868_p0  ;;  %s11559_s12 = sshll.u32 %s11635_s20, 4  ;;  %s11560_s12 = int_to_ptr.vmem [resolvable:$false] %s11559_s12 }
  0x8c   : > { %1048 = vmatpush1.bf16.msra.mxu0 %v11115_v25  ;;  %v11975_v25 = vld [vmem:[%s11841_s10 + $0x7c] sm:$0xf]  ;;  %s11561_s27 = scalar_lea.vmem %s11560_s12, 6912  ;;  %p11562_p7 = scmp.lt.s32.totalorder %s15208_s11, %s11560_s12 }
  0x8d   : > { %9957 = vmatpush3.bf16.msra.mxu1 %v11114_v24  ;;  %9902 = vmatprep.subr.bf16.mxu0 %v11118_v28  ;;  %v11972_v24 = vld [vmem:[%s11841_s10 + $0x78] sm:$0xf]  ;;  %p11558_p3 = pneg %p11557_p1  ;;  %p11563_p9 = scmp.lt.s32.totalorder %s11561_s27, %s11555_s28 }
  0x8e   : > { %9982 = vmatprep.subr.bf16.mxu1 %v11127_v30  ;;  %v11979_v26 = vcombine.low %v11972_v24, %v11975_v25 }
  0x8f   : > { %1066 = vmatmul.mubr.bf16.vlgmr.msra.gmra.mrb[0].mxu0 %v11860_v32  ;;  %p11564_p12 = por %p11563_p9, %p11562_p7 }
  0x90   : > { %9959 = vmatmul.mubr.bf16.vlgmr.msra.gmra.mrb[0].mxu1 %v11862_v33  ;;  %9903 = vmatpush3.bf16.msra.mxu0 %v11118_v28  ;;  %v11149_v28 = vld [vmem:[%s11841_s10 + $0x20] sm:$0xff]  }
  0x91   : > { %1075 = vmatprep.mubr.bf16.mxu0 %v11634_v0  ;;  %9962 = vmatprep.mubr.bf16.mxu1 %v11864_v34  ;;  %p11565_p2 = pnand %p11564_p12, %p11558_p3 }
  0x92   : > { %9904 = vmatprep.subr.bf16.mxu0 %v11123_v35  ;;  %9983 = vmatpush3.bf16.msra.mxu1 %v11127_v30  ;;  %v11990_v30 = vld [vmem:[%s11841_s10 + $0x80] sm:$0xf] }
  0x93   : > { %9984 = vmatprep.subr.bf16.mxu1 %v11128_v37 }
  0x94   : > { %9905 = vmatpush3.bf16.msra.mxu0 %v11123_v35  ;;  %v11997_v35 = vcombine.low %v11990_v30, %v11993_v31 }
  0x95   : > { %9906 = vmatprep.subr.bf16.mxu0 %v11131_v41 }
  0x96   : > { %9985 = vmatpush3.bf16.msra.mxu1 %v11128_v37  ;;  %v11152_v37 = vld [vmem:[%s11841_s10 + $0x30] sm:$0xff]  }
  0x97   : > { %1076 = vmatmul.mubr.bf16.gmra.mrb[4].mxu0 %v11874_v42  ;;  %9986 = vmatprep.subr.bf16.mxu1 %v11133_v45 }
  0x98   : > { %9963 = vmatmul.mubr.bf16.gmra.mrb[4].mxu1 %v11876_v43  ;;  %1085 = vmatprep.mubr.bf16.mxu0 %v11634_v0 }
  0x99   : > { %9966 = vmatprep.mubr.bf16.mxu1 %v11878_v44  ;;  %9907 = vmatpush3.bf16.msra.mxu0 %v11131_v41  ;;  %v12007_v41 = vld [vmem:[%s11841_s10 + $0x88] sm:$0xf] }
  0x9a   : > { %9987 = vmatpush3.bf16.msra.mxu1 %v11133_v45  ;;  %9908 = vmatprep.subr.bf16.mxu0 %v11139_v48  ;;  %v12010_v45 = vld [vmem:[%s11841_s10 + $0x8c] sm:$0xf] }
  0x9b   : > { %9988 = vmatprep.subr.bf16.mxu1 %v11134_v49  ;;  %v12014_v46 = vcombine.low %v12007_v41, %v12010_v45 }
  0x9d   : > { %9909 = vmatpush3.bf16.msra.mxu0 %v11139_v48  ;;  %v11168_v48 = vld [vmem:[#allocation6 + $0x128] ss:$12 sps:$4 sm:$0xff]  }
  0x9e   : > { %9989 = vmatpush3.bf16.msra.mxu1 %v11134_v49  ;;  %9910 = vmatprep.subr.bf16.mxu0 %v11148_v52  ;;  %v11156_v49 = vld [vmem:[%s11841_s10 + $0x40] sm:$0xff]  }
  0x9f   : > { %1086 = vmatmul.mubr.bf16.gmra.mrb[8].mxu0 %v11890_v53  ;;  %9990 = vmatprep.subr.bf16.mxu1 %v11138_v56 }
  0xa0   : > { %9967 = vmatmul.mubr.bf16.gmra.mrb[8].mxu1 %v11892_v54  ;;  %1095 = vmatprep.mubr.bf16.mxu0 %v11634_v0 }
  0xa1   : > { %9970 = vmatprep.mubr.bf16.mxu1 %v11895_v55  ;;  %9911 = vmatpush3.bf16.msra.mxu0 %v11148_v52  ;;  %v12024_v52 = vld [vmem:[%s11841_s10 + $0x94] sm:$0xf] }
  0xa2   : > { %9991 = vmatpush3.bf16.msra.mxu1 %v11138_v56  ;;  %9912 = vmatprep.subr.bf16.mxu0 %v11153_v59  ;;  %v12028_v56 = vcombine.low %v11919_v6, %v11926_v9  ;;  %v12032_v58 = vcombine.low %v12021_v51, %v12024_v52  ;;  %v11171_v9 = vld [vmem:[%s11841_s10 + $0x68] sm:$0xff]  }
  0xa3   : > { %9992 = vmatprep.subr.bf16.mxu1 %v11140_v60 }
  0xa5   : > { %9913 = vmatpush3.bf16.msra.mxu0 %v11153_v59  ;;  %v11174_v59 = vld [vmem:[#allocation6 + $0x158] ss:$12 sps:$4 sm:$0xff]  }
  0xa6   : > { %9993 = vmatpush3.bf16.msra.mxu1 %v11140_v60  ;;  %9914 = vmatprep.subr.bf16.mxu0 %v11161_v63  ;;  %v11162_v60 = vld [vmem:[%s11841_s10 + $0x50] sm:$0xff]  }
  0xa7   : > { %1096 = vmatmul.mubr.bf16.gmra.mrb[12].mxu0 %v11909_v1  ;;  %9994 = vmatprep.subr.bf16.mxu1 %v11144_v4 }
  0xa8   : > { %9971 = vmatmul.mubr.bf16.gmra.mrb[12].mxu1 %v11912_v2  ;;  %1105 = vmatprep.mubr.bf16.mxu0 %v11634_v0 }
  0xa9   : > { %9974 = vmatprep.mubr.bf16.mxu1 %v11915_v3  ;;  %9915 = vmatpush3.bf16.msra.mxu0 %v11161_v63  ;;  %v12042_v63 = vld [vmem:[%s11841_s10 + $0x9c] sm:$0xf] }
  0xaa   : > { %9995 = vmatpush3.bf16.msra.mxu1 %v11144_v4  ;;  %9916 = vmatprep.subr.bf16.mxu0 %v11169_v7  ;;  %v12046_v4 = vcombine.low %v11929_v10, %v11957_v19  ;;  %v12050_v6 = vcombine.low %v12039_v62, %v12042_v63  ;;  %v2804_v10 = vld [vmem:[%s11841_s10 + $0xa0] sm:$0xf] }
  0xab   : > { %9996 = vmatprep.subr.bf16.mxu1 %v11145_v8 }
  0xad   : > { %9917 = vmatpush3.bf16.msra.mxu0 %v11169_v7  ;;  %v797_v7 = vld [vmem:[%s11841_s10 + $0x60] sm:$0xf] }
  0xae   : > { %9997 = vmatpush3.bf16.msra.mxu1 %v11145_v8  ;;  %1473 = vmatprep.subr.bf16.mxu0 %v11943_v16  ;;  %v11167_v8 = vld [vmem:[%s11841_s10 + $0x60] sm:$0xff]   ;;  %v12062_v19 = vcombine.low %v11960_v20, %v797_v7  ;;  %v11173_v20 = vld [vmem:[%s11841_s10 + $0x70] sm:$0xff]  }
  0xaf   : > { %1106 = vmatmul.mubr.bf16.gmra.mrb[16].mxu0 %v11931_v11  ;;  %10022 = vmatprep.subr.bf16.mxu1 %v11157_v14  ;;  %v12148_v7 = vld [vmem:[#allocation6 + $0x184] ss:$12 sps:$4 sm:$0xff]  }
  0xb0   : > { %9975 = vmatmul.mubr.bf16.gmra.mrb[16].mxu1 %v11934_v12  ;;  %1115 = vmatprep.mubr.bf16.mxu0 %v11634_v0 }
  0xb1   : > { %9978 = vmatprep.mubr.bf16.mxu1 %v11938_v13 }
  0xb7   : > { %1116 = vmatmul.mubr.bf16.gmra.mrb[20].mxu0 %v11964_v21 }
  0xb8   : > { %9979 = vmatmul.mubr.bf16.gmra.mrb[20].mxu1 %v11968_v22  ;;  %1125 = vmatprep.mubr.bf16.mxu0 %v11634_v0 }
  0xb9   : > { %9998 = vmatprep.mubr.bf16.mxu1 %v11146_v23 }
  0xbf   : > { %1126 = vmatmul.mubr.bf16.gmra.mrb[24].mxu0 %v11985_v27 }
  0xc0   : > { %9999 = vmatmul.mubr.bf16.vlgmr.msra.gmra.mrb[0].mxu1 %v11149_v28  ;;  %1135 = vmatprep.mubr.bf16.mxu0 %v11634_v0  ;;  %v12070_v28 = vld [vmem:[%s11841_s10 + $0x6c] sm:$0xf] }
  0xc1   : > { %10002 = vmatprep.mubr.bf16.mxu1 %v11150_v29  ;;  %10023 = vmatpush3.bf16.msra.mxu1 %v11157_v14  ;;  %v12059_v14 = vld [vmem:[%s11841_s10 + $0xa4] sm:$0xf] }
  0xc2   : > { %10024 = vmatprep.subr.bf16.mxu1 %v11158_v36  ;;  %v12065_v23 = vcombine.low %v2804_v10, %v12059_v14  ;;  %v12074_v29 = vld [vmem:[%s11841_s10 + $0x64] sm:$0xff]  }
  0xc5   : > { %10025 = vmatpush3.bf16.msra.mxu1 %v11158_v36  ;;  %v2806_v36 = vld [vmem:[%s11841_s10 + $0xa8] sm:$0xf] }
  0xc6   : > { %10026 = vmatprep.subr.bf16.mxu1 %v11163_v38 }
  0xc7   : > { %1136 = vmatmul.mubr.bf16.gmra.mrb[28].mxu0 %v12003_v39 }
  0xc8   : > { %10003 = vmatmul.mubr.bf16.gmra.mrb[4].mxu1 %v11152_v37  ;;  %1145 = vmatprep.mubr.bf16.mxu0 %v11634_v0  ;;  %v12079_v37 = vld [vmem:[%s11841_s10 + $0xac] sm:$0xf] }
  0xc9   : > { %10006 = vmatprep.mubr.bf16.mxu1 %v11154_v40  ;;  %10027 = vmatpush3.bf16.msra.mxu1 %v11163_v38  ;;  %v12083_v38 = vcombine.low %v12070_v28, %v11941_v15  ;;  %v2808_v40 = vld [vmem:[%s11841_s10 + $0xb0] sm:$0xf]  ;;  %v12097_v15 = vcombine.low %v11946_v17, %v11972_v24  ;;  %v11186_v17 = vld [vmem:[#allocation6 + $0x30] ss:$12 sps:$4 sm:$0xff]   ;;  %v2810_v24 = vld [vmem:[%s11841_s10 + $0xb8] sm:$0xf] }
  0xca   : > { %10028 = vmatprep.subr.bf16.mxu1 %v11164_v47 }
  0xcd   : > { %10029 = vmatpush3.bf16.msra.mxu1 %v11164_v47  ;;  %v12093_v47 = vld [vmem:[%s11841_s10 + $0xb4] sm:$0xf] }
  0xce   : > { %10030 = vmatprep.subr.bf16.mxu1 %v11168_v48 }
  0xcf   : > { %1146 = vmatmul.mubr.bf16.gmra.mrb[32].mxu0 %v12028_v56 }
  0xd0   : > { %10007 = vmatmul.mubr.bf16.gmra.mrb[8].mxu1 %v11156_v49  ;;  %1155 = vmatprep.mubr.bf16.mxu0 %v11634_v0  ;;  %v12101_v49 = vcombine.low %v11975_v25, %v11990_v30  ;;  %v2811_v25 = vld [vmem:[%s11841_s10 + $0xbc] sm:$0xf]  ;;  %v12114_v30 = vcombine.low %v11993_v31, %v12007_v41  ;;  %v12128_v31 = vcombine.low %v12024_v52, %v12039_v62  ;;  %v11204_v62 = vld [vmem:[#allocation6 + $0x90] ss:$12 sps:$4 sm:$0xff]  }
  0xd1   : > { %10010 = vmatprep.mubr.bf16.mxu1 %v11159_v50  ;;  %10031 = vmatpush3.bf16.msra.mxu1 %v11168_v48  ;;  %v11183_v48 = vld [vmem:[#allocation6 + $0x1c] ss:$12 sps:$4 sm:$0xff]   ;;  %v12104_v50 = vcombine.low %v2808_v40, %v12093_v47  ;;  %v11195_v41 = vld [vmem:[#allocation6 + $0x60] ss:$12 sps:$4 sm:$0xff]   ;;  %v12138_v52 = vcombine.low %v12059_v14, %v2806_v36 }
  0xd2   : > { %10032 = vmatprep.subr.bf16.mxu1 %v11170_v57  ;;  %v12172_v14 = vld [vmem:[#allocation6 + $0x180] ss:$12 sps:$4 sm:$0xff]  }
  0xd5   : > { %10033 = vmatpush3.bf16.msra.mxu1 %v11170_v57  ;;  %v11188_v57 = vld [vmem:[#allocation6 + $0x34] ss:$12 sps:$4 sm:$0xff]  }
  0xd6   : > { %10034 = vmatprep.subr.bf16.mxu1 %v11174_v59 }
  0xd7   : > { %1156 = vmatmul.mubr.bf16.gmra.mrb[36].mxu0 %v12046_v4 }
  0xd8   : > { %10011 = vmatmul.mubr.bf16.gmra.mrb[12].mxu1 %v11162_v60  ;;  %1165 = vmatprep.mubr.bf16.mxu0 %v11634_v0  ;;  %v11191_v60 = vld [vmem:[#allocation6 + $0x48] ss:$12 sps:$4 sm:$0xff]  }
  0xd9   : > { %10014 = vmatprep.mubr.bf16.mxu1 %v11165_v61  ;;  %10035 = vmatpush3.bf16.msra.mxu1 %v11174_v59  ;;  %v11193_v59 = vld [vmem:[#allocation6 + $0x4c] ss:$12 sps:$4 sm:$0xff]   ;;  %v11197_v61 = vld [vmem:[#allocation6 + $0x64] ss:$12 sps:$4 sm:$0xff]  }
  0xda   : > { %10036 = vmatprep.subr.bf16.mxu1 %v11175_v5 }
  0xdd   : > { %10037 = vmatpush3.bf16.msra.mxu1 %v11175_v5  ;;  %v11209_v5 = vld [vmem:[#allocation6 + $0xa8] ss:$12 sps:$4 sm:$0xff]  }
  0xde   : > { %3519 = vmatprep.subr.bf16.mxu1 %v11943_v16  ;;  %v12086_v16 = vcombine.low %v2806_v36, %v12079_v37  ;;  %v11235_v36 = vld [vmem:[#allocation6 + $0x20] ss:$12 sps:$4 sm:$0xff]  }
  0xdf   : > { %1166 = vmatmul.mubr.bf16.gmra.mrb[40].mxu0 %v12062_v19 }
  0xe0   : > { %10015 = vmatmul.mubr.bf16.gmra.mrb[16].mxu1 %v11167_v8  ;;  %1175 = vmatprep.mubr.bf16.mxu0 %v11634_v0  ;;  %v11177_v0 = vld [vmem:[#allocation6] ss:$12 sps:$4 sm:$0xff]   ;;  %v12151_v8 = vcombine.low %v12093_v47, %v2810_v24  ;;  %v12191_v47 = vld [vmem:[#allocation6 + $0x1b0] ss:$12 sps:$4 sm:$0xff]  }
  0xe1   : > { %10018 = vmatprep.mubr.bf16.mxu1 %v11171_v9 }
  0xe7   : > { %1176 = vmatmul.mubr.bf16.gmra.mrb[44].mxu0 %v12074_v29 }
  0xe8   : > { %10019 = vmatmul.mubr.bf16.gmra.mrb[20].mxu1 %v11173_v20  ;;  %9918 = vmatprep.mubr.bf16.mxu0 %v11860_v32  ;;  %v11181_v32 = vld [vmem:[#allocation6 + $0x18] ss:$12 sps:$4 sm:$0xff]   ;;  %v11436_v20 = vld [vmem:[%s11841_s10] sm:$0xff]  }
  0xe9   : > { %10038 = vmatprep.mubr.bf16.mxu1 %v12083_v38 }
  0xef   : > { %9919 = vmatmul.mubr.bf16.vlgmr.msra.gmra.mrb[48].mxu0 %v11874_v42  ;;  %v12118_v42 = vcombine.low %v12010_v45, %v12021_v51  ;;  %v12131_v45 = vcombine.low %v12042_v63, %v2804_v10  ;;  %v11206_v51 = vld [vmem:[#allocation6 + $0x94] ss:$12 sps:$4 sm:$0xff]   ;;  %v12141_v63 = vcombine.low %v12079_v37, %v2808_v40  ;;  %v12165_v10 = vld [vmem:[#allocation2] sm:$0xff] }
  0xf0   : > { %10039 = vmatmul.mubr.bf16.vlgmr.msra.gmra.mrb[24].mxu1 %v12097_v15  ;;  %1474 = vmatpush1.bf16.msra.mxu0 %v11177_v0  ;;  %v12181_v37 = vld [vmem:[#allocation6 + $0x198] ss:$12 sps:$4 sm:$0xff]  }
  0xf1   : > { %9922 = vmatprep.mubr.bf16.mxu0 %v11890_v53  ;;  %1475 = vmatprep.subr.bf16.mxu0 %v11183_v48  ;;  %v12120_v53 = vcombine.low %v2810_v24, %v2811_v25  ;;  %v11248_v24 = vld [vmem:[#allocation6 + $0x68] ss:$12 sps:$4 sm:$0xff]  }
  0xf2   : > { %10042 = vmatprep.mubr.bf16.mxu1 %v12101_v49  ;;  %3520 = vmatpush1.bf16.msra.mxu1 %v11177_v0  ;;  %v12185_v0 = vld [vmem:[#allocation6 + $0x1b4] ss:$12 sps:$4 sm:$0xff]  }
  0xf3   : > { %3521 = vmatprep.subr.bf16.mxu1 %v11183_v48  ;;  %v11240_v48 = vld [vmem:[#allocation6 + $0x38] ss:$12 sps:$4 sm:$0xff]  }
  0xf4   : > { %1476 = vmatpush1.bf16.msra.mxu0 %v11181_v32 }
  0xf5   : > { %1477 = vmatprep.subr.bf16.mxu0 %v11188_v57 }
  0xf6   : > { %3522 = vmatpush1.bf16.msra.mxu1 %v11181_v32  ;;  %v12194_v32 = vld [vmem:[#allocation6 + $0x1cc] ss:$12 sps:$4 sm:$0xff]  }
  0xf7   : > { %9923 = vmatmul.mubr.bf16.gmra.mrb[52].mxu0 %v11909_v1  ;;  %3523 = vmatprep.subr.bf16.mxu1 %v11188_v57  ;;  %v11201_v1 = vld [vmem:[#allocation6 + $0x7c] ss:$12 sps:$4 sm:$0xff]  }
  0xf8   : > { %10043 = vmatmul.mubr.bf16.gmra.mrb[28].mxu1 %v12114_v30  ;;  %1478 = vmatpush1.bf16.msra.mxu0 %v11186_v17  ;;  %v11246_v57 = vld [vmem:[#allocation6 + $0x50] ss:$12 sps:$4 sm:$0xff]  }
  0xf9   : > { %9926 = vmatprep.mubr.bf16.mxu0 %v11931_v11  ;;  %10046 = vmatprep.mubr.bf16.mxu1 %v12118_v42  ;;  %v11199_v11 = vld [vmem:[#allocation6 + $0x78] ss:$12 sps:$4 sm:$0xff]  }
  0xfa   : > { %1479 = vmatprep.subr.bf16.mxu0 %v11193_v59  ;;  %3524 = vmatpush1.bf16.msra.mxu1 %v11186_v17  ;;  %v12204_v17 = vld [vmem:[#allocation6 + $0x1e4] ss:$12 sps:$4 sm:$0xff]  }
  0xfb   : > { %3525 = vmatprep.subr.bf16.mxu1 %v11193_v59  ;;  %v11252_v59 = vld [vmem:[#allocation6 + $0x80] ss:$12 sps:$4 sm:$0xff]  }
  0xfc   : > { %1480 = vmatpush1.bf16.msra.mxu0 %v11191_v60 }
  0xfd   : > { %1481 = vmatprep.subr.bf16.mxu0 %v11197_v61 }
  0xfe   : > { %3526 = vmatpush1.bf16.msra.mxu1 %v11191_v60  ;;  %v12217_v60 = vld [vmem:[#allocation6 + $0x1f8] ss:$12 sps:$4 sm:$0xff]  }
  0xff   : > { %9927 = vmatmul.mubr.bf16.gmra.mrb[56].mxu0 %v11964_v21  ;;  %3527 = vmatprep.subr.bf16.mxu1 %v11197_v61  ;;  %v11211_v21 = vld [vmem:[#allocation6 + $0xac] ss:$12 sps:$4 sm:$0xff]   ;;  %v12220_v61 = vld [vmem:[#allocation6 + $0x214] ss:$12 sps:$4 sm:$0xff]  }
 0x100   : > { %10047 = vmatmul.mubr.bf16.gmra.mrb[32].mxu1 %v12128_v31  ;;  %9930 = vmatprep.mubr.bf16.mxu0 %v11985_v27  ;;  %v2844_v27 = vld [vmem:[%s11841_s10 + $0xc0] sm:$0xf] }
 0x101   : > { %10050 = vmatprep.mubr.bf16.mxu1 %v12131_v45  ;;  %1482 = vmatpush1.bf16.msra.mxu0 %v11195_v41  ;;  %v12153_v9 = vcombine.low %v2811_v25, %v2844_v27  ;;  %v12210_v25 = vld [vmem:[#allocation6 + $0x1fc] ss:$12 sps:$4 sm:$0xff]  }
 0x102   : > { %1483 = vmatprep.subr.bf16.mxu0 %v11201_v1  ;;  %3528 = vmatpush1.bf16.msra.mxu1 %v11195_v41  ;;  %v11254_v41 = vld [vmem:[#allocation6 + $0x98] ss:$12 sps:$4 sm:$0xff]  }
 0x103   : > { %3529 = vmatprep.subr.bf16.mxu1 %v11201_v1  ;;  %v12226_v1 = vld [vmem:[#allocation6 + $0x22c] ss:$12 sps:$4 sm:$0xff]  }
 0x104   : > { %v11439_v27 = vld [vmem:[%s11841_s10 + $0x28] sm:$0xff]  }
 0x105   : > { %1484 = vmatpush1.bf16.msra.mxu0 %v11199_v11 }
 0x106   : > { %1485 = vmatprep.subr.bf16.mxu0 %v11206_v51  ;;  %3530 = vmatpush1.bf16.msra.mxu1 %v11199_v11  ;;  %v11255_v11 = vld [vmem:[#allocation6 + $0xb0] ss:$12 sps:$4 sm:$0xff]  }
 0x107   : > { %9931 = vmatmul.mubr.bf16.gmra.mrb[60].mxu0 %v12003_v39  ;;  %3531 = vmatprep.subr.bf16.mxu1 %v11206_v51  ;;  %v11229_v39 = vld [vmem:[#allocation6 + $0x8] ss:$12 sps:$4 sm:$0xff]  }
 0x108   : > { %10051 = vmatmul.mubr.bf16.gmra.mrb[36].mxu1 %v12138_v52  ;;  %9934 = vmatprep.mubr.bf16.mxu0 %v12028_v56  ;;  %v12161_v56 = vld [vmem:[%s11841_s10 + $0xc4] sm:$0xff]  }
 0x109   : > { %10054 = vmatprep.mubr.bf16.mxu1 %v12141_v63  ;;  %1486 = vmatpush1.bf16.msra.mxu0 %v11204_v62  ;;  %v12233_v51 = vld [vmem:[#allocation6 + $0x228] ss:$12 sps:$4 sm:$0xff]  }
 0x10a   : > { %1487 = vmatprep.subr.bf16.mxu0 %v11211_v21  ;;  %3532 = vmatpush1.bf16.msra.mxu1 %v11204_v62  ;;  %v11258_v62 = vld [vmem:[#allocation6 + $0xc4] ss:$12 sps:$4 sm:$0xff]  }
 0x10b   : > { %3533 = vmatprep.subr.bf16.mxu1 %v11211_v21  ;;  %v11268_v21 = vld [vmem:[#allocation6 + $0x120] ss:$12 sps:$4 sm:$0xff]  }
 0x10d   : > { %1488 = vmatpush1.bf16.msra.mxu0 %v11209_v5 }
 0x10e   : > { %2012 = vmatprep.subr.bf16.mxu0 %v12148_v7  ;;  %3534 = vmatpush1.bf16.msra.mxu1 %v11209_v5 }
 0x10f   : > { %9935 = vmatmul.mubr.bf16.gmra.mrb[64].mxu0 %v12046_v4  ;;  %10062 = vmatprep.subr.bf16.mxu1 %v11229_v39  ;;  %v12170_v4 = vld [vmem:[%s11841_s10 + $0x60] sm:$0xff]  }
 0x110   : > { %10055 = vmatmul.mubr.bf16.gmra.mrb[40].mxu1 %v12151_v8  ;;  %9938 = vmatprep.mubr.bf16.mxu0 %v12062_v19  ;;  %v12174_v19 = vld [vmem:[#allocation6 + $0x19c] ss:$12 sps:$4 sm:$0xff]  }
 0x111   : > { %10058 = vmatprep.mubr.bf16.mxu1 %v12153_v9 }
 0x117   : > { %9939 = vmatmul.mubr.bf16.gmra.mrb[68].mxu0 %v12074_v29  ;;  %v2790_v29 = vld [vmem:[%s11841_s10 + $0x68] sm:$0xf] }
 0x118   : > { %10059 = vmatmul.mubr.bf16.gmra.mrb[44].mxu1 %v12161_v56  ;;  %1505 = vmatprep.mubr.bf16.mxu0 %v12165_v10  ;;  %v12188_v40 = vcombine.low %v2790_v29, %v12070_v28  ;;  %v12201_v28 = vld [vmem:[#allocation6 + $0x1c8] ss:$12 sps:$4 sm:$0xff]  }
 0x119   : > { %3551 = vmatprep.mubr.bf16.mxu1 %v12165_v10 }
 0x11f   : > { %1506 = vmatmul.mubr.bf16.vlgmr.msra.gmra.mrb[0].mxu0 %v11436_v20  ;;  %v11282_v20 = vld [vmem:[#allocation6 + $0x168] ss:$12 sps:$4 sm:$0xff]  }
 0x120   : > { %3552 = vmatmul.mubr.bf16.vlgmr.msra.gmra.mrb[48].mxu1 %v12170_v4  ;;  %2013 = vmatpush1.bf16.msra.mxu0 %v12172_v14 }
 0x121   : > { %1515 = vmatprep.mubr.bf16.mxu0 %v12165_v10  ;;  %3561 = vmatprep.mubr.bf16.mxu1 %v12165_v10 }
 0x122   : > { %2014 = vmatprep.subr.bf16.mxu0 %v12174_v19  ;;  %10063 = vmatpush3.bf16.msra.mxu1 %v11229_v39 }
 0x123   : > { %10064 = vmatprep.subr.bf16.mxu1 %v11235_v36 }
 0x124   : > { %2015 = vmatpush1.bf16.msra.mxu0 %v12181_v37 }
 0x125   : > { %2016 = vmatprep.subr.bf16.mxu0 %v12185_v0 }
 0x126   : > { %10065 = vmatpush3.bf16.msra.mxu1 %v11235_v36 }
 0x127   : > { %1516 = vmatmul.mubr.bf16.gmra.mrb[4].mxu0 %v11862_v33  ;;  %10066 = vmatprep.subr.bf16.mxu1 %v11240_v48  ;;  %v12207_v33 = vld [vmem:[#allocation6 + $0x1e0] ss:$12 sps:$4 sm:$0xff]  }
 0x128   : > { %3562 = vmatmul.mubr.bf16.gmra.mrb[52].mxu1 %v12188_v40  ;;  %1525 = vmatprep.mubr.bf16.mxu0 %v12165_v10 }
 0x129   : > { %3571 = vmatprep.mubr.bf16.mxu1 %v12165_v10  ;;  %2017 = vmatpush1.bf16.msra.mxu0 %v12191_v47 }
 0x12a   : > { %2018 = vmatprep.subr.bf16.mxu0 %v12194_v32  ;;  %10067 = vmatpush3.bf16.msra.mxu1 %v11240_v48 }
 0x12b   : > { %10068 = vmatprep.subr.bf16.mxu1 %v11246_v57 }
 0x12d   : > { %2019 = vmatpush1.bf16.msra.mxu0 %v12201_v28 }
 0x12e   : > { %2020 = vmatprep.subr.bf16.mxu0 %v12204_v17  ;;  %10069 = vmatpush3.bf16.msra.mxu1 %v11246_v57  ;;  %v11442_v57 = vld [vmem:[%s11841_s10 + $0x40] sm:$0xff]  }
 0x12f   : > { %1526 = vmatmul.mubr.bf16.gmra.mrb[8].mxu0 %v11864_v34  ;;  %10070 = vmatprep.subr.bf16.mxu1 %v11248_v24  ;;  %v12223_v34 = vld [vmem:[#allocation6 + $0x210] ss:$12 sps:$4 sm:$0xff]  }
 0x130   : > { %3572 = vmatmul.mubr.bf16.gmra.mrb[56].mxu1 %v11952_v18  ;;  %1535 = vmatprep.mubr.bf16.mxu0 %v12165_v10 }
 0x131   : > { %3581 = vmatprep.mubr.bf16.mxu1 %v12165_v10  ;;  %2021 = vmatpush1.bf16.msra.mxu0 %v12207_v33 }
 0x132   : > { %2022 = vmatprep.subr.bf16.mxu0 %v12210_v25  ;;  %10071 = vmatpush3.bf16.msra.mxu1 %v11248_v24  ;;  %v11288_v24 = vld [vmem:[#allocation6 + $0x1a0] ss:$12 sps:$4 sm:$0xff]  }
 0x133   : > { %10072 = vmatprep.subr.bf16.mxu1 %v11252_v59 }
 0x135   : > { %2023 = vmatpush1.bf16.msra.mxu0 %v12217_v60 }
 0x136   : > { %2024 = vmatprep.subr.bf16.mxu0 %v12220_v61  ;;  %10073 = vmatpush3.bf16.msra.mxu1 %v11252_v59  ;;  %v11290_v59 = vld [vmem:[#allocation6 + $0x1b8] ss:$12 sps:$4 sm:$0xff]  }
 0x137   : > { %1536 = vmatmul.mubr.bf16.gmra.mrb[12].mxu0 %v11876_v43  ;;  %10074 = vmatprep.subr.bf16.mxu1 %v11254_v41  ;;  %v11256_v43 = vld [vmem:[#allocation6 + $0xc0] ss:$12 sps:$4 sm:$0xff]  }
 0x138   : > { %3582 = vmatmul.mubr.bf16.gmra.mrb[60].mxu1 %v11979_v26  ;;  %1545 = vmatprep.mubr.bf16.mxu0 %v12165_v10 }
 0x139   : > { %3591 = vmatprep.mubr.bf16.mxu1 %v12165_v10  ;;  %2025 = vmatpush1.bf16.msra.mxu0 %v12223_v34 }
 0x13a   : > { %2026 = vmatprep.subr.bf16.mxu0 %v12226_v1  ;;  %10075 = vmatpush3.bf16.msra.mxu1 %v11254_v41 }
 0x13b   : > { %10076 = vmatprep.subr.bf16.mxu1 %v11255_v11 }
 0x13d   : > { %2027 = vmatpush1.bf16.msra.mxu0 %v12233_v51 }
 0x13e   : > { %10077 = vmatpush3.bf16.msra.mxu1 %v11255_v11  ;;  %3079 = vmatprep.subr.bf16.mxu0 %v11258_v62  ;;  %v11444_v11 = vld [vmem:[%s11841_s10 + $0x50] sm:$0xff]   ;;  %v11295_v62 = vld [vmem:[#allocation6 + $0x1e8] ss:$12 sps:$4 sm:$0xff]  }
 0x13f   : > { %1546 = vmatmul.mubr.bf16.gmra.mrb[16].mxu0 %v11878_v44  ;;  %4057 = vmatprep.subr.bf16.mxu1 %v12148_v7  ;;  %v11261_v44 = vld [vmem:[#allocation6 + $0xdc] ss:$12 sps:$4 sm:$0xff]   ;;  %v11279_v7 = vld [vmem:[#allocation6 + $0x154] ss:$12 sps:$4 sm:$0xff]  }
 0x140   : > { %3592 = vmatmul.mubr.bf16.gmra.mrb[64].mxu1 %v11997_v35  ;;  %1555 = vmatprep.mubr.bf16.mxu0 %v12165_v10 }
 0x141   : > { %3601 = vmatprep.mubr.bf16.mxu1 %v12165_v10 }
 0x147   : > { %1556 = vmatmul.mubr.bf16.gmra.mrb[20].mxu0 %v11892_v54  ;;  %v11437_v54 = vld [vmem:[%s11841_s10 + $0x18] sm:$0xff]  }
 0x148   : > { %3602 = vmatmul.mubr.bf16.gmra.mrb[68].mxu1 %v12014_v46  ;;  %1565 = vmatprep.mubr.bf16.mxu0 %v12165_v10 }
 0x149   : > { %3611 = vmatprep.mubr.bf16.mxu1 %v12165_v10 }
 0x14f   : > { %1566 = vmatmul.mubr.bf16.gmra.mrb[24].mxu0 %v11895_v55  ;;  %v11259_v55 = vld [vmem:[#allocation6 + $0xd8] ss:$12 sps:$4 sm:$0xff]  }
 0x150   : > { %3612 = vmatmul.mubr.bf16.gmra.mrb[72].mxu1 %v12032_v58  ;;  %1575 = vmatprep.mubr.bf16.mxu0 %v12165_v10 }
 0x151   : > { %3621 = vmatprep.mubr.bf16.mxu1 %v12165_v10 }
 0x157   : > { %1576 = vmatmul.mubr.bf16.gmra.mrb[28].mxu0 %v11912_v2  ;;  %v11264_v2 = vld [vmem:[#allocation6 + $0xf4] ss:$12 sps:$4 sm:$0xff]  }
 0x158   : > { %3622 = vmatmul.mubr.bf16.gmra.mrb[76].mxu1 %v12050_v6  ;;  %1585 = vmatprep.mubr.bf16.mxu0 %v12165_v10 }
 0x159   : > { %3631 = vmatprep.mubr.bf16.mxu1 %v12165_v10 }
 0x15f   : > { %1586 = vmatmul.mubr.bf16.gmra.mrb[32].mxu0 %v11915_v3  ;;  %v11262_v3 = vld [vmem:[#allocation6 + $0xf0] ss:$12 sps:$4 sm:$0xff]  }
 0x160   : > { %3632 = vmatmul.mubr.bf16.gmra.mrb[80].mxu1 %v12065_v23  ;;  %1595 = vmatprep.mubr.bf16.mxu0 %v12165_v10 }
 0x161   : > { %3641 = vmatprep.mubr.bf16.mxu1 %v12165_v10 }
 0x167   : > { %1596 = vmatmul.mubr.bf16.gmra.mrb[36].mxu0 %v11934_v12  ;;  %v11267_v12 = vld [vmem:[#allocation6 + $0x10c] ss:$12 sps:$4 sm:$0xff]  }
 0x168   : > { %3642 = vmatmul.mubr.bf16.gmra.mrb[84].mxu1 %v12086_v16  ;;  %1605 = vmatprep.mubr.bf16.mxu0 %v12165_v10 }
 0x169   : > { %3651 = vmatprep.mubr.bf16.mxu1 %v12165_v10 }
 0x16f   : > { %1606 = vmatmul.mubr.bf16.gmra.mrb[40].mxu0 %v11938_v13  ;;  %v11438_v13 = vld [vmem:[%s11841_s10 + $0x20] sm:$0xff]  }
 0x170   : > { %3652 = vmatmul.mubr.bf16.gmra.mrb[88].mxu1 %v12104_v50  ;;  %1615 = vmatprep.mubr.bf16.mxu0 %v12165_v10 }
 0x171   : > { %3661 = vmatprep.mubr.bf16.mxu1 %v12165_v10 }
 0x177   : > { %1616 = vmatmul.mubr.bf16.gmra.mrb[44].mxu0 %v11968_v22  ;;  %v11270_v22 = vld [vmem:[#allocation6 + $0x124] ss:$12 sps:$4 sm:$0xff]  }
 0x178   : > { %3662 = vmatmul.mubr.bf16.gmra.mrb[92].mxu1 %v12120_v53  ;;  %2044 = vmatprep.mubr.bf16.mxu0 %v12165_v10 }
 0x179   : > { %10078 = vmatprep.mubr.bf16.mxu1 %v12170_v4 }
 0x17f   : > { %2045 = vmatmul.mubr.bf16.vlgmr.msra.gmra.mrb[0].mxu0 %v11437_v54 }
 0x180   : > { %10079 = vmatmul.mubr.bf16.vlgmr.msra.gmra.mrb[24].mxu1 %v12188_v40  ;;  %3080 = vmatpush1.bf16.msra.mxu0 %v11256_v43 }
 0x181   : > { %2054 = vmatprep.mubr.bf16.mxu0 %v12165_v10  ;;  %10082 = vmatprep.mubr.bf16.mxu1 %v11952_v18  ;;  %v11265_v18 = vld [vmem:[#allocation6 + $0x108] ss:$12 sps:$4 sm:$0xff]  }
 0x182   : > { %3081 = vmatprep.subr.bf16.mxu0 %v11261_v44  ;;  %4058 = vmatpush1.bf16.msra.mxu1 %v12172_v14  ;;  %v11284_v14 = vld [vmem:[#allocation6 + $0x16c] ss:$12 sps:$4 sm:$0xff]  }
 0x183   : > { %4059 = vmatprep.subr.bf16.mxu1 %v12174_v19  ;;  %v11440_v19 = vld [vmem:[%s11841_s10 + $0x30] sm:$0xff]   ;;  %v12368_v44 = vld [vmem:[%s11841_s10 + $0x88] sm:$0xff]  }
 0x184   : > { %3082 = vmatpush1.bf16.msra.mxu0 %v11259_v55 }
 0x185   : > { %3083 = vmatprep.subr.bf16.mxu0 %v11264_v2  ;;  %v11296_v2 = vld [vmem:[#allocation6 + $0x200] ss:$12 sps:$4 sm:$0xff]  }
 0x186   : > { %4060 = vmatpush1.bf16.msra.mxu1 %v12181_v37 }
 0x187   : > { %2055 = vmatmul.mubr.bf16.gmra.mrb[4].mxu0 %v11438_v13  ;;  %4061 = vmatprep.subr.bf16.mxu1 %v12185_v0  ;;  %v11441_v0 = vld [vmem:[%s11841_s10 + $0x38] sm:$0xff]  }
 0x188   : > { %10083 = vmatmul.mubr.bf16.gmra.mrb[28].mxu1 %v11979_v26  ;;  %2064 = vmatprep.mubr.bf16.mxu0 %v12165_v10  ;;  %v11275_v26 = vld [vmem:[#allocation6 + $0x13c] ss:$12 sps:$4 sm:$0xff]   ;;  %v11298_v13 = vld [vmem:[#allocation6 + $0x218] ss:$12 sps:$4 sm:$0xff]  }
 0x189   : > { %10086 = vmatprep.mubr.bf16.mxu1 %v11997_v35  ;;  %3084 = vmatpush1.bf16.msra.mxu0 %v11262_v3  ;;  %v11273_v35 = vld [vmem:[#allocation6 + $0x138] ss:$12 sps:$4 sm:$0xff]  }
 0x18a   : > { %4062 = vmatpush1.bf16.msra.mxu1 %v12191_v47  ;;  %3085 = vmatprep.subr.bf16.mxu0 %v11267_v12  ;;  %v11445_v3 = vld [vmem:[%s11841_s10 + $0x58] sm:$0xff]  }
 0x18b   : > { %4063 = vmatprep.subr.bf16.mxu1 %v12194_v32 }
 0x18d   : > { %3086 = vmatpush1.bf16.msra.mxu0 %v11265_v18 }
 0x18e   : > { %4064 = vmatpush1.bf16.msra.mxu1 %v12201_v28  ;;  %3087 = vmatprep.subr.bf16.mxu0 %v11270_v22  ;;  %v12338_v28 = vld [vmem:[%s11841_s10 + $0x78] sm:$0xff]  }
 0x18f   : > { %2065 = vmatmul.mubr.bf16.gmra.mrb[8].mxu0 %v11439_v27  ;;  %4065 = vmatprep.subr.bf16.mxu1 %v12204_v17 }
 0x190   : > { %10087 = vmatmul.mubr.bf16.gmra.mrb[32].mxu1 %v12014_v46  ;;  %2074 = vmatprep.mubr.bf16.mxu0 %v12165_v10 }
 0x191   : > { %10090 = vmatprep.mubr.bf16.mxu1 %v12032_v58  ;;  %3088 = vmatpush1.bf16.msra.mxu0 %v11268_v21  ;;  %v11277_v58 = vld [vmem:[#allocation6 + $0x150] ss:$12 sps:$4 sm:$0xff]  }
 0x192   : > { %4066 = vmatpush1.bf16.msra.mxu1 %v12207_v33  ;;  %3089 = vmatprep.subr.bf16.mxu0 %v11275_v26  ;;  %v12380_v21 = vld [vmem:[%s11841_s10 + $0x90] sm:$0xff]  }
 0x193   : > { %v12290_v5 = vpop.f32.mrb[0].mxu1  ;;  %4067 = vmatprep.subr.bf16.mxu1 %v12210_v25  ;;  %v11443_v25 = vld [vmem:[%s11841_s10 + $0x48] sm:$0xff]  }
 0x194   : > { %v12293_v39 = vpop.f32.mrb[1].mxu1 }
 0x195   : > { %v12296_v46 = vpop.f32.mrb[2].mxu1  ;;  %3090 = vmatpush1.bf16.msra.mxu0 %v11273_v35 }
 0x196   : > { %v12298_v4 = vpop.f32.mrb[3].mxu1  ;;  %4068 = vmatpush1.bf16.msra.mxu1 %v12217_v60  ;;  %3091 = vmatprep.subr.bf16.mxu0 %v11279_v7 }
 0x197   : > { %2075 = vmatmul.mubr.bf16.gmra.mrb[12].mxu0 %v11440_v19  ;;  %4069 = vmatprep.subr.bf16.mxu1 %v12220_v61  ;;  %v12353_v61 = vld [vmem:[%s11841_s10 + $0x80] sm:$0xff]  }
 0x198   : > { %10091 = vmatmul.mubr.bf16.gmra.mrb[36].mxu1 %v12050_v6  ;;  %2084 = vmatprep.mubr.bf16.mxu0 %v12165_v10 }
 0x199   : > { %10094 = vmatprep.mubr.bf16.mxu1 %v12065_v23  ;;  %3092 = vmatpush1.bf16.msra.mxu0 %v11277_v58  ;;  %v11285_v23 = vld [vmem:[#allocation6 + $0x188] ss:$12 sps:$4 sm:$0xff]  }
 0x19a   : > { %4070 = vmatpush1.bf16.msra.mxu1 %v12223_v34  ;;  %3093 = vmatprep.subr.bf16.mxu0 %v11284_v14  ;;  %v11299_v14 = vld [vmem:[#allocation6 + $0x230] ss:$12 sps:$4 sm:$0xff]  }
 0x19b   : > { %v12306_v36 = vpop.f32.mrb[4].mxu1  ;;  %4071 = vmatprep.subr.bf16.mxu1 %v12226_v1  ;;  %v11293_v1 = vld [vmem:[#allocation6 + $0x1d0] ss:$12 sps:$4 sm:$0xff]  }
 0x19c   : > { %v12309_v29 = vpop.f32.mrb[5].mxu1 }
 0x19d   : > { %v12312_v6 = vpop.f32.mrb[6].mxu1  ;;  %3094 = vmatpush1.bf16.msra.mxu0 %v11282_v20 }
 0x19e   : > { %v12314_v37 = vpop.f32.mrb[7].mxu1  ;;  %4072 = vmatpush1.bf16.msra.mxu1 %v12233_v51 }
 0x19f   : > { %2085 = vmatmul.mubr.bf16.gmra.mrb[16].mxu0 %v11441_v0  ;;  %10102 = vmatprep.subr.bf16.mxu1 %v11285_v23 }
 0x1a0   : > { %10095 = vmatmul.mubr.bf16.gmra.mrb[40].mxu1 %v12086_v16  ;;  %2094 = vmatprep.mubr.bf16.mxu0 %v12165_v10 }
 0x1a1   : > { %10098 = vmatprep.mubr.bf16.mxu1 %v12104_v50 }
 0x1a3   : > { %v12321_v40 = vpop.f32.mrb[8].mxu1 }
 0x1a4   : > { %v12323_v47 = vpop.f32.mrb[9].mxu1 }
 0x1a5   : > { %v12325_v48 = vpop.f32.mrb[10].mxu1 }
 0x1a6   : > { %v12327_v32 = vpop.f32.mrb[11].mxu1 }
 0x1a7   : > { %2095 = vmatmul.mubr.bf16.gmra.mrb[20].mxu0 %v11442_v57 }
 0x1a8   : > { %10099 = vmatmul.mubr.bf16.gmra.mrb[44].mxu1 %v12120_v53  ;;  %2104 = vmatprep.mubr.bf16.mxu0 %v12165_v10 }
 0x1a9   : > { %4089 = vmatprep.mubr.bf16.mxu1 %v12165_v10 }
 0x1ab   : > { %v12333_v16 = vpop.f32.mrb[12].mxu1 }
 0x1ac   : > { %v12335_v50 = vpop.f32.mrb[13].mxu1 }
 0x1ad   : > { %v12340_v17 = vpop.f32.mrb[14].mxu1 }
 0x1ae   : > { %v12342_v33 = vpop.f32.mrb[15].mxu1 }
 0x1af   : > { %2105 = vmatmul.mubr.bf16.gmra.mrb[24].mxu0 %v11443_v25 }
 0x1b0   : > { %4090 = vmatmul.mubr.bf16.vlgmr.msra.gmra.mrb[48].mxu1 %v12338_v28  ;;  %2114 = vmatprep.mubr.bf16.mxu0 %v12165_v10 }
 0x1b1   : > { %4099 = vmatprep.mubr.bf16.mxu1 %v12165_v10  ;;  %10103 = vmatpush3.bf16.msra.mxu1 %v11285_v23 }
 0x1b2   : > { %10104 = vmatprep.subr.bf16.mxu1 %v11288_v24 }
 0x1b3   : > { %v12348_v53 = vpop.f32.mrb[16].mxu1 }
 0x1b4   : > { %v12350_v60 = vpop.f32.mrb[17].mxu1 }
 0x1b5   : > { %v12355_v34 = vpop.f32.mrb[18].mxu1  ;;  %10105 = vmatpush3.bf16.msra.mxu1 %v11288_v24 }
 0x1b6   : > { %v12357_v41 = vpop.f32.mrb[19].mxu1  ;;  %10106 = vmatprep.subr.bf16.mxu1 %v11290_v59 }
 0x1b7   : > { %2115 = vmatmul.mubr.bf16.gmra.mrb[28].mxu0 %v11444_v11 }
 0x1b8   : > { %4100 = vmatmul.mubr.bf16.gmra.mrb[52].mxu1 %v12353_v61  ;;  %2124 = vmatprep.mubr.bf16.mxu0 %v12165_v10 }
 0x1b9   : > { %4109 = vmatprep.mubr.bf16.mxu1 %v12165_v10  ;;  %10107 = vmatpush3.bf16.msra.mxu1 %v11290_v59  ;;  %v12405_v59 = vld [vmem:[%s11841_s10 + $0x98] sm:$0xff]  }
 0x1ba   : > { %10108 = vmatprep.subr.bf16.mxu1 %v11293_v1 }
 0x1bb   : > { %v12363_v51 = vpop.f32.mrb[20].mxu1 }
 0x1bc   : > { %v12365_v43 = vpop.f32.mrb[21].mxu1 }
 0x1bd   : > { %v12370_v54 = vpop.f32.mrb[22].mxu1  ;;  %10109 = vmatpush3.bf16.msra.mxu1 %v11293_v1 }
 0x1be   : > { %v12372_v55 = vpop.f32.mrb[23].mxu1  ;;  %10110 = vmatprep.subr.bf16.mxu1 %v11295_v62 }
 0x1bf   : > { %2125 = vmatmul.mubr.bf16.gmra.mrb[32].mxu0 %v11445_v3 }
 0x1c0   : > { %4110 = vmatmul.mubr.bf16.gmra.mrb[56].mxu1 %v12368_v44  ;;  %2134 = vmatprep.mubr.bf16.mxu0 %v12165_v10 }
 0x1c1   : > { %4119 = vmatprep.mubr.bf16.mxu1 %v12165_v10  ;;  %10111 = vmatpush3.bf16.msra.mxu1 %v11295_v62 }
 0x1c2   : > { %v9920_v12 = vpop.f32.mrb[48].mxu0  ;;  %10112 = vmatprep.subr.bf16.mxu1 %v11296_v2 }
 0x1c3   : > { %v10382_v18 = vadd.f32 %v12290_v5, %v9920_v12  ;;  %v1220_v22 = vpop.f32.mrb[49].mxu0  ;;  %v11446_v5 = vld [vmem:[%s11841_s10 + $0x60] sm:$0xff]  }
 0x1c4   : > { %v12383_v26 = vadd.f32 %v12293_v39, %v1220_v22  ;;  %v9921_v27 = vpop.f32.mrb[50].mxu0  ;;  %v11447_v22 = vld [vmem:[%s11841_s10 + $0x68] sm:$0xff]  }
 0x1c5   : > { %v10384_v35 = vadd.f32 %v12296_v46, %v9921_v27  ;;  %v1223_v7 = vpop.f32.mrb[51].mxu0  ;;  %10113 = vmatpush3.bf16.msra.mxu1 %v11296_v2  ;;  %v2516_v19 = vrot.slane %v10382_v18, 1 }
 0x1c6   : > { %v10385_v58 = vadd.f32 %v12298_v4, %v1223_v7  ;;  %10114 = vmatprep.subr.bf16.mxu1 %v11298_v13  ;;  %v2513_v39 = vrot.slane %v12383_v26, 1  ;;  %v11303_v26 = vld [vmem:[#allocation8 + $0xd8] ss:$12 sps:$4 sm:$0xff]  }
 0x1c7   : > { %v2518_v20 = vrot.slane %v10384_v35, 1  ;;  %2135 = vmatmul.mubr.bf16.gmra.mrb[36].mxu0 %v11446_v5 }
 0x1c8   : > { %4120 = vmatmul.mubr.bf16.gmra.mrb[60].mxu1 %v12380_v21  ;;  %v2514_v23 = vrot.slane %v10385_v58, 1  ;;  %2144 = vmatprep.mubr.bf16.mxu0 %v12165_v10 }
 0x1c9   : > { %4129 = vmatprep.mubr.bf16.mxu1 %v12165_v10  ;;  %10115 = vmatpush3.bf16.msra.mxu1 %v11298_v13  ;;  %v12393_v46 = vsel %vm15263_vm0, %v2516_v19, %v2518_v20 }
 0x1ca   : > { %v12398_v4 = vsel %vm15263_vm0, %v2513_v39, %v2514_v23  ;;  %v9924_v0 = vpop.f32.mrb[52].mxu0  ;;  %10116 = vmatprep.subr.bf16.mxu1 %v11299_v14  ;;  %v12401_v57 = vsel %vm15263_vm0, %v2514_v23, %v2516_v19 }
 0x1cb   : > { %15370 = vst [vmem:[#allocation13_spill] sm:$0xff] %v12398_v4  ;;  %v10386_v24 = vadd.f32 %v12306_v36, %v9924_v0  ;;  %v1236_v25 = vpop.f32.mrb[53].mxu0 }
 0x1cc   : > { %v10387_v1 = vadd.f32 %v12309_v29, %v1236_v25  ;;  %v9925_v11 = vpop.f32.mrb[54].mxu0 }
 0x1cd   : > { %v10388_v62 = vadd.f32 %v12312_v6, %v9925_v11  ;;  %v1239_v2 = vpop.f32.mrb[55].mxu0  ;;  %10117 = vmatpush3.bf16.msra.mxu1 %v11299_v14  ;;  %v2524_v13 = vrot.slane %v10386_v24, 1  ;;  %v12428_v14 = vld [vmem:[%s11841_s10 + $0xa0] sm:$0xff]  }
 0x1ce   : > { %v2520_v3 = vrot.slane %v10387_v1, 1  ;;  %v10389_v12 = vadd.f32 %v12314_v37, %v1239_v2  ;;  %v11448_v1 = vld [vmem:[%s11841_s10 + $0x70] sm:$0xff]  }
 0x1cf   : > { %v2526_v18 = vrot.slane %v10388_v62, 1  ;;  %2145 = vmatmul.mubr.bf16.gmra.mrb[40].mxu0 %v11447_v22 }
 0x1d0   : > { %4130 = vmatmul.mubr.bf16.gmra.mrb[64].mxu1 %v12405_v59  ;;  %v2522_v36 = vrot.slane %v10389_v12, 1  ;;  %2154 = vmatprep.mubr.bf16.mxu0 %v12165_v10  ;;  %v12415_v29 = vsel %vm15263_vm0, %v2518_v20, %v2520_v3 }
 0x1d1   : > { %4139 = vmatprep.mubr.bf16.mxu1 %v12165_v10  ;;  %v12418_v6 = vsel %vm15263_vm0, %v2524_v13, %v2526_v18 }
 0x1d2   : > { %v9928_v37 = vpop.f32.mrb[56].mxu0  ;;  %v12421_v27 = vsel %vm15263_vm0, %v2520_v3, %v2522_v36  ;;  %v12424_v35 = vsel %vm15263_vm0, %v2522_v36, %v2524_v13  ;;  %v12451_v13 = vld [vmem:[%s11841_s10 + $0xa8] sm:$0xff]  }
 0x1d3   : > { %v10390_v7 = vadd.f32 %v12321_v40, %v9928_v37  ;;  %v1252_v58 = vpop.f32.mrb[57].mxu0 }
 0x1d4   : > { %v10391_v19 = vadd.f32 %v12323_v47, %v1252_v58  ;;  %v9929_v5 = vpop.f32.mrb[58].mxu0 }
 0x1d5   : > { %v10392_v20 = vadd.f32 %v12325_v48, %v9929_v5  ;;  %v1255_v23 = vpop.f32.mrb[59].mxu0  ;;  %v2532_v11 = vrot.slane %v10390_v7, 1 }
 0x1d6   : > { %v2528_v0 = vrot.slane %v10391_v19, 1  ;;  %v10393_v24 = vadd.f32 %v12327_v32, %v1255_v23 }
 0x1d7   : > { %v2534_v25 = vrot.slane %v10392_v20, 1  ;;  %2155 = vmatmul.mubr.bf16.gmra.mrb[44].mxu0 %v11448_v1 }
 0x1d8   : > { %4140 = vmatmul.mubr.bf16.gmra.mrb[68].mxu1 %v12428_v14  ;;  %v2530_v40 = vrot.slane %v10393_v24, 1  ;;  %3111 = vmatprep.mubr.bf16.mxu0 %v12165_v10  ;;  %v12438_v47 = vsel %vm15263_vm0, %v2526_v18, %v2528_v0 }
 0x1d9   : > { %4149 = vmatprep.mubr.bf16.mxu1 %v12165_v10  ;;  %v12447_v2 = vsel %vm15263_vm0, %v2532_v11, %v2534_v25 }
 0x1da   : > { %v9932_v48 = vpop.f32.mrb[60].mxu0  ;;  %v12441_v62 = vsel %vm15263_vm0, %v2528_v0, %v2530_v40  ;;  %v12444_v32 = vsel %vm15263_vm0, %v2530_v40, %v2532_v11 }
 0x1db   : > { %v10394_v3 = vadd.f32 %v12333_v16, %v9932_v48  ;;  %v1268_v12 = vpop.f32.mrb[61].mxu0 }
 0x1dc   : > { %v10395_v22 = vadd.f32 %v12335_v50, %v1268_v12  ;;  %v9933_v18 = vpop.f32.mrb[62].mxu0  ;;  %v11291_v12 = vld [vmem:[%s11841_s10 + $0xb8] sm:$0xff]  }
 0x1dd   : > { %v10396_v36 = vadd.f32 %v12340_v17, %v9933_v18  ;;  %v1271_v37 = vpop.f32.mrb[63].mxu0 }
 0x1de   : > { %v2536_v7 = vrot.slane %v10395_v22, 1  ;;  %v10397_v58 = vadd.f32 %v12342_v33, %v1271_v37  ;;  %v12468_v33 = vld [vmem:[%s11841_s10 + $0xb0] sm:$0xff]  }
 0x1df   : > { %3112 = vmatmul.mubr.bf16.vlgmr.msra.gmra.mrb[72].mxu0 %v12083_v38  ;;  %v2542_v11 = vrot.slane %v10396_v36, 1 }
 0x1e0   : > { %4150 = vmatmul.mubr.bf16.gmra.mrb[72].mxu1 %v12451_v13  ;;  %v2538_v19 = vrot.slane %v10397_v58, 1  ;;  %3121 = vmatprep.mubr.bf16.mxu0 %v12165_v10  ;;  %v12461_v16 = vsel %vm15263_vm0, %v2534_v25, %v2536_v7  ;;  %v2540_v25 = vrot.slane %v10394_v3, 1 }
 0x1e1   : > { %4159 = vmatprep.mubr.bf16.mxu1 %v12165_v10 }
 0x1e2   : > { %v9936_v50 = vpop.f32.mrb[64].mxu0  ;;  %v12464_v5 = vsel %vm15263_vm0, %v2536_v7, %v2538_v19  ;;  %v12484_v3 = vsel %vm15263_vm0, %v2540_v25, %v2542_v11 }
 0x1e3   : > { %v10398_v17 = vadd.f32 %v12348_v53, %v9936_v50  ;;  %v1284_v20 = vpop.f32.mrb[65].mxu0 }
 0x1e4   : > { %v10399_v38 = vadd.f32 %v12350_v60, %v1284_v20  ;;  %v9937_v23 = vpop.f32.mrb[66].mxu0  ;;  %v12478_v60 = vsel %vm15263_vm0, %v2538_v19, %v2540_v25  ;;  %v11292_v19 = vld [vmem:[%s11841_s10 + $0xc0] sm:$0xff]   ;;  %v11297_v25 = vld [vmem:[%s11841_s10 + $0xd0] sm:$0xff]  }
 0x1e5   : > { %v10400_v0 = vadd.f32 %v12355_v34, %v9937_v23  ;;  %v1287_v24 = vpop.f32.mrb[67].mxu0  ;;  %v2548_v7 = vrot.slane %v10398_v17, 1 }
 0x1e6   : > { %v10401_v1 = vadd.f32 %v12357_v41, %v1287_v24  ;;  %v2544_v40 = vrot.slane %v10399_v38, 1 }
 0x1e7   : > { %3122 = vmatmul.mubr.bf16.gmra.mrb[76].mxu0 %v12097_v15 }
 0x1e8   : > { %4160 = vmatmul.mubr.bf16.gmra.mrb[76].mxu1 %v12468_v33  ;;  %3131 = vmatprep.mubr.bf16.mxu0 %v12165_v10  ;;  %v12487_v22 = vsel %vm15263_vm0, %v2542_v11, %v2544_v40 }
 0x1e9   : > { %4169 = vmatprep.mubr.bf16.mxu1 %v12165_v10 }
 0x1ea   : > { %v9940_v53 = vpop.f32.mrb[68].mxu0 }
 0x1eb   : > { %v10402_v34 = vadd.f32 %v12363_v51, %v9940_v53  ;;  %v1300_v48 = vpop.f32.mrb[69].mxu0  ;;  %v2546_v51 = vrot.slane %v10401_v1, 1  ;;  %v11306_v53 = vld [vmem:[#allocation8 + $0xf0] ss:$12 sps:$4 sm:$0xff]  }
 0x1ec   : > { %v10403_v15 = vadd.f32 %v12365_v43, %v1300_v48  ;;  %v9941_v41 = vpop.f32.mrb[70].mxu0  ;;  %v2550_v43 = vrot.slane %v10400_v0, 1  ;;  %v11294_v0 = vld [vmem:[%s11841_s10 + $0xc8] sm:$0xff]  }
 0x1ed   : > { %v10404_v18 = vadd.f32 %v12370_v54, %v9941_v41  ;;  %v1303_v36 = vpop.f32.mrb[71].mxu0  ;;  %v12496_v50 = vsel %vm15263_vm0, %v2544_v40, %v2546_v51  ;;  %v12499_v20 = vsel %vm15263_vm0, %v2546_v51, %v2548_v7  ;;  %v2556_v17 = vrot.slane %v10402_v34, 1  ;;  %v11308_v40 = vld [vmem:[#allocation8 + $0xf4] ss:$12 sps:$4 sm:$0xff]  }
 0x1ee   : > { %v10405_v37 = vadd.f32 %v12372_v55, %v1303_v36  ;;  %v2552_v58 = vrot.slane %v10403_v15, 1  ;;  %v11309_v41 = vld [vmem:[#allocation8 + $0x108] ss:$12 sps:$4 sm:$0xff]  }
 0x1ef   : > { %3132 = vmatmul.mubr.bf16.gmra.mrb[80].mxu0 %v12101_v49  ;;  %v12502_v49 = vsel %vm15263_vm0, %v2548_v7, %v2550_v43  ;;  %v2558_v55 = vrot.slane %v10404_v18, 1  ;;  %v11311_v18 = vld [vmem:[#allocation8 + $0x10c] ss:$12 sps:$4 sm:$0xff]  }
 0x1f0   : > { %4170 = vmatmul.mubr.bf16.gmra.mrb[80].mxu1 %v11291_v12  ;;  %3141 = vmatprep.mubr.bf16.mxu0 %v12165_v10  ;;  %v2554_v54 = vrot.slane %v10405_v37, 1  ;;  %v12506_v38 = vsel %vm15263_vm0, %v2550_v43, %v2552_v58  ;;  %v11314_v43 = vld [vmem:[#allocation8 + $0x124] ss:$12 sps:$4 sm:$0xff]  }
 0x1f1   : > { %4179 = vmatprep.mubr.bf16.mxu1 %v12165_v10  ;;  %v12518_v1 = vsel %vm15263_vm0, %v2556_v17, %v2558_v55 }
 0x1f2   : > { %v12511_v23 = vsel %vm15263_vm0, %v2552_v58, %v2554_v54  ;;  %v12515_v24 = vsel %vm15263_vm0, %v2554_v54, %v2556_v17 }
 0x1f7   : > { %3142 = vmatmul.mubr.bf16.gmra.mrb[84].mxu0 %v12114_v30  ;;  %v12523_v30 = vsel %vm15263_vm0, %v2558_v55, %v2513_v39 }
 0x1f8   : > { %4180 = vmatmul.mubr.bf16.gmra.mrb[84].mxu1 %v11292_v19  ;;  %3151 = vmatprep.mubr.bf16.mxu0 %v12165_v10  ;;  %15371 = vst [vmem:[#allocation14_spill] sm:$0xff] %v12523_v30 }
 0x1f9   : > { %4189 = vmatprep.mubr.bf16.mxu1 %v12165_v10 }
 0x1ff   : > { %3152 = vmatmul.mubr.bf16.gmra.mrb[88].mxu0 %v12118_v42  ;;  %v246_v42 = vlaneseq }
 0x200   : > { %4190 = vmatmul.mubr.bf16.gmra.mrb[88].mxu1 %v11294_v0  ;;  %3161 = vmatprep.mubr.bf16.mxu0 %v12165_v10 }
 0x201   : > { %4199 = vmatprep.mubr.bf16.mxu1 %v12165_v10 }
 0x207   : > { %3162 = vmatmul.mubr.bf16.gmra.mrb[92].mxu0 %v12128_v31  ;;  %v12549_v31 = vshrl.u32 %v246_v42, 7 }
 0x208   : > { %4200 = vmatmul.mubr.bf16.gmra.mrb[92].mxu1 %v11297_v25  ;;  %3171 = vmatprep.mubr.bf16.mxu0 %v12165_v10 }
 0x209   : > { %10118 = vmatprep.mubr.bf16.mxu1 %v12338_v28  ;;  %v12557_v28 = vadd.s32 32, %v12549_v31  ;;  %v12591_v15 = vadd.s32 56, %v12549_v31  ;;  %v12594_v36 = vadd.s32 64, %v12549_v31 }
 0x20b   : > { %v12604_v55 = vmul.u32.u64.low 2863311531, %v12591_v15  ;;  %v12605_v17 = vmul.u32.u64.high 2863311531, %v12591_v15, %v12604_v55 }
 0x20f   : > { %3172 = vmatmul.mubr.bf16.gmra.mrb[96].mxu0 %v12131_v45  ;;  %v249_v45 = vadd.s32 16, %v12549_v31 }
 0x210   : > { %10119 = vmatmul.mubr.bf16.vlgmr.msra.gmra.mrb[24].mxu1 %v12353_v61  ;;  %3181 = vmatprep.mubr.bf16.mxu0 %v12165_v10 }
 0x211   : > { %10122 = vmatprep.mubr.bf16.mxu1 %v12368_v44  ;;  %v12563_v44 = vadd.s32 40, %v12549_v31 }
 0x217   : > { %3182 = vmatmul.mubr.bf16.gmra.mrb[100].mxu0 %v12138_v52  ;;  %v11302_v52 = vld [vmem:[#allocation8 + $0xc4] ss:$12 sps:$4 sm:$0xff]  }
 0x218   : > { %10123 = vmatmul.mubr.bf16.gmra.mrb[28].mxu1 %v12380_v21  ;;  %3191 = vmatprep.mubr.bf16.mxu0 %v12165_v10  ;;  %v11305_v21 = vld [vmem:[#allocation8 + $0xdc] ss:$12 sps:$4 sm:$0xff]  }
 0x219   : > { %10126 = vmatprep.mubr.bf16.mxu1 %v12405_v59  ;;  %5080 = vmatprep.subr.bf16.mxu0 %v11302_v52 }
 0x21a   : > { %7094 = vmatprep.subr.bf16.mxu1 %v11302_v52  ;;  %v12612_v52 = vadd.s32 72, %v12549_v31 }
 0x21f   : > { %3192 = vmatmul.mubr.bf16.gmra.mrb[104].mxu0 %v12141_v63  ;;  %v11300_v63 = vld [vmem:[#allocation8 + $0xc0] ss:$12 sps:$4 sm:$0xff]  }
 0x220   : > { %10127 = vmatmul.mubr.bf16.gmra.mrb[32].mxu1 %v12428_v14  ;;  %3201 = vmatprep.mubr.bf16.mxu0 %v12165_v10 }
 0x221   : > { %10130 = vmatprep.mubr.bf16.mxu1 %v12451_v13  ;;  %5081 = vmatpush1.bf16.msra.mxu0 %v11300_v63  ;;  %v12575_v14 = vmul.u32.u64.low 2863311531, %v12557_v28  ;;  %v12576_v13 = vmul.u32.u64.high 2863311531, %v12557_v28, %v12575_v14 }
 0x222   : > { %7095 = vmatpush1.bf16.msra.mxu1 %v11300_v63  ;;  %5082 = vmatprep.subr.bf16.mxu0 %v11305_v21  ;;  %v11317_v63 = vld [vmem:[#allocation8 + $0x13c] ss:$12 sps:$4 sm:$0xff]  }
 0x223   : > { %7096 = vmatprep.subr.bf16.mxu1 %v11305_v21  ;;  %v321_v51 = vshrl.u32 %v12576_v13, 4  ;;  %v11315_v13 = vld [vmem:[#allocation8 + $0x138] ss:$12 sps:$4 sm:$0xff]  }
 0x225   : > { %5083 = vmatpush1.bf16.msra.mxu0 %v11303_v26  ;;  %v322_v21 = vmul.u32 24, %v321_v51 }
 0x226   : > { %7097 = vmatpush1.bf16.msra.mxu1 %v11303_v26  ;;  %5084 = vmatprep.subr.bf16.mxu0 %v11308_v40  ;;  %v12616_v26 = vadd.s32 80, %v12549_v31 }
 0x227   : > { %3202 = vmatmul.mubr.bf16.gmra.mrb[108].mxu0 %v12151_v8  ;;  %v12554_v8 = vadd.s32 24, %v12549_v31  ;;  %7098 = vmatprep.subr.bf16.mxu1 %v11308_v40  ;;  %v11320_v40 = vld [vmem:[#allocation8 + $0x154] ss:$12 sps:$4 sm:$0xff]  }
 0x228   : > { %10131 = vmatmul.mubr.bf16.gmra.mrb[36].mxu1 %v12468_v33  ;;  %3211 = vmatprep.mubr.bf16.mxu0 %v12165_v10  ;;  %v12579_v33 = vmul.u32.u64.low 2863311531, %v12563_v44  ;;  %v12580_v11 = vmul.u32.u64.high 2863311531, %v12563_v44, %v12579_v33 }
 0x229   : > { %10134 = vmatprep.mubr.bf16.mxu1 %v11291_v12  ;;  %v12571_v39 = vmul.u32.u64.low 2863311531, %v12554_v8  ;;  %v12572_v59 = vmul.u32.u64.high 2863311531, %v12554_v8, %v12571_v39  ;;  %v12588_v12 = vadd.s32 48, %v12549_v31  ;;  %5085 = vmatpush1.bf16.msra.mxu0 %v11306_v53 }
 0x22a   : > { %7099 = vmatpush1.bf16.msra.mxu1 %v11306_v53  ;;  %5086 = vmatprep.subr.bf16.mxu0 %v11311_v18  ;;  %v332_v58 = vshrl.u32 %v12580_v11, 4  ;;  %v12619_v39 = vadd.s32 88, %v12549_v31  ;;  %v12622_v33 = vmul.u32.u64.low 2863311531, %v12612_v52  ;;  %v12623_v11 = vmul.u32.u64.high 2863311531, %v12612_v52, %v12622_v33 }
 0x22b   : > { %v310_v37 = vshrl.u32 %v12572_v59, 4 }
 0x22c   : > { %v333_v14 = vmul.u32 24, %v332_v58 }
 0x22d   : > { %5087 = vmatpush1.bf16.msra.mxu0 %v11309_v41 }
 0x22e   : > { %5088 = vmatprep.subr.bf16.mxu0 %v11314_v43  ;;  %v11318_v43 = vld [vmem:[#allocation8 + $0x150] ss:$12 sps:$4 sm:$0xff]  }
 0x22f   : > { %3212 = vmatmul.mubr.bf16.gmra.mrb[112].mxu0 %v12153_v9  ;;  %v12559_v9 = vmul.u32.u64.low 2863311531, %v249_v45  ;;  %v12560_v61 = vmul.u32.u64.high 2863311531, %v249_v45, %v12559_v9 }
 0x230   : > { %10135 = vmatmul.mubr.bf16.gmra.mrb[40].mxu1 %v11292_v19  ;;  %3221 = vmatprep.mubr.bf16.mxu0 %v12165_v10  ;;  %v12600_v19 = vmul.u32.u64.low 2863311531, %v12588_v12  ;;  %v12601_v54 = vmul.u32.u64.high 2863311531, %v12588_v12, %v12600_v19 }
 0x231   : > { %10138 = vmatprep.mubr.bf16.mxu1 %v11294_v0  ;;  %v299_v48 = vshrl.u32 %v12560_v61, 4  ;;  %v11312_v0 = vld [vmem:[#allocation8 + $0x120] ss:$12 sps:$4 sm:$0xff]   ;;  %v311_v61 = vmul.u32 24, %v310_v37  ;;  %v334_v37 = vsub.s32 %v12563_v44, %v333_v14 }
 0x232   : > { %5089 = vmatpush1.bf16.msra.mxu0 %v11312_v0  ;;  %v343_v51 = vshrl.u32 %v12601_v54, 4  ;;  %v12649_v54 = vadd.s32 96, %v12549_v31  ;;  %v11321_v0 = vld [vmem:[#allocation8 + $0x168] ss:$12 sps:$4 sm:$0xff]  }
 0x233   : > { %v300_v7 = vmul.u32 24, %v299_v48  ;;  %5090 = vmatprep.subr.bf16.mxu0 %v11317_v63  ;;  %v12628_v48 = vmul.u32.u64.low 2863311531, %v12616_v26  ;;  %v12629_v41 = vmul.u32.u64.high 2863311531, %v12616_v26, %v12628_v48  ;;  %vm540_vm9 = vcmp.ne.s32.totalorder %v334_v37, 0 }
 0x234   : > { %vm564_vm11 = vcmp.lt.s32.totalorder %v334_v37, 0  ;;  %v612_v33 = vadd.s32 24, %v334_v37 }
 0x235   : > { %v301_v59 = vsub.s32 %v249_v45, %v300_v7  ;;  %v12632_v45 = vmul.u32.u64.low 2863311531, %v12619_v39  ;;  %v12633_v18 = vmul.u32.u64.high 2863311531, %v12619_v39, %v12632_v45  ;;  %v11323_v7 = vld [vmem:[#allocation8 + $0x16c] ss:$12 sps:$4 sm:$0xff]   ;;  %vm588_vm13 = vmand %vm564_vm11, %vm540_vm9 }
 0x236   : > { %5091 = vmatpush1.bf16.msra.mxu0 %v11315_v13 }
 0x237   : > { %3222 = vmatmul.mubr.bf16.gmra.mrb[116].mxu0 %v12161_v56  ;;  %v12567_v56 = vadd.s32 8, %v12549_v31  ;;  %vm537_vm1 = vcmp.ne.s32.totalorder %v301_v59, 0  ;;  %vm561_vm2 = vcmp.lt.s32.totalorder %v301_v59, 0  ;;  %5092 = vmatprep.subr.bf16.mxu0 %v11320_v40  ;;  %v609_v19 = vadd.s32 24, %v301_v59 }
 0x238   : > { %10139 = vmatmul.mubr.bf16.gmra.mrb[44].mxu1 %v11297_v25  ;;  %5112 = vmatprep.mubr.bf16.mxu0 %v12165_v10  ;;  %v12608_v25 = vmul.u32.u64.low 2863311531, %v12594_v36  ;;  %v12609_v42 = vmul.u32.u64.high 2863311531, %v12594_v36, %v12608_v25  ;;  %vm12644_vm6 = vmand %vm561_vm2, %vm537_vm1  ;;  %v12672_v40 = vadd.s32 104, %v12549_v31  ;;  %v398_v48 = vshrl.u32 %v12633_v18, 4 }
 0x239   : > { %7126 = vmatprep.mubr.bf16.mxu1 %v12165_v10  ;;  %v12583_v10 = vmul.u32.u64.low 2863311531, %v12567_v56  ;;  %v12584_v34 = vmul.u32.u64.high 2863311531, %v12567_v56, %v12583_v10  ;;  %v12667_v13 = vsel %vm12644_vm6, %v609_v19, %v301_v59 }
 0x23a   : > { %v312_v10 = vsub.s32 %v12554_v8, %v311_v61  ;;  %v354_v8 = vshrl.u32 %v12605_v17, 4  ;;  %5093 = vmatpush1.bf16.msra.mxu0 %v11318_v43  ;;  %v376_v61 = vshrl.u32 %v12623_v11, 4  ;;  %v387_v11 = vshrl.u32 %v12629_v41, 4 }
 0x23b   : > { %v288_v9 = vshrl.u32 %v12584_v34, 4  ;;  %v323_v34 = vsub.s32 %v12557_v28, %v322_v21  ;;  %v365_v28 = vshrl.u32 %v12609_v42, 4  ;;  %5094 = vmatprep.subr.bf16.mxu0 %v11323_v7 }
 0x23c   : > { %vm538_vm3 = vcmp.ne.s32.totalorder %v312_v10, 0  ;;  %vm562_vm4 = vcmp.lt.s32.totalorder %v312_v10, 0  ;;  %v610_v55 = vadd.s32 24, %v312_v10  ;;  %v355_v63 = vmul.u32 24, %v354_v8 }
 0x23d   : > { %v289_v53 = vmul.u32 24, %v288_v9  ;;  %vm539_vm7 = vcmp.ne.s32.totalorder %v323_v34, 0  ;;  %vm563_vm8 = vcmp.lt.s32.totalorder %v323_v34, 0  ;;  %v611_v17 = vadd.s32 24, %v323_v34  ;;  %vm12655_vm10 = vmand %vm562_vm4, %vm538_vm3 }
 0x23e   : > { %v366_v9 = vmul.u32 24, %v365_v28  ;;  %vm587_vm12 = vmand %vm563_vm8, %vm539_vm7  ;;  %v12683_v28 = vsel %vm12655_vm10, %v610_v55, %v312_v10  ;;  %5095 = vmatpush1.bf16.msra.mxu0 %v11321_v0  ;;  %v12691_v18 = vsub.s32 %v12591_v15, %v355_v63  ;;  %v377_v44 = vmul.u32 24, %v376_v61 }
 0x23f   : > { %v12640_v58 = vsub.s32 %v12567_v56, %v289_v53  ;;  %v344_v56 = vmul.u32 24, %v343_v51  ;;  %v12677_v45 = vmul.u32.u64.low 2863311531, %v12649_v54  ;;  %v12678_v51 = vmul.u32.u64.high 2863311531, %v12649_v54, %v12677_v45 }
 0x240   : > { %v12688_v41 = vsel %vm587_vm12, %v611_v17, %v323_v34  ;;  %v12694_v19 = vsub.s32 %v12594_v36, %v366_v9  ;;  %v12700_v55 = vmul.u32.u64.low 2863311531, %v12672_v40  ;;  %v12701_v42 = vmul.u32.u64.high 2863311531, %v12672_v40, %v12700_v55 }
 0x241   : > { %v12663_v14 = vadd.s32 24, %v12640_v58  ;;  %v345_v7 = vsub.s32 %v12588_v12, %v344_v56  ;;  %v12704_v12 = vadd.s32 112, %v12549_v31  ;;  %v12706_v17 = vsel %vm588_vm13, %v612_v33, %v334_v37 }
 0x242   : > { %v388_v15 = vmul.u32 24, %v387_v11  ;;  %v399_v56 = vmul.u32 24, %v398_v48  ;;  %v12709_v0 = vadd.s32 120, %v12549_v31  ;;  %vm542_vm1 = vcmp.ne.s32.totalorder %v12691_v18, 0 }
 0x243   : > { %vm541_vm14 = vcmp.ne.s32.totalorder %v345_v7, 0  ;;  %vm565_vm15 = vcmp.lt.s32.totalorder %v345_v7, 0  ;;  %v613_v36 = vadd.s32 24, %v345_v7  ;;  %vm566_vm2 = vcmp.lt.s32.totalorder %v12691_v18, 0 }
 0x244   : > { %v12717_v61 = vsub.s32 %v12612_v52, %v377_v44  ;;  %vm657_vm3 = vcmp.ge.s32.totalorder %v12667_v13, 1  ;;  %vm681_vm4 = vcmp.le.s32.totalorder %v12667_v13, 16  ;;  %vm543_vm6 = vcmp.ne.s32.totalorder %v12694_v19, 0  ;;  %vm12741_vm10 = vmand %vm565_vm15, %vm541_vm14 }
 0x245   : > { %vm658_vm7 = vcmp.ge.s32.totalorder %v12683_v28, 1  ;;  %vm682_vm8 = vcmp.le.s32.totalorder %v12683_v28, 16  ;;  %vm567_vm9 = vcmp.lt.s32.totalorder %v12694_v19, 0  ;;  %v389_v52 = vsub.s32 %v12616_v26, %v388_v15  ;;  %vm12753_vm13 = vmand %vm566_vm2, %vm542_vm1 }
 0x246   : > { %v12731_v48 = vsub.s32 %v12619_v39, %v399_v56  ;;  %v409_v45 = vshrl.u32 %v12678_v51, 4  ;;  %v614_v26 = vadd.s32 24, %v12691_v18  ;;  %vm544_vm11 = vcmp.ne.s32.totalorder %v12717_v61, 0  ;;  %vm12765_vm14 = vmand %vm567_vm9, %vm543_vm6 }
 0x247   : > { %vm568_vm12 = vcmp.lt.s32.totalorder %v12717_v61, 0  ;;  %v616_v15 = vadd.s32 24, %v12717_v61  ;;  %v420_v56 = vshrl.u32 %v12701_v42, 4  ;;  %vm545_vm15 = vcmp.ne.s32.totalorder %v389_v52, 0 }
 0x248   : > { %vm569_vm1 = vcmp.lt.s32.totalorder %v389_v52, 0  ;;  %v12776_v42 = vsel %vm12741_vm10, %v613_v36, %v345_v7  ;;  %vm12780_vm2 = vmand %vm568_vm12, %vm544_vm11  ;;  %vm546_vm6 = vcmp.ne.s32.totalorder %v12731_v48, 0  ;;  %vm570_vm9 = vcmp.lt.s32.totalorder %v12731_v48, 0 }
 0x249   : > { %vm659_vm10 = vcmp.ge.s32.totalorder %v12688_v41, 1  ;;  %vm683_vm11 = vcmp.le.s32.totalorder %v12688_v41, 16  ;;  %vm12802_vm12 = vmand %vm569_vm1, %vm545_vm15  ;;  %vm684_vm0 = vcmp.le.s32.totalorder %v12706_v17, 16 }
 0x24a   : > { %vm594_vm15 = vmand %vm570_vm9, %vm546_vm6  ;;  %vm15264_vm6 = vcmask 1043456  }
 0x24b   : > { %vm12846_vm1 = vmand %vm658_vm7, %vm682_vm8  ;;  %vm661_vm7 = vcmp.ge.s32.totalorder %v12776_v42, 1  ;;  %vm685_vm8 = vcmp.le.s32.totalorder %v12776_v42, 16 }
 0x24c   : > { %vm12894_vm9 = vmand %vm659_vm10, %vm683_vm11 }
 0x252   : > { %v12651_v25 = vpop.f32.mrb[0].mxu0 }
 0x253   : > { %v12660_v21 = vpop.f32.mrb[1].mxu0  ;;  %v15262_v43 = vrot.slane %v12651_v25, 7 }
 0x254   : > { %v2050_v53 = vpop.f32.mrb[2].mxu0 }
 0x255   : > { %v2394_v59 = vrot.slane %v2050_v53, 7  ;;  %v2052_v8 = vpop.f32.mrb[3].mxu0 }
 0x257   : > { %v2395_v10 = vsel %vm15271_vm5, %v15262_v43, %v2394_v59 }
 0x258   : > { %v2465_v34 = vadd.f32 %v2395_v10, %v2052_v8 }
 0x25a   : > { %v12712_v63 = vadd.f32 %v12401_v57, %v2465_v34  ;;  %v2056_v9 = vpop.f32.mrb[4].mxu0  ;;  %v12723_v53 = vmul.u32.u64.low 2863311531, %v12704_v12  ;;  %v12724_v57 = vmul.u32.u64.high 2863311531, %v12704_v12, %v12723_v53 }
 0x25b   : > { %v2396_v37 = vrot.slane %v2056_v9, 7  ;;  %v2058_v33 = vpop.f32.mrb[5].mxu0  ;;  %v12736_v55 = vmul.u32.u64.low 2863311531, %v12709_v0  ;;  %v12737_v34 = vmul.u32.u64.high 2863311531, %v12709_v0, %v12736_v55  ;;  %v12796_v53 = vsel %vm12753_vm13, %v614_v26, %v12691_v18 }
 0x25c   : > { %v2060_v11 = vpop.f32.mrb[6].mxu0  ;;  %v12789_v55 = vld [vmem:[%s15257_s3 + $0x1] ss:$0 sm:$0xff]  ;;  %v431_v51 = vshrl.u32 %v12724_v57, 4  ;;  %vm660_vm13 = vcmp.ge.s32.totalorder %v12706_v17, 1 }
 0x25d   : > { %v2397_v8 = vsel %vm15271_vm5, %v2394_v59, %v2396_v37  ;;  %v2398_v44 = vrot.slane %v2060_v11, 7  ;;  %v2062_v10 = vpop.f32.mrb[7].mxu0  ;;  %v615_v59 = vadd.s32 24, %v12694_v19 }
 0x25e   : > { %v2466_v9 = vadd.f32 %v2397_v8, %v2058_v33  ;;  %v12772_v8 = vld [vmem:[%s15257_s3] ss:$0 sm:$0xff] }
 0x25f   : > { %v2399_v39 = vsel %vm15271_vm5, %v2396_v37, %v2398_v44  ;;  %v442_v37 = vshrl.u32 %v12737_v34, 4 }
 0x260   : > { %v2588_v33 = vadd.f32 %v12393_v46, %v2466_v9  ;;  %v2467_v11 = vadd.f32 %v2399_v39, %v2062_v10  ;;  %v410_v10 = vmul.u32 24, %v409_v45  ;;  %v617_v39 = vadd.s32 24, %v389_v52 }
 0x262   : > { %v2616_v9 = vmul.f32 %v12772_v8, %v2588_v33  ;;  %v2589_v7 = vadd.f32 %v12415_v29, %v2467_v11  ;;  %v2066_v36 = vpop.f32.mrb[8].mxu0  ;;  %v618_v29 = vadd.s32 24, %v12731_v48  ;;  %v421_v33 = vmul.u32 24, %v420_v56 }
 0x263   : > { %v2400_v43 = vrot.slane %v2066_v36, 7  ;;  %v2068_v45 = vpop.f32.mrb[9].mxu0  ;;  %v12815_v36 = vsel %vm12765_vm14, %v615_v59, %v12694_v19  ;;  %v12820_v56 = vsel %vm12780_vm2, %v616_v15, %v12717_v61  ;;  %v411_v4 = vsub.s32 %v12649_v54, %v410_v10  ;;  %vm12833_vm14 = vmand %vm657_vm3, %vm681_vm4 }
 0x264   : > { %v2644_v18 = vadd.f32 %v12789_v55, %v2616_v9  ;;  %v2617_v26 = vmul.f32 %v12772_v8, %v2589_v7  ;;  %v2070_v11 = vpop.f32.mrb[10].mxu0  ;;  %v12852_v34 = vsel %vm594_vm15, %v618_v29, %v12731_v48  ;;  %v12855_v46 = vsub.s32 %v12672_v40, %v421_v33 }
 0x265   : > { %v2401_v57 = vsel %vm15271_vm5, %v2398_v44, %v2400_v43  ;;  %v2402_v9 = vrot.slane %v2070_v11, 7  ;;  %v2072_v7 = vpop.f32.mrb[11].mxu0  ;;  %v12840_v44 = vsel %vm12802_vm12, %v617_v39, %v389_v52  ;;  %v432_v10 = vmul.u32 24, %v431_v51 }
 0x266   : > { %v2668_v61 = vmax.f32 %v2644_v18, 0.0  ;;  %v2645_v59 = vadd.f32 %v12789_v55, %v2617_v26  ;;  %v2468_v15 = vadd.f32 %v2401_v57, %v2068_v45  ;;  %v12859_v45 = vadd.s32 128, %v12549_v31 }
 0x267   : > { %v2403_v13 = vsel %vm15271_vm5, %v2400_v43, %v2402_v9  ;;  %vm547_vm3 = vcmp.ne.s32.totalorder %v411_v4, 0  ;;  %vm571_vm4 = vcmp.lt.s32.totalorder %v411_v4, 0  ;;  %v619_v28 = vadd.s32 24, %v411_v4 }
 0x268   : > { %v2669_v30 = vmax.f32 %v2645_v59, 0.0  ;;  %v2590_v52 = vadd.f32 %v12421_v27, %v2468_v15  ;;  %v2469_v39 = vadd.f32 %v2403_v13, %v2072_v7  ;;  %v443_v18 = vmul.u32 24, %v442_v37  ;;  %vm595_vm15 = vmand %vm571_vm4, %vm547_vm3 }
 0x269   : > { %v2692_v43 = vsel %vm12833_vm14, %v2668_v61, 0.0  ;;  %vm548_vm2 = vcmp.ne.s32.totalorder %v12855_v46, 0  ;;  %v12871_v11 = vsub.s32 %v12704_v12, %v432_v10  ;;  %vm686_vm12 = vcmp.le.s32.totalorder %v12796_v53, 16  ;;  %vm12904_vm4 = vmand %vm660_vm13, %vm684_vm0 }
 0x26a   : > { %v2693_v48 = vsel %vm12846_vm1, %v2669_v30, 0.0  ;;  %v2618_v40 = vmul.f32 %v12772_v8, %v2590_v52  ;;  %v2591_v29 = vadd.f32 %v12424_v35, %v2469_v39  ;;  %v2076_v33 = vpop.f32.mrb[12].mxu0  ;;  %v12885_v13 = vsub.s32 %v12709_v0, %v443_v18  ;;  %vm12949_vm13 = vmand %vm661_vm7, %vm685_vm8 }
 0x26b   : > { %v2715_v27 = vpack.c.bf16 %v2693_v48, %v2692_v43  ;;  %v2404_v51 = vrot.slane %v2076_v33, 7  ;;  %v2078_v26 = vpop.f32.mrb[13].mxu0  ;;  %v12880_v35 = vmul.u32.u64.low 2863311531, %v12859_v45  ;;  %v12881_v61 = vmul.u32.u64.high 2863311531, %v12859_v45, %v12880_v35 }
 0x26c   : > { %v2646_v57 = vadd.f32 %v12789_v55, %v2618_v40  ;;  %v2619_v7 = vmul.f32 %v12772_v8, %v2591_v29  ;;  %v2080_v37 = vpop.f32.mrb[14].mxu0  ;;  %v12888_v10 = vadd.s32 136, %v12549_v31  ;;  %v15390_v30 = vmov 0 }
 0x26d   : > { %v2405_v12 = vsel %vm15271_vm5, %v2402_v9, %v2404_v51  ;;  %v2406_v59 = vrot.slane %v2080_v37, 7  ;;  %v2082_v15 = vpop.f32.mrb[15].mxu0  ;;  %v15391_v30 = vsel %vm12894_vm9, 4294967295, %v15390_v30  ;;  %vm572_vm3 = vcmp.lt.s32.totalorder %v12855_v46, 0 }
 0x26e   : > { %15392 = vst [vmem:[#allocation15_spill] sm:$0xff] %v15391_v30  ;;  %v2670_v52 = vmax.f32 %v2646_v57, 0.0  ;;  %v2647_v39 = vadd.f32 %v12789_v55, %v2619_v7  ;;  %v2470_v9 = vadd.f32 %v2405_v12, %v2078_v26  ;;  %v15393_v0 = vmov 0  ;;  %vm596_vm11 = vmand %vm572_vm3, %vm548_vm2 }
 0x26f   : > { %v15394_v0 = vsel %vm12904_vm4, 4294967295, %v15393_v0  ;;  %v2407_v41 = vsel %vm15271_vm5, %v2404_v51, %v2406_v59  ;;  %v12909_v18 = vsel %vm595_vm15, %v619_v28, %v411_v4  ;;  %v620_v43 = vadd.s32 24, %v12855_v46 }
 0x270   : > { %15395 = vst [vmem:[#allocation16_spill] sm:$0xff] %v15394_v0  ;;  %v12913_v48 = vadd.s32 144, %v12549_v31  ;;  %v2671_v40 = vmax.f32 %v2647_v39, 0.0  ;;  %v2592_v29 = vadd.f32 %v12418_v6, %v2470_v9  ;;  %v2471_v33 = vadd.f32 %v2407_v41, %v2082_v15 }
 0x271   : > { %vm549_vm10 = vcmp.ne.s32.totalorder %v12871_v11, 0  ;;  %v12920_v17 = vmul.u32.u64.low 2863311531, %v12888_v10  ;;  %v12921_v51 = vmul.u32.u64.high 2863311531, %v12888_v10, %v12920_v17  ;;  %v2694_v4 = vsel %vm12894_vm9, %v2670_v52, 0.0 }
 0x272   : > { %v2695_v28 = vsel %vm12904_vm4, %v2671_v40, 0.0  ;;  %v2620_v26 = vmul.f32 %v12772_v8, %v2592_v29  ;;  %v2593_v6 = vadd.f32 %v12438_v47, %v2471_v33  ;;  %v2086_v57 = vpop.f32.mrb[16].mxu0  ;;  %vm687_vm15 = vcmp.le.s32.totalorder %v12815_v36, 16 }
 0x273   : > { %v2716_v7 = vpack.c.bf16 %v2695_v28, %v2694_v4  ;;  %v2408_v37 = vrot.slane %v2086_v57, 7  ;;  %v2088_v35 = vpop.f32.mrb[17].mxu0  ;;  %v12932_v12 = vmul.u32.u64.low 2863311531, %v12913_v48  ;;  %v12933_v15 = vmul.u32.u64.high 2863311531, %v12913_v48, %v12932_v12 }
 0x274   : > { %v2648_v52 = vadd.f32 %v12789_v55, %v2620_v26  ;;  %v2621_v39 = vmul.f32 %v12772_v8, %v2593_v6  ;;  %v2090_v9 = vpop.f32.mrb[18].mxu0  ;;  %v453_v47 = vshrl.u32 %v12881_v61, 4  ;;  %v12941_v41 = vadd.s32 152, %v12549_v31 }
 0x275   : > { %v12943_v40 = vrot.slane %v2715_v27, 4  ;;  %v2742_v29 = vrot.slane %v2716_v7, 4  ;;  %v15396_v33 = vmov 0  ;;  %v2409_v17 = vsel %vm15271_vm5, %v2406_v59, %v2408_v37  ;;  %v2092_v28 = vpop.f32.mrb[19].mxu0 }
 0x276   : > { %v15397_v33 = vsel %vm12949_vm13, 4294967295, %v15396_v33  ;;  %v2410_v4 = vrot.slane %v2090_v9, 7  ;;  %v2672_v26 = vmax.f32 %v2648_v52, 0.0  ;;  %v2649_v61 = vadd.f32 %v12789_v55, %v2621_v39 }
 0x277   : > { %15398 = vst [vmem:[#allocation17_spill] sm:$0xff] %v15397_v33  ;;  %v2472_v6 = vadd.f32 %v2409_v17, %v2088_v35  ;;  %vm574_vm0 = vcmp.lt.s32.totalorder %v12885_v13, 0  ;;  %v2743_v42 = vsel %vm15264_vm6, %v12943_v40, %v2742_v29  ;;  %vm15399_vm7 = vcmp.ge.s32.totalorder %v12796_v53, 1  ;;  %v13266_v33 = vld [vmem:[#allocation8 + $0xc8] ss:$12 sps:$4 sm:$0xff]  }
 0x278   : > { %vm12966_vm8 = vmand %vm15399_vm7, %vm686_vm12  ;;  %v15400_v27 = vmov 0  ;;  %v2411_v59 = vsel %vm15271_vm5, %v2408_v37, %v2410_v4  ;;  %v621_v57 = vadd.s32 24, %v12871_v11  ;;  %v622_v7 = vadd.s32 24, %v12885_v13  ;;  %2777 = vst [vmem:[#allocation2 + $0x18] sm:$0xff] %v2743_v42  ;;  %10142 = vmatprep.subr.bf16.mxu0 %v13266_v33 }
 0x279   : > { %v15401_v27 = vsel %vm12966_vm8, 4294967295, %v15400_v27  ;;  %v2673_v35 = vmax.f32 %v2649_v61, 0.0  ;;  %v2594_v12 = vadd.f32 %v12441_v62, %v2472_v6  ;;  %v2473_v52 = vadd.f32 %v2411_v59, %v2092_v28 }
 0x27a   : > { %15402 = vst [vmem:[#allocation18_spill] sm:$0xff] %v15401_v27  ;;  %vm15403_vm2 = vcmp.lt.s32.totalorder %v12871_v11, 0  ;;  %v454_v39 = vmul.u32 24, %v453_v47  ;;  %v12983_v37 = vsel %vm596_vm11, %v620_v43, %v12855_v46  ;;  %vm15406_vm12 = vcmp.ne.s32.totalorder %v12885_v13, 0  ;;  %v2096_v6 = vpop.f32.mrb[20].mxu0 }
 0x27b   : > { %vm12978_vm3 = vmand %vm15403_vm2, %vm549_vm10  ;;  %v464_v62 = vshrl.u32 %v12921_v51, 4  ;;  %v12993_v17 = vmul.u32.u64.low 2863311531, %v12941_v41  ;;  %v12994_v28 = vmul.u32.u64.high 2863311531, %v12941_v41, %v12993_v17  ;;  %v2696_v61 = vsel %vm12949_vm13, %v2672_v26, 0.0  ;;  %v2098_v51 = vpop.f32.mrb[21].mxu0 }
 0x27c   : > { %vm12987_vm7 = vmand %vm574_vm0, %vm15406_vm12  ;;  %v2697_v47 = vsel %vm12966_vm8, %v2673_v35, 0.0  ;;  %v2622_v46 = vmul.f32 %v12772_v8, %v2594_v12  ;;  %v2595_v43 = vadd.f32 %v12444_v32, %v2473_v52  ;;  %v2412_v59 = vrot.slane %v2096_v6, 7  ;;  %v2100_v12 = vpop.f32.mrb[22].mxu0 }
 0x27d   : > { %v2717_v42 = vpack.c.bf16 %v2697_v47, %v2696_v61  ;;  %vm665_vm10 = vcmp.ge.s32.totalorder %v12840_v44, 1  ;;  %vm689_vm0 = vcmp.le.s32.totalorder %v12840_v44, 16  ;;  %v13007_v17 = vsel %vm12978_vm3, %v621_v57, %v12871_v11  ;;  %v2102_v47 = vpop.f32.mrb[23].mxu0 }
 0x27e   : > { %v13010_v26 = vadd.s32 160, %v12549_v31  ;;  %v2650_v35 = vadd.f32 %v12789_v55, %v2622_v46  ;;  %v2623_v32 = vmul.f32 %v12772_v8, %v2595_v43  ;;  %v13019_v52 = vsel %vm12987_vm7, %v622_v7, %v12885_v13 }
 0x27f   : > { %v13022_v11 = vsub.s32 %v12859_v45, %v454_v39  ;;  %v2744_v57 = vrot.slane %v2717_v42, 4  ;;  %v2413_v53 = vsel %vm15271_vm5, %v2410_v4, %v2412_v59  ;;  %v2414_v61 = vrot.slane %v2100_v12, 7 }
 0x280   : > { %v475_v46 = vshrl.u32 %v12933_v15, 4  ;;  %vm15409_vm3 = vcmp.ge.s32.totalorder %v12815_v36, 1  ;;  %v15410_v43 = vmov 0  ;;  %v2674_v13 = vmax.f32 %v2650_v35, 0.0 }
 0x281   : > { %vm13030_vm12 = vmand %vm15409_vm3, %vm687_vm15  ;;  %v2651_v7 = vadd.f32 %v12789_v55, %v2623_v32  ;;  %v2474_v45 = vadd.f32 %v2413_v53, %v2098_v51  ;;  %v465_v39 = vmul.u32 24, %v464_v62  ;;  %v2745_v9 = vsel %vm15264_vm6, %v2742_v29, %v2744_v57 }
 0x282   : > { %v15411_v43 = vsel %vm13030_vm12, 4294967295, %v15410_v43  ;;  %vm15413_vm7 = vcmp.le.s32.totalorder %v12820_v56, 16  ;;  %vm15414_vm11 = vcmp.ge.s32.totalorder %v12820_v56, 1  ;;  %v15415_v15 = vmov 0  ;;  %2778 = vst [vmem:[#allocation2 + $0x20] sm:$0xff] %v2745_v9  ;;  %v2106_v53 = vpop.f32.mrb[24].mxu0 }
 0x283   : > { %15412 = vst [vmem:[#allocation19_spill] sm:$0xff] %v15411_v43  ;;  %vm13040_vm2 = vmand %vm15414_vm11, %vm15413_vm7  ;;  %v2415_v36 = vsel %vm15271_vm5, %v2412_v59, %v2414_v61  ;;  %v13046_v4 = vmul.u32.u64.low 2863311531, %v13010_v26  ;;  %v13047_v6 = vmul.u32.u64.high 2863311531, %v13010_v26, %v13046_v4  ;;  %v2675_v42 = vmax.f32 %v2651_v7, 0.0 }
 0x284   : > { %v15416_v15 = vsel %vm13040_vm2, 4294967295, %v15415_v15  ;;  %v2596_v62 = vadd.f32 %v12447_v2, %v2474_v45  ;;  %v2475_v51 = vadd.f32 %v2415_v36, %v2102_v47  ;;  %v13051_v29 = vadd.s32 168, %v12549_v31  ;;  %v13062_v47 = vpop.f32.mrb[48].mxu1 }
 0x285   : > { %15417 = vst [vmem:[#allocation20_spill] sm:$0xff] %v15416_v15  ;;  %vm551_vm15 = vcmp.ne.s32.totalorder %v13022_v11, 0  ;;  %vm575_vm11 = vcmp.lt.s32.totalorder %v13022_v11, 0  ;;  %v476_v56 = vmul.u32 24, %v475_v46  ;;  %v486_v35 = vshrl.u32 %v12994_v28, 4  ;;  %v2108_v28 = vpop.f32.mrb[25].mxu0 }
 0x286   : > { %v2698_v59 = vsel %vm13030_vm12, %v2674_v13, 0.0  ;;  %v2699_v32 = vsel %vm13040_vm2, %v2675_v42, 0.0  ;;  %v2624_v12 = vmul.f32 %v12772_v8, %v2596_v62  ;;  %v2597_v2 = vadd.f32 %v12461_v16, %v2475_v51  ;;  %v13066_v46 = vpop.f32.mrb[49].mxu1  ;;  %v2110_v4 = vpop.f32.mrb[26].mxu0  ;;  %vm13082_vm7 = vmand %vm575_vm11, %vm551_vm15 }
 0x287   : > { %v2718_v7 = vpack.c.bf16 %v2699_v32, %v2698_v59  ;;  %v2416_v45 = vrot.slane %v2106_v53, 7  ;;  %v623_v13 = vadd.s32 24, %v13022_v11  ;;  %v13070_v9 = vsub.s32 %v12888_v10, %v465_v39  ;;  %v13074_v42 = vpop.f32.mrb[50].mxu1  ;;  %vm13099_vm15 = vmand %vm665_vm10, %vm689_vm0 }
 0x288   : > { %v2652_v36 = vadd.f32 %v12789_v55, %v2624_v12  ;;  %v2625_v16 = vmul.f32 %v12772_v8, %v2597_v2  ;;  %v13087_v10 = vmul.u32.u64.low 2863311531, %v13051_v29  ;;  %v13088_v39 = vmul.u32.u64.high 2863311531, %v13051_v29, %v13087_v10  ;;  %v2112_v12 = vpop.f32.mrb[27].mxu0  ;;  %v13093_v2 = vpop.f32.mrb[51].mxu1 }
 0x289   : > { %v13090_v51 = vrot.slane %v2718_v7, 4  ;;  %v2417_v59 = vsel %vm15271_vm5, %v2414_v61, %v2416_v45  ;;  %v2418_v32 = vrot.slane %v2110_v4, 7  ;;  %v487_v53 = vmul.u32 24, %v486_v35 }
 0x28a   : > { %v15420_v15 = vmov 0  ;;  %v2676_v43 = vmax.f32 %v2652_v36, 0.0  ;;  %v2653_v10 = vadd.f32 %v12789_v55, %v2625_v16  ;;  %v2476_v7 = vadd.f32 %v2417_v59, %v2108_v28  ;;  %v2116_v4 = vpop.f32.mrb[28].mxu0 }
 0x28b   : > { %v15421_v15 = vsel %vm13099_vm15, 4294967295, %v15420_v15  ;;  %v13105_v27 = vsub.s32 %v12913_v48, %v476_v56  ;;  %vm15423_vm3 = vcmask 1043456   ;;  %vm15424_vm5 = vcmp.le.s32.totalorder %v12852_v34, 16  ;;  %v13146_v62 = vpop.f32.mrb[52].mxu1 }
 0x28c   : > { %15422 = vst [vmem:[#allocation21_spill] sm:$0xff] %v15421_v15  ;;  %v2747_v61 = vsel %vm15423_vm3, %v2744_v57, %v13090_v51  ;;  %vm15425_vm10 = vcmp.ge.s32.totalorder %v12852_v34, 1  ;;  %v15426_v44 = vmov 0  ;;  %vm15429_vm2 = vcmask 1040384  }
 0x28d   : > { %vm13115_vm0 = vmand %vm15425_vm10, %vm15424_vm5  ;;  %v2419_v35 = vsel %vm15429_vm2, %v2416_v45, %v2418_v32  ;;  %v13123_v48 = vsel %vm13082_vm7, %v623_v13, %v13022_v11  ;;  %v497_v56 = vshrl.u32 %v13047_v6, 4  ;;  %2779 = vst [vmem:[#allocation2 + $0x28] sm:$0xff] %v2747_v61  ;;  %v2677_v28 = vmax.f32 %v2653_v10, 0.0 }
 0x28e   : > { %v15427_v44 = vsel %vm13115_vm0, 4294967295, %v15426_v44  ;;  %v2598_v57 = vadd.f32 %v12464_v5, %v2476_v7  ;;  %v2477_v36 = vadd.f32 %v2419_v35, %v2112_v12  ;;  %v13128_v34 = vadd.s32 176, %v12549_v31  ;;  %v2118_v12 = vpop.f32.mrb[29].mxu0  ;;  %vm15430_vm3 = vmmov %vm15429_vm2 }
 0x28f   : > { %15428 = vst [vmem:[#allocation22_spill] sm:$0xff] %v15427_v44  ;;  %v13135_v11 = vadd.s32 24, %v13070_v9  ;;  %v13138_v6 = vsub.s32 %v12941_v41, %v487_v53  ;;  %v2700_v5 = vsel %vm13099_vm15, %v2676_v43, 0.0  ;;  %v2701_v45 = vsel %vm13115_vm0, %v2677_v28, 0.0  ;;  %v13150_v53 = vpop.f32.mrb[53].mxu1  ;;  %v2120_v61 = vpop.f32.mrb[30].mxu0 }
 0x290   : > { %v2626_v13 = vmul.f32 %v12772_v8, %v2598_v57  ;;  %v2599_v16 = vadd.f32 %v12478_v60, %v2477_v36  ;;  %v2719_v59 = vpack.c.bf16 %v2701_v45, %v2700_v5  ;;  %v2420_v41 = vrot.slane %v2116_v4, 7  ;;  %v13157_v35 = vpop.f32.mrb[54].mxu1 }
 0x291   : > { %v13153_v43 = vadd.s32 24, %v13105_v27  ;;  %v498_v10 = vmul.u32 24, %v497_v56  ;;  %v13162_v28 = vmul.u32.u64.low 2863311531, %v13128_v34  ;;  %v13163_v57 = vmul.u32.u64.high 2863311531, %v13128_v34, %v13162_v28  ;;  %v2122_v56 = vpop.f32.mrb[31].mxu0  ;;  %v13166_v4 = vpop.f32.mrb[55].mxu1 }
 0x292   : > { %v2654_v7 = vadd.f32 %v12789_v55, %v2626_v13  ;;  %v2627_v60 = vmul.f32 %v12772_v8, %v2599_v16  ;;  %v2748_v36 = vrot.slane %v2719_v59, 4  ;;  %v2421_v5 = vsel %vm15430_vm3, %v2418_v32, %v2420_v41 }
 0x293   : > { %v2422_v45 = vrot.slane %v2120_v61, 7  ;;  %v508_v13 = vshrl.u32 %v13088_v39, 4  ;;  %vm15431_vm10 = vcmp.le.s32.totalorder %v12909_v18, 16  ;;  %vm15432_vm2 = vcmp.ge.s32.totalorder %v12909_v18, 1 }
 0x294   : > { %vm13173_vm7 = vmand %vm15432_vm2, %vm15431_vm10  ;;  %v15433_v16 = vmov 0  ;;  %v2678_v44 = vmax.f32 %v2654_v7, 0.0  ;;  %v2655_v28 = vadd.f32 %v12789_v55, %v2627_v60  ;;  %v2478_v59 = vadd.f32 %v2421_v5, %v2118_v12 }
 0x295   : > { %v15434_v16 = vsel %vm13173_vm7, 4294967295, %v15433_v16  ;;  %vm15436_vm5 = vcmask 1043456   ;;  %vm15437_vm6 = vcmp.le.s32.totalorder %v12983_v37, 16  ;;  %vm15438_vm11 = vcmp.ge.s32.totalorder %v12983_v37, 1  ;;  %vm15442_vm2 = vmmov %vm15430_vm3 }
 0x296   : > { %15435 = vst [vmem:[#allocation23_spill] sm:$0xff] %v15434_v16  ;;  %v2749_v32 = vsel %vm15436_vm5, %v13090_v51, %v2748_v36  ;;  %vm13185_vm0 = vmand %vm15438_vm11, %vm15437_vm6  ;;  %v15439_v39 = vmov 0  ;;  %v2423_v18 = vsel %vm15442_vm2, %v2420_v41, %v2422_v45  ;;  %v13192_v7 = vadd.s32 184, %v12549_v31 }
 0x297   : > { %v15440_v39 = vsel %vm13185_vm0, 4294967295, %v15439_v39  ;;  %2780 = vst [vmem:[#allocation2 + $0x30] sm:$0xff] %v2749_v32  ;;  %v2679_v12 = vmax.f32 %v2655_v28, 0.0  ;;  %v2600_v60 = vadd.f32 %v12484_v3, %v2478_v59  ;;  %v2479_v51 = vadd.f32 %v2423_v18, %v2122_v56 }
 0x298   : > { %15441 = vst [vmem:[#allocation24_spill] sm:$0xff] %v15440_v39  ;;  %v13196_v61 = vsub.s32 %v13010_v26, %v498_v10  ;;  %v626_v37 = vadd.s32 24, %v13138_v6  ;;  %v509_v5 = vmul.u32 24, %v508_v13  ;;  %vm15443_vm6 = vcmp.ne.s32.totalorder %v12640_v58, 0  ;;  %v2126_v13 = vpop.f32.mrb[32].mxu0 }
 0x299   : > { %v13200_v15 = vmul.u32.u64.low 2863311531, %v12549_v31  ;;  %v13201_v0 = vmul.u32.u64.high 2863311531, %v12549_v31, %v13200_v15  ;;  %vm15444_vm11 = vcmp.lt.s32.totalorder %v12640_v58, 0  ;;  %v2702_v3 = vsel %vm13173_vm7, %v2678_v44, 0.0  ;;  %v2128_v32 = vpop.f32.mrb[33].mxu0 }
 0x29a   : > { %vm13207_vm5 = vmand %vm15444_vm11, %vm15443_vm6  ;;  %v2703_v26 = vsel %vm13185_vm0, %v2679_v12, 0.0  ;;  %v2628_v10 = vmul.f32 %v12772_v8, %v2600_v60  ;;  %v2601_v56 = vadd.f32 %v12487_v22, %v2479_v51  ;;  %v13217_v15 = vpop.f32.mrb[56].mxu1  ;;  %v2424_v59 = vrot.slane %v2126_v13, 7 }
 0x29b   : > { %v2720_v28 = vpack.c.bf16 %v2703_v26, %v2702_v3  ;;  %v13221_v18 = vpop.f32.mrb[57].mxu1  ;;  %vm15447_vm11 = vcmp.ne.s32.totalorder %v13070_v9, 0  ;;  %vm15448_vm10 = vcmp.lt.s32.totalorder %v13070_v9, 0  ;;  %vm15451_vm0 = vcmp.le.s32.totalorder %v13007_v17, 16  ;;  %v2130_v26 = vpop.f32.mrb[34].mxu0 }
 0x29c   : > { %vm13227_vm3 = vmand %vm15448_vm10, %vm15447_vm11  ;;  %v13232_v22 = vmul.u32.u64.low 2863311531, %v13192_v7  ;;  %v13233_v12 = vmul.u32.u64.high 2863311531, %v13192_v7, %v13232_v22  ;;  %vm15452_vm2 = vcmp.ge.s32.totalorder %v13007_v17, 1  ;;  %v15453_v60 = vmov 0  ;;  %v13245_v13 = vpop.f32.mrb[58].mxu1 }
 0x29d   : > { %vm13239_vm6 = vmand %vm15452_vm2, %vm15451_vm0  ;;  %v2656_v51 = vadd.f32 %v12789_v55, %v2628_v10  ;;  %v2629_v3 = vmul.f32 %v12772_v8, %v2601_v56  ;;  %v13253_v17 = vsel %vm13207_vm5, %v12663_v14, %v12640_v58  ;;  %v2750_v22 = vrot.slane %v2720_v28, 4  ;;  %v2132_v10 = vpop.f32.mrb[35].mxu0  ;;  %v13256_v30 = vpop.f32.mrb[59].mxu1 }
 0x29e   : > { %v15454_v60 = vsel %vm13239_vm6, 4294967295, %v15453_v60  ;;  %vm15455_vm0 = vcmask 1040384   ;;  %v2426_v16 = vrot.slane %v2130_v26, 7  ;;  %vm15456_vm2 = vcmp.ne.s32.totalorder %v13105_v27, 0 }
 0x29f   : > { %v2425_v39 = vsel %vm15455_vm0, %v2422_v45, %v2424_v59  ;;  %vm15457_vm7 = vcmp.lt.s32.totalorder %v13105_v27, 0  ;;  %v2680_v41 = vmax.f32 %v2656_v51, 0.0  ;;  %v2657_v58 = vadd.f32 %v12789_v55, %v2629_v3 }
 0x2a0   : > { %vm13262_vm10 = vmand %vm15457_vm7, %vm15456_vm2  ;;  %v2480_v14 = vadd.f32 %v2425_v39, %v2128_v32  ;;  %v648_v45 = vsel %vm13227_vm3, %v13135_v11, %v13070_v9  ;;  %vm15460_vm5 = vcmp.ne.s32.totalorder %v13138_v6, 0  ;;  %vm15461_vm0 = vcmp.lt.s32.totalorder %v13138_v6, 0 }
 0x2a1   : > { %vm13277_vm11 = vmand %vm15461_vm0, %vm15460_vm5  ;;  %vm15464_vm7 = vcmask 1043456   ;;  %vm15465_vm2 = vcmp.le.s32.totalorder %v13019_v52, 16  ;;  %vm15466_vm15 = vcmp.ge.s32.totalorder %v13019_v52, 1  ;;  %v15467_v39 = vmov 0 }
 0x2a2   : > { %v2751_v26 = vsel %vm15464_vm7, %v2748_v36, %v2750_v22  ;;  %vm13286_vm12 = vmand %vm15466_vm15, %vm15465_vm2  ;;  %vm15470_vm8 = vcmask 1040384   ;;  %v627_v11 = vadd.s32 24, %v13196_v61  ;;  %v13293_v32 = vsub.s32 %v13051_v29, %v509_v5 }
 0x2a3   : > { %v15468_v39 = vsel %vm13286_vm12, 4294967295, %v15467_v39  ;;  %v2427_v9 = vsel %vm15470_vm8, %v2424_v59, %v2426_v16  ;;  %2781 = vst [vmem:[#allocation2 + $0x38] sm:$0xff] %v2751_v26  ;;  %v2681_v44 = vmax.f32 %v2657_v58, 0.0  ;;  %v2602_v36 = vadd.f32 %v12496_v50, %v2480_v14  ;;  %v2136_v58 = vpop.f32.mrb[36].mxu0  ;;  %v13323_v14 = vpop.f32.mrb[60].mxu1 }
 0x2a4   : > { %15469 = vst [vmem:[#allocation25_spill] sm:$0xff] %v15468_v39  ;;  %v2481_v51 = vadd.f32 %v2427_v9, %v2132_v10  ;;  %vm15471_vm3 = vcmp.ne.s32.totalorder %v13196_v61, 0  ;;  %vm15472_vm15 = vcmp.lt.s32.totalorder %v13196_v61, 0  ;;  %v519_v59 = vshrl.u32 %v13163_v57, 4  ;;  %v2138_v56 = vpop.f32.mrb[37].mxu0  ;;  %v13325_v26 = vpop.f32.mrb[61].mxu1 }
 0x2a5   : > { %vm13301_vm5 = vmand %vm15472_vm15, %vm15471_vm3  ;;  %vm672_vm8 = vcmp.ge.s32.totalorder %v648_v45, 1  ;;  %vm696_vm0 = vcmp.le.s32.totalorder %v648_v45, 16  ;;  %v13310_v29 = vsel %vm13262_vm10, %v13153_v43, %v13105_v27  ;;  %v13315_v50 = vsel %vm13277_vm11, %v626_v37, %v13138_v6  ;;  %v13335_v9 = vpop.f32.mrb[62].mxu1 }
 0x2a6   : > { %v2704_v5 = vsel %vm13239_vm6, %v2680_v41, 0.0  ;;  %v2705_v3 = vsel %vm13286_vm12, %v2681_v44, 0.0  ;;  %v2630_v57 = vmul.f32 %v12772_v8, %v2602_v36  ;;  %v2603_v10 = vadd.f32 %v12499_v20, %v2481_v51  ;;  %v2140_v20 = vpop.f32.mrb[38].mxu0  ;;  %v13339_v52 = vpop.f32.mrb[63].mxu1 }
 0x2a7   : > { %v2721_v27 = vpack.c.bf16 %v2705_v3, %v2704_v5  ;;  %v2428_v43 = vrot.slane %v2136_v58, 7  ;;  %v13330_v6 = vsel %vm13301_vm5, %v627_v11, %v13196_v61  ;;  %v277_v37 = vshrl.u32 %v13201_v0, 4  ;;  %v2142_v3 = vpop.f32.mrb[39].mxu0  ;;  %vm15481_vm5 = vmmov %vm15464_vm7 }
 0x2a8   : > { %v2658_v41 = vadd.f32 %v12789_v55, %v2630_v57  ;;  %v2631_v28 = vmul.f32 %v12772_v8, %v2603_v10  ;;  %vm556_vm10 = vcmp.ne.s32.totalorder %v13293_v32, 0  ;;  %v520_v44 = vmul.u32 24, %v519_v59 }
 0x2a9   : > { %v2752_v36 = vrot.slane %v2721_v27, 4  ;;  %vm15475_vm11 = vcmask 1040384   ;;  %v2430_v5 = vrot.slane %v2140_v20, 7  ;;  %vm15476_vm2 = vcmp.le.s32.totalorder %v13123_v48, 16 }
 0x2aa   : > { %v2429_v51 = vsel %vm15475_vm11, %v2426_v16, %v2428_v43  ;;  %vm15477_vm3 = vcmp.ge.s32.totalorder %v13123_v48, 1  ;;  %v15478_v0 = vmov 0  ;;  %v2682_v61 = vmax.f32 %v2658_v41, 0.0  ;;  %vm13355_vm11 = vmand %vm672_vm8, %vm696_vm0 }
 0x2ab   : > { %vm13346_vm15 = vmand %vm15477_vm3, %vm15476_vm2  ;;  %v2659_v11 = vadd.f32 %v12789_v55, %v2631_v28  ;;  %v2482_v59 = vadd.f32 %v2429_v51, %v2138_v56  ;;  %v628_v16 = vadd.s32 24, %v13293_v32  ;;  %v2753_v57 = vsel %vm15481_vm5, %v2750_v22, %v2752_v36 }
 0x2ac   : > { %v15479_v0 = vsel %vm13346_vm15, 4294967295, %v15478_v0  ;;  %v15482_v10 = vmov 0  ;;  %vm15485_vm7 = vcmask 1040384   ;;  %v278_v58 = vmul.u32 24, %v277_v37  ;;  %2782 = vst [vmem:[#allocation2 + $0x40] sm:$0xff] %v2753_v57  ;;  %v13383_v37 = vpop.f32.mrb[64].mxu1 }
 0x2ad   : > { %15480 = vst [vmem:[#allocation26_spill] sm:$0xff] %v15479_v0  ;;  %v15483_v10 = vsel %vm13355_vm11, 4294967295, %v15482_v10  ;;  %v2431_v48 = vsel %vm15485_vm7, %v2428_v43, %v2430_v5  ;;  %v530_v27 = vshrl.u32 %v13233_v12, 4  ;;  %v2683_v41 = vmax.f32 %v2659_v11, 0.0  ;;  %v2146_v43 = vpop.f32.mrb[40].mxu0  ;;  %v13386_v11 = vpop.f32.mrb[65].mxu1 }
 0x2ae   : > { %15484 = vst [vmem:[#allocation27_spill] sm:$0xff] %v15483_v10  ;;  %v2604_v28 = vadd.f32 %v12502_v49, %v2482_v59  ;;  %v2483_v56 = vadd.f32 %v2431_v48, %v2142_v3  ;;  %v13363_v20 = vsub.s32 %v13128_v34, %v520_v44  ;;  %vm673_vm2 = vcmp.ge.s32.totalorder %v13310_v29, 1  ;;  %v2148_v3 = vpop.f32.mrb[41].mxu0 }
 0x2af   : > { %vm697_vm8 = vcmp.le.s32.totalorder %v13310_v29, 16  ;;  %vm15486_vm7 = vcmp.lt.s32.totalorder %v13293_v32, 0  ;;  %v2706_v49 = vsel %vm13346_vm15, %v2682_v61, 0.0  ;;  %v2707_v34 = vsel %vm13355_vm11, %v2683_v41, 0.0  ;;  %v2150_v41 = vpop.f32.mrb[42].mxu0 }
 0x2b0   : > { %vm13373_vm5 = vmand %vm15486_vm7, %vm556_vm10  ;;  %v2632_v22 = vmul.f32 %v12772_v8, %v2604_v28  ;;  %v2605_v45 = vadd.f32 %v12506_v38, %v2483_v56  ;;  %v2722_v44 = vpack.c.bf16 %v2707_v34, %v2706_v49  ;;  %v2432_v51 = vrot.slane %v2146_v43, 7  ;;  %v13393_v38 = vpop.f32.mrb[66].mxu1 }
 0x2b1   : > { %v13389_v59 = vsub.s32 %v12549_v31, %v278_v58  ;;  %v531_v61 = vmul.u32 24, %v530_v27  ;;  %v13398_v28 = vsel %vm13373_vm5, %v628_v16, %v13293_v32  ;;  %vm15489_vm7 = vcmask 1040384   ;;  %v2152_v27 = vpop.f32.mrb[43].mxu0  ;;  %v13404_v49 = vpop.f32.mrb[67].mxu1  ;;  %vm13411_vm3 = vmand %vm673_vm2, %vm697_vm8 }
 0x2b2   : > { %v2660_v57 = vadd.f32 %v12789_v55, %v2632_v22  ;;  %v2633_v48 = vmul.f32 %v12772_v8, %v2605_v45  ;;  %v13401_v56 = vrot.slane %v2722_v44, 4  ;;  %v2433_v31 = vsel %vm15489_vm7, %v2430_v5, %v2432_v51 }
 0x2b3   : > { %v2434_v58 = vrot.slane %v2150_v41, 7  ;;  %v15490_v12 = vmov 0  ;;  %v2484_v34 = vadd.f32 %v2433_v31, %v2148_v3  ;;  %v629_v5 = vadd.s32 24, %v13363_v20  ;;  %v2156_v31 = vpop.f32.mrb[44].mxu0 }
 0x2b4   : > { %v15491_v12 = vsel %vm13411_vm3, 4294967295, %v15490_v12  ;;  %v2684_v32 = vmax.f32 %v2660_v57, 0.0  ;;  %v2661_v16 = vadd.f32 %v12789_v55, %v2633_v48  ;;  %vm15493_vm5 = vcmask 1043456   ;;  %v11328_v57 = vld [vmem:[#allocation8 + $0x10c] ss:$12 sps:$4 sm:$0xff]  }
 0x2b5   : > { %15492 = vst [vmem:[#allocation28_spill] sm:$0xff] %v15491_v12  ;;  %v2755_v22 = vsel %vm15493_vm5, %v2752_v36, %v13401_v56  ;;  %vm15494_vm7 = vcmp.le.s32.totalorder %v13315_v50, 16  ;;  %vm15495_vm0 = vcmp.ge.s32.totalorder %v13315_v50, 1  ;;  %v15496_v45 = vmov 0  ;;  %v11326_v50 = vld [vmem:[#allocation8 + $0x108] ss:$12 sps:$4 sm:$0xff]   ;;  %7100 = vmatprep.subr.bf16.mxu1 %v11328_v57 }
 0x2b6   : > { %vm13423_vm10 = vmand %vm15495_vm0, %vm15494_vm7  ;;  %vm15499_vm2 = vcmask 1040384   ;;  %v13430_v43 = vsub.s32 %v13192_v7, %v531_v61  ;;  %2783 = vst [vmem:[#allocation2 + $0x48] sm:$0xff] %v2755_v22  ;;  %v2685_v44 = vmax.f32 %v2661_v16, 0.0  ;;  %v2606_v3 = vadd.f32 %v12511_v23, %v2484_v34  ;;  %v2158_v22 = vpop.f32.mrb[45].mxu0  ;;  %7101 = vmatpush1.bf16.msra.mxu1 %v11326_v50 }
 0x2b7   : > { %v15497_v45 = vsel %vm13423_vm10, 4294967295, %v15496_v45  ;;  %v2435_v29 = vsel %vm15499_vm2, %v2432_v51, %v2434_v58  ;;  %vm699_vm0 = vcmp.le.s32.totalorder %v13330_v6, 16  ;;  %vm700_vm11 = vcmp.le.s32.totalorder %v13398_v28, 16 }
 0x2b8   : > { %15498 = vst [vmem:[#allocation29_spill] sm:$0xff] %v15497_v45  ;;  %v2485_v36 = vadd.f32 %v2435_v29, %v2152_v27  ;;  %vm15500_vm2 = vcmp.ne.s32.totalorder %v13363_v20, 0  ;;  %vm15501_vm8 = vcmp.lt.s32.totalorder %v13363_v20, 0  ;;  %v607_v23 = vadd.s32 24, %v13389_v59  ;;  %v13454_v27 = vpop.f32.mrb[68].mxu1 }
 0x2b9   : > { %vm13441_vm15 = vmand %vm15501_vm8, %vm15500_vm2  ;;  %v2708_v51 = vsel %vm13411_vm3, %v2684_v32, 0.0  ;;  %v2709_v61 = vsel %vm13423_vm10, %v2685_v44, 0.0  ;;  %v2634_v48 = vmul.f32 %v12772_v8, %v2606_v3  ;;  %v2436_v34 = vrot.slane %v2156_v31, 7  ;;  %v13456_v29 = vpop.f32.mrb[69].mxu1 }
 0x2ba   : > { %v2607_v41 = vadd.f32 %v12515_v24, %v2485_v36  ;;  %v2723_v16 = vpack.c.bf16 %v2709_v61, %v2708_v51  ;;  %vm15504_vm8 = vcmp.ne.s32.totalorder %v13389_v59, 0  ;;  %vm15505_vm2 = vcmp.lt.s32.totalorder %v13389_v59, 0  ;;  %v2160_v36 = vpop.f32.mrb[46].mxu0  ;;  %v13475_v57 = vpop.f32.mrb[70].mxu1  ;;  %v11332_v61 = vld [vmem:[#allocation8 + $0x124] ss:$12 sps:$4 sm:$0xff]  }
 0x2bb   : > { %vm13462_vm5 = vmand %vm15505_vm2, %vm15504_vm8  ;;  %vm558_vm12 = vcmp.ne.s32.totalorder %v13430_v43, 0  ;;  %vm582_vm7 = vcmp.lt.s32.totalorder %v13430_v43, 0  ;;  %v2662_v24 = vadd.f32 %v12789_v55, %v2634_v48  ;;  %v13473_v3 = vsel %vm13441_vm15, %v629_v5, %v13363_v20  ;;  %v2162_v7 = vpop.f32.mrb[47].mxu0  ;;  %v13491_v48 = vpop.f32.mrb[71].mxu1  ;;  %7102 = vmatprep.subr.bf16.mxu1 %v11332_v61 }
 0x2bc   : > { %v2635_v44 = vmul.f32 %v12772_v8, %v2607_v41  ;;  %v630_v51 = vadd.s32 24, %v13430_v43  ;;  %v2615_v31 = vmul.f32 %v12772_v8, %v12712_v63  ;;  %v13480_v45 = vrot.slane %v2723_v16, 4  ;;  %v11330_v41 = vld [vmem:[#allocation8 + $0x120] ss:$12 sps:$4 sm:$0xff]  }
 0x2bd   : > { %vm15508_vm8 = vcmp.ge.s32.totalorder %v13330_v6, 1  ;;  %v15509_v50 = vmov 0  ;;  %vm15512_vm15 = vcmask 1040384   ;;  %v2367_v5 = vrot.slane %v2160_v36, 7  ;;  %7103 = vmatpush1.bf16.msra.mxu1 %v11330_v41  ;;  %v15523_v41 = vld [vmem:[#allocation13_spill] sm:$0xff] }
 0x2be   : > { %vm13486_vm2 = vmand %vm15508_vm8, %vm699_vm0  ;;  %v2437_v20 = vsel %vm15512_vm15, %v2434_v58, %v2436_v34  ;;  %v2686_v12 = vmax.f32 %v2662_v24, 0.0  ;;  %v2663_v63 = vadd.f32 %v12789_v55, %v2635_v44  ;;  %v631_v10 = vsel %vm13462_vm5, %v607_v23, %v13389_v59  ;;  %v11337_v44 = vld [vmem:[#allocation8 + $0x13c] ss:$12 sps:$4 sm:$0xff]  }
 0x2bf   : > { %v15510_v50 = vsel %vm13486_vm2, 4294967295, %v15509_v50  ;;  %v2486_v16 = vadd.f32 %v2437_v20, %v2158_v22  ;;  %vm13501_vm0 = vmand %vm582_vm7, %vm558_vm12  ;;  %vm15515_vm8 = vcmask 1043456   ;;  %vm15516_vm15 = vcmp.ge.s32.totalorder %v13398_v28, 1  ;;  %v11335_v20 = vld [vmem:[#allocation8 + $0x138] ss:$12 sps:$4 sm:$0xff]   ;;  %7104 = vmatprep.subr.bf16.mxu1 %v11337_v44 }
 0x2c0   : > { %15511 = vst [vmem:[#allocation30_spill] sm:$0xff] %v15510_v50  ;;  %v2757_v58 = vsel %vm15515_vm8, %v13401_v56, %v13480_v45  ;;  %vm13512_vm10 = vmand %vm15516_vm15, %vm700_vm11  ;;  %v15517_v22 = vmov 0  ;;  %vm677_vm5 = vcmp.ge.s32.totalorder %v13473_v3, 1  ;;  %v15520_v59 = vrot.slane %v12651_v25, 7  ;;  %v11346_v44 = vld [vmem:[#allocation8 + $0x16c] ss:$12 sps:$4 sm:$0xff]  }
 0x2c1   : > { %v15518_v22 = vsel %vm13512_vm10, 4294967295, %v15517_v22  ;;  %vm15521_vm12 = vcmask 1040384   ;;  %2784 = vst [vmem:[#allocation2 + $0x50] sm:$0xff] %v2757_v58  ;;  %v2687_v24 = vmax.f32 %v2663_v63, 0.0  ;;  %vm701_vm8 = vcmp.le.s32.totalorder %v13473_v3, 16  ;;  %v3113_v63 = vpop.f32.mrb[72].mxu0  ;;  %7105 = vmatpush1.bf16.msra.mxu1 %v11335_v20 }
 0x2c2   : > { %15519 = vst [vmem:[#allocation31_spill] sm:$0xff] %v15518_v22  ;;  %v2463_v23 = vsel %vm15521_vm12, %v2367_v5, %v15520_v59  ;;  %vm15522_vm7 = vmmov %vm15521_vm12  ;;  %v2608_v56 = vadd.f32 %v12518_v1, %v2486_v16  ;;  %v2643_v36 = vadd.f32 %v12789_v55, %v2615_v31  ;;  %v654_v25 = vsel %vm13501_vm0, %v630_v51, %v13430_v43  ;;  %v13534_v16 = vpop.f32.mrb[72].mxu1  ;;  %v11341_v31 = vld [vmem:[#allocation8 + $0x154] ss:$12 sps:$4 sm:$0xff]   ;;  %v15524_v43 = vld [vmem:[#allocation14_spill] sm:$0xff] }
 0x2c3   : > { %v2438_v32 = vsel %vm15522_vm7, %v2436_v34, %v2367_v5  ;;  %v2464_v28 = vadd.f32 %v2463_v23, %v12660_v21  ;;  %v2710_v34 = vsel %vm13486_vm2, %v2686_v12, 0.0  ;;  %v2711_v5 = vsel %vm13512_vm10, %v2687_v24, 0.0  ;;  %v3115_v12 = vpop.f32.mrb[73].mxu0  ;;  %v13540_v6 = vpop.f32.mrb[73].mxu1  ;;  %v11339_v59 = vld [vmem:[#allocation8 + $0x150] ss:$12 sps:$4 sm:$0xff]   ;;  %7106 = vmatprep.subr.bf16.mxu1 %v11341_v31  ;;  %vm13565_vm0 = vmand %vm677_vm5, %vm701_vm8 }
 0x2c4   : > { %v2487_v61 = vadd.f32 %v2438_v32, %v2162_v7  ;;  %v2636_v1 = vmul.f32 %v12772_v8, %v2608_v56  ;;  %v2724_v58 = vpack.c.bf16 %v2711_v5, %v2710_v34  ;;  %v13538_v7 = vadd.f32 %v13062_v47, %v3113_v63  ;;  %v3117_v56 = vpop.f32.mrb[74].mxu0  ;;  %v13583_v3 = vld [vmem:[%s15257_s3 + $0x1] ss:$0 sm:$0xff] }
 0x2c5   : > { %v2586_v21 = vadd.f32 %v15523_v41, %v2464_v28  ;;  %v13545_v24 = vadd.f32 %v13066_v46, %v3115_v12  ;;  %v13547_v28 = vpop.f32.mrb[74].mxu1  ;;  %vm15527_vm12 = vcmp.le.s32.totalorder %v13253_v17, 16  ;;  %vm15528_vm7 = vcmp.ge.s32.totalorder %v13253_v17, 1  ;;  %v3119_v34 = vpop.f32.mrb[75].mxu0  ;;  %7107 = vmatpush1.bf16.msra.mxu1 %v11339_v59 }
 0x2c6   : > { %v2609_v51 = vadd.f32 %v15524_v43, %v2487_v61  ;;  %15525 = vst [vmem:[#allocation13_spill] sm:$0xff] %v13538_v7  ;;  %v2664_v23 = vadd.f32 %v12789_v55, %v2636_v1  ;;  %vm13553_vm11 = vmand %vm15528_vm7, %vm15527_vm12  ;;  %v15529_v47 = vmov 0  ;;  %v2758_v61 = vrot.slane %v2724_v58, 4  ;;  %v13559_v5 = vpop.f32.mrb[75].mxu1  ;;  %7108 = vmatprep.subr.bf16.mxu1 %v11346_v44 }
 0x2c7   : > { %v2614_v32 = vmul.f32 %v12772_v8, %v2586_v21  ;;  %15526 = vst [vmem:[#allocation14_spill] sm:$0xff] %v13545_v24  ;;  %v15530_v47 = vsel %vm13553_vm11, 4294967295, %v15529_v47  ;;  %v10408_v46 = vadd.f32 %v13074_v42, %v3117_v56  ;;  %v2667_v1 = vmax.f32 %v2643_v36, 0.0 }
 0x2c8   : > { %15531 = vst [vmem:[#allocation32_spill] sm:$0xff] %v15530_v47  ;;  %v2637_v20 = vmul.f32 %v12772_v8, %v2609_v51  ;;  %v15532_v17 = vmov 0  ;;  %v15316_v21 = vrot.slane %v13538_v7, 7  ;;  %v10409_v8 = vadd.f32 %v13093_v2, %v3119_v34  ;;  %v11344_v2 = vld [vmem:[#allocation8 + $0x168] ss:$12 sps:$4 sm:$0xff]   ;;  %v13720_v47 = vld [vmem:[#allocation2 + $0x40] sm:$0xff] }
 0x2c9   : > { %v15533_v17 = vsel %vm13565_vm0, 4294967295, %v15532_v17  ;;  %v2642_v41 = vadd.f32 %v12789_v55, %v2614_v32  ;;  %vm15535_vm12 = vcmask 1043456   ;;  %v2688_v63 = vmax.f32 %v2664_v23, 0.0  ;;  %v13601_v32 = vpop.f32.mrb[76].mxu1  ;;  %7109 = vmatpush1.bf16.msra.mxu1 %v11344_v2 }
 0x2ca   : > { %15534 = vst [vmem:[#allocation33_spill] sm:$0xff] %v15533_v17  ;;  %v2759_v42 = vsel %vm15535_vm12, %v13480_v45, %v2758_v61  ;;  %vm15536_vm7 = vcmp.le.s32.totalorder %v631_v10, 16  ;;  %vm15537_vm15 = vcmp.ge.s32.totalorder %v631_v10, 1  ;;  %v15538_v36 = vmov 0  ;;  %v11347_v45 = vld [vmem:[#allocation8 + $0xc8] ss:$12 sps:$4 sm:$0xff]  }
 0x2cb   : > { %vm13576_vm10 = vmand %vm15537_vm15, %vm15536_vm7  ;;  %v2665_v55 = vadd.f32 %v13583_v3, %v2637_v20  ;;  %v4438_v31 = vrot.slane %v10408_v46, 7  ;;  %2785 = vst [vmem:[#allocation2 + $0x58] sm:$0xff] %v2759_v42  ;;  %v2666_v58 = vmax.f32 %v2642_v41, 0.0  ;;  %vm15541_vm5 = vcmp.le.s32.totalorder %v654_v25, 16  ;;  %v13608_v41 = vpop.f32.mrb[77].mxu1  ;;  %10262 = vmatprep.subr.bf16.mxu1 %v11347_v45 }
 0x2cc   : > { %v15539_v36 = vsel %vm13576_vm10, 4294967295, %v15538_v36  ;;  %vm15542_vm8 = vcmp.ge.s32.totalorder %v654_v25, 1  ;;  %v15543_v10 = vmov 0  ;;  %vm15546_vm15 = vcmask 1040384   ;;  %v3123_v25 = vpop.f32.mrb[76].mxu0 }
 0x2cd   : > { %15540 = vst [vmem:[#allocation34_spill] sm:$0xff] %v15539_v36  ;;  %vm13588_vm12 = vmand %vm15542_vm8, %vm15541_vm5  ;;  %v2689_v43 = vmax.f32 %v2665_v55, 0.0  ;;  %v4439_v51 = vsel %vm15546_vm15, %v15316_v21, %v4438_v31  ;;  %v2691_v12 = vsel %vm13553_vm11, %v2667_v1, 0.0  ;;  %v2690_v59 = vsel %vm13576_vm10, %v2666_v58, 0.0  ;;  %v3125_v34 = vpop.f32.mrb[77].mxu0  ;;  %v13611_v55 = vpop.f32.mrb[78].mxu1 }
 0x2ce   : > { %v15544_v10 = vsel %vm13588_vm12, 4294967295, %v15543_v10  ;;  %v13599_v23 = vadd.f32 %v10409_v8, %v4439_v51  ;;  %v2712_v56 = vsel %vm13565_vm0, %v2688_v63, 0.0  ;;  %v2714_v44 = vpack.c.bf16 %v2691_v12, %v2690_v59  ;;  %v3127_v42 = vpop.f32.mrb[78].mxu0  ;;  %v13614_v59 = vpop.f32.mrb[79].mxu1  ;;  %vm15548_vm5 = vmmov %vm15546_vm15  ;;  %v4828_v36 = vld [vmem:[#allocation2 + $0x30] sm:$0xff] }
 0x2cf   : > { %15545 = vst [vmem:[#allocation35_spill] sm:$0xff] %v15544_v10  ;;  %v2713_v20 = vsel %vm13588_vm12, %v2689_v43, 0.0  ;;  %v10410_v46 = vadd.f32 %v13146_v62, %v3123_v25  ;;  %v10411_v8 = vadd.f32 %v13150_v53, %v3125_v34  ;;  %v10412_v63 = vadd.f32 %v13157_v35, %v3127_v42  ;;  %v3129_v12 = vpop.f32.mrb[79].mxu0  ;;  %vm15550_vm15 = vmmov %vm15548_vm5 }
 0x2d0   : > { %v2725_v1 = vpack.c.bf16 %v2713_v20, %v2712_v56  ;;  %v2739_v58 = vrot.slane %v2714_v44, 4  ;;  %v10413_v62 = vadd.f32 %v13166_v4, %v3129_v12  ;;  %vm15547_vm7 = vcmask 1043456   ;;  %v3133_v4 = vpop.f32.mrb[80].mxu0  ;;  %v13629_v20 = vpop.f32.mrb[80].mxu1 }
 0x2d1   : > { %v4440_v51 = vrot.slane %v10410_v46, 7  ;;  %v4442_v25 = vrot.slane %v10412_v63, 7  ;;  %vm15549_vm8 = vmmov %vm15547_vm7  ;;  %v3135_v46 = vpop.f32.mrb[81].mxu0 }
 0x2d2   : > { %v2760_v43 = vrot.slane %v2725_v1, 4  ;;  %v13619_v2 = vsel %vm15547_vm7, %v2739_v58, %v12943_v40  ;;  %2775 = vst [vmem:[#allocation2 + $0x8] sm:$0xf0] %v2739_v58  ;;  %v10414_v40 = vadd.f32 %v13217_v15, %v3133_v4  ;;  %v10415_v34 = vadd.f32 %v13221_v18, %v3135_v46  ;;  %v3137_v1 = vpop.f32.mrb[82].mxu0  ;;  %vm15551_vm7 = vmmov %vm15548_vm5  ;;  %v11325_v18 = vld [vmem:[#allocation8 + $0xe0] ss:$12 sps:$4 sm:$0xff]  }
 0x2d3   : > { %v4441_v53 = vsel %vm15548_vm5, %v4438_v31, %v4440_v51  ;;  %2776 = vst [vmem:[#allocation2 + $0x10] sm:$0xff] %v13619_v2  ;;  %v4443_v56 = vsel %vm15550_vm15, %v4440_v51, %v4442_v25  ;;  %v13632_v31 = vpop.f32.mrb[81].mxu1  ;;  %v10416_v42 = vadd.f32 %v13245_v13, %v3137_v1  ;;  %v3139_v58 = vpop.f32.mrb[83].mxu0  ;;  %vm15553_vm15 = vmmov %vm15548_vm5 }
 0x2d4   : > { %v2761_v45 = vsel %vm15549_vm8, %v2758_v61, %v2760_v43  ;;  %2787 = vst [vmem:[#allocation2 + $0x68] sm:$0xf] %v2760_v43  ;;  %v13624_v35 = vadd.f32 %v10411_v8, %v4441_v53  ;;  %v13627_v44 = vadd.f32 %v10413_v62, %v4443_v56  ;;  %v13635_v61 = vpop.f32.mrb[82].mxu1  ;;  %v4444_v8 = vrot.slane %v10414_v40, 7  ;;  %v3143_v40 = vpop.f32.mrb[84].mxu0 }
 0x2d5   : > { %2786 = vst [vmem:[#allocation2 + $0x60] sm:$0xff] %v2761_v45  ;;  %v13638_v51 = vpop.f32.mrb[83].mxu1  ;;  %v10417_v63 = vadd.f32 %v13256_v30, %v3139_v58  ;;  %v4446_v15 = vrot.slane %v10416_v42, 7  ;;  %v4916_v53 = vrot.slane %v13619_v2, 4  ;;  %v10418_v30 = vadd.f32 %v13323_v14, %v3143_v40  ;;  %v13657_v2 = vld [vmem:[#allocation2] sm:$0xff]  ;;  %v4825_v58 = vld [vmem:[#allocation2 + $0x18] sm:$0xff] }
 0x2d6   : > { %v4445_v43 = vsel %vm15551_vm7, %v4442_v25, %v4444_v8  ;;  %v13651_v46 = vpop.f32.mrb[84].mxu1  ;;  %v3145_v25 = vpop.f32.mrb[85].mxu0  ;;  %vm15554_vm7 = vmmov %vm15548_vm5 }
 0x2d7   : > { %v13643_v45 = vadd.f32 %v10415_v34, %v4445_v43  ;;  %v4447_v56 = vsel %vm15548_vm5, %v4444_v8, %v4446_v15  ;;  %v13655_v1 = vpop.f32.mrb[85].mxu1  ;;  %v10419_v34 = vadd.f32 %v13325_v26, %v3145_v25  ;;  %v3147_v8 = vpop.f32.mrb[86].mxu0  ;;  %v11333_v25 = vld [vmem:[#allocation8 + $0x110] ss:$12 sps:$4 sm:$0xff]   ;;  %vm15555_vm5 = vmmov %vm15549_vm8 }
 0x2d8   : > { %v13649_v13 = vadd.f32 %v10417_v63, %v4447_v56  ;;  %v13662_v42 = vpop.f32.mrb[86].mxu1  ;;  %v11329_v63 = vld [vmem:[#allocation8 + $0xf8] ss:$12 sps:$4 sm:$0xff]   ;;  %v10420_v14 = vadd.f32 %v13335_v9, %v3147_v8  ;;  %v3149_v43 = vpop.f32.mrb[87].mxu0 }
 0x2d9   : > { %v4866_v12 = vld [vmem:[#allocation2 + $0x8] sm:$0xf0]  ;;  %v10421_v56 = vadd.f32 %v13339_v52, %v3149_v43  ;;  %v3153_v8 = vpop.f32.mrb[88].mxu0  ;;  %v4826_v52 = vld [vmem:[#allocation2 + $0x20] sm:$0xff] }
 0x2da   : > { %v4915_v62 = vrot.slane %v4866_v12, 4  ;;  %v4448_v12 = vrot.slane %v10418_v30, 7  ;;  %v4450_v21 = vrot.slane %v10420_v14, 7 }
 0x2dc   : > { %v13647_v4 = vsel %vm15549_vm8, %v4915_v62, %v4916_v53  ;;  %v13665_v62 = vpop.f32.mrb[87].mxu1  ;;  %v4449_v40 = vsel %vm15553_vm15, %v4446_v15, %v4448_v12  ;;  %v4451_v22 = vsel %vm15554_vm7, %v4448_v12, %v4450_v21  ;;  %v10422_v15 = vadd.f32 %v13383_v37, %v3153_v8  ;;  %vm15557_vm8 = vmmov %vm15554_vm7 }
 0x2dd   : > { %15552 = vst [vmem:[#allocation36_spill] sm:$0xff] %v13647_v4  ;;  %5113 = vmatmul.mubr.bf16.vlgmr.msra.gmra.mrb[120].mxu0 %v13647_v4  ;;  %v13669_v26 = vadd.f32 %v10419_v34, %v4449_v40  ;;  %v13675_v9 = vadd.f32 %v10421_v56, %v4451_v22  ;;  %v13677_v50 = vpop.f32.mrb[88].mxu1  ;;  %v11334_v22 = vld [vmem:[#allocation8 + $0x128] ss:$12 sps:$4 sm:$0xff]   ;;  %v4920_v37 = vrot.slane %v4826_v52, 4  ;;  %vm15558_vm15 = vmmov %vm15554_vm7 }
 0x2de   : > { %5122 = vmatprep.mubr.bf16.mxu0 %v13657_v2  ;;  %10143 = vmatpush3.bf16.msra.mxu0 %v13266_v33  ;;  %v4918_v33 = vrot.slane %v4825_v58, 4  ;;  %v13681_v34 = vpop.f32.mrb[89].mxu1  ;;  %v4452_v14 = vrot.slane %v10422_v15, 7  ;;  %vm15559_vm7 = vmmov %vm15555_vm5 }
 0x2df   : > { %10144 = vmatprep.subr.bf16.mxu0 %v11325_v18  ;;  %v13685_v12 = vpop.f32.mrb[90].mxu1 }
 0x2e0   : > { %v13673_v30 = vsel %vm15555_vm5, %v4916_v53, %v4918_v33  ;;  %v13688_v40 = vpop.f32.mrb[91].mxu1  ;;  %v13696_v15 = vsel %vm15559_vm7, %v4918_v33, %v4920_v37  ;;  %vm15565_vm5 = vmmov %vm15557_vm8 }
 0x2e1   : > { %15556 = vst [vmem:[#allocation37_spill] sm:$0xff] %v13673_v30  ;;  %15560 = vst [vmem:[#allocation38_spill] sm:$0xff] %v13696_v15  ;;  %v13700_v17 = vpop.f32.mrb[92].mxu1 }
 0x2e2   : > { %10145 = vmatpush3.bf16.msra.mxu0 %v11325_v18  ;;  %v3155_v18 = vpop.f32.mrb[89].mxu0  ;;  %15561 = vst [vmem:[#allocation39_spill] sm:$0xff] %v13700_v17 }
 0x2e3   : > { %10146 = vmatprep.subr.bf16.mxu0 %v11329_v63  ;;  %v10423_v58 = vadd.f32 %v13386_v11, %v3155_v18  ;;  %v3157_v53 = vpop.f32.mrb[90].mxu0  ;;  %v11338_v11 = vld [vmem:[#allocation8 + $0x140] ss:$12 sps:$4 sm:$0xff]  }
 0x2e4   : > { %v10424_v43 = vadd.f32 %v13393_v38, %v3157_v53  ;;  %v3159_v56 = vpop.f32.mrb[91].mxu0 }
 0x2e5   : > { %5123 = vmatmul.mubr.bf16.gmra.mrb[124].mxu0 %v13673_v30  ;;  %v10425_v8 = vadd.f32 %v13404_v49, %v3159_v56  ;;  %v4453_v30 = vsel %vm15557_vm8, %v4450_v21, %v4452_v14  ;;  %v3163_v53 = vpop.f32.mrb[92].mxu0  ;;  %v13703_v49 = vld [vmem:[#allocation2 + $0x28] sm:$0xff]  ;;  %vm15566_vm8 = vmmov %vm15565_vm5 }
 0x2e6   : > { %5132 = vmatprep.mubr.bf16.mxu0 %v13657_v2  ;;  %10147 = vmatpush3.bf16.msra.mxu0 %v11329_v63  ;;  %v4454_v10 = vrot.slane %v10424_v43, 7  ;;  %v13692_v63 = vadd.f32 %v10423_v58, %v4453_v30  ;;  %v10426_v21 = vadd.f32 %v13454_v27, %v3163_v53  ;;  %v13706_v30 = vpop.f32.mrb[93].mxu1  ;;  %v4922_v27 = vrot.slane %v13703_v49, 4  ;;  %v4831_v49 = vld [vmem:[#allocation2 + $0x48] sm:$0xff] }
 0x2e7   : > { %10148 = vmatprep.subr.bf16.mxu0 %v11333_v25  ;;  %15562 = vst [vmem:[#allocation40_spill] sm:$0xff] %v13706_v30  ;;  %v13710_v58 = vpop.f32.mrb[94].mxu1  ;;  %v4930_v0 = vrot.slane %v4831_v49, 4 }
 0x2e8   : > { %v4455_v18 = vsel %vm15558_vm15, %v4452_v14, %v4454_v10  ;;  %15563 = vst [vmem:[#allocation41_spill] sm:$0xff] %v13710_v58  ;;  %v11342_v14 = vld [vmem:[#allocation8 + $0x158] ss:$12 sps:$4 sm:$0xff]   ;;  %v4456_v43 = vrot.slane %v10426_v21, 7  ;;  %v11343_v21 = vld [vmem:[#allocation8 + $0x170] ss:$12 sps:$4 sm:$0xff]   ;;  %vm15567_vm15 = vmmov %vm15559_vm7 }
 0x2e9   : > { %v13698_v38 = vadd.f32 %v10425_v8, %v4455_v18  ;;  %v13713_v18 = vpop.f32.mrb[95].mxu1  ;;  %vm15570_vm7 = vmmov %vm15565_vm5 }
 0x2ea   : > { %10149 = vmatpush3.bf16.msra.mxu0 %v11333_v25  ;;  %v3165_v25 = vpop.f32.mrb[93].mxu0  ;;  %15564 = vst [vmem:[#allocation42_spill] sm:$0xff] %v13713_v18  ;;  %v13735_v18 = vld [vmem:[#allocation2 + $0x58] sm:$0xff] }
 0x2eb   : > { %10150 = vmatprep.subr.bf16.mxu0 %v11334_v22  ;;  %v10427_v33 = vadd.f32 %v13456_v29, %v3165_v25  ;;  %v3167_v52 = vpop.f32.mrb[94].mxu0  ;;  %v4829_v25 = vld [vmem:[#allocation2 + $0x38] sm:$0xff]  ;;  %v4934_v17 = vrot.slane %v13735_v18, 4 }
 0x2ec   : > { %v10428_v56 = vadd.f32 %v13475_v57, %v3167_v52  ;;  %v3169_v8 = vpop.f32.mrb[95].mxu0  ;;  %v13724_v52 = vsel %vm15567_vm15, %v4920_v37, %v4922_v27  ;;  %v4832_v37 = vld [vmem:[#allocation2 + $0x50] sm:$0xff] }
 0x2ed   : > { %5133 = vmatmul.mubr.bf16.gmra.mrb[128].mxu0 %v13696_v15  ;;  %v10429_v53 = vadd.f32 %v13491_v48, %v3169_v8  ;;  %v4457_v15 = vsel %vm15565_vm5, %v4454_v10, %v4456_v43  ;;  %15568 = vst [vmem:[#allocation43_spill] sm:$0xff] %v13724_v52  ;;  %v3173_v48 = vpop.f32.mrb[96].mxu0  ;;  %v10120_v10 = vpop.f32.mrb[24].mxu1  ;;  %v4926_v8 = vrot.slane %v4829_v25, 4  ;;  %vm15571_vm5 = vcmask 1046528  }
 0x2ee   : > { %5142 = vmatprep.mubr.bf16.mxu0 %v13657_v2  ;;  %10151 = vmatpush3.bf16.msra.mxu0 %v11334_v22  ;;  %v4458_v22 = vrot.slane %v10428_v56, 7  ;;  %v13718_v29 = vadd.f32 %v10427_v33, %v4457_v15  ;;  %v3175_v15 = vpop.f32.mrb[97].mxu0  ;;  %v13730_v33 = vpop.f32.mrb[25].mxu1  ;;  %v4924_v56 = vrot.slane %v4828_v36, 4  ;;  %vm15574_vm15 = vmmov %vm15571_vm5 }
 0x2ef   : > { %10152 = vmatprep.subr.bf16.mxu0 %v11338_v11  ;;  %v10121_v24 = vpop.f32.mrb[26].mxu1 }
 0x2f0   : > { %v4459_v57 = vsel %vm15566_vm8, %v4456_v43, %v4458_v22  ;;  %v4928_v43 = vrot.slane %v13720_v47, 4  ;;  %v4561_v36 = vrot.slane %v10121_v24, 1  ;;  %v4247_v39 = vpop.f32.mrb[27].mxu1  ;;  %v15340_v47 = vrot.slane %v13730_v33, 1  ;;  %vm15572_vm8 = vmmov %vm15571_vm5 }
 0x2f1   : > { %v13726_v4 = vadd.f32 %v10429_v53, %v4459_v57  ;;  %v10431_v53 = vadd.f32 %v13540_v6, %v3175_v15  ;;  %v3177_v57 = vpop.f32.mrb[98].mxu0  ;;  %v4557_v6 = vrot.slane %v4247_v39, 1  ;;  %v4932_v15 = vrot.slane %v4832_v37, 4 }
 0x2f2   : > { %10153 = vmatpush3.bf16.msra.mxu0 %v11338_v11  ;;  %v10430_v11 = vadd.f32 %v13534_v16, %v3173_v48  ;;  %v13737_v16 = vld [vmem:[#allocation8 + $0x4] ss:$12 sps:$4 sm:$0xff]   ;;  %v10432_v7 = vadd.f32 %v13547_v28, %v3177_v57  ;;  %v3179_v25 = vpop.f32.mrb[99].mxu0 }
 0x2f3   : > { %10154 = vmatprep.subr.bf16.mxu0 %v11342_v14  ;;  %15569 = vst [vmem:[#allocation44_spill] sm:$0xff] %v13737_v16  ;;  %v13751_v28 = vsel %vm15572_vm8, %v15340_v47, %v4557_v6 }
 0x2f4   : > { %v4460_v48 = vrot.slane %v10430_v11, 7  ;;  %v4462_v58 = vrot.slane %v10432_v7, 7  ;;  %15573 = vst [vmem:[#allocation45_spill] sm:$0xff] %v13751_v28  ;;  %v10124_v11 = vpop.f32.mrb[28].mxu1 }
 0x2f5   : > { %5143 = vmatmul.mubr.bf16.gmra.mrb[132].mxu0 %v13724_v52  ;;  %v4559_v52 = vrot.slane %v10120_v10, 1  ;;  %v4260_v57 = vpop.f32.mrb[29].mxu1 }
 0x2f6   : > { %5152 = vmatprep.mubr.bf16.mxu0 %v13657_v2  ;;  %10155 = vmatpush3.bf16.msra.mxu0 %v11342_v14  ;;  %v10433_v14 = vadd.f32 %v13559_v5, %v3179_v25  ;;  %v4461_v49 = vsel %vm15570_vm7, %v4458_v22, %v4460_v48  ;;  %v4463_v7 = vsel %vm15570_vm7, %v4460_v48, %v4462_v58  ;;  %v13760_v22 = vld [vmem:[#allocation2 + $0x60] sm:$0xff] }
 0x2f7   : > { %10156 = vmatprep.subr.bf16.mxu0 %v11343_v21  ;;  %v4562_v30 = vsel %vm15571_vm5, %v4559_v52, %v4561_v36  ;;  %v13745_v10 = vadd.f32 %v10431_v53, %v4461_v49  ;;  %v4560_v39 = vsel %vm15574_vm15, %v4557_v6, %v4559_v52  ;;  %vm15575_vm5 = vcmask 1043456   ;;  %v3183_v52 = vpop.f32.mrb[100].mxu0 }
 0x2f8   : > { %v4631_v24 = vadd.f32 %v4562_v30, %v13624_v35  ;;  %v4630_v5 = vadd.f32 %v4560_v39, %v13599_v23  ;;  %v13758_v18 = vsel %vm15575_vm5, %v4922_v27, %v4924_v56  ;;  %v13765_v35 = vld [vmem:[%s15257_s3] ss:$0 sm:$0xff]  ;;  %vm15577_vm8 = vmmov %vm15575_vm5  ;;  %v10434_v37 = vadd.f32 %v13601_v32, %v3183_v52  ;;  %v3185_v53 = vpop.f32.mrb[101].mxu0  ;;  %v10125_v32 = vpop.f32.mrb[30].mxu1  ;;  %v13791_v39 = vld [vmem:[#allocation2 + $0x68] sm:$0xf] }
 0x2f9   : > { %15576 = vst [vmem:[#allocation46_spill] sm:$0xff] %v13758_v18  ;;  %v13772_v23 = vsel %vm15577_vm8, %v4924_v56, %v4926_v8  ;;  %vm15578_vm15 = vmmov %vm15575_vm5  ;;  %v13783_v25 = vsel %vm15575_vm5, %v4930_v0, %v4932_v15  ;;  %v4563_v6 = vrot.slane %v4260_v57, 1  ;;  %v3187_v49 = vpop.f32.mrb[102].mxu0  ;;  %vm15582_vm8 = vcmask 1040384  }
 0x2fa   : > { %10157 = vmatpush3.bf16.msra.mxu0 %v11343_v21  ;;  %v4655_v30 = vmul.f32 %v13765_v35, %v4631_v24  ;;  %v13768_v21 = vadd.f32 %v10433_v14, %v4463_v7  ;;  %v13775_v27 = vsel %vm15578_vm15, %v4926_v8, %v4928_v43  ;;  %vm15579_vm7 = vmmov %vm15575_vm5  ;;  %v10435_v8 = vadd.f32 %v13608_v41, %v3185_v53  ;;  %v3189_v47 = vpop.f32.mrb[103].mxu0 }
 0x2fb   : > { %5490 = vmatprep.subr.bf16.mxu0 %v13737_v16  ;;  %v13780_v48 = vsel %vm15579_vm7, %v4928_v43, %v4930_v0  ;;  %vm15580_vm2 = vmmov %vm15575_vm5  ;;  %v4464_v7 = vrot.slane %v10434_v37, 7  ;;  %v4567_v43 = vrot.slane %v10124_v11, 1  ;;  %v10436_v52 = vadd.f32 %v13611_v55, %v3187_v49  ;;  %v4263_v16 = vpop.f32.mrb[31].mxu1  ;;  %v3193_v49 = vpop.f32.mrb[104].mxu0 }
 0x2fc   : > { %v13786_v14 = vsel %vm15580_vm2, %v4932_v15, %v4934_v17  ;;  %v4679_v56 = vadd.f32 %v13583_v3, %v4655_v30  ;;  %v4569_v0 = vrot.slane %v10125_v32, 1  ;;  %vm15581_vm2 = vcmask 1046528  }
 0x2fd   : > { %5153 = vmatmul.mubr.bf16.gmra.mrb[136].mxu0 %v13758_v18  ;;  %v4564_v18 = vsel %vm15581_vm2, %v4561_v36, %v4563_v6  ;;  %v10437_v30 = vadd.f32 %v13614_v59, %v3189_v47  ;;  %v4565_v41 = vrot.slane %v4263_v16, 1  ;;  %v4465_v53 = vsel %vm15582_vm8, %v4462_v58, %v4464_v7  ;;  %vm15583_vm15 = vmmov %vm15581_vm2 }
 0x2fe   : > { %5162 = vmatprep.mubr.bf16.mxu0 %v13657_v2  ;;  %v4703_v15 = vmax.f32 %v4679_v56, 0.0  ;;  %v4632_v57 = vadd.f32 %v4564_v18, %v13627_v44  ;;  %v4466_v24 = vrot.slane %v10436_v52, 7  ;;  %v13799_v37 = vadd.f32 %v10435_v8, %v4465_v53  ;;  %vm15584_vm7 = vmmov %vm15581_vm2  ;;  %v3195_v52 = vpop.f32.mrb[105].mxu0 }
 0x2ff   : > { %v4570_v55 = vsel %vm15583_vm15, %v4567_v43, %v4569_v0  ;;  %v4566_v11 = vsel %vm15584_vm7, %v4563_v6, %v4565_v41  ;;  %v15585_v56 = vrot.slane %v13760_v22, 4  ;;  %v4654_v59 = vmul.f32 %v13765_v35, %v4630_v5  ;;  %vm15586_vm2 = vmmov %vm15582_vm8  ;;  %v3197_v53 = vpop.f32.mrb[106].mxu0 }
 0x300   : > { %v4656_v58 = vmul.f32 %v13765_v35, %v4632_v57  ;;  %v4635_v44 = vadd.f32 %v4570_v55, %v13669_v26  ;;  %v4467_v16 = vsel %vm15586_vm2, %v4464_v7, %v4466_v24  ;;  %v4727_v47 = vsel %vm12833_vm14, %v4703_v15, 0.0  ;;  %vm15587_vm8 = vmmov %vm15584_vm7 }
 0x301   : > { %v13806_v36 = vsel %vm15575_vm5, %v4934_v17, %v15585_v56  ;;  %v13814_v18 = vadd.f32 %v10437_v30, %v4467_v16  ;;  %v4568_v8 = vsel %vm15587_vm8, %v4565_v41, %v4567_v43  ;;  %v4633_v6 = vadd.f32 %v4566_v11, %v13643_v45  ;;  %v10128_v17 = vpop.f32.mrb[32].mxu1  ;;  %vm15588_vm15 = vmmov %vm15584_vm7 }
 0x302   : > { %v4680_v5 = vadd.f32 %v13583_v3, %v4656_v58  ;;  %v4659_v32 = vmul.f32 %v13765_v35, %v4635_v44  ;;  %v4634_v26 = vadd.f32 %v4568_v8, %v13649_v13  ;;  %v10438_v7 = vadd.f32 %v13629_v20, %v3193_v49  ;;  %v4276_v15 = vpop.f32.mrb[33].mxu1  ;;  %v3199_v20 = vpop.f32.mrb[107].mxu0  ;;  %vm15589_vm7 = vmmov %vm15586_vm2 }
 0x303   : > { %v4657_v43 = vmul.f32 %v13765_v35, %v4633_v6  ;;  %v4575_v30 = vrot.slane %v10128_v17, 1  ;;  %v10439_v45 = vadd.f32 %v13632_v31, %v3195_v52  ;;  %v4571_v41 = vrot.slane %v4276_v15, 1  ;;  %v13826_v57 = vpop.f32.mrb[34].mxu1  ;;  %vm15590_vm5 = vmmov %vm15587_vm8 }
 0x304   : > { %v4704_v55 = vmax.f32 %v4680_v5, 0.0  ;;  %v4683_v11 = vadd.f32 %v13583_v3, %v4659_v32  ;;  %v4658_v13 = vmul.f32 %v13765_v35, %v4634_v26  ;;  %v4468_v56 = vrot.slane %v10438_v7, 7  ;;  %v4279_v58 = vpop.f32.mrb[35].mxu1  ;;  %vm15594_vm8 = vmmov %vm15590_vm5 }
 0x305   : > { %5163 = vmatmul.mubr.bf16.gmra.mrb[140].mxu0 %v13772_v23  ;;  %v4681_v44 = vadd.f32 %v13583_v3, %v4657_v43  ;;  %v4572_v16 = vsel %vm15588_vm15, %v4569_v0, %v4571_v41  ;;  %v10440_v8 = vadd.f32 %v13635_v61, %v3197_v53  ;;  %v4577_v31 = vrot.slane %v13826_v57, 1  ;;  %vm15595_vm15 = vmmov %vm15590_vm5 }
 0x306   : > { %5172 = vmatprep.mubr.bf16.mxu0 %v13657_v2  ;;  %v4728_v6 = vsel %vm12846_vm1, %v4704_v55, 0.0  ;;  %v4707_v49 = vmax.f32 %v4683_v11, 0.0  ;;  %v4682_v17 = vadd.f32 %v13583_v3, %v4658_v13  ;;  %v4469_v5 = vsel %vm15589_vm7, %v4466_v24, %v4468_v56  ;;  %v13851_v13 = vpop.f32.mrb[36].mxu1 }
 0x307   : > { %v4750_v32 = vpack.c.bf16 %v4728_v6, %v4727_v47  ;;  %v4705_v26 = vmax.f32 %v4681_v44, 0.0  ;;  %v13838_v7 = vadd.f32 %v10439_v45, %v4469_v5  ;;  %v4636_v52 = vadd.f32 %v4572_v16, %v13675_v9  ;;  %v3203_v45 = vpop.f32.mrb[108].mxu0 }
 0x308   : > { %v13842_v0 = vadd.f32 %v13583_v3, %v4654_v59  ;;  %v4706_v61 = vmax.f32 %v4682_v17, 0.0  ;;  %v4470_v15 = vrot.slane %v10440_v8, 7  ;;  %v4578_v43 = vsel %vm15590_vm5, %v4575_v30, %v4577_v31  ;;  %v3205_v6 = vpop.f32.mrb[109].mxu0 }
 0x309   : > { %v4731_v57 = vsel %vm12949_vm13, %v4707_v49, 0.0  ;;  %v4729_v11 = vsel %vm12894_vm9, %v4705_v26, 0.0  ;;  %v4660_v24 = vmul.f32 %v13765_v35, %v4636_v52  ;;  %v4639_v47 = vadd.f32 %v4578_v43, %v13718_v29  ;;  %v13858_v49 = vpop.f32.mrb[37].mxu1  ;;  %v3207_v52 = vpop.f32.mrb[110].mxu0 }
 0x30a   : > { %v4730_v59 = vsel %vm12904_vm4, %v4706_v61, 0.0  ;;  %v10441_v44 = vadd.f32 %v13638_v51, %v3199_v20  ;;  %v4471_v16 = vsel %vm15586_vm2, %v4468_v56, %v4470_v15  ;;  %v4573_v8 = vrot.slane %v4279_v58, 1  ;;  %v13864_v43 = vpop.f32.mrb[38].mxu1  ;;  %v3209_v58 = vpop.f32.mrb[111].mxu0 }
 0x30b   : > { %v4751_v17 = vpack.c.bf16 %v4730_v59, %v4729_v11  ;;  %v4684_v29 = vadd.f32 %v13583_v3, %v4660_v24  ;;  %v4663_v5 = vmul.f32 %v13765_v35, %v4639_v47  ;;  %v10442_v26 = vadd.f32 %v13651_v46, %v3203_v45  ;;  %v4295_v28 = vpop.f32.mrb[39].mxu1 }
 0x30c   : > { %v13866_v61 = vrot.slane %v4750_v32, 4  ;;  %v13868_v51 = vadd.f32 %v10441_v44, %v4471_v16  ;;  %v4574_v56 = vsel %vm15594_vm8, %v4571_v41, %v4573_v8  ;;  %v4576_v20 = vsel %vm15595_vm15, %v4573_v8, %v4575_v30  ;;  %v15597_v30 = vld [vmem:[#allocation18_spill] sm:$0xff] }
 0x30d   : > { %5173 = vmatmul.mubr.bf16.gmra.mrb[144].mxu0 %v13775_v27  ;;  %v4776_v11 = vrot.slane %v4751_v17, 4  ;;  %v4708_v59 = vmax.f32 %v4684_v29, 0.0  ;;  %v4687_v24 = vadd.f32 %v13583_v3, %v4663_v5  ;;  %v4637_v47 = vadd.f32 %v4574_v56, %v13692_v63  ;;  %v3213_v56 = vpop.f32.mrb[112].mxu0 }
 0x30e   : > { %5182 = vmatprep.mubr.bf16.mxu0 %v13657_v2  ;;  %v4638_v46 = vadd.f32 %v4576_v20, %v13698_v38  ;;  %v4472_v45 = vrot.slane %v10442_v26, 7  ;;  %v10443_v32 = vadd.f32 %v13655_v1, %v3205_v6  ;;  %v4579_v44 = vrot.slane %v13858_v49, 1  ;;  %v13893_v20 = vpop.f32.mrb[40].mxu1 }
 0x30f   : > { %vm15596_vm7 = vcmask 1043456   ;;  %vm15598_vm5 = vnez %v15597_v30  ;;  %v4661_v8 = vmul.f32 %v13765_v35, %v4637_v47  ;;  %v4583_v17 = vrot.slane %v13851_v13, 1 }
 0x310   : > { %v13879_v41 = vsel %vm15596_vm7, %v13866_v61, %v4776_v11  ;;  %v4732_v16 = vsel %vm15598_vm5, %v4708_v59, 0.0  ;;  %v4662_v38 = vmul.f32 %v13765_v35, %v4638_v46  ;;  %v4473_v1 = vsel %vm15586_vm2, %v4470_v15, %v4472_v45  ;;  %vm15599_vm15 = vmmov %vm15596_vm7 }
 0x311   : > { %4811 = vst [vmem:[#allocation2 + $0x78] sm:$0xff] %v13879_v41  ;;  %v4752_v63 = vpack.c.bf16 %v4732_v16, %v4731_v57  ;;  %v4580_v6 = vsel %vm15594_vm8, %v4577_v31, %v4579_v44  ;;  %v4711_v49 = vmax.f32 %v4687_v24, 0.0  ;;  %v4685_v29 = vadd.f32 %v13583_v3, %v4661_v8  ;;  %v3215_v31 = vpop.f32.mrb[113].mxu0  ;;  %v13899_v24 = vpop.f32.mrb[41].mxu1  ;;  %vm15600_vm7 = vmmov %vm15594_vm8 }
 0x312   : > { %v13890_v5 = vadd.f32 %v10443_v32, %v4473_v1  ;;  %v4640_v26 = vadd.f32 %v4580_v6, %v13726_v4  ;;  %v4686_v57 = vadd.f32 %v13583_v3, %v4662_v38  ;;  %v10444_v59 = vadd.f32 %v13662_v42, %v3207_v52  ;;  %v3217_v16 = vpop.f32.mrb[114].mxu0  ;;  %v13904_v8 = vpop.f32.mrb[42].mxu1  ;;  %vm15603_vm8 = vmmov %vm15600_vm7 }
 0x313   : > { %v4778_v13 = vrot.slane %v4752_v63, 4  ;;  %v15343_v15 = vrot.slane %v13864_v43, 1  ;;  %v4709_v47 = vmax.f32 %v4685_v29, 0.0  ;;  %v10445_v46 = vadd.f32 %v13665_v62, %v3209_v58  ;;  %v3219_v1 = vpop.f32.mrb[115].mxu0  ;;  %v13912_v6 = vpop.f32.mrb[43].mxu1  ;;  %v15601_v29 = vld [vmem:[#allocation19_spill] sm:$0xff] }
 0x314   : > { %v4664_v4 = vmul.f32 %v13765_v35, %v4640_v26  ;;  %v4581_v32 = vrot.slane %v4295_v28, 1  ;;  %v4710_v42 = vmax.f32 %v4686_v57, 0.0  ;;  %v4474_v52 = vrot.slane %v10444_v59, 7  ;;  %v15604_v26 = vld [vmem:[#allocation20_spill] sm:$0xff] }
 0x315   : > { %5183 = vmatmul.mubr.bf16.gmra.mrb[148].mxu0 %v13780_v48  ;;  %v13907_v63 = vsel %vm15599_vm15, %v4776_v11, %v4778_v13  ;;  %v4586_v38 = vsel %vm15600_vm7, %v4583_v17, %v15343_v15  ;;  %vm15602_vm2 = vnez %v15601_v29  ;;  %vm15605_vm15 = vnez %v15604_v26  ;;  %v15609_v26 = vld [vmem:[#allocation22_spill] sm:$0xff] }
 0x316   : > { %5192 = vmatprep.mubr.bf16.mxu0 %v13657_v2  ;;  %4812 = vst [vmem:[#allocation2 + $0x80] sm:$0xff] %v13907_v63  ;;  %v4733_v62 = vsel %vm15602_vm2, %v4709_v47, 0.0  ;;  %v4688_v28 = vadd.f32 %v13583_v3, %v4664_v4  ;;  %v4643_v58 = vadd.f32 %v4586_v38, %v13799_v37  ;;  %v4582_v11 = vsel %vm15603_vm8, %v4579_v44, %v4581_v32  ;;  %v15607_v4 = vld [vmem:[#allocation21_spill] sm:$0xff] }
 0x317   : > { %v4734_v57 = vsel %vm15605_vm15, %v4710_v42, 0.0  ;;  %vm15606_vm5 = vcmask 1040384   ;;  %v4584_v15 = vsel %vm15600_vm7, %v4581_v32, %v4583_v17  ;;  %v4641_v30 = vadd.f32 %v4582_v11, %v13745_v10 }
 0x318   : > { %v4475_v59 = vsel %vm15606_vm5, %v4472_v45, %v4474_v52  ;;  %v4753_v9 = vpack.c.bf16 %v4734_v57, %v4733_v62  ;;  %v4712_v55 = vmax.f32 %v4688_v28, 0.0  ;;  %v4667_v29 = vmul.f32 %v13765_v35, %v4643_v58  ;;  %v3223_v62 = vpop.f32.mrb[116].mxu0 }
 0x319   : > { %v13926_v47 = vadd.f32 %v10445_v46, %v4475_v59  ;;  %vm15608_vm2 = vnez %v15607_v4  ;;  %v4642_v44 = vadd.f32 %v4584_v15, %v13768_v21  ;;  %v4665_v38 = vmul.f32 %v13765_v35, %v4641_v30  ;;  %v13937_v46 = vpop.f32.mrb[44].mxu1 }
 0x31a   : > { %v4735_v37 = vsel %vm15608_vm2, %v4711_v49, 0.0  ;;  %v10446_v42 = vadd.f32 %v13677_v50, %v3213_v56  ;;  %v4780_v45 = vrot.slane %v4753_v9, 4  ;;  %vm15610_vm5 = vnez %v15609_v26  ;;  %v3225_v50 = vpop.f32.mrb[117].mxu0  ;;  %v13942_v9 = vpop.f32.mrb[45].mxu1 }
 0x31b   : > { %v4736_v17 = vsel %vm15610_vm5, %v4712_v55, 0.0  ;;  %v4691_v10 = vadd.f32 %v13583_v3, %v4667_v29  ;;  %v10447_v32 = vadd.f32 %v13681_v34, %v3215_v31  ;;  %v4666_v21 = vmul.f32 %v13765_v35, %v4642_v44  ;;  %v3227_v29 = vpop.f32.mrb[118].mxu0  ;;  %v13950_v28 = vpop.f32.mrb[46].mxu1 }
 0x31c   : > { %v4754_v49 = vpack.c.bf16 %v4736_v17, %v4735_v37  ;;  %v4689_v30 = vadd.f32 %v13583_v3, %v4665_v38  ;;  %v4476_v15 = vrot.slane %v10446_v42, 7  ;;  %vm15611_vm8 = vcmask 1043456   ;;  %v3229_v37 = vpop.f32.mrb[119].mxu0  ;;  %v13955_v44 = vpop.f32.mrb[47].mxu1 }
 0x31d   : > { %5193 = vmatmul.mubr.bf16.gmra.mrb[152].mxu0 %v13783_v25  ;;  %v13946_v55 = vsel %vm15611_vm8, %v4778_v13, %v4780_v45  ;;  %v4715_v34 = vmax.f32 %v4691_v10, 0.0  ;;  %v4587_v56 = vrot.slane %v13899_v24, 1  ;;  %v10448_v31 = vadd.f32 %v13685_v12, %v3217_v16  ;;  %v15616_v10 = vld [vmem:[#allocation23_spill] sm:$0xff] }
 0x31e   : > { %5202 = vmatprep.mubr.bf16.mxu0 %v13657_v2  ;;  %4813 = vst [vmem:[#allocation2 + $0x88] sm:$0xff] %v13946_v55  ;;  %v4782_v58 = vrot.slane %v4754_v49, 4  ;;  %v4690_v11 = vadd.f32 %v13583_v3, %v4666_v21  ;;  %v4713_v57 = vmax.f32 %v4689_v30, 0.0  ;;  %vm15612_vm7 = vcmask 1040384   ;;  %v15618_v30 = vld [vmem:[#allocation24_spill] sm:$0xff] }
 0x31f   : > { %v4477_v59 = vsel %vm15612_vm7, %v4474_v52, %v4476_v15  ;;  %v4591_v13 = vrot.slane %v13893_v20, 1  ;;  %v15613_v12 = vrot.slane %v13864_v43, 1  ;;  %vm15614_vm8 = vcmask 1046528  }
 0x320   : > { %v13958_v38 = vadd.f32 %v10447_v32, %v4477_v59  ;;  %v4478_v16 = vrot.slane %v10448_v31, 7  ;;  %vm15615_vm5 = vcmask 1043456   ;;  %v4714_v17 = vmax.f32 %v4690_v11, 0.0 }
 0x321   : > { %v4588_v24 = vsel %vm15614_vm8, %v15613_v12, %v4587_v56  ;;  %v13964_v42 = vsel %vm15615_vm5, %v4780_v45, %v4782_v58  ;;  %vm15617_vm15 = vnez %v15616_v10  ;;  %v4593_v20 = vrot.slane %v13904_v8, 1 }
 0x322   : > { %v4737_v49 = vsel %vm15617_vm15, %v4713_v57, 0.0  ;;  %v4644_v52 = vadd.f32 %v4588_v24, %v13814_v18  ;;  %4814 = vst [vmem:[#allocation2 + $0x90] sm:$0xff] %v13964_v42  ;;  %v10449_v32 = vadd.f32 %v13688_v40, %v3219_v1  ;;  %v4479_v43 = vsel %vm15612_vm7, %v4476_v15, %v4478_v16  ;;  %v15620_v57 = vld [vmem:[#allocation39_spill] sm:$0xff]  ;;  %vm15621_vm15 = vmmov %vm15614_vm8 }
 0x323   : > { %v4589_v21 = vrot.slane %v13912_v6, 1  ;;  %v4739_v45 = vsel %vm13239_vm6, %v4715_v34, 0.0  ;;  %vm15619_vm5 = vnez %v15618_v30  ;;  %v10450_v18 = vadd.f32 %v15620_v57, %v3223_v62  ;;  %vm15622_vm7 = vmmov %vm15614_vm8 }
 0x324   : > { %v4738_v31 = vsel %vm15619_vm5, %v4714_v17, 0.0  ;;  %v4668_v11 = vmul.f32 %v13765_v35, %v4644_v52  ;;  %v4594_v12 = vsel %vm15614_vm8, %v4591_v13, %v4593_v20  ;;  %v13981_v8 = vadd.f32 %v10449_v32, %v4479_v43 }
 0x325   : > { %v4755_v59 = vpack.c.bf16 %v4738_v31, %v4737_v49  ;;  %v4590_v40 = vsel %vm15621_vm15, %v4587_v56, %v4589_v21  ;;  %5203 = vmatmul.mubr.bf16.gmra.mrb[156].mxu0 %v13786_v14  ;;  %v4647_v6 = vadd.f32 %v4594_v12, %v13890_v5  ;;  %v4592_v15 = vsel %vm15622_vm7, %v4589_v21, %v4591_v13  ;;  %v15623_v49 = vld [vmem:[#allocation40_spill] sm:$0xff]  ;;  %v15626_v21 = vld [vmem:[#allocation41_spill] sm:$0xff] }
 0x326   : > { %v4692_v1 = vadd.f32 %v13583_v3, %v4668_v11  ;;  %v4645_v34 = vadd.f32 %v4590_v40, %v13838_v7  ;;  %5212 = vmatprep.mubr.bf16.mxu0 %v13657_v2  ;;  %v4646_v24 = vadd.f32 %v4592_v15, %v13868_v51  ;;  %v4480_v17 = vrot.slane %v10450_v18, 7  ;;  %v15627_v51 = vld [vmem:[#allocation25_spill] sm:$0xff] }
 0x327   : > { %v4784_v62 = vrot.slane %v4755_v59, 4  ;;  %v10451_v52 = vadd.f32 %v15623_v49, %v3225_v50  ;;  %v4671_v56 = vmul.f32 %v13765_v35, %v4647_v6  ;;  %v4595_v31 = vrot.slane %v13942_v9, 1 }
 0x328   : > { %v4716_v32 = vmax.f32 %v4692_v1, 0.0  ;;  %v4669_v43 = vmul.f32 %v13765_v35, %v4645_v34  ;;  %vm15624_vm15 = vcmask 1043456   ;;  %v4670_v7 = vmul.f32 %v13765_v35, %v4646_v24  ;;  %v15630_v24 = vld [vmem:[#allocation13_spill] sm:$0xff] }
 0x329   : > { %v13996_v5 = vsel %vm15624_vm15, %v4782_v58, %v4784_v62  ;;  %vm15625_vm8 = vcmask 1040384   ;;  %v10452_v11 = vadd.f32 %v15626_v21, %v3227_v29  ;;  %vm15628_vm7 = vnez %v15627_v51 }
 0x32a   : > { %v4481_v13 = vsel %vm15625_vm8, %v4478_v16, %v4480_v17  ;;  %4815 = vst [vmem:[#allocation2 + $0x98] sm:$0xff] %v13996_v5  ;;  %v4740_v50 = vsel %vm15628_vm7, %v4716_v32, 0.0  ;;  %v4695_v57 = vadd.f32 %v13583_v3, %v4671_v56  ;;  %v4693_v18 = vadd.f32 %v13583_v3, %v4669_v43 }
 0x32b   : > { %v4530_v59 = vadd.f32 %v10451_v52, %v4481_v13  ;;  %v4756_v9 = vpack.c.bf16 %v4740_v50, %v4739_v45  ;;  %v4694_v58 = vadd.f32 %v13583_v3, %v4670_v7  ;;  %vm15629_vm15 = vcmask 1046528   ;;  %v15632_v52 = vld [vmem:[#allocation42_spill] sm:$0xff]  ;;  %v15637_v13 = vld [vmem:[#allocation27_spill] sm:$0xff] }
 0x32c   : > { %v4596_v12 = vsel %vm15629_vm15, %v4593_v20, %v4595_v31  ;;  %v4412_v40 = vrot.slane %v10452_v11, 7  ;;  %v4717_v1 = vmax.f32 %v4693_v18, 0.0  ;;  %v4599_v16 = vrot.slane %v13937_v46, 1  ;;  %v15633_v20 = vld [vmem:[#allocation26_spill] sm:$0xff] }
 0x32d   : > { %v4648_v29 = vadd.f32 %v4596_v12, %v13926_v47  ;;  %v4601_v6 = vrot.slane %v13950_v28, 1  ;;  %v4786_v15 = vrot.slane %v4756_v9, 4  ;;  %v4718_v34 = vmax.f32 %v4694_v58, 0.0  ;;  %5213 = vmatmul.mubr.bf16.gmra.mrb[160].mxu0 %v13806_v36  ;;  %v15635_v7 = vld [vmem:[#allocation14_spill] sm:$0xff]  ;;  %v15642_v9 = vld [vmem:[#allocation45_spill] sm:$0xff] }
 0x32e   : > { %v15631_v49 = vrot.slane %v15630_v24, 7  ;;  %v10453_v45 = vadd.f32 %v15632_v52, %v3229_v37  ;;  %v4719_v56 = vmax.f32 %v4695_v57, 0.0  ;;  %vm15634_vm15 = vnez %v15633_v20  ;;  %5222 = vmatprep.mubr.bf16.mxu0 %v13657_v2 }
 0x32f   : > { %v4741_v43 = vsel %vm15634_vm15, %v4717_v1, 0.0  ;;  %v4672_v46 = vmul.f32 %v13765_v35, %v4648_v29  ;;  %vm15636_vm7 = vcmask 1043456   ;;  %vm15638_vm5 = vnez %v15637_v13 }
 0x330   : > { %v4507_v32 = vsel %vm15625_vm8, %v4412_v40, %v15631_v49  ;;  %v14022_v28 = vsel %vm15636_vm7, %v4784_v62, %v4786_v15  ;;  %v4742_v21 = vsel %vm15638_vm5, %v4718_v34, 0.0  ;;  %vm15639_vm8 = vcmask 1046528  }
 0x331   : > { %v4508_v47 = vadd.f32 %v15635_v7, %v4507_v32  ;;  %v4602_v37 = vsel %vm15639_vm8, %v4599_v16, %v4601_v6  ;;  %v15640_v11 = vrot.slane %v13730_v33, 1  ;;  %vm15641_vm6 = vmmov %vm15639_vm8  ;;  %4816 = vst [vmem:[#allocation2 + $0xa0] sm:$0xff] %v14022_v28  ;;  %v4757_v57 = vpack.c.bf16 %v4742_v21, %v4741_v43 }
 0x332   : > { %v4696_v18 = vadd.f32 %v13583_v3, %v4672_v46  ;;  %v4651_v12 = vadd.f32 %v4602_v37, %v4530_v59  ;;  %v4702_v62 = vmax.f32 %v13842_v0, 0.0  ;;  %vm15643_vm7 = vcmask 1040384  }
 0x333   : > { %v4628_v50 = vsel %vm15641_vm6, %v4601_v6, %v15640_v11  ;;  %v4629_v58 = vadd.f32 %v15642_v9, %v4508_v47  ;;  %v4482_v1 = vsel %vm15643_vm7, %v4480_v17, %v4412_v40  ;;  %v4597_v29 = vrot.slane %v13955_v44, 1  ;;  %vm15648_vm7 = vmmov %vm15641_vm6 }
 0x334   : > { %v15644_v34 = vrot.slane %v13791_v39, 4  ;;  %v15645_v33 = vrot.slane %v13760_v22, 4  ;;  %vm15646_vm8 = vcmask 1043456   ;;  %v4788_v24 = vrot.slane %v4757_v57, 4  ;;  %v15650_v22 = vld [vmem:[#allocation29_spill] sm:$0xff] }
 0x335   : > { %v4720_v49 = vmax.f32 %v4696_v18, 0.0  ;;  %v4653_v32 = vmul.f32 %v13765_v35, %v4629_v58  ;;  %v4675_v52 = vmul.f32 %v13765_v35, %v4651_v12  ;;  %v4743_v0 = vsel %vm13411_vm3, %v4719_v56, 0.0  ;;  %vm15649_vm5 = vmmov %vm15646_vm8 }
 0x336   : > { %v14041_v6 = vsel %vm15646_vm8, %v15645_v33, %v15644_v34  ;;  %v4531_v43 = vadd.f32 %v10453_v45, %v4482_v1  ;;  %v4598_v17 = vsel %vm15641_vm6, %v4595_v31, %v4597_v29  ;;  %v4600_v44 = vsel %vm15648_vm7, %v4597_v29, %v4599_v16  ;;  %vm15655_vm6 = vmmov %vm15649_vm5 }
 0x337   : > { %v14050_v39 = vsel %vm15649_vm5, %v4786_v15, %v4788_v24  ;;  %vm15651_vm8 = vnez %v15650_v22  ;;  %v4677_v46 = vadd.f32 %v13583_v3, %v4653_v32  ;;  %v4699_v7 = vadd.f32 %v13583_v3, %v4675_v52  ;;  %5223 = vmatmul.mubr.bf16.gmra.mrb[164].mxu0 %v14041_v6  ;;  %v15652_v15 = vld [vmem:[#allocation36_spill] sm:$0xff] }
 0x338   : > { %v4744_v40 = vsel %vm15651_vm8, %v4720_v49, 0.0  ;;  %4817 = vst [vmem:[#allocation2 + $0xa8] sm:$0xff] %v14050_v39  ;;  %v4652_v21 = vadd.f32 %v4628_v50, %v4531_v43  ;;  %v4649_v45 = vadd.f32 %v4598_v17, %v13958_v38  ;;  %v4650_v31 = vadd.f32 %v4600_v44, %v13981_v8  ;;  %10158 = vmatprep.mubr.bf16.mxu0 %v15652_v15  ;;  %v14077_v32 = vld [vmem:[#allocation8 + $0x1c] ss:$12 sps:$4 sm:$0xff]  }
 0x339   : > { %v4758_v47 = vpack.c.bf16 %v4744_v40, %v4743_v0  ;;  %v4701_v16 = vmax.f32 %v4677_v46, 0.0  ;;  %v4726_v9 = vsel %vm13553_vm11, %v4702_v62, 0.0  ;;  %v4723_v58 = vmax.f32 %v4699_v7, 0.0  ;;  %v15660_v46 = vld [vmem:[#allocation37_spill] sm:$0xff]  ;;  %v14238_v17 = vld [vmem:[#allocation2 + $0x30] sm:$0xff] }
 0x33a   : > { %v4676_v37 = vmul.f32 %v13765_v35, %v4652_v21  ;;  %v4673_v11 = vmul.f32 %v13765_v35, %v4649_v45  ;;  %v4674_v57 = vmul.f32 %v13765_v35, %v4650_v31  ;;  %v14075_v35 = vld [vmem:[#allocation8] ss:$12 sps:$4 sm:$0xff]   ;;  %v14095_v45 = vld [vmem:[#allocation8 + $0x18] ss:$12 sps:$4 sm:$0xff]  }
 0x33b   : > { %v4790_v56 = vrot.slane %v4758_v47, 4  ;;  %v4725_v38 = vsel %vm13576_vm10, %v4701_v16, 0.0  ;;  %v4747_v43 = vsel %vm13565_vm0, %v4723_v58, 0.0  ;;  %v15661_v47 = vld [vmem:[#allocation31_spill] sm:$0xff] }
 0x33c   : > { %v4749_v12 = vpack.c.bf16 %v4726_v9, %v4725_v38  ;;  %v4700_v1 = vadd.f32 %v13583_v3, %v4676_v37  ;;  %v4697_v29 = vadd.f32 %v13583_v3, %v4673_v11  ;;  %v4698_v34 = vadd.f32 %v13583_v3, %v4674_v57  ;;  %v15658_v3 = vld [vmem:[#allocation30_spill] sm:$0xff]  ;;  %v14098_v16 = vld [vmem:[#allocation8 + $0x34] ss:$12 sps:$4 sm:$0xff]  }
 0x33d   : > { %v14069_v8 = vsel %vm15649_vm5, %v4788_v24, %v4790_v56  ;;  %vm15659_vm7 = vnez %v15658_v3  ;;  %vm15662_vm5 = vnez %v15661_v47  ;;  %v14101_v11 = vld [vmem:[#allocation8 + $0x30] ss:$12 sps:$4 sm:$0xff]   ;;  %v14110_v38 = vld [vmem:[#allocation8 + $0x4c] ss:$12 sps:$4 sm:$0xff]   ;;  %v14232_v3 = vld [vmem:[#allocation2 + $0x28] sm:$0xff] }
 0x33e   : > { %4818 = vst [vmem:[#allocation2 + $0xb0] sm:$0xff] %v14069_v8  ;;  %v4773_v33 = vrot.slane %v4749_v12, 4  ;;  %v4724_v62 = vmax.f32 %v4700_v1, 0.0  ;;  %v4721_v49 = vmax.f32 %v4697_v29, 0.0  ;;  %v4722_v52 = vmax.f32 %v4698_v34, 0.0  ;;  %v15665_v29 = vld [vmem:[#allocation43_spill] sm:$0xff] }
 0x33f   : > { %10159 = vmatmul.mubr.bf16.vlgmr.msra.gmra.mrb[168].mxu0 %v15660_v46  ;;  %v15666_v34 = vld [vmem:[#allocation46_spill] sm:$0xff]  ;;  %v6932_v46 = vrot.slane %v13879_v41, 4 }
 0x340   : > { %v14081_v24 = vsel %vm15655_vm6, %v4773_v33, %v13866_v61  ;;  %4809 = vst [vmem:[#allocation2 + $0x68] sm:$0xf0] %v4773_v33  ;;  %v4748_v44 = vsel %vm13588_vm12, %v4724_v62, 0.0  ;;  %v4745_v40 = vsel %vm15659_vm7, %v4721_v49, 0.0  ;;  %v4746_v21 = vsel %vm15662_vm5, %v4722_v52, 0.0  ;;  %v15663_v61 = vld [vmem:[#allocation38_spill] sm:$0xff]  ;;  %5491 = vmatpush1.bf16.msra.mxu0 %v14075_v35  ;;  %vm15664_vm5 = vmmov %vm15655_vm6 }
 0x341   : > { %4810 = vst [vmem:[#allocation2 + $0x70] sm:$0xff] %v14081_v24  ;;  %v4760_v7 = vpack.c.bf16 %v4748_v44, %v4747_v43  ;;  %10162 = vmatprep.mubr.bf16.mxu0 %v15663_v61  ;;  %v4759_v31 = vpack.c.bf16 %v4746_v21, %v4745_v40  ;;  %5492 = vmatprep.subr.bf16.mxu0 %v14077_v32  ;;  %v6930_v1 = vrot.slane %v14081_v24, 4  ;;  %v14118_v33 = vld [vmem:[#allocation8 + $0x48] ss:$12 sps:$4 sm:$0xff]   ;;  %v14124_v49 = vld [vmem:[#allocation8 + $0x64] ss:$12 sps:$4 sm:$0xff]  }
 0x342   : > { %v11452_v52 = vld [vmem:[#allocation8 + $0xc8] ss:$12 sps:$4 sm:$0xff]   ;;  %v11358_v43 = vld [vmem:[#allocation8 + $0xf8] ss:$12 sps:$4 sm:$0xff]   ;;  %v14129_v44 = vld [vmem:[#allocation8 + $0x60] ss:$12 sps:$4 sm:$0xff]  }
 0x343   : > { %v4794_v15 = vrot.slane %v4760_v7, 4  ;;  %v4792_v37 = vrot.slane %v4759_v31, 4  ;;  %v14132_v40 = vld [vmem:[#allocation8 + $0x7c] ss:$12 sps:$4 sm:$0xff]   ;;  %v14141_v61 = vld [vmem:[#allocation8 + $0x78] ss:$12 sps:$4 sm:$0xff]  }
 0x344   : > { %5493 = vmatpush1.bf16.msra.mxu0 %v14095_v45  ;;  %v11368_v7 = vld [vmem:[#allocation8 + $0x110] ss:$12 sps:$4 sm:$0xff]   ;;  %v14145_v31 = vld [vmem:[#allocation8 + $0x94] ss:$12 sps:$4 sm:$0xff]  }
 0x345   : > { %4821 = vst [vmem:[#allocation2 + $0xc8] sm:$0xf] %v4794_v15  ;;  %v14104_v57 = vsel %vm15655_vm6, %v4790_v56, %v4792_v37  ;;  %v14107_v9 = vsel %vm15664_vm5, %v4792_v37, %v4794_v15  ;;  %5494 = vmatprep.subr.bf16.mxu0 %v14098_v16  ;;  %v11348_v56 = vld [vmem:[#allocation8 + $0xe0] ss:$12 sps:$4 sm:$0xff]   ;;  %vm15667_vm6 = vmmov %vm15664_vm5  ;;  %v14150_v15 = vld [vmem:[#allocation8 + $0x90] ss:$12 sps:$4 sm:$0xff]  }
 0x346   : > { %4819 = vst [vmem:[#allocation2 + $0xb8] sm:$0xff] %v14104_v57  ;;  %4820 = vst [vmem:[#allocation2 + $0xc0] sm:$0xff] %v14107_v9  ;;  %v14138_v21 = vsel %vm15667_vm6, %v6930_v1, %v6932_v46  ;;  %v14153_v37 = vld [vmem:[#allocation8 + $0xac] ss:$12 sps:$4 sm:$0xff]  }
 0x347   : > { %v6881_v58 = vld [vmem:[#allocation2 + $0x68] sm:$0xf0]  ;;  %10163 = vmatmul.mubr.bf16.gmra.mrb[172].mxu0 %v15665_v29  ;;  %v14165_v29 = vld [vmem:[#allocation2] sm:$0xff]  ;;  %vm15668_vm6 = vmmov %vm15664_vm5 }
 0x348   : > { %v6929_v12 = vrot.slane %v6881_v58, 4  ;;  %10166 = vmatprep.mubr.bf16.mxu0 %v15666_v34  ;;  %5495 = vmatpush1.bf16.msra.mxu0 %v14101_v11  ;;  %v11378_v34 = vld [vmem:[#allocation8 + $0x170] ss:$12 sps:$4 sm:$0xff]   ;;  %735 = vst [vmem:[%s14449_s24] sm:$0xf] %v14165_v29  ;;  %736 = vst [vmem:[%s14449_s24 + $0x4] sm:$0xf] %v14165_v29 }
 0x349   : > { %5496 = vmatprep.subr.bf16.mxu0 %v14110_v38  ;;  %v14225_v47 = vld [vmem:[#allocation2 + $0x20] sm:$0xff]  ;;  %737 = vst [vmem:[%s14449_s24 + $0x8] sm:$0xf] %v14165_v29  ;;  %738 = vst [vmem:[%s14449_s24 + $0xcc] sm:$0xf] %v14165_v29 }
 0x34a   : > { %v14121_v62 = vsel %vm15664_vm5, %v6929_v12, %v6930_v1  ;;  %v14161_v12 = vld [vmem:[#allocation8 + $0xa8] ss:$12 sps:$4 sm:$0xff]   ;;  %739 = vst [vmem:[%s14449_s24 + $0xd0] sm:$0xf] %v14165_v29  ;;  %740 = vst [vmem:[%s14449_s24 + $0xd4] sm:$0xf] %v14165_v29 }
 0x34b   : > { %7127 = vmatmul.mubr.bf16.vlgmr.msra.gmra.mrb[96].mxu1 %v14121_v62  ;;  %v11379_v1 = vld [vmem:[#allocation8 + $0x8] ss:$12 sps:$4 sm:$0xff]  }
 0x34c   : > { %10263 = vmatpush3.bf16.msra.mxu1 %v11452_v52  ;;  %7136 = vmatprep.mubr.bf16.mxu1 %v13657_v2  ;;  %v6938_v52 = vrot.slane %v13964_v42, 4  ;;  %v6883_v22 = vld [vmem:[#allocation2 + $0xc8] sm:$0xf] }
 0x34d   : > { %10264 = vmatprep.subr.bf16.mxu1 %v11348_v56  ;;  %5497 = vmatpush1.bf16.msra.mxu0 %v14118_v33  ;;  %v6952_v0 = vrot.slane %v6883_v22, 4  ;;  %v14253_v22 = vld [vmem:[#allocation2 + $0x40] sm:$0xff] }
 0x34e   : > { %5498 = vmatprep.subr.bf16.mxu0 %v14124_v49 }
 0x34f   : > { %10167 = vmatmul.mubr.bf16.gmra.mrb[176].mxu0 %v13772_v23  ;;  %v11375_v23 = vld [vmem:[#allocation8 + $0x128] ss:$12 sps:$4 sm:$0xff]  }
 0x350   : > { %10265 = vmatpush3.bf16.msra.mxu1 %v11348_v56  ;;  %10170 = vmatprep.mubr.bf16.mxu0 %v13775_v27  ;;  %v6934_v27 = vrot.slane %v13907_v63, 4 }
 0x351   : > { %10266 = vmatprep.subr.bf16.mxu1 %v11358_v43  ;;  %5499 = vmatpush1.bf16.msra.mxu0 %v14129_v44 }
 0x352   : > { %5500 = vmatprep.subr.bf16.mxu0 %v14132_v40  ;;  %v14158_v58 = vsel %vm15664_vm5, %v6932_v46, %v6934_v27  ;;  %v11380_v46 = vld [vmem:[#allocation8 + $0x20] ss:$12 sps:$4 sm:$0xff]  }
 0x353   : > { %7137 = vmatmul.mubr.bf16.gmra.mrb[100].mxu1 %v14138_v21 }
 0x354   : > { %7146 = vmatprep.mubr.bf16.mxu1 %v13657_v2  ;;  %10267 = vmatpush3.bf16.msra.mxu1 %v11358_v43  ;;  %v11376_v2 = vld [vmem:[#allocation8 + $0x140] ss:$12 sps:$4 sm:$0xff]   ;;  %v6940_v43 = vrot.slane %v13996_v5, 4 }
 0x355   : > { %10268 = vmatprep.subr.bf16.mxu1 %v11368_v7  ;;  %5501 = vmatpush1.bf16.msra.mxu0 %v14141_v61 }
 0x356   : > { %5502 = vmatprep.subr.bf16.mxu0 %v14145_v31 }
 0x357   : > { %10171 = vmatmul.mubr.bf16.gmra.mrb[180].mxu0 %v13780_v48  ;;  %v11377_v48 = vld [vmem:[#allocation8 + $0x158] ss:$12 sps:$4 sm:$0xff]  }
 0x358   : > { %10269 = vmatpush3.bf16.msra.mxu1 %v11368_v7  ;;  %10174 = vmatprep.mubr.bf16.mxu0 %v13783_v25  ;;  %v6936_v25 = vrot.slane %v13946_v55, 4  ;;  %v11381_v7 = vld [vmem:[#allocation8 + $0x38] ss:$12 sps:$4 sm:$0xff]  }
 0x359   : > { %10270 = vmatprep.subr.bf16.mxu1 %v11375_v23  ;;  %5503 = vmatpush1.bf16.msra.mxu0 %v14150_v15 }
 0x35a   : > { %5504 = vmatprep.subr.bf16.mxu0 %v14153_v37  ;;  %v14173_v56 = vsel %vm15668_vm6, %v6934_v27, %v6936_v25  ;;  %vm15670_vm6 = vmmov %vm15664_vm5  ;;  %v11382_v27 = vld [vmem:[#allocation8 + $0x50] ss:$12 sps:$4 sm:$0xff]  }
 0x35b   : > { %7147 = vmatmul.mubr.bf16.gmra.mrb[104].mxu1 %v14158_v58 }
 0x35c   : > { %7156 = vmatprep.mubr.bf16.mxu1 %v14165_v29  ;;  %10271 = vmatpush3.bf16.msra.mxu1 %v11375_v23  ;;  %v6942_v23 = vrot.slane %v14022_v28, 4 }
 0x35d   : > { %10272 = vmatprep.subr.bf16.mxu1 %v11376_v2  ;;  %5505 = vmatpush1.bf16.msra.mxu0 %v14161_v12 }
 0x35e   : > { %10182 = vmatprep.subr.bf16.mxu0 %v11379_v1 }
 0x35f   : > { %10175 = vmatmul.mubr.bf16.gmra.mrb[184].mxu0 %v13786_v14  ;;  %v15669_v14 = vld [vmem:[#allocation44_spill] sm:$0xff] }
 0x360   : > { %10273 = vmatpush3.bf16.msra.mxu1 %v11376_v2  ;;  %10178 = vmatprep.mubr.bf16.mxu0 %v13806_v36  ;;  %v14182_v36 = vsel %vm15664_vm5, %v6936_v25, %v6938_v52  ;;  %v14195_v2 = vld [vmem:[#allocation2 + $0x8] sm:$0xff]  ;;  %v6944_v25 = vrot.slane %v14050_v39, 4 }
 0x361   : > { %10274 = vmatprep.subr.bf16.mxu1 %v11377_v48 }
 0x363   : > { %7157 = vmatmul.mubr.bf16.gmra.mrb[108].mxu1 %v14173_v56 }
 0x364   : > { %7166 = vmatprep.mubr.bf16.mxu1 %v14165_v29  ;;  %10275 = vmatpush3.bf16.msra.mxu1 %v11377_v48  ;;  %v11383_v48 = vld [vmem:[#allocation8 + $0x68] ss:$12 sps:$4 sm:$0xff]  }
 0x365   : > { %10276 = vmatprep.subr.bf16.mxu1 %v11378_v34 }
 0x367   : > { %10179 = vmatmul.mubr.bf16.gmra.mrb[188].mxu0 %v14041_v6  ;;  %v14190_v6 = vsel %vm15670_vm6, %v6938_v52, %v6940_v43  ;;  %v14205_v52 = vld [vmem:[#allocation2 + $0x10] sm:$0xff]  ;;  %vm15671_vm6 = vmmov %vm15664_vm5 }
 0x368   : > { %10277 = vmatpush3.bf16.msra.mxu1 %v11378_v34  ;;  %5522 = vmatprep.mubr.bf16.mxu0 %v14165_v29  ;;  %v11384_v34 = vld [vmem:[#allocation8 + $0x80] ss:$12 sps:$4 sm:$0xff]  }
 0x369   : > { %7504 = vmatprep.subr.bf16.mxu1 %v15669_v14  ;;  %v14210_v14 = vsel %vm15671_vm6, %v6942_v23, %v6944_v25  ;;  %vm15672_vm6 = vmmov %vm15664_vm5 }
 0x36b   : > { %7167 = vmatmul.mubr.bf16.gmra.mrb[112].mxu1 %v14182_v36 }
 0x36c   : > { %7176 = vmatprep.mubr.bf16.mxu1 %v14165_v29 }
 0x36f   : > { %5523 = vmatmul.mubr.bf16.vlgmr.msra.gmra.mrb[120].mxu0 %v14165_v29 }
 0x370   : > { %5532 = vmatprep.mubr.bf16.mxu0 %v14165_v29  ;;  %10183 = vmatpush3.bf16.msra.mxu0 %v11379_v1  ;;  %v14200_v1 = vsel %vm15664_vm5, %v6940_v43, %v6942_v23  ;;  %v11385_v43 = vld [vmem:[#allocation8 + $0x98] ss:$12 sps:$4 sm:$0xff]  }
 0x371   : > { %10184 = vmatprep.subr.bf16.mxu0 %v11380_v46 }
 0x373   : > { %7177 = vmatmul.mubr.bf16.gmra.mrb[116].mxu1 %v14190_v6 }
 0x374   : > { %7186 = vmatprep.mubr.bf16.mxu1 %v14165_v29  ;;  %10185 = vmatpush3.bf16.msra.mxu0 %v11380_v46  ;;  %v6946_v46 = vrot.slane %v14069_v8, 4 }
 0x375   : > { %10186 = vmatprep.subr.bf16.mxu0 %v11381_v7 }
 0x376   : > { %v6947_v23 = vsel %vm15664_vm5, %v6944_v25, %v6946_v46  ;;  %v6950_v25 = vrot.slane %v14107_v9, 4 }
 0x377   : > { %5533 = vmatmul.mubr.bf16.gmra.mrb[124].mxu0 %v14195_v2 }
 0x378   : > { %5542 = vmatprep.mubr.bf16.mxu0 %v14165_v29  ;;  %10187 = vmatpush3.bf16.msra.mxu0 %v11381_v7  ;;  %v11386_v7 = vld [vmem:[#allocation8 + $0xb0] ss:$12 sps:$4 sm:$0xff]  }
 0x379   : > { %10188 = vmatprep.subr.bf16.mxu0 %v11382_v27 }
 0x37b   : > { %7187 = vmatmul.mubr.bf16.gmra.mrb[120].mxu1 %v14200_v1 }
 0x37c   : > { %7196 = vmatprep.mubr.bf16.mxu1 %v14165_v29  ;;  %10189 = vmatpush3.bf16.msra.mxu0 %v11382_v27  ;;  %v14215_v27 = vld [vmem:[#allocation2 + $0x18] sm:$0xff] }
 0x37d   : > { %10190 = vmatprep.subr.bf16.mxu0 %v11383_v48 }
 0x37f   : > { %5543 = vmatmul.mubr.bf16.gmra.mrb[128].mxu0 %v14205_v52 }
 0x380   : > { %5552 = vmatprep.mubr.bf16.mxu0 %v14165_v29  ;;  %10191 = vmatpush3.bf16.msra.mxu0 %v11383_v48  ;;  %v14220_v48 = vld [vmem:[#allocation8 + $0x184] ss:$12 sps:$4 sm:$0xff]  }
 0x381   : > { %10192 = vmatprep.subr.bf16.mxu0 %v11384_v34 }
 0x383   : > { %7197 = vmatmul.mubr.bf16.gmra.mrb[124].mxu1 %v14210_v14 }
 0x384   : > { %7206 = vmatprep.mubr.bf16.mxu1 %v14165_v29  ;;  %10193 = vmatpush3.bf16.msra.mxu0 %v11384_v34  ;;  %v6948_v34 = vrot.slane %v14104_v57, 4 }
 0x385   : > { %10194 = vmatprep.subr.bf16.mxu0 %v11385_v43 }
 0x387   : > { %5553 = vmatmul.mubr.bf16.gmra.mrb[132].mxu0 %v14215_v27 }
 0x388   : > { %5562 = vmatprep.mubr.bf16.mxu0 %v14165_v29  ;;  %10195 = vmatpush3.bf16.msra.mxu0 %v11385_v43  ;;  %v6949_v43 = vsel %vm15672_vm6, %v6946_v46, %v6948_v34  ;;  %vm15673_vm6 = vmmov %vm15664_vm5  ;;  %v14244_v46 = vld [vmem:[#allocation2 + $0x38] sm:$0xff] }
 0x389   : > { %10196 = vmatprep.subr.bf16.mxu0 %v11386_v7  ;;  %v6953_v9 = vsel %vm15673_vm6, %v6950_v25, %v6952_v0  ;;  %v11387_v0 = vld [vmem:[#allocation8 + $0x8] ss:$12 sps:$4 sm:$0xff]  }
 0x38b   : > { %7207 = vmatmul.mubr.bf16.gmra.mrb[128].mxu1 %v6947_v23 }
 0x38c   : > { %7216 = vmatprep.mubr.bf16.mxu1 %v14165_v29  ;;  %10197 = vmatpush3.bf16.msra.mxu0 %v11386_v7  ;;  %v6951_v7 = vsel %vm15664_vm5, %v6948_v34, %v6950_v25  ;;  %v11423_v34 = vld [vmem:[#allocation8 + $0x1e8] ss:$12 sps:$4 sm:$0xff]   ;;  %v14371_v25 = vld [vmem:[#allocation2 + $0x28] sm:$0xff]  ;;  %vm15674_vm5 = vcmask 1040384  }
 0x38d   : > { %5945 = vmatprep.subr.bf16.mxu0 %v14220_v48  ;;  %vm15675_vm6 = vmmov %vm15674_vm5 }
 0x38e   : > { %vm15676_vm7 = vmmov %vm15674_vm5 }
 0x38f   : > { %5563 = vmatmul.mubr.bf16.gmra.mrb[136].mxu0 %v14225_v47  ;;  %vm15681_vm8 = vmmov %vm15674_vm5 }
 0x390   : > { %5572 = vmatprep.mubr.bf16.mxu0 %v14165_v29 }
 0x393   : > { %7217 = vmatmul.mubr.bf16.gmra.mrb[132].mxu1 %v6949_v43 }
 0x394   : > { %7226 = vmatprep.mubr.bf16.mxu1 %v14165_v29 }
 0x397   : > { %5573 = vmatmul.mubr.bf16.gmra.mrb[140].mxu0 %v14232_v3 }
 0x398   : > { %5582 = vmatprep.mubr.bf16.mxu0 %v14165_v29 }
 0x39b   : > { %7227 = vmatmul.mubr.bf16.gmra.mrb[136].mxu1 %v6951_v7 }
 0x39c   : > { %7236 = vmatprep.mubr.bf16.mxu1 %v14165_v29 }
 0x39f   : > { %5583 = vmatmul.mubr.bf16.gmra.mrb[144].mxu0 %v14238_v17 }
 0x3a0   : > { %5592 = vmatprep.mubr.bf16.mxu0 %v14165_v29 }
 0x3a3   : > { %7237 = vmatmul.mubr.bf16.gmra.mrb[140].mxu1 %v6953_v9 }
 0x3a4   : > { %10278 = vmatprep.mubr.bf16.mxu1 %v14121_v62  ;;  %v14300_v62 = vld [vmem:[#allocation8 + $0x1b0] ss:$12 sps:$4 sm:$0xff]  }
 0x3a7   : > { %5593 = vmatmul.mubr.bf16.gmra.mrb[148].mxu0 %v14244_v46 }
 0x3a8   : > { %5602 = vmatprep.mubr.bf16.mxu0 %v14165_v29 }
 0x3ab   : > { %10279 = vmatmul.mubr.bf16.vlgmr.msra.gmra.mrb[144].mxu1 %v14138_v21  ;;  %v14311_v21 = vld [vmem:[#allocation8 + $0x1e4] ss:$12 sps:$4 sm:$0xff]  }
 0x3ac   : > { %10282 = vmatprep.mubr.bf16.mxu1 %v14158_v58  ;;  %7505 = vmatpush1.bf16.msra.mxu1 %v14075_v35  ;;  %v14263_v35 = vld [vmem:[#allocation2 + $0x48] sm:$0xff] }
 0x3ad   : > { %7506 = vmatprep.subr.bf16.mxu1 %v14077_v32  ;;  %v14272_v32 = vld [vmem:[#allocation2 + $0x50] sm:$0xff]  ;;  %v14325_v58 = vld [vmem:[#allocation2 + $0x68] sm:$0xff] }
 0x3af   : > { %5603 = vmatmul.mubr.bf16.gmra.mrb[152].mxu0 %v14253_v22 }
 0x3b0   : > { %7507 = vmatpush1.bf16.msra.mxu1 %v14095_v45  ;;  %5612 = vmatprep.mubr.bf16.mxu0 %v14165_v29  ;;  %v14281_v45 = vld [vmem:[#allocation2 + $0x58] sm:$0xff] }
 0x3b1   : > { %7508 = vmatprep.subr.bf16.mxu1 %v14098_v16  ;;  %v14286_v16 = vld [vmem:[#allocation8 + $0x180] ss:$12 sps:$4 sm:$0xff]  }
 0x3b3   : > { %10283 = vmatmul.mubr.bf16.gmra.mrb[148].mxu1 %v14173_v56  ;;  %v14332_v56 = vld [vmem:[#allocation8 + $0x214] ss:$12 sps:$4 sm:$0xff]  }
 0x3b4   : > { %10286 = vmatprep.mubr.bf16.mxu1 %v14182_v36  ;;  %7509 = vmatpush1.bf16.msra.mxu1 %v14101_v11  ;;  %v14288_v11 = vld [vmem:[#allocation8 + $0x19c] ss:$12 sps:$4 sm:$0xff]   ;;  %v14339_v36 = vld [vmem:[#allocation8 + $0x22c] ss:$12 sps:$4 sm:$0xff]  }
 0x3b5   : > { %7510 = vmatprep.subr.bf16.mxu1 %v14110_v38  ;;  %v14293_v38 = vld [vmem:[#allocation8 + $0x198] ss:$12 sps:$4 sm:$0xff]  }
 0x3b7   : > { %5613 = vmatmul.mubr.bf16.gmra.mrb[156].mxu0 %v14263_v35 }
 0x3b8   : > { %7511 = vmatpush1.bf16.msra.mxu1 %v14118_v33  ;;  %5622 = vmatprep.mubr.bf16.mxu0 %v14165_v29  ;;  %v14296_v33 = vld [vmem:[#allocation8 + $0x1b4] ss:$12 sps:$4 sm:$0xff]  }
 0x3b9   : > { %7512 = vmatprep.subr.bf16.mxu1 %v14124_v49  ;;  %v14303_v49 = vld [vmem:[#allocation8 + $0x1cc] ss:$12 sps:$4 sm:$0xff]  }
 0x3bb   : > { %10287 = vmatmul.mubr.bf16.gmra.mrb[152].mxu1 %v14190_v6  ;;  %v11416_v6 = vld [vmem:[#allocation8 + $0x80] ss:$12 sps:$4 sm:$0xff]  }
 0x3bc   : > { %10290 = vmatprep.mubr.bf16.mxu1 %v14200_v1  ;;  %7513 = vmatpush1.bf16.msra.mxu1 %v14129_v44  ;;  %v11388_v44 = vld [vmem:[#allocation8 + $0x20] ss:$12 sps:$4 sm:$0xff]   ;;  %v11419_v1 = vld [vmem:[#allocation8 + $0x188] ss:$12 sps:$4 sm:$0xff]  }
 0x3bd   : > { %7514 = vmatprep.subr.bf16.mxu1 %v14132_v40  ;;  %v14308_v40 = vld [vmem:[#allocation8 + $0x1c8] ss:$12 sps:$4 sm:$0xff]  }
 0x3bf   : > { %5623 = vmatmul.mubr.bf16.gmra.mrb[160].mxu0 %v14272_v32 }
 0x3c0   : > { %7515 = vmatpush1.bf16.msra.mxu1 %v14141_v61  ;;  %5632 = vmatprep.mubr.bf16.mxu0 %v14165_v29  ;;  %v14313_v61 = vld [vmem:[#allocation2 + $0x60] sm:$0xff] }
 0x3c1   : > { %7516 = vmatprep.subr.bf16.mxu1 %v14145_v31  ;;  %v11398_v31 = vld [vmem:[#allocation8 + $0x38] ss:$12 sps:$4 sm:$0xff]  }
 0x3c3   : > { %10291 = vmatmul.mubr.bf16.gmra.mrb[156].mxu1 %v14210_v14  ;;  %v11418_v14 = vld [vmem:[#allocation8 + $0xb0] ss:$12 sps:$4 sm:$0xff]  }
 0x3c4   : > { %10294 = vmatprep.mubr.bf16.mxu1 %v6947_v23  ;;  %7517 = vmatpush1.bf16.msra.mxu1 %v14150_v15  ;;  %v14321_v15 = vld [vmem:[#allocation8 + $0x1fc] ss:$12 sps:$4 sm:$0xff]   ;;  %v14359_v23 = vld [vmem:[#allocation2 + $0x18] sm:$0xff] }
 0x3c5   : > { %7518 = vmatprep.subr.bf16.mxu1 %v14153_v37  ;;  %v11408_v37 = vld [vmem:[#allocation8 + $0x50] ss:$12 sps:$4 sm:$0xff]  }
 0x3c7   : > { %5633 = vmatmul.mubr.bf16.gmra.mrb[164].mxu0 %v14281_v45 }
 0x3c8   : > { %7519 = vmatpush1.bf16.msra.mxu1 %v14161_v12  ;;  %10198 = vmatprep.mubr.bf16.mxu0 %v14165_v29  ;;  %v14328_v12 = vld [vmem:[#allocation8 + $0x1f8] ss:$12 sps:$4 sm:$0xff]  }
 0x3c9   : > { %10302 = vmatprep.subr.bf16.mxu1 %v11387_v0 }
 0x3cb   : > { %10295 = vmatmul.mubr.bf16.gmra.mrb[160].mxu1 %v6949_v43  ;;  %v11424_v43 = vld [vmem:[#allocation8 + $0x200] ss:$12 sps:$4 sm:$0xff]  }
 0x3cc   : > { %10298 = vmatprep.mubr.bf16.mxu1 %v6951_v7  ;;  %v11425_v7 = vld [vmem:[#allocation8 + $0x218] ss:$12 sps:$4 sm:$0xff]  }
 0x3cf   : > { %10199 = vmatmul.mubr.bf16.vlgmr.msra.gmra.mrb[168].mxu0 %v14195_v2  ;;  %v14344_v2 = vld [vmem:[#allocation8 + $0x228] ss:$12 sps:$4 sm:$0xff]  }
 0x3d0   : > { %10202 = vmatprep.mubr.bf16.mxu0 %v14205_v52  ;;  %5946 = vmatpush1.bf16.msra.mxu0 %v14286_v16  ;;  %v11417_v52 = vld [vmem:[#allocation8 + $0x98] ss:$12 sps:$4 sm:$0xff]  }
 0x3d1   : > { %5947 = vmatprep.subr.bf16.mxu0 %v14288_v11 }
 0x3d3   : > { %10299 = vmatmul.mubr.bf16.gmra.mrb[164].mxu1 %v6953_v9  ;;  %v11426_v9 = vld [vmem:[#allocation8 + $0x230] ss:$12 sps:$4 sm:$0xff]  }
 0x3d4   : > { %7536 = vmatprep.mubr.bf16.mxu1 %v14165_v29  ;;  %5948 = vmatpush1.bf16.msra.mxu0 %v14293_v38 }
 0x3d5   : > { %5949 = vmatprep.subr.bf16.mxu0 %v14296_v33 }
 0x3d7   : > { %10203 = vmatmul.mubr.bf16.gmra.mrb[172].mxu0 %v14215_v27  ;;  %v11420_v27 = vld [vmem:[#allocation8 + $0x1a0] ss:$12 sps:$4 sm:$0xff]  }
 0x3d8   : > { %10206 = vmatprep.mubr.bf16.mxu0 %v14225_v47  ;;  %5950 = vmatpush1.bf16.msra.mxu0 %v14300_v62  ;;  %v14318_v47 = vld [vmem:[#allocation8 + $0x1e0] ss:$12 sps:$4 sm:$0xff]  }
 0x3d9   : > { %5951 = vmatprep.subr.bf16.mxu0 %v14303_v49 }
 0x3db   : > { %7537 = vmatmul.mubr.bf16.vlgmr.msra.gmra.mrb[96].mxu1 %v14313_v61 }
 0x3dc   : > { %10303 = vmatpush3.bf16.msra.mxu1 %v11387_v0  ;;  %7546 = vmatprep.mubr.bf16.mxu1 %v14165_v29  ;;  %v14395_v0 = vld [vmem:[#allocation2 + $0x50] sm:$0xff] }
 0x3dd   : > { %10304 = vmatprep.subr.bf16.mxu1 %v11388_v44  ;;  %5952 = vmatpush1.bf16.msra.mxu0 %v14308_v40 }
 0x3de   : > { %5953 = vmatprep.subr.bf16.mxu0 %v14311_v21 }
 0x3df   : > { %10207 = vmatmul.mubr.bf16.gmra.mrb[176].mxu0 %v14232_v3  ;;  %v11415_v3 = vld [vmem:[#allocation8 + $0x68] ss:$12 sps:$4 sm:$0xff]  }
 0x3e0   : > { %10305 = vmatpush3.bf16.msra.mxu1 %v11388_v44  ;;  %10210 = vmatprep.mubr.bf16.mxu0 %v14238_v17  ;;  %v14336_v17 = vld [vmem:[#allocation8 + $0x210] ss:$12 sps:$4 sm:$0xff]  }
 0x3e1   : > { %10306 = vmatprep.subr.bf16.mxu1 %v11398_v31  ;;  %5954 = vmatpush1.bf16.msra.mxu0 %v14318_v47  ;;  %v11465_v44 = vld [vmem:[#allocation2 + $0x78] sm:$0xff] }
 0x3e2   : > { %5955 = vmatprep.subr.bf16.mxu0 %v14321_v15 }
 0x3e3   : > { %7547 = vmatmul.mubr.bf16.gmra.mrb[100].mxu1 %v14325_v58 }
 0x3e4   : > { %7556 = vmatprep.mubr.bf16.mxu1 %v14165_v29  ;;  %10307 = vmatpush3.bf16.msra.mxu1 %v11398_v31  ;;  %v7792_v31 = vld [vmem:[#allocation2 + $0xa8] sm:$0xff] }
 0x3e5   : > { %10308 = vmatprep.subr.bf16.mxu1 %v11408_v37  ;;  %5956 = vmatpush1.bf16.msra.mxu0 %v14328_v12 }
 0x3e6   : > { %5957 = vmatprep.subr.bf16.mxu0 %v14332_v56 }
 0x3e7   : > { %10211 = vmatmul.mubr.bf16.gmra.mrb[180].mxu0 %v14244_v46  ;;  %v14377_v46 = vld [vmem:[#allocation2 + $0x30] sm:$0xff] }
 0x3e8   : > { %10309 = vmatpush3.bf16.msra.mxu1 %v11408_v37  ;;  %10214 = vmatprep.mubr.bf16.mxu0 %v14253_v22  ;;  %v5776_v22 = vld [vmem:[#allocation2 + $0x38] sm:$0xff]  ;;  %v7795_v37 = vld [vmem:[#allocation2 + $0xc0] sm:$0xff] }
 0x3e9   : > { %10310 = vmatprep.subr.bf16.mxu1 %v11415_v3  ;;  %5958 = vmatpush1.bf16.msra.mxu0 %v14336_v17 }
 0x3ea   : > { %5959 = vmatprep.subr.bf16.mxu0 %v14339_v36 }
 0x3eb   : > { %7557 = vmatmul.mubr.bf16.gmra.mrb[104].mxu1 %v14081_v24 }
 0x3ec   : > { %7566 = vmatprep.mubr.bf16.mxu1 %v14165_v29  ;;  %10311 = vmatpush3.bf16.msra.mxu1 %v11415_v3 }
 0x3ed   : > { %10312 = vmatprep.subr.bf16.mxu1 %v11416_v6  ;;  %5960 = vmatpush1.bf16.msra.mxu0 %v14344_v2 }
 0x3ee   : > { %10222 = vmatprep.subr.bf16.mxu0 %v11419_v1 }
 0x3ef   : > { %10215 = vmatmul.mubr.bf16.gmra.mrb[184].mxu0 %v14263_v35  ;;  %v14386_v35 = vld [vmem:[#allocation2 + $0x40] sm:$0xff] }
 0x3f0   : > { %10313 = vmatpush3.bf16.msra.mxu1 %v11416_v6  ;;  %10218 = vmatprep.mubr.bf16.mxu0 %v14272_v32  ;;  %v5778_v32 = vld [vmem:[#allocation2 + $0x48] sm:$0xff] }
 0x3f1   : > { %10314 = vmatprep.subr.bf16.mxu1 %v11417_v52 }
 0x3f3   : > { %7567 = vmatmul.mubr.bf16.gmra.mrb[108].mxu1 %v13879_v41  ;;  %v11421_v41 = vld [vmem:[#allocation8 + $0x1b8] ss:$12 sps:$4 sm:$0xff]  }
 0x3f4   : > { %7576 = vmatprep.mubr.bf16.mxu1 %v14165_v29  ;;  %10315 = vmatpush3.bf16.msra.mxu1 %v11417_v52 }
 0x3f5   : > { %10316 = vmatprep.subr.bf16.mxu1 %v11418_v14 }
 0x3f7   : > { %10219 = vmatmul.mubr.bf16.gmra.mrb[188].mxu0 %v14281_v45  ;;  %v5780_v45 = vld [vmem:[#allocation2 + $0x58] sm:$0xff] }
 0x3f8   : > { %10317 = vmatpush3.bf16.msra.mxu1 %v11418_v14  ;;  %5977 = vmatprep.mubr.bf16.mxu0 %v14165_v29 }
 0x3f9   : > { %7958 = vmatprep.subr.bf16.mxu1 %v14220_v48  ;;  %v11422_v48 = vld [vmem:[#allocation8 + $0x1d0] ss:$12 sps:$4 sm:$0xff]  }
 0x3fb   : > { %7577 = vmatmul.mubr.bf16.gmra.mrb[112].mxu1 %v13907_v63  ;;  %v14365_v63 = vld [vmem:[#allocation2 + $0x20] sm:$0xff] }
 0x3fc   : > { %7586 = vmatprep.mubr.bf16.mxu1 %v14165_v29 }
 0x3ff   : > { %5978 = vmatmul.mubr.bf16.vlgmr.msra.gmra.mrb[120].mxu0 %v14359_v23 }
 0x400   : > { %5987 = vmatprep.mubr.bf16.mxu0 %v14165_v29  ;;  %10223 = vmatpush3.bf16.msra.mxu0 %v11419_v1 }
 0x401   : > { %10224 = vmatprep.subr.bf16.mxu0 %v11420_v27 }
 0x403   : > { %7587 = vmatmul.mubr.bf16.gmra.mrb[116].mxu1 %v13946_v55 }
 0x404   : > { %7596 = vmatprep.mubr.bf16.mxu1 %v14165_v29  ;;  %10225 = vmatpush3.bf16.msra.mxu0 %v11420_v27 }
 0x405   : > { %10226 = vmatprep.subr.bf16.mxu0 %v11421_v41 }
 0x407   : > { %5988 = vmatmul.mubr.bf16.gmra.mrb[124].mxu0 %v14365_v63 }
 0x408   : > { %5997 = vmatprep.mubr.bf16.mxu0 %v14165_v29  ;;  %10227 = vmatpush3.bf16.msra.mxu0 %v11421_v41 }
 0x409   : > { %10228 = vmatprep.subr.bf16.mxu0 %v11422_v48 }
 0x40b   : > { %7597 = vmatmul.mubr.bf16.gmra.mrb[120].mxu1 %v13964_v42 }
 0x40c   : > { %7606 = vmatprep.mubr.bf16.mxu1 %v14165_v29  ;;  %10229 = vmatpush3.bf16.msra.mxu0 %v11422_v48 }
 0x40d   : > { %10230 = vmatprep.subr.bf16.mxu0 %v11423_v34 }
 0x40f   : > { %5998 = vmatmul.mubr.bf16.gmra.mrb[128].mxu0 %v14371_v25 }
 0x410   : > { %6007 = vmatprep.mubr.bf16.mxu0 %v14165_v29  ;;  %10231 = vmatpush3.bf16.msra.mxu0 %v11423_v34 }
 0x411   : > { %10232 = vmatprep.subr.bf16.mxu0 %v11424_v43 }
 0x413   : > { %7607 = vmatmul.mubr.bf16.gmra.mrb[124].mxu1 %v13996_v5 }
 0x414   : > { %7616 = vmatprep.mubr.bf16.mxu1 %v14165_v29  ;;  %10233 = vmatpush3.bf16.msra.mxu0 %v11424_v43 }
 0x415   : > { %10234 = vmatprep.subr.bf16.mxu0 %v11425_v7 }
 0x417   : > { %6008 = vmatmul.mubr.bf16.gmra.mrb[132].mxu0 %v14377_v46 }
 0x418   : > { %6017 = vmatprep.mubr.bf16.mxu0 %v14165_v29  ;;  %10235 = vmatpush3.bf16.msra.mxu0 %v11425_v7 }
 0x419   : > { %10236 = vmatprep.subr.bf16.mxu0 %v11426_v9 }
 0x41b   : > { %7617 = vmatmul.mubr.bf16.gmra.mrb[128].mxu1 %v14022_v28 }
 0x41c   : > { %7626 = vmatprep.mubr.bf16.mxu1 %v14165_v29  ;;  %10237 = vmatpush3.bf16.msra.mxu0 %v11426_v9 }
 0x41f   : > { %6018 = vmatmul.mubr.bf16.gmra.mrb[136].mxu0 %v5776_v22 }
 0x420   : > { %6027 = vmatprep.mubr.bf16.mxu0 %v14165_v29 }
 0x423   : > { %7627 = vmatmul.mubr.bf16.gmra.mrb[132].mxu1 %v14050_v39 }
 0x424   : > { %7636 = vmatprep.mubr.bf16.mxu1 %v14165_v29 }
 0x427   : > { %6028 = vmatmul.mubr.bf16.gmra.mrb[140].mxu0 %v14386_v35 }
 0x428   : > { %6037 = vmatprep.mubr.bf16.mxu0 %v14165_v29 }
 0x42b   : > { %7637 = vmatmul.mubr.bf16.gmra.mrb[136].mxu1 %v14069_v8 }
 0x42c   : > { %7646 = vmatprep.mubr.bf16.mxu1 %v14165_v29 }
 0x42f   : > { %6038 = vmatmul.mubr.bf16.gmra.mrb[144].mxu0 %v5778_v32 }
 0x430   : > { %6047 = vmatprep.mubr.bf16.mxu0 %v14165_v29 }
 0x433   : > { %7647 = vmatmul.mubr.bf16.gmra.mrb[140].mxu1 %v14104_v57 }
 0x434   : > { %10318 = vmatprep.mubr.bf16.mxu1 %v14313_v61  ;;  %v11466_v61 = vld [vmem:[#allocation2 + $0x80] sm:$0xff] }
 0x437   : > { %6048 = vmatmul.mubr.bf16.gmra.mrb[148].mxu0 %v14395_v0 }
 0x438   : > { %6057 = vmatprep.mubr.bf16.mxu0 %v14165_v29 }
 0x43b   : > { %10319 = vmatmul.mubr.bf16.vlgmr.msra.gmra.mrb[144].mxu1 %v14325_v58 }
 0x43c   : > { %10322 = vmatprep.mubr.bf16.mxu1 %v14081_v24  ;;  %7959 = vmatpush1.bf16.msra.mxu1 %v14286_v16  ;;  %v5781_v24 = vld [vmem:[#allocation2 + $0x60] sm:$0xff]  ;;  %v11431_v16 = vld [vmem:[#allocation8 + $0x1e8] ss:$12 sps:$4 sm:$0xff]  }
 0x43d   : > { %7960 = vmatprep.subr.bf16.mxu1 %v14288_v11  ;;  %v11432_v11 = vld [vmem:[#allocation8 + $0x200] ss:$12 sps:$4 sm:$0xff]  }
 0x43f   : > { %6058 = vmatmul.mubr.bf16.gmra.mrb[152].mxu0 %v5780_v45 }
 0x440   : > { %7961 = vmatpush1.bf16.msra.mxu1 %v14293_v38  ;;  %6067 = vmatprep.mubr.bf16.mxu0 %v14165_v29  ;;  %v7788_v38 = vld [vmem:[#allocation2 + $0x88] sm:$0xff] }
 0x441   : > { %7962 = vmatprep.subr.bf16.mxu1 %v14296_v33  ;;  %v11433_v33 = vld [vmem:[#allocation8 + $0x218] ss:$12 sps:$4 sm:$0xff]  }
 0x443   : > { %10323 = vmatmul.mubr.bf16.gmra.mrb[148].mxu1 %v11465_v44 }
 0x444   : > { %10326 = vmatprep.mubr.bf16.mxu1 %v11466_v61  ;;  %7963 = vmatpush1.bf16.msra.mxu1 %v14300_v62  ;;  %v11434_v62 = vld [vmem:[#allocation8 + $0x230] ss:$12 sps:$4 sm:$0xff]  }
 0x445   : > { %7964 = vmatprep.subr.bf16.mxu1 %v14303_v49  ;;  %v7789_v49 = vld [vmem:[#allocation2 + $0x90] sm:$0xff] }
 0x447   : > { %6068 = vmatmul.mubr.bf16.gmra.mrb[156].mxu0 %v5781_v24 }
 0x448   : > { %7965 = vmatpush1.bf16.msra.mxu1 %v14308_v40  ;;  %6077 = vmatprep.mubr.bf16.mxu0 %v14165_v29  ;;  %v7790_v40 = vld [vmem:[#allocation2 + $0x98] sm:$0xff] }
 0x449   : > { %7966 = vmatprep.subr.bf16.mxu1 %v14311_v21  ;;  %v7791_v21 = vld [vmem:[#allocation2 + $0xa0] sm:$0xff] }
 0x44b   : > { %10327 = vmatmul.mubr.bf16.gmra.mrb[152].mxu1 %v13946_v55  ;;  %v11427_v55 = vld [vmem:[#allocation8 + $0x188] ss:$12 sps:$4 sm:$0xff]  }
 0x44c   : > { %10330 = vmatprep.mubr.bf16.mxu1 %v13964_v42  ;;  %7967 = vmatpush1.bf16.msra.mxu1 %v14318_v47  ;;  %v5783_v42 = vld [vmem:[#allocation2 + $0x70] sm:$0xff] }
 0x44d   : > { %7968 = vmatprep.subr.bf16.mxu1 %v14321_v15  ;;  %v7793_v47 = vld [vmem:[#allocation2 + $0xb0] sm:$0xff]  ;;  %v7794_v15 = vld [vmem:[#allocation2 + $0xb8] sm:$0xff] }
 0x44f   : > { %6078 = vmatmul.mubr.bf16.gmra.mrb[160].mxu0 %v14325_v58 }
 0x450   : > { %7969 = vmatpush1.bf16.msra.mxu1 %v14328_v12  ;;  %6087 = vmatprep.mubr.bf16.mxu0 %v14165_v29 }
 0x451   : > { %7970 = vmatprep.subr.bf16.mxu1 %v14332_v56 }
 0x453   : > { %10331 = vmatmul.mubr.bf16.gmra.mrb[156].mxu1 %v13996_v5  ;;  %v11428_v5 = vld [vmem:[#allocation8 + $0x1a0] ss:$12 sps:$4 sm:$0xff]  }
 0x454   : > { %10334 = vmatprep.mubr.bf16.mxu1 %v14022_v28  ;;  %7971 = vmatpush1.bf16.msra.mxu1 %v14336_v17  ;;  %v7786_v28 = vld [vmem:[#allocation2 + $0x78] sm:$0xff] }
 0x455   : > { %7972 = vmatprep.subr.bf16.mxu1 %v14339_v36 }
 0x457   : > { %6088 = vmatmul.mubr.bf16.gmra.mrb[164].mxu0 %v5783_v42 }
 0x458   : > { %7973 = vmatpush1.bf16.msra.mxu1 %v14344_v2  ;;  %10238 = vmatprep.mubr.bf16.mxu0 %v14359_v23 }
 0x459   : > { %10342 = vmatprep.subr.bf16.mxu1 %v11427_v55 }
 0x45b   : > { %10335 = vmatmul.mubr.bf16.gmra.mrb[160].mxu1 %v14050_v39  ;;  %v11429_v39 = vld [vmem:[#allocation8 + $0x1b8] ss:$12 sps:$4 sm:$0xff]  }
 0x45c   : > { %10338 = vmatprep.mubr.bf16.mxu1 %v14069_v8  ;;  %v11430_v8 = vld [vmem:[#allocation8 + $0x1d0] ss:$12 sps:$4 sm:$0xff]  }
 0x45f   : > { %10239 = vmatmul.mubr.bf16.vlgmr.msra.gmra.mrb[168].mxu0 %v14365_v63 }
 0x460   : > { %10242 = vmatprep.mubr.bf16.mxu0 %v14371_v25 }
 0x463   : > { %10339 = vmatmul.mubr.bf16.gmra.mrb[164].mxu1 %v14104_v57  ;;  %v7787_v57 = vld [vmem:[#allocation2 + $0x80] sm:$0xff] }
 0x464   : > { %7990 = vmatprep.mubr.bf16.mxu1 %v14165_v29 }
 0x467   : > { %10243 = vmatmul.mubr.bf16.gmra.mrb[172].mxu0 %v14377_v46 }
 0x468   : > { %10246 = vmatprep.mubr.bf16.mxu0 %v5776_v22 }
 0x46b   : > { %7991 = vmatmul.mubr.bf16.vlgmr.msra.gmra.mrb[96].mxu1 %v7786_v28 }
 0x46c   : > { %10343 = vmatpush3.bf16.msra.mxu1 %v11427_v55  ;;  %8000 = vmatprep.mubr.bf16.mxu1 %v14165_v29 }
 0x46d   : > { %10344 = vmatprep.subr.bf16.mxu1 %v11428_v5 }
 0x46f   : > { %10247 = vmatmul.mubr.bf16.gmra.mrb[176].mxu0 %v14386_v35 }
 0x470   : > { %10345 = vmatpush3.bf16.msra.mxu1 %v11428_v5  ;;  %10250 = vmatprep.mubr.bf16.mxu0 %v5778_v32 }
 0x471   : > { %10346 = vmatprep.subr.bf16.mxu1 %v11429_v39 }
 0x473   : > { %8001 = vmatmul.mubr.bf16.gmra.mrb[100].mxu1 %v7787_v57 }
 0x474   : > { %8010 = vmatprep.mubr.bf16.mxu1 %v14165_v29  ;;  %10347 = vmatpush3.bf16.msra.mxu1 %v11429_v39 }
 0x475   : > { %10348 = vmatprep.subr.bf16.mxu1 %v11430_v8 }
 0x477   : > { %10251 = vmatmul.mubr.bf16.gmra.mrb[180].mxu0 %v14395_v0 }
 0x478   : > { %10349 = vmatpush3.bf16.msra.mxu1 %v11430_v8  ;;  %10254 = vmatprep.mubr.bf16.mxu0 %v5780_v45 }
 0x479   : > { %10350 = vmatprep.subr.bf16.mxu1 %v11431_v16 }
 0x47b   : > { %8011 = vmatmul.mubr.bf16.gmra.mrb[104].mxu1 %v7788_v38 }
 0x47c   : > { %8020 = vmatprep.mubr.bf16.mxu1 %v14165_v29  ;;  %10351 = vmatpush3.bf16.msra.mxu1 %v11431_v16 }
 0x47d   : > { %10352 = vmatprep.subr.bf16.mxu1 %v11432_v11 }
 0x47f   : > { %10255 = vmatmul.mubr.bf16.gmra.mrb[184].mxu0 %v5781_v24 }
 0x480   : > { %10353 = vmatpush3.bf16.msra.mxu1 %v11432_v11  ;;  %10258 = vmatprep.mubr.bf16.mxu0 %v14325_v58  ;;  %v7796_v58 = vld [vmem:[#allocation2 + $0xc8] sm:$0xff] }
 0x481   : > { %10354 = vmatprep.subr.bf16.mxu1 %v11433_v33 }
 0x483   : > { %8021 = vmatmul.mubr.bf16.gmra.mrb[108].mxu1 %v7789_v49 }
 0x484   : > { %8030 = vmatprep.mubr.bf16.mxu1 %v14165_v29  ;;  %10355 = vmatpush3.bf16.msra.mxu1 %v11433_v33 }
 0x485   : > { %10356 = vmatprep.subr.bf16.mxu1 %v11434_v62 }
 0x487   : > { %10259 = vmatmul.mubr.bf16.gmra.mrb[188].mxu0 %v5783_v42 }
 0x488   : > { %10357 = vmatpush3.bf16.msra.mxu1 %v11434_v62 }
 0x48b   : > { %8031 = vmatmul.mubr.bf16.gmra.mrb[112].mxu1 %v7790_v40 }
 0x48c   : > { %8040 = vmatprep.mubr.bf16.mxu1 %v14165_v29 }
 0x493   : > { %8041 = vmatmul.mubr.bf16.gmra.mrb[116].mxu1 %v7791_v21 }
 0x494   : > { %8050 = vmatprep.mubr.bf16.mxu1 %v14165_v29 }
 0x49b   : > { %8051 = vmatmul.mubr.bf16.gmra.mrb[120].mxu1 %v7792_v31 }
 0x49c   : > { %8060 = vmatprep.mubr.bf16.mxu1 %v14165_v29 }
 0x4a3   : > { %8061 = vmatmul.mubr.bf16.gmra.mrb[124].mxu1 %v7793_v47 }
 0x4a4   : > { %8070 = vmatprep.mubr.bf16.mxu1 %v14165_v29 }
 0x4ab   : > { %8071 = vmatmul.mubr.bf16.gmra.mrb[128].mxu1 %v7794_v15 }
 0x4ac   : > { %8080 = vmatprep.mubr.bf16.mxu1 %v14165_v29 }
 0x4b3   : > { %8081 = vmatmul.mubr.bf16.gmra.mrb[132].mxu1 %v7795_v37 }
 0x4b4   : > { %8090 = vmatprep.mubr.bf16.mxu1 %v14165_v29 }
 0x4bb   : > { %8091 = vmatmul.mubr.bf16.gmra.mrb[136].mxu1 %v7796_v58 }
 0x4bc   : > { %8100 = vmatprep.mubr.bf16.mxu1 %v14165_v29 }
 0x4c3   : > { %8101 = vmatmul.mubr.bf16.gmra.mrb[140].mxu1 %v14165_v29 }
 0x4c4   : > { %10358 = vmatprep.mubr.bf16.mxu1 %v7786_v28 }
 0x4cb   : > { %10359 = vmatmul.mubr.bf16.vlgmr.msra.gmra.mrb[144].mxu1 %v7787_v57 }
 0x4cc   : > { %10362 = vmatprep.mubr.bf16.mxu1 %v7788_v38 }
 0x4d2   : > { %v14463_v12 = vpop.f32.mrb[120].mxu0 }
 0x4d3   : > { %10363 = vmatmul.mubr.bf16.gmra.mrb[148].mxu1 %v7789_v49  ;;  %v14465_v56 = vpop.f32.mrb[121].mxu0  ;;  %v6325_v17 = vrot.slane %v14463_v12, 7  ;;  %v14557_v12 = vld [vmem:[%s11841_s10 + $0x28] sm:$0xff]  }
 0x4d4   : > { %10366 = vmatprep.mubr.bf16.mxu1 %v7790_v40  ;;  %v5983_v3 = vpop.f32.mrb[122].mxu0 }
 0x4d5   : > { %v6326_v36 = vrot.slane %v5983_v3, 7  ;;  %v5985_v6 = vpop.f32.mrb[123].mxu0 }
 0x4d7   : > { %v6327_v2 = vsel %vm15674_vm5, %v6325_v17, %v6326_v36 }
 0x4d8   : > { %v14471_v1 = vadd.f32 %v6327_v2, %v5985_v6 }
 0x4da   : > { %v5989_v52 = vpop.f32.mrb[124].mxu0 }
 0x4db   : > { %10367 = vmatmul.mubr.bf16.gmra.mrb[152].mxu1 %v7791_v21  ;;  %v6328_v14 = vrot.slane %v5989_v52, 7  ;;  %v5991_v27 = vpop.f32.mrb[125].mxu0 }
 0x4dc   : > { %10370 = vmatprep.mubr.bf16.mxu1 %v7792_v31  ;;  %v5993_v23 = vpop.f32.mrb[126].mxu0 }
 0x4dd   : > { %v6329_v41 = vsel %vm15675_vm6, %v6326_v36, %v6328_v14  ;;  %v6330_v48 = vrot.slane %v5993_v23, 7  ;;  %v5995_v63 = vpop.f32.mrb[127].mxu0  ;;  %vm15677_vm6 = vmmov %vm15674_vm5 }
 0x4de   : > { %v14474_v34 = vadd.f32 %v6329_v41, %v5991_v27 }
 0x4df   : > { %v6331_v43 = vsel %vm15676_vm7, %v6328_v14, %v6330_v48  ;;  %vm15678_vm7 = vmmov %vm15674_vm5 }
 0x4e0   : > { %v14477_v25 = vadd.f32 %v6331_v43, %v5995_v63 }
 0x4e2   : > { %v5999_v7 = vpop.f32.mrb[128].mxu0 }
 0x4e3   : > { %10371 = vmatmul.mubr.bf16.gmra.mrb[156].mxu1 %v7793_v47  ;;  %v6332_v9 = vrot.slane %v5999_v7, 7  ;;  %v6001_v46 = vpop.f32.mrb[129].mxu0 }
 0x4e4   : > { %10374 = vmatprep.mubr.bf16.mxu1 %v7794_v15  ;;  %v6003_v22 = vpop.f32.mrb[130].mxu0 }
 0x4e5   : > { %v6333_v35 = vsel %vm15674_vm5, %v6330_v48, %v6332_v9  ;;  %v6334_v32 = vrot.slane %v6003_v22, 7  ;;  %v6005_v0 = vpop.f32.mrb[131].mxu0 }
 0x4e6   : > { %v14480_v45 = vadd.f32 %v6333_v35, %v6001_v46 }
 0x4e7   : > { %v6335_v44 = vsel %vm15677_vm6, %v6332_v9, %v6334_v32  ;;  %vm15679_vm6 = vmmov %vm15674_vm5 }
 0x4e8   : > { %v14483_v61 = vadd.f32 %v6335_v44, %v6005_v0 }
 0x4ea   : > { %v6009_v24 = vpop.f32.mrb[132].mxu0 }
 0x4eb   : > { %10375 = vmatmul.mubr.bf16.gmra.mrb[160].mxu1 %v7795_v37  ;;  %v6336_v55 = vrot.slane %v6009_v24, 7  ;;  %v6011_v42 = vpop.f32.mrb[133].mxu0 }
 0x4ec   : > { %10378 = vmatprep.mubr.bf16.mxu1 %v7796_v58  ;;  %v6013_v5 = vpop.f32.mrb[134].mxu0 }
 0x4ed   : > { %v6337_v28 = vsel %vm15678_vm7, %v6334_v32, %v6336_v55  ;;  %v6338_v39 = vrot.slane %v6013_v5, 7  ;;  %v6015_v8 = vpop.f32.mrb[135].mxu0  ;;  %vm15680_vm7 = vmmov %vm15674_vm5 }
 0x4ee   : > { %v14486_v57 = vadd.f32 %v6337_v28, %v6011_v42 }
 0x4ef   : > { %v6339_v16 = vsel %vm15674_vm5, %v6336_v55, %v6338_v39 }
 0x4f0   : > { %v14489_v11 = vadd.f32 %v6339_v16, %v6015_v8 }
 0x4f2   : > { %v6019_v38 = vpop.f32.mrb[136].mxu0 }
 0x4f3   : > { %10379 = vmatmul.mubr.bf16.gmra.mrb[164].mxu1 %v14165_v29  ;;  %v6340_v33 = vrot.slane %v6019_v38, 7  ;;  %v6021_v62 = vpop.f32.mrb[137].mxu0 }
 0x4f4   : > { %v6023_v49 = vpop.f32.mrb[138].mxu0 }
 0x4f5   : > { %v6341_v40 = vsel %vm15679_vm6, %v6338_v39, %v6340_v33  ;;  %v6342_v21 = vrot.slane %v6023_v49, 7  ;;  %v6025_v31 = vpop.f32.mrb[139].mxu0  ;;  %vm15682_vm6 = vmmov %vm15674_vm5 }
 0x4f6   : > { %v14493_v47 = vadd.f32 %v6341_v40, %v6021_v62 }
 0x4f7   : > { %v6343_v15 = vsel %vm15680_vm7, %v6340_v33, %v6342_v21  ;;  %vm15683_vm7 = vmmov %vm15674_vm5 }
 0x4f8   : > { %v14496_v37 = vadd.f32 %v6343_v15, %v6025_v31 }
 0x4fa   : > { %v6029_v58 = vpop.f32.mrb[140].mxu0 }
 0x4fb   : > { %v6344_v3 = vrot.slane %v6029_v58, 7  ;;  %v6031_v36 = vpop.f32.mrb[141].mxu0 }
 0x4fc   : > { %v6033_v6 = vpop.f32.mrb[142].mxu0 }
 0x4fd   : > { %v6345_v29 = vsel %vm15674_vm5, %v6342_v21, %v6344_v3  ;;  %v6346_v2 = vrot.slane %v6033_v6, 7  ;;  %v6035_v52 = vpop.f32.mrb[143].mxu0 }
 0x4fe   : > { %v14499_v14 = vadd.f32 %v6345_v29, %v6031_v36 }
 0x4ff   : > { %v6347_v27 = vsel %vm15681_vm8, %v6344_v3, %v6346_v2  ;;  %vm15684_vm8 = vmmov %vm15674_vm5 }
 0x500   : > { %v14502_v23 = vadd.f32 %v6347_v27, %v6035_v52 }
 0x502   : > { %v6039_v41 = vpop.f32.mrb[144].mxu0 }
 0x503   : > { %v6348_v48 = vrot.slane %v6039_v41, 7  ;;  %v6041_v63 = vpop.f32.mrb[145].mxu0 }
 0x504   : > { %v6043_v43 = vpop.f32.mrb[146].mxu0 }
 0x505   : > { %v6349_v7 = vsel %vm15682_vm6, %v6346_v2, %v6348_v48  ;;  %v6350_v9 = vrot.slane %v6043_v43, 7  ;;  %v6045_v46 = vpop.f32.mrb[147].mxu0  ;;  %vm15685_vm6 = vmmov %vm15674_vm5 }
 0x506   : > { %v14505_v22 = vadd.f32 %v6349_v7, %v6041_v63 }
 0x507   : > { %v6351_v35 = vsel %vm15683_vm7, %v6348_v48, %v6350_v9  ;;  %vm15686_vm7 = vmmov %vm15674_vm5 }
 0x508   : > { %v14508_v32 = vadd.f32 %v6351_v35, %v6045_v46 }
 0x50a   : > { %v6049_v0 = vpop.f32.mrb[148].mxu0 }
 0x50b   : > { %v6352_v44 = vrot.slane %v6049_v0, 7  ;;  %v6051_v24 = vpop.f32.mrb[149].mxu0 }
 0x50c   : > { %v6053_v55 = vpop.f32.mrb[150].mxu0 }
 0x50d   : > { %v6353_v42 = vsel %vm15684_vm8, %v6350_v9, %v6352_v44  ;;  %v6354_v5 = vrot.slane %v6053_v55, 7  ;;  %v6055_v28 = vpop.f32.mrb[151].mxu0  ;;  %vm15687_vm8 = vmmov %vm15674_vm5 }
 0x50e   : > { %v14511_v39 = vadd.f32 %v6353_v42, %v6051_v24 }
 0x50f   : > { %v6355_v8 = vsel %vm15674_vm5, %v6352_v44, %v6354_v5 }
 0x510   : > { %v14514_v16 = vadd.f32 %v6355_v8, %v6055_v28 }
 0x512   : > { %v6059_v38 = vpop.f32.mrb[152].mxu0 }
 0x513   : > { %v6356_v33 = vrot.slane %v6059_v38, 7  ;;  %v6061_v62 = vpop.f32.mrb[153].mxu0 }
 0x514   : > { %v6063_v49 = vpop.f32.mrb[154].mxu0 }
 0x515   : > { %v6357_v40 = vsel %vm15685_vm6, %v6354_v5, %v6356_v33  ;;  %v6358_v21 = vrot.slane %v6063_v49, 7  ;;  %v6065_v31 = vpop.f32.mrb[155].mxu0  ;;  %vm15689_vm6 = vmmov %vm15674_vm5 }
 0x516   : > { %v14517_v15 = vadd.f32 %v6357_v40, %v6061_v62 }
 0x517   : > { %v6359_v58 = vsel %vm15686_vm7, %v6356_v33, %v6358_v21  ;;  %vm15691_vm7 = vmmov %vm15674_vm5 }
 0x518   : > { %v14520_v3 = vadd.f32 %v6359_v58, %v6065_v31 }
 0x51a   : > { %v6069_v36 = vpop.f32.mrb[156].mxu0 }
 0x51b   : > { %v6360_v6 = vrot.slane %v6069_v36, 7  ;;  %v6071_v29 = vpop.f32.mrb[157].mxu0 }
 0x51c   : > { %v6073_v2 = vpop.f32.mrb[158].mxu0 }
 0x51d   : > { %v6361_v52 = vsel %vm15687_vm8, %v6358_v21, %v6360_v6  ;;  %v6362_v27 = vrot.slane %v6073_v2, 7  ;;  %v6075_v41 = vpop.f32.mrb[159].mxu0  ;;  %vm15693_vm8 = vmmov %vm15674_vm5  ;;  %v14548_v2 = vld [vmem:[%s11841_s10 + $0xc] sm:$0xf] }
 0x51e   : > { %v14523_v48 = vadd.f32 %v6361_v52, %v6071_v29  ;;  %v14545_v29 = vld [vmem:[%s11841_s10 + $0x10] sm:$0xff]   ;;  %v14551_v52 = vld [vmem:[%s11841_s10 + $0x18] sm:$0xff]  }
 0x51f   : > { %v6363_v63 = vsel %vm15674_vm5, %v6360_v6, %v6362_v27 }
 0x520   : > { %v14526_v43 = vadd.f32 %v6363_v63, %v6075_v41  ;;  %v9423_v63 = vunpack.c.h.bf16 %v14545_v29 }
 0x522   : > { %15688 = vst [vmem:[#allocation17_spill] sm:$0xff] %v14526_v43  ;;  %v6079_v7 = vpop.f32.mrb[160].mxu0 }
 0x523   : > { %v6364_v9 = vrot.slane %v6079_v7, 7  ;;  %v6081_v46 = vpop.f32.mrb[161].mxu0  ;;  %v14564_v7 = vld [vmem:[%s11841_s10 + $0x30] sm:$0xff]  }
 0x524   : > { %v6083_v35 = vpop.f32.mrb[162].mxu0 }
 0x525   : > { %v6365_v0 = vsel %vm15689_vm6, %v6362_v27, %v6364_v9  ;;  %v6366_v44 = vrot.slane %v6083_v35, 7  ;;  %v6085_v24 = vpop.f32.mrb[163].mxu0  ;;  %vm15695_vm6 = vmmov %vm15674_vm5  ;;  %v14554_v27 = vld [vmem:[%s11841_s10 + $0x20] sm:$0xff]   ;;  %v15705_v35 = vunpack.c.l.bf16 %v14545_v29 }
 0x526   : > { %v14529_v55 = vadd.f32 %v6365_v0, %v6081_v46  ;;  %v6621_v46 = vunpack.c.l.bf16 %v14548_v2  ;;  %v14582_v2 = vld [vmem:[%s11841_s10 + $0x48] sm:$0xff]  }
 0x527   : > { %v6367_v42 = vsel %vm15691_vm7, %v6364_v9, %v6366_v44  ;;  %vm15697_vm7 = vcmask 1046528  }
 0x528   : > { %15690 = vst [vmem:[#allocation21_spill] sm:$0xff] %v14529_v55  ;;  %v14532_v5 = vadd.f32 %v6367_v42, %v6085_v24  ;;  %v14571_v24 = vld [vmem:[%s11841_s10 + $0x38] sm:$0xff]   ;;  %v14574_v42 = vld [vmem:[%s11841_s10 + $0x40] sm:$0xff]  }
 0x52a   : > { %15692 = vst [vmem:[#allocation22_spill] sm:$0xff] %v14532_v5  ;;  %v6089_v28 = vpop.f32.mrb[164].mxu0  ;;  %v14606_v5 = vld [vmem:[%s11841_s10 + $0x60] sm:$0xff]  }
 0x52b   : > { %v6368_v8 = vrot.slane %v6089_v28, 7  ;;  %v6091_v38 = vpop.f32.mrb[165].mxu0  ;;  %15701 = vst [vmem:[#allocation41_spill] sm:$0xff] %v14606_v5 }
 0x52c   : > { %v6093_v33 = vpop.f32.mrb[166].mxu0 }
 0x52d   : > { %v6369_v62 = vsel %vm15693_vm8, %v6366_v44, %v6368_v8  ;;  %v6300_v49 = vrot.slane %v6093_v33, 7  ;;  %v6095_v40 = vpop.f32.mrb[167].mxu0  ;;  %v14594_v44 = vld [vmem:[%s11841_s10 + $0x50] sm:$0xff]   ;;  %vm15698_vm8 = vmmov %vm15697_vm7 }
 0x52e   : > { %v14535_v21 = vadd.f32 %v6369_v62, %v6091_v38  ;;  %v14617_v62 = vld [vmem:[%s11841_s10 + $0x68] sm:$0xff]  }
 0x52f   : > { %v6395_v31 = vsel %vm15674_vm5, %v6300_v49, %v6325_v17  ;;  %v6370_v58 = vsel %vm15695_vm6, %v6368_v8, %v6300_v49  ;;  %vm15699_vm5 = vmmov %vm15697_vm7  ;;  %15702 = vst [vmem:[#allocation13_spill] sm:$0xff] %v14617_v62 }
 0x530   : > { %15694 = vst [vmem:[#allocation23_spill] sm:$0xff] %v14535_v21  ;;  %v6396_v36 = vadd.f32 %v6395_v31, %v14465_v56  ;;  %v14542_v6 = vadd.f32 %v6370_v58, %v6095_v40  ;;  %v14603_v56 = vld [vmem:[%s11841_s10 + $0x58] sm:$0xff]   ;;  %vm15704_vm6 = vmmov %vm15699_vm5 }
 0x531   : > { %15700 = vst [vmem:[#allocation40_spill] sm:$0xff] %v14603_v56 }
 0x532   : > { %15696 = vst [vmem:[#allocation39_spill] sm:$0xff] %v14542_v6  ;;  %v10240_v41 = vpop.f32.mrb[168].mxu0 }
 0x533   : > { %v14559_v17 = vpop.f32.mrb[169].mxu0  ;;  %v6447_v28 = vrot.slane %v10240_v41, 1  ;;  %v14587_v41 = vld [vmem:[%s15257_s3 + $0x2] ss:$0 sm:$0xff] }
 0x534   : > { %v10241_v9 = vpop.f32.mrb[170].mxu0  ;;  %v15346_v49 = vrot.slane %v14559_v17, 1 }
 0x535   : > { %v6449_v8 = vrot.slane %v10241_v9, 1  ;;  %v6135_v38 = vpop.f32.mrb[171].mxu0 }
 0x536   : > { %v6445_v40 = vrot.slane %v6135_v38, 1  ;;  %v14611_v38 = vld [vmem:[%s15257_s3 + $0x3] ss:$0 sm:$0xff] }
 0x537   : > { %v6450_v9 = vsel %vm15697_vm7, %v6447_v28, %v6449_v8  ;;  %vm15706_vm7 = vmmov %vm15699_vm5 }
 0x538   : > { %v6519_v58 = vadd.f32 %v6450_v9, %v14474_v34  ;;  %v6446_v31 = vsel %vm15698_vm8, %v15346_v49, %v6445_v40  ;;  %v6448_v0 = vsel %vm15699_vm5, %v6445_v40, %v6447_v28  ;;  %vm15707_vm8 = vmmov %vm15699_vm5 }
 0x539   : > { %v6517_v33 = vadd.f32 %v6446_v31, %v6396_v36  ;;  %v6518_v34 = vadd.f32 %v6448_v0, %v14471_v1 }
 0x53a   : > { %v6571_v28 = vmul.f32 %v14587_v41, %v6519_v58  ;;  %v10244_v40 = vpop.f32.mrb[172].mxu0 }
 0x53b   : > { %v6569_v20 = vmul.f32 %v14587_v41, %v6517_v33  ;;  %v6570_v36 = vmul.f32 %v14587_v41, %v6518_v34  ;;  %v6148_v1 = vpop.f32.mrb[173].mxu0  ;;  %v6455_v34 = vrot.slane %v10244_v40, 1 }
 0x53c   : > { %v6599_v49 = vadd.f32 %v14611_v38, %v6571_v28  ;;  %v6451_v9 = vrot.slane %v6148_v1, 1  ;;  %v10245_v58 = vpop.f32.mrb[174].mxu0 }
 0x53d   : > { %v6597_v13 = vadd.f32 %v14611_v38, %v6569_v20  ;;  %v6598_v33 = vadd.f32 %v14611_v38, %v6570_v36  ;;  %v6457_v21 = vrot.slane %v10245_v58, 1  ;;  %v6151_v43 = vpop.f32.mrb[175].mxu0 }
 0x53e   : > { %v14630_v55 = vpop.f32.mrb[96].mxu1  ;;  %v6647_v0 = vadd.f32 %v9423_v63, %v6599_v49  ;;  %v6452_v28 = vsel %vm15704_vm6, %v6449_v8, %v6451_v9  ;;  %v6453_v1 = vrot.slane %v6151_v43, 1  ;;  %vm15709_vm6 = vcmask 1040384  }
 0x53f   : > { %v14635_v5 = vpop.f32.mrb[97].mxu1  ;;  %v6645_v6 = vadd.f32 %v6621_v46, %v6597_v13  ;;  %v6646_v62 = vadd.f32 %v15705_v35, %v6598_v33  ;;  %v6520_v20 = vadd.f32 %v6452_v28, %v14477_v25  ;;  %v6458_v36 = vsel %vm15706_vm7, %v6455_v34, %v6457_v21  ;;  %vm15712_vm7 = vmmov %vm15699_vm5 }
 0x540   : > { %15703 = vst [vmem:[#allocation42_spill] sm:$0xff] %v14635_v5  ;;  %v7996_v56 = vpop.f32.mrb[98].mxu1  ;;  %v6671_v40 = vmax.f32 %v6647_v0, 0.0  ;;  %v6523_v63 = vadd.f32 %v6458_v36, %v14486_v57  ;;  %v6454_v49 = vsel %vm15707_vm8, %v6451_v9, %v6453_v1  ;;  %v6456_v13 = vsel %vm15699_vm5, %v6453_v1, %v6455_v34  ;;  %vm15713_vm8 = vmmov %vm15709_vm6 }
 0x541   : > { %v8339_v58 = vrot.slane %v7996_v56, 7  ;;  %v7998_v59 = vpop.f32.mrb[99].mxu1  ;;  %v6669_v31 = vmax.f32 %v6645_v6, 0.0  ;;  %v6670_v5 = vmax.f32 %v6646_v62, 0.0  ;;  %v6572_v43 = vmul.f32 %v14587_v41, %v6520_v20  ;;  %vm15716_vm5 = vmmov %vm15709_vm6 }
 0x542   : > { %v6695_v29 = vsel %vm12833_vm14, %v6671_v40, 0.0  ;;  %v15708_v25 = vrot.slane %v14630_v55, 7  ;;  %v6575_v56 = vmul.f32 %v14587_v41, %v6523_v63  ;;  %v6521_v35 = vadd.f32 %v6454_v49, %v14480_v45  ;;  %v10248_v57 = vpop.f32.mrb[176].mxu0 }
 0x543   : > { %v6693_v6 = vsel %vm13576_vm10, %v6669_v31, 0.0  ;;  %v6694_v8 = vsel %vm13553_vm11, %v6670_v5, 0.0  ;;  %v6600_v9 = vadd.f32 %v14611_v38, %v6572_v43  ;;  %v6164_v0 = vpop.f32.mrb[177].mxu0  ;;  %v6522_v45 = vadd.f32 %v6456_v13, %v14483_v61 }
 0x544   : > { %v8340_v46 = vsel %vm15709_vm6, %v15708_v25, %v8339_v58  ;;  %v9372_v33 = vpack.c.bf16 %v6693_v6, %v6693_v6  ;;  %v9467_v34 = vpack.c.bf16 %v6695_v29, %v6694_v8  ;;  %v6603_v28 = vadd.f32 %v14611_v38, %v6575_v56  ;;  %v14662_v1 = vpop.f32.mrb[178].mxu0  ;;  %vm15717_vm6 = vmmov %vm15712_vm7 }
 0x545   : > { %v14657_v62 = vadd.f32 %v8340_v46, %v7998_v59  ;;  %v15710_v31 = vunpack.c.l.bf16 %v14551_v52  ;;  %v6573_v5 = vmul.f32 %v14587_v41, %v6521_v35  ;;  %v6463_v40 = vrot.slane %v10248_v57, 1  ;;  %v6167_v63 = vpop.f32.mrb[179].mxu0 }
 0x546   : > { %v8002_v36 = vpop.f32.mrb[100].mxu1  ;;  %v6459_v59 = vrot.slane %v6164_v0, 1  ;;  %6813 = vst [vmem:[%s14449_s24 + $0xc] sm:$0xf] %v9372_v33  ;;  %9629 = vst [vmem:[%s14449_s24 + $0x10] sm:$0xff] %v9467_v34   ;;  %v15711_v49 = vunpack.c.h.bf16 %v14554_v27  ;;  %v6574_v25 = vmul.f32 %v14587_v41, %v6522_v45  ;;  %v6465_v13 = vrot.slane %v14662_v1, 1 }
 0x547   : > { %v6648_v20 = vadd.f32 %v15710_v31, %v6600_v9  ;;  %v8341_v29 = vrot.slane %v8002_v36, 7  ;;  %v8004_v61 = vpop.f32.mrb[101].mxu1  ;;  %v6601_v56 = vadd.f32 %v14611_v38, %v6573_v5  ;;  %v6461_v57 = vrot.slane %v6167_v63, 1 }
 0x548   : > { %v6651_v43 = vadd.f32 %v15711_v49, %v6603_v28  ;;  %v8006_v6 = vpop.f32.mrb[102].mxu1  ;;  %v6460_v35 = vsel %vm15712_vm7, %v6457_v21, %v6459_v59  ;;  %v6602_v9 = vadd.f32 %v14611_v38, %v6574_v25  ;;  %v15714_v45 = vunpack.c.h.bf16 %v14551_v52  ;;  %vm15718_vm7 = vmmov %vm15717_vm6 }
 0x549   : > { %v6672_v46 = vmax.f32 %v6648_v20, 0.0  ;;  %v8342_v0 = vsel %vm15713_vm8, %v8339_v58, %v8341_v29  ;;  %v8343_v33 = vrot.slane %v8006_v6, 7  ;;  %v8008_v34 = vpop.f32.mrb[103].mxu1  ;;  %v6524_v20 = vadd.f32 %v6460_v35, %v14489_v11  ;;  %vm15719_vm8 = vmmov %vm15717_vm6 }
 0x54a   : > { %v6675_v8 = vmax.f32 %v6651_v43, 0.0  ;;  %v6649_v1 = vadd.f32 %v15714_v45, %v6601_v56  ;;  %v14681_v31 = vadd.f32 %v8342_v0, %v8004_v61  ;;  %v15715_v36 = vunpack.c.l.bf16 %v14554_v27  ;;  %v14690_v49 = vpop.f32.mrb[180].mxu0 }
 0x54b   : > { %v6696_v28 = vsel %vm12846_vm1, %v6672_v46, 0.0  ;;  %v8344_v58 = vsel %vm15716_vm5, %v8341_v29, %v8343_v33  ;;  %v6466_v63 = vsel %vm15717_vm6, %v6463_v40, %v6465_v13  ;;  %v6576_v52 = vmul.f32 %v14587_v41, %v6524_v20  ;;  %v6180_v11 = vpop.f32.mrb[181].mxu0  ;;  %vm15724_vm6 = vmmov %vm15716_vm5 }
 0x54c   : > { %v6699_v21 = vsel %vm12949_vm13, %v6675_v8, 0.0  ;;  %v6650_v5 = vadd.f32 %v15715_v36, %v6602_v9  ;;  %v6673_v43 = vmax.f32 %v6649_v1, 0.0  ;;  %v14692_v25 = vadd.f32 %v8344_v58, %v8008_v34  ;;  %v14699_v29 = vpop.f32.mrb[182].mxu0 }
 0x54d   : > { %v6527_v61 = vadd.f32 %v6466_v63, %v14499_v14  ;;  %v6462_v56 = vsel %vm15718_vm7, %v6459_v59, %v6461_v57  ;;  %v6464_v27 = vsel %vm15719_vm8, %v6461_v57, %v6463_v40  ;;  %v6471_v6 = vrot.slane %v14690_v49, 1  ;;  %v6183_v45 = vpop.f32.mrb[183].mxu0 }
 0x54e   : > { %v6674_v46 = vmax.f32 %v6650_v5, 0.0  ;;  %v6697_v8 = vsel %vm12894_vm9, %v6673_v43, 0.0  ;;  %v6604_v9 = vadd.f32 %v14611_v38, %v6576_v52  ;;  %v8012_v34 = vpop.f32.mrb[104].mxu1  ;;  %v6525_v14 = vadd.f32 %v6462_v56, %v14493_v47 }
 0x54f   : > { %v6579_v0 = vmul.f32 %v14587_v41, %v6527_v61  ;;  %v9472_v40 = vpack.c.bf16 %v6697_v8, %v6696_v28  ;;  %v8345_v57 = vrot.slane %v8012_v34, 7  ;;  %v6526_v20 = vadd.f32 %v6464_v27, %v14496_v37  ;;  %v8014_v36 = vpop.f32.mrb[105].mxu1 }
 0x550   : > { %v6698_v59 = vsel %vm12904_vm4, %v6674_v46, 0.0  ;;  %v15722_v58 = vunpack.c.l.bf16 %v14557_v12  ;;  %v6577_v43 = vmul.f32 %v14587_v41, %v6525_v14  ;;  %v8016_v52 = vpop.f32.mrb[106].mxu1  ;;  %v6467_v56 = vrot.slane %v6180_v11, 1  ;;  %v15725_v11 = vld [vmem:[#allocation18_spill] sm:$0xff] }
 0x551   : > { %v9477_v5 = vpack.c.bf16 %v6699_v21, %v6698_v59  ;;  %v6607_v49 = vadd.f32 %v14611_v38, %v6579_v0  ;;  %9630 = vst [vmem:[%s14449_s24 + $0x18] sm:$0xff] %v9472_v40   ;;  %v6578_v47 = vmul.f32 %v14587_v41, %v6526_v20  ;;  %v8346_v61 = vsel %vm15716_vm5, %v8343_v33, %v8345_v57  ;;  %v8018_v28 = vpop.f32.mrb[107].mxu1  ;;  %vm15729_vm5 = vmmov %vm15718_vm7 }
 0x552   : > { %v6652_v63 = vadd.f32 %v15722_v58, %v6604_v9  ;;  %v8347_v46 = vrot.slane %v8016_v52, 7  ;;  %v15723_v21 = vunpack.c.h.bf16 %v14564_v7  ;;  %v6605_v8 = vadd.f32 %v14611_v38, %v6577_v43  ;;  %v14726_v59 = vpop.f32.mrb[184].mxu0 }
 0x553   : > { %9631 = vst [vmem:[%s14449_s24 + $0x20] sm:$0xff] %v9477_v5   ;;  %v14720_v9 = vadd.f32 %v8346_v61, %v8014_v36  ;;  %v6606_v0 = vadd.f32 %v14611_v38, %v6578_v47  ;;  %v6468_v14 = vsel %vm15718_vm7, %v6465_v13, %v6467_v56  ;;  %v6473_v33 = vrot.slane %v14699_v29, 1  ;;  %v14734_v36 = vpop.f32.mrb[185].mxu0 }
 0x554   : > { %v6676_v37 = vmax.f32 %v6652_v63, 0.0  ;;  %v6655_v27 = vadd.f32 %v15723_v21, %v6607_v49  ;;  %v8348_v34 = vsel %vm15724_vm6, %v8345_v57, %v8347_v46  ;;  %vm15726_vm8 = vnez %v15725_v11  ;;  %v14740_v52 = vpop.f32.mrb[186].mxu0  ;;  %vm15730_vm6 = vmmov %vm15729_vm5 }
 0x555   : > { %v15727_v5 = vunpack.c.h.bf16 %v14557_v12  ;;  %v14732_v63 = vadd.f32 %v8348_v34, %v8018_v28  ;;  %v15728_v49 = vunpack.c.l.bf16 %v14564_v7  ;;  %v6528_v13 = vadd.f32 %v6468_v14, %v14502_v23  ;;  %v6199_v21 = vpop.f32.mrb[187].mxu0 }
 0x556   : > { %v6700_v40 = vsel %vm15726_vm8, %v6676_v37, 0.0  ;;  %v6679_v20 = vmax.f32 %v6655_v27, 0.0  ;;  %v6474_v29 = vsel %vm15729_vm5, %v6471_v6, %v6473_v33  ;;  %v6469_v43 = vrot.slane %v6183_v45, 1  ;;  %v8022_v28 = vpop.f32.mrb[108].mxu1 }
 0x557   : > { %v6653_v58 = vadd.f32 %v15727_v5, %v6605_v8  ;;  %v6654_v57 = vadd.f32 %v15728_v49, %v6606_v0  ;;  %v6531_v12 = vadd.f32 %v6474_v29, %v14511_v39  ;;  %v6479_v37 = vrot.slane %v14726_v59, 1  ;;  %v8024_v45 = vpop.f32.mrb[109].mxu1  ;;  %v15731_v0 = vld [vmem:[#allocation19_spill] sm:$0xff]  ;;  %v15733_v59 = vld [vmem:[#allocation20_spill] sm:$0xff] }
 0x558   : > { %v6703_v47 = vsel %vm15608_vm2, %v6679_v20, 0.0  ;;  %v6580_v7 = vmul.f32 %v14587_v41, %v6528_v13  ;;  %v8349_v8 = vrot.slane %v8022_v28, 7  ;;  %v6470_v23 = vsel %vm15730_vm6, %v6467_v56, %v6469_v43  ;;  %v8026_v5 = vpop.f32.mrb[110].mxu1 }
 0x559   : > { %v6677_v61 = vmax.f32 %v6653_v58, 0.0  ;;  %v6678_v27 = vmax.f32 %v6654_v57, 0.0  ;;  %vm15732_vm7 = vnez %v15731_v0  ;;  %v6583_v14 = vmul.f32 %v14587_v41, %v6531_v12  ;;  %v8028_v13 = vpop.f32.mrb[111].mxu1 }
 0x55a   : > { %v6472_v20 = vsel %vm15729_vm5, %v6469_v43, %v6471_v6  ;;  %v6529_v39 = vadd.f32 %v6470_v23, %v14505_v22  ;;  %vm15734_vm2 = vnez %v15733_v59  ;;  %v6608_v57 = vadd.f32 %v14611_v38, %v6580_v7  ;;  %v14766_v7 = vpop.f32.mrb[188].mxu0 }
 0x55b   : > { %v6701_v34 = vsel %vm15732_vm7, %v6677_v61, 0.0  ;;  %v6702_v58 = vsel %vm15734_vm2, %v6678_v27, 0.0  ;;  %v6530_v56 = vadd.f32 %v6472_v20, %v14508_v32  ;;  %v6611_v61 = vadd.f32 %v14611_v38, %v6583_v14  ;;  %v14774_v14 = vpop.f32.mrb[189].mxu0 }
 0x55c   : > { %v9482_v49 = vpack.c.bf16 %v6701_v34, %v6700_v40  ;;  %v9487_v29 = vpack.c.bf16 %v6703_v47, %v6702_v58  ;;  %v6581_v12 = vmul.f32 %v14587_v41, %v6529_v39  ;;  %vm15735_vm6 = vcmask 1040384   ;;  %v10261_v58 = vpop.f32.mrb[190].mxu0 }
 0x55d   : > { %v8350_v6 = vsel %vm15735_vm6, %v8347_v46, %v8349_v8  ;;  %v15736_v22 = vunpack.c.l.bf16 %v14571_v24  ;;  %v6582_v28 = vmul.f32 %v14587_v41, %v6530_v56  ;;  %v8351_v40 = vrot.slane %v8026_v5, 7  ;;  %vm15738_vm5 = vmmov %vm15735_vm6 }
 0x55e   : > { %9632 = vst [vmem:[%s14449_s24 + $0x28] sm:$0xff] %v9482_v49   ;;  %v14764_v27 = vadd.f32 %v8350_v6, %v8024_v45  ;;  %9633 = vst [vmem:[%s14449_s24 + $0x30] sm:$0xff] %v9487_v29   ;;  %v15737_v32 = vunpack.c.h.bf16 %v14574_v42  ;;  %v6609_v23 = vadd.f32 %v14611_v38, %v6581_v12  ;;  %v6475_v34 = vrot.slane %v14734_v36, 1  ;;  %v8032_v36 = vpop.f32.mrb[112].mxu1  ;;  %v14783_v12 = vpop.f32.mrb[191].mxu0 }
 0x55f   : > { %v6656_v43 = vadd.f32 %v15736_v22, %v6608_v57  ;;  %v6481_v46 = vrot.slane %v14740_v52, 1  ;;  %v6610_v39 = vadd.f32 %v14611_v38, %v6582_v28  ;;  %v8352_v45 = vsel %vm15738_vm5, %v8349_v8, %v8351_v40  ;;  %v8034_v8 = vpop.f32.mrb[113].mxu1 }
 0x560   : > { %v6659_v47 = vadd.f32 %v15737_v32, %v6611_v61  ;;  %v6477_v5 = vrot.slane %v6199_v21, 1  ;;  %v15739_v57 = vunpack.c.h.bf16 %v14571_v24  ;;  %v14780_v29 = vadd.f32 %v8352_v45, %v8028_v13 }
 0x561   : > { %v6680_v20 = vmax.f32 %v6656_v43, 0.0  ;;  %vm15740_vm6 = vcmask 1046528   ;;  %vm15741_vm2 = vnez %v15609_v26  ;;  %v15742_v22 = vunpack.c.l.bf16 %v14574_v42 }
 0x562   : > { %v6683_v49 = vmax.f32 %v6659_v47, 0.0  ;;  %v6657_v56 = vadd.f32 %v15739_v57, %v6609_v23  ;;  %v6476_v61 = vsel %vm15740_vm6, %v6473_v33, %v6475_v34  ;;  %vm15743_vm5 = vmmov %vm15740_vm6  ;;  %vm15744_vm7 = vnez %v15454_v60  ;;  %v8036_v47 = vpop.f32.mrb[114].mxu1 }
 0x563   : > { %v6704_v6 = vsel %vm15741_vm2, %v6680_v20, 0.0  ;;  %v6658_v43 = vadd.f32 %v15742_v22, %v6610_v39  ;;  %v6532_v21 = vadd.f32 %v6476_v61, %v14514_v16  ;;  %v6482_v24 = vsel %vm15743_vm5, %v6479_v37, %v6481_v46  ;;  %vm15745_vm6 = vmmov %vm15743_vm5  ;;  %v8038_v39 = vpop.f32.mrb[115].mxu1 }
 0x564   : > { %v6707_v13 = vsel %vm15744_vm7, %v6683_v49, 0.0  ;;  %v6681_v33 = vmax.f32 %v6657_v56, 0.0  ;;  %v6535_v28 = vadd.f32 %v6482_v24, %v14523_v48  ;;  %v8353_v32 = vrot.slane %v8032_v36, 7  ;;  %vm15746_vm2 = vmmov %vm15743_vm5 }
 0x565   : > { %v6682_v23 = vmax.f32 %v6658_v43, 0.0  ;;  %v6584_v20 = vmul.f32 %v14587_v41, %v6532_v21  ;;  %v6478_v42 = vsel %vm15745_vm6, %v6475_v34, %v6477_v5  ;;  %v6480_v16 = vsel %vm15746_vm2, %v6477_v5, %v6479_v37 }
 0x566   : > { %vm15747_vm5 = vnez %v15616_v10  ;;  %v6587_v57 = vmul.f32 %v14587_v41, %v6535_v28  ;;  %v6533_v49 = vadd.f32 %v6478_v42, %v14517_v15  ;;  %v6534_v48 = vadd.f32 %v6480_v16, %v14520_v3 }
 0x567   : > { %v6705_v45 = vsel %vm15747_vm5, %v6681_v33, 0.0  ;;  %vm15748_vm7 = vnez %v15618_v30  ;;  %v6612_v36 = vadd.f32 %v14611_v38, %v6584_v20  ;;  %vm15749_vm6 = vcmask 1040384   ;;  %v8042_v20 = vpop.f32.mrb[116].mxu1 }
 0x568   : > { %v6706_v56 = vsel %vm15748_vm7, %v6682_v23, 0.0  ;;  %v9492_v61 = vpack.c.bf16 %v6705_v45, %v6704_v6  ;;  %v8354_v34 = vsel %vm15749_vm6, %v8351_v40, %v8353_v32  ;;  %v6615_v5 = vadd.f32 %v14611_v38, %v6587_v57  ;;  %vm15752_vm2 = vmmov %vm15749_vm6  ;;  %v8044_v57 = vpop.f32.mrb[117].mxu1 }
 0x569   : > { %v9497_v37 = vpack.c.bf16 %v6707_v13, %v6706_v56  ;;  %v6585_v22 = vmul.f32 %v14587_v41, %v6533_v49  ;;  %v6586_v43 = vmul.f32 %v14587_v41, %v6534_v48  ;;  %v15750_v15 = vunpack.c.l.bf16 %v14582_v2 }
 0x56a   : > { %9634 = vst [vmem:[%s14449_s24 + $0x38] sm:$0xff] %v9492_v61   ;;  %v14814_v3 = vadd.f32 %v8354_v34, %v8034_v8  ;;  %v8355_v24 = vrot.slane %v8036_v47, 7  ;;  %v6487_v6 = vrot.slane %v14766_v7, 1  ;;  %v15751_v33 = vunpack.c.h.bf16 %v14594_v44 }
 0x56b   : > { %v6660_v21 = vadd.f32 %v15750_v15, %v6612_v36  ;;  %9635 = vst [vmem:[%s14449_s24 + $0x40] sm:$0xff] %v9497_v37   ;;  %v6613_v13 = vadd.f32 %v14611_v38, %v6585_v22  ;;  %v6614_v28 = vadd.f32 %v14611_v38, %v6586_v43  ;;  %v6483_v23 = vrot.slane %v14774_v14, 1  ;;  %v8046_v36 = vpop.f32.mrb[118].mxu1  ;;  %v15761_v43 = vld [vmem:[#allocation17_spill] sm:$0xff] }
 0x56c   : > { %v6663_v40 = vadd.f32 %v15751_v33, %v6615_v5  ;;  %v8356_v16 = vsel %vm15752_vm2, %v8353_v32, %v8355_v24  ;;  %v6489_v45 = vrot.slane %v10261_v58, 1  ;;  %v8357_v8 = vrot.slane %v8042_v20, 7  ;;  %v8048_v37 = vpop.f32.mrb[119].mxu1  ;;  %v15766_v20 = vld [vmem:[#allocation27_spill] sm:$0xff] }
 0x56d   : > { %v6684_v42 = vmax.f32 %v6660_v21, 0.0  ;;  %v15753_v7 = vunpack.c.h.bf16 %v14582_v2  ;;  %v15754_v48 = vunpack.c.l.bf16 %v14594_v44  ;;  %v14828_v61 = vadd.f32 %v8356_v16, %v8038_v39  ;;  %v15762_v21 = vld [vmem:[#allocation23_spill] sm:$0xff] }
 0x56e   : > { %v6687_v47 = vmax.f32 %v6663_v40, 0.0  ;;  %vm15755_vm6 = vnez %v15627_v51  ;;  %vm15756_vm7 = vcmask 1046528   ;;  %v15758_v34 = vrot.slane %v14559_v17, 1  ;;  %v15763_v40 = vld [vmem:[#allocation39_spill] sm:$0xff]  ;;  %v14964_v51 = vld [vmem:[%s11841_s10 + $0xa0] sm:$0xff]  }
 0x56f   : > { %v6661_v49 = vadd.f32 %v15753_v7, %v6613_v13  ;;  %v6662_v56 = vadd.f32 %v15754_v48, %v6614_v28  ;;  %v6708_v14 = vsel %vm15755_vm6, %v6684_v42, 0.0  ;;  %v6484_v32 = vsel %vm15756_vm7, %v6481_v46, %v6483_v23  ;;  %vm15757_vm2 = vmmov %vm15756_vm7 }
 0x570   : > { %v6490_v58 = vsel %vm15757_vm2, %v6487_v6, %v6489_v45  ;;  %vm15759_vm5 = vmmov %vm15757_vm2  ;;  %v6711_v44 = vsel %vm13411_vm3, %v6687_v47, 0.0  ;;  %v6536_v15 = vadd.f32 %v6484_v32, %v15761_v43  ;;  %v6485_v46 = vrot.slane %v14783_v12, 1  ;;  %v15771_v43 = vld [vmem:[#allocation40_spill] sm:$0xff] }
 0x571   : > { %v6516_v2 = vsel %vm15759_vm5, %v6489_v45, %v15758_v34  ;;  %v6685_v39 = vmax.f32 %v6661_v49, 0.0  ;;  %v6686_v22 = vmax.f32 %v6662_v56, 0.0  ;;  %v6539_v33 = vadd.f32 %v6490_v58, %v15762_v21  ;;  %v8052_v58 = vpop.f32.mrb[120].mxu1 }
 0x572   : > { %v6540_v52 = vadd.f32 %v6516_v2, %v15763_v40  ;;  %vm15764_vm7 = vcmask 1040384   ;;  %vm15767_vm5 = vnez %v15766_v20  ;;  %v6588_v16 = vmul.f32 %v14587_v41, %v6536_v15  ;;  %v14955_v20 = vld [vmem:[%s11841_s10 + $0x98] sm:$0xff]  }
 0x573   : > { %v8358_v17 = vsel %vm15764_vm7, %v8355_v24, %v8357_v8  ;;  %v6709_v28 = vsel %vm15634_vm15, %v6685_v39, 0.0  ;;  %v6710_v42 = vsel %vm15767_vm5, %v6686_v22, 0.0  ;;  %v6591_v49 = vmul.f32 %v14587_v41, %v6539_v33  ;;  %vm15768_vm7 = vmmov %vm15757_vm2  ;;  %v8054_v22 = vpop.f32.mrb[121].mxu1  ;;  %v15773_v33 = vld [vmem:[#allocation41_spill] sm:$0xff] }
 0x574   : > { %v14851_v45 = vadd.f32 %v8358_v17, %v8044_v57  ;;  %v9502_v47 = vpack.c.bf16 %v6709_v28, %v6708_v14  ;;  %v9507_v7 = vpack.c.bf16 %v6711_v44, %v6710_v42  ;;  %v6592_v48 = vmul.f32 %v14587_v41, %v6540_v52  ;;  %v15769_v14 = vld [vmem:[#allocation21_spill] sm:$0xff]  ;;  %v15770_v44 = vld [vmem:[#allocation22_spill] sm:$0xff]  ;;  %v8056_v40 = vpop.f32.mrb[122].mxu1 }
 0x575   : > { %v6616_v12 = vadd.f32 %v14611_v38, %v6588_v16  ;;  %v6486_v24 = vsel %vm15757_vm2, %v6483_v23, %v6485_v46  ;;  %v6488_v56 = vsel %vm15768_vm7, %v6485_v46, %v6487_v6  ;;  %v8359_v32 = vrot.slane %v8046_v36, 7  ;;  %v15776_v17 = vld [vmem:[#allocation13_spill] sm:$0xff] }
 0x576   : > { %9636 = vst [vmem:[%s14449_s24 + $0x48] sm:$0xff] %v9502_v47   ;;  %9637 = vst [vmem:[%s14449_s24 + $0x50] sm:$0xff] %v9507_v7   ;;  %v6619_v34 = vadd.f32 %v14611_v38, %v6591_v49  ;;  %v6620_v57 = vadd.f32 %v14611_v38, %v6592_v48  ;;  %v6537_v2 = vadd.f32 %v6486_v24, %v15769_v14  ;;  %v15772_v15 = vunpack.c.l.bf16 %v15771_v43  ;;  %v8058_v7 = vpop.f32.mrb[123].mxu1 }
 0x577   : > { %v6538_v39 = vadd.f32 %v6488_v56, %v15770_v44  ;;  %v9462_v23 = vunpack.c.l.bf16 %v15773_v33  ;;  %vm15774_vm2 = vcmask 1040384   ;;  %v8361_v36 = vrot.slane %v8052_v58, 7 }
 0x578   : > { %v6664_v21 = vadd.f32 %v15772_v15, %v6616_v12  ;;  %v8360_v6 = vsel %vm15774_vm2, %v8357_v8, %v8359_v32  ;;  %v15775_v52 = vunpack.c.h.bf16 %v15773_v33  ;;  %v15777_v28 = vunpack.c.l.bf16 %v15776_v17  ;;  %vm15778_vm7 = vmmov %vm15774_vm2 }
 0x579   : > { %v6589_v16 = vmul.f32 %v14587_v41, %v6537_v2  ;;  %v6590_v47 = vmul.f32 %v14587_v41, %v6538_v39  ;;  %v14874_v49 = vadd.f32 %v8360_v6, %v8048_v37  ;;  %v8362_v48 = vsel %vm15778_vm7, %v8359_v32, %v8361_v36  ;;  %v8062_v6 = vpop.f32.mrb[124].mxu1 }
 0x57a   : > { %v6667_v46 = vadd.f32 %v15775_v52, %v6619_v34  ;;  %v6668_v42 = vadd.f32 %v15777_v28, %v6620_v57  ;;  %v8363_v12 = vrot.slane %v8056_v40, 7  ;;  %v6688_v34 = vmax.f32 %v6664_v21, 0.0  ;;  %v15782_v28 = vld [vmem:[#allocation29_spill] sm:$0xff] }
 0x57b   : > { %v6617_v56 = vadd.f32 %v14611_v38, %v6589_v16  ;;  %v6618_v58 = vadd.f32 %v14611_v38, %v6590_v47  ;;  %v14879_v14 = vadd.f32 %v8362_v48, %v8054_v22  ;;  %v15780_v37 = vunpack.c.h.bf16 %v15771_v43  ;;  %v15784_v16 = vld [vmem:[#allocation30_spill] sm:$0xff]  ;;  %v15786_v47 = vld [vmem:[#allocation31_spill] sm:$0xff] }
 0x57c   : > { %v6691_v24 = vmax.f32 %v6667_v46, 0.0  ;;  %v6692_v8 = vmax.f32 %v6668_v42, 0.0  ;;  %v8364_v57 = vsel %vm15774_vm2, %v8361_v36, %v8363_v12  ;;  %v8365_v21 = vrot.slane %v8062_v6, 7  ;;  %v8064_v36 = vpop.f32.mrb[125].mxu1 }
 0x57d   : > { %v6665_v39 = vadd.f32 %v15780_v37, %v6617_v56  ;;  %v6666_v32 = vadd.f32 %v9462_v23, %v6618_v58  ;;  %v14886_v33 = vadd.f32 %v8364_v57, %v8058_v7  ;;  %vm15783_vm7 = vnez %v15782_v28  ;;  %v8066_v43 = vpop.f32.mrb[126].mxu1  ;;  %v14948_v28 = vld [vmem:[%s11841_s10 + $0x90] sm:$0xff]  }
 0x57e   : > { %v6716_v44 = vsel %vm13588_vm12, %v6692_v8, 0.0  ;;  %v6715_v52 = vsel %vm13565_vm0, %v6691_v24, 0.0  ;;  %v6712_v42 = vsel %vm15783_vm7, %v6688_v34, 0.0  ;;  %vm15785_vm2 = vnez %v15784_v16  ;;  %v8068_v8 = vpop.f32.mrb[127].mxu1 }
 0x57f   : > { %v9395_v15 = vpack.c.bf16 %v6716_v44, %v6716_v44  ;;  %v6689_v46 = vmax.f32 %v6665_v39, 0.0  ;;  %v6690_v22 = vmax.f32 %v6666_v32, 0.0  ;;  %vm15787_vm12 = vnez %v15786_v47  ;;  %v8072_v37 = vpop.f32.mrb[128].mxu1  ;;  %v9640_v47 = vld [vmem:[%s11841_s10 + $0x70] sm:$0xff]  }
 0x580   : > { %vm15788_vm5 = vcmask 1040384   ;;  %v8367_v24 = vrot.slane %v8066_v43, 7  ;;  %v8369_v39 = vrot.slane %v8072_v37, 7  ;;  %v8074_v32 = vpop.f32.mrb[129].mxu1 }
 0x581   : > { %6836 = vst [vmem:[%s14449_s24 + $0x68] sm:$0xf] %v9395_v15  ;;  %v6713_v23 = vsel %vm15785_vm2, %v6689_v46, 0.0  ;;  %v6714_v7 = vsel %vm15787_vm12, %v6690_v22, 0.0  ;;  %v8366_v48 = vsel %vm15788_vm5, %v8363_v12, %v8365_v21  ;;  %vm15789_vm0 = vmmov %vm15788_vm5  ;;  %v8076_v15 = vpop.f32.mrb[130].mxu1 }
 0x582   : > { %v9512_v56 = vpack.c.bf16 %v6713_v23, %v6712_v42  ;;  %v9517_v58 = vpack.c.bf16 %v6715_v52, %v6714_v7  ;;  %v14898_v57 = vadd.f32 %v8366_v48, %v8064_v36  ;;  %v8368_v44 = vsel %vm15789_vm0, %v8365_v21, %v8367_v24  ;;  %vm15790_vm2 = vmmov %vm15789_vm0  ;;  %v8078_v12 = vpop.f32.mrb[131].mxu1 }
 0x583   : > { %v14903_v34 = vadd.f32 %v8368_v44, %v8068_v8  ;;  %v8370_v6 = vsel %vm15790_vm2, %v8367_v24, %v8369_v39  ;;  %v8371_v46 = vrot.slane %v8076_v15, 7  ;;  %vm15791_vm5 = vmmov %vm15789_vm0 }
 0x584   : > { %9638 = vst [vmem:[%s14449_s24 + $0x58] sm:$0xff] %v9512_v56   ;;  %9639 = vst [vmem:[%s14449_s24 + $0x60] sm:$0xff] %v9517_v58   ;;  %v14906_v22 = vadd.f32 %v8370_v6, %v8074_v32 }
 0x585   : > { %v8372_v52 = vsel %vm15791_vm5, %v8369_v39, %v8371_v46  ;;  %vm15792_vm12 = vmmov %vm15789_vm0 }
 0x586   : > { %v14909_v36 = vadd.f32 %v8372_v52, %v8078_v12  ;;  %v8082_v42 = vpop.f32.mrb[132].mxu1  ;;  %vm15794_vm2 = vmmov %vm15789_vm0 }
 0x587   : > { %v8373_v21 = vrot.slane %v8082_v42, 7  ;;  %v8084_v43 = vpop.f32.mrb[133].mxu1  ;;  %vm15796_vm5 = vmmov %vm15789_vm0 }
 0x588   : > { %v8086_v23 = vpop.f32.mrb[134].mxu1 }
 0x589   : > { %v8374_v7 = vsel %vm15789_vm0, %v8371_v46, %v8373_v21  ;;  %v8375_v48 = vrot.slane %v8086_v23, 7  ;;  %v8088_v8 = vpop.f32.mrb[135].mxu1 }
 0x58a   : > { %v14912_v56 = vadd.f32 %v8374_v7, %v8084_v43 }
 0x58b   : > { %v8376_v24 = vsel %vm15792_vm12, %v8373_v21, %v8375_v48  ;;  %vm15798_vm12 = vmmov %vm15789_vm0 }
 0x58c   : > { %v14915_v58 = vadd.f32 %v8376_v24, %v8088_v8 }
 0x58e   : > { %15793 = vst [vmem:[#allocation14_spill] sm:$0xff] %v14915_v58  ;;  %v8092_v44 = vpop.f32.mrb[136].mxu1 }
 0x58f   : > { %v8377_v37 = vrot.slane %v8092_v44, 7  ;;  %v8094_v32 = vpop.f32.mrb[137].mxu1 }
 0x590   : > { %v8096_v39 = vpop.f32.mrb[138].mxu1 }
 0x591   : > { %v8378_v15 = vsel %vm15794_vm2, %v8375_v48, %v8377_v37  ;;  %v8379_v6 = vrot.slane %v8096_v39, 7  ;;  %v8098_v12 = vpop.f32.mrb[139].mxu1  ;;  %vm15801_vm2 = vmmov %vm15789_vm0 }
 0x592   : > { %v14918_v52 = vadd.f32 %v8378_v15, %v8094_v32  ;;  %v15800_v32 = vrot.slane %v14630_v55, 7  ;;  %v15802_v15 = vld [vmem:[#allocation42_spill] sm:$0xff] }
 0x593   : > { %v8380_v46 = vsel %vm15796_vm5, %v8377_v37, %v8379_v6  ;;  %vm15805_vm5 = vcmask 1046528  }
 0x594   : > { %15795 = vst [vmem:[#allocation45_spill] sm:$0xff] %v14918_v52  ;;  %v14921_v42 = vadd.f32 %v8380_v46, %v8098_v12  ;;  %v14970_v52 = vld [vmem:[%s11841_s10 + $0xa8] sm:$0xff]  }
 0x596   : > { %15797 = vst [vmem:[#allocation36_spill] sm:$0xff] %v14921_v42  ;;  %v8102_v43 = vpop.f32.mrb[140].mxu1  ;;  %v14981_v42 = vld [vmem:[%s11841_s10 + $0xb0] sm:$0xff]  }
 0x597   : > { %v8381_v21 = vrot.slane %v8102_v43, 7  ;;  %v8104_v23 = vpop.f32.mrb[141].mxu1  ;;  %v9554_v58 = vunpack.c.h.bf16 %v14981_v42 }
 0x598   : > { %v8106_v7 = vpop.f32.mrb[142].mxu1 }
 0x599   : > { %v8382_v8 = vsel %vm15798_vm12, %v8379_v6, %v8381_v21  ;;  %v8313_v24 = vrot.slane %v8106_v7, 7  ;;  %v8108_v44 = vpop.f32.mrb[143].mxu1  ;;  %v14937_v7 = vld [vmem:[%s11841_s10 + $0x78] sm:$0xff]   ;;  %vm15806_vm12 = vmmov %vm15805_vm5 }
 0x59a   : > { %v14924_v48 = vadd.f32 %v8382_v8, %v8104_v23  ;;  %v14940_v23 = vld [vmem:[%s11841_s10 + $0x80] sm:$0xff]   ;;  %v15811_v50 = vunpack.c.l.bf16 %v14937_v7 }
 0x59b   : > { %v8408_v39 = vsel %vm15789_vm0, %v8313_v24, %v15800_v32  ;;  %v8383_v37 = vsel %vm15801_vm2, %v8381_v21, %v8313_v24  ;;  %v9522_v32 = vunpack.c.h.bf16 %v9640_v47  ;;  %vm15807_vm0 = vmmov %vm15805_vm5 }
 0x59c   : > { %15799 = vst [vmem:[#allocation32_spill] sm:$0xff] %v14924_v48  ;;  %v8409_v12 = vadd.f32 %v8408_v39, %v15802_v15  ;;  %v14931_v46 = vadd.f32 %v8383_v37, %v8108_v44  ;;  %v9521_v39 = vunpack.c.l.bf16 %v9640_v47  ;;  %v8626_v37 = vunpack.c.h.bf16 %v15776_v17  ;;  %v14945_v15 = vld [vmem:[%s11841_s10 + $0x88] sm:$0xff]   ;;  %vm15808_vm2 = vmmov %vm15807_vm0 }
 0x59d   : > { %v15819_v1 = vunpack.c.l.bf16 %v14945_v15 }
 0x59e   : > { %15803 = vst [vmem:[#allocation34_spill] sm:$0xff] %v14931_v46  ;;  %v10360_v43 = vpop.f32.mrb[144].mxu1 }
 0x59f   : > { %v14934_v16 = vpop.f32.mrb[145].mxu1  ;;  %v8460_v55 = vrot.slane %v10360_v43, 1 }
 0x5a0   : > { %15804 = vst [vmem:[#allocation37_spill] sm:$0xff] %v14934_v16  ;;  %v10361_v6 = vpop.f32.mrb[146].mxu1  ;;  %v15357_v24 = vrot.slane %v14934_v16, 1 }
 0x5a1   : > { %v8462_v8 = vrot.slane %v10361_v6, 1  ;;  %v8148_v21 = vpop.f32.mrb[147].mxu1 }
 0x5a2   : > { %v8458_v44 = vrot.slane %v8148_v21, 1 }
 0x5a3   : > { %v8463_v40 = vsel %vm15805_vm5, %v8460_v55, %v8462_v8  ;;  %vm15809_vm5 = vmmov %vm15807_vm0 }
 0x5a4   : > { %v8532_v21 = vadd.f32 %v8463_v40, %v14681_v31  ;;  %v8459_v17 = vsel %vm15806_vm12, %v15357_v24, %v8458_v44  ;;  %v8461_v47 = vsel %vm15807_vm0, %v8458_v44, %v8460_v55  ;;  %vm15810_vm12 = vmmov %vm15807_vm0 }
 0x5a5   : > { %v8530_v2 = vadd.f32 %v8459_v17, %v8409_v12  ;;  %v8531_v43 = vadd.f32 %v8461_v47, %v14657_v62 }
 0x5a6   : > { %v8580_v31 = vmul.f32 %v14587_v41, %v8532_v21  ;;  %v10364_v40 = vpop.f32.mrb[148].mxu1 }
 0x5a7   : > { %v8578_v13 = vmul.f32 %v14587_v41, %v8530_v2  ;;  %v8579_v12 = vmul.f32 %v14587_v41, %v8531_v43  ;;  %v8161_v62 = vpop.f32.mrb[149].mxu1  ;;  %v8468_v43 = vrot.slane %v10364_v40, 1 }
 0x5a8   : > { %v8604_v21 = vadd.f32 %v14611_v38, %v8580_v31  ;;  %v8464_v6 = vrot.slane %v8161_v62, 1  ;;  %v10365_v46 = vpop.f32.mrb[150].mxu1 }
 0x5a9   : > { %v8602_v44 = vadd.f32 %v14611_v38, %v8578_v13  ;;  %v8603_v2 = vadd.f32 %v14611_v38, %v8579_v12  ;;  %v8470_v5 = vrot.slane %v10365_v46, 1  ;;  %v8164_v48 = vpop.f32.mrb[151].mxu1 }
 0x5aa   : > { %v8652_v17 = vadd.f32 %v9522_v32, %v8604_v21  ;;  %v8465_v47 = vsel %vm15808_vm2, %v8462_v8, %v8464_v6  ;;  %v8466_v16 = vrot.slane %v8164_v48, 1  ;;  %vm15818_vm2 = vmmov %vm15807_vm0 }
 0x5ab   : > { %v8650_v31 = vadd.f32 %v8626_v37, %v8602_v44  ;;  %v8651_v62 = vadd.f32 %v9521_v39, %v8603_v2  ;;  %v8533_v30 = vadd.f32 %v8465_v47, %v14692_v25  ;;  %v8471_v24 = vsel %vm15809_vm5, %v8468_v43, %v8470_v5 }
 0x5ac   : > { %v8676_v55 = vmax.f32 %v8652_v17, 0.0  ;;  %v8536_v13 = vadd.f32 %v8471_v24, %v14764_v27  ;;  %v8467_v12 = vsel %vm15810_vm12, %v8464_v6, %v8466_v16  ;;  %v8469_v46 = vsel %vm15807_vm0, %v8466_v16, %v8468_v43 }
 0x5ad   : > { %v8674_v40 = vmax.f32 %v8650_v31, 0.0  ;;  %v8675_v32 = vmax.f32 %v8651_v62, 0.0  ;;  %v8581_v8 = vmul.f32 %v14587_v41, %v8533_v30  ;;  %v8534_v48 = vadd.f32 %v8467_v12, %v14720_v9 }
 0x5ae   : > { %v8700_v39 = vsel %vm12833_vm14, %v8676_v55, 0.0  ;;  %v8584_v25 = vmul.f32 %v14587_v41, %v8536_v13  ;;  %v8535_v37 = vadd.f32 %v8469_v46, %v14732_v63  ;;  %v10368_v44 = vpop.f32.mrb[152].mxu1  ;;  %v9550_v27 = vunpack.c.h.bf16 %v14970_v52  ;;  %vm15814_vm14 = vmmov %vm15807_vm0 }
 0x5af   : > { %v8698_v16 = vsel %vm13576_vm10, %v8674_v40, 0.0  ;;  %v8699_v30 = vsel %vm13553_vm11, %v8675_v32, 0.0  ;;  %v8605_v9 = vadd.f32 %v14611_v38, %v8581_v8  ;;  %v8582_v19 = vmul.f32 %v14587_v41, %v8534_v48  ;;  %v8177_v24 = vpop.f32.mrb[153].mxu1  ;;  %vm15816_vm10 = vmmov %vm15807_vm0 }
 0x5b0   : > { %v9396_v6 = vpack.c.bf16 %v8698_v16, %v8698_v16  ;;  %v9566_v55 = vpack.c.bf16 %v8700_v39, %v8699_v30  ;;  %v8608_v63 = vadd.f32 %v14611_v38, %v8584_v25  ;;  %v8583_v17 = vmul.f32 %v14587_v41, %v8535_v37  ;;  %v10369_v47 = vpop.f32.mrb[154].mxu1  ;;  %vm15817_vm11 = vmmov %vm15807_vm0 }
 0x5b1   : > { %v8653_v21 = vadd.f32 %v15811_v50, %v8605_v9  ;;  %v8606_v2 = vadd.f32 %v14611_v38, %v8582_v19  ;;  %v8476_v18 = vrot.slane %v10368_v44, 1  ;;  %v8472_v43 = vrot.slane %v8177_v24, 1  ;;  %v8180_v31 = vpop.f32.mrb[155].mxu1 }
 0x5b2   : > { %8818 = vst [vmem:[%s14449_s24 + $0x6c] sm:$0xf] %v9396_v6  ;;  %9651 = vst [vmem:[%s14449_s24 + $0x70] sm:$0xff] %v9566_v55   ;;  %v15812_v62 = vunpack.c.h.bf16 %v14940_v23  ;;  %v8607_v12 = vadd.f32 %v14611_v38, %v8583_v17  ;;  %v8478_v46 = vrot.slane %v10369_v47, 1  ;;  %v8474_v40 = vrot.slane %v8180_v31, 1  ;;  %v15043_v31 = vld [vmem:[%s11841_s10 + $0xb8] sm:$0xff]  }
 0x5b3   : > { %v8677_v32 = vmax.f32 %v8653_v21, 0.0  ;;  %v15813_v8 = vunpack.c.h.bf16 %v14937_v7  ;;  %v8473_v39 = vsel %vm15814_vm14, %v8470_v5, %v8472_v43  ;;  %v9553_v25 = vunpack.c.l.bf16 %v14981_v42  ;;  %vm15833_vm14 = vmmov %vm15807_vm0 }
 0x5b4   : > { %v8656_v13 = vadd.f32 %v15812_v62, %v8608_v63  ;;  %v15815_v44 = vunpack.c.l.bf16 %v14940_v23  ;;  %v8537_v30 = vadd.f32 %v8473_v39, %v14780_v29  ;;  %v8479_v9 = vsel %vm15816_vm10, %v8476_v18, %v8478_v46  ;;  %vm15835_vm10 = vmmov %vm15807_vm0 }
 0x5b5   : > { %v8654_v48 = vadd.f32 %v15813_v8, %v8606_v2  ;;  %v8701_v19 = vsel %vm12846_vm1, %v8677_v32, 0.0  ;;  %v8540_v6 = vadd.f32 %v8479_v9, %v14851_v45  ;;  %v8475_v7 = vsel %vm15817_vm11, %v8472_v43, %v8474_v40  ;;  %vm15821_vm1 = vmmov %vm15807_vm0 }
 0x5b6   : > { %v8680_v37 = vmax.f32 %v8656_v13, 0.0  ;;  %v8655_v16 = vadd.f32 %v15815_v44, %v8607_v12  ;;  %v8585_v23 = vmul.f32 %v14587_v41, %v8537_v30  ;;  %v8477_v63 = vsel %vm15818_vm2, %v8474_v40, %v8476_v18  ;;  %v10372_v29 = vpop.f32.mrb[156].mxu1  ;;  %vm15836_vm11 = vmmov %vm15807_vm0 }
 0x5b7   : > { %v8678_v24 = vmax.f32 %v8654_v48, 0.0  ;;  %v8588_v54 = vmul.f32 %v14587_v41, %v8540_v6  ;;  %v8538_v45 = vadd.f32 %v8475_v7, %v14814_v3  ;;  %v8539_v47 = vadd.f32 %v8477_v63, %v14828_v61  ;;  %v8193_v50 = vpop.f32.mrb[157].mxu1 }
 0x5b8   : > { %v8704_v5 = vsel %vm12949_vm13, %v8680_v37, 0.0  ;;  %v8679_v55 = vmax.f32 %v8655_v16, 0.0  ;;  %v8609_v2 = vadd.f32 %v14611_v38, %v8585_v23  ;;  %v8484_v18 = vrot.slane %v10372_v29, 1  ;;  %v10373_v43 = vpop.f32.mrb[158].mxu1  ;;  %vm15826_vm13 = vmmov %vm15807_vm0 }
 0x5b9   : > { %v8702_v17 = vsel %vm12894_vm9, %v8678_v24, 0.0  ;;  %v8612_v62 = vadd.f32 %v14611_v38, %v8588_v54  ;;  %v8586_v13 = vmul.f32 %v14587_v41, %v8538_v45  ;;  %v8587_v3 = vmul.f32 %v14587_v41, %v8539_v47  ;;  %v8196_v61 = vpop.f32.mrb[159].mxu1  ;;  %vm15822_vm9 = vmmov %vm15807_vm0 }
 0x5ba   : > { %v8703_v53 = vsel %vm12904_vm4, %v8679_v55, 0.0  ;;  %v9571_v21 = vpack.c.bf16 %v8702_v17, %v8701_v19  ;;  %v8657_v12 = vadd.f32 %v15819_v1, %v8609_v2  ;;  %v8480_v40 = vrot.slane %v8193_v50, 1  ;;  %vm15823_vm4 = vmmov %vm15807_vm0  ;;  %v15090_v2 = vld [vmem:[%s15257_s3 + $0x3] ss:$0 sm:$0xff] }
 0x5bb   : > { %v9576_v35 = vpack.c.bf16 %v8704_v5, %v8703_v53  ;;  %v8486_v32 = vrot.slane %v10373_v43, 1  ;;  %v8482_v8 = vrot.slane %v8196_v61, 1  ;;  %v15820_v48 = vunpack.c.h.bf16 %v14948_v28 }
 0x5bc   : > { %9652 = vst [vmem:[%s14449_s24 + $0x78] sm:$0xff] %v9571_v21   ;;  %v8610_v37 = vadd.f32 %v14611_v38, %v8586_v13  ;;  %v8611_v44 = vadd.f32 %v14611_v38, %v8587_v3  ;;  %v9557_v16 = vunpack.c.l.bf16 %v15043_v31  ;;  %v8681_v30 = vmax.f32 %v8657_v12, 0.0  ;;  %v15096_v3 = vld [vmem:[%s11841_s10 + $0xc0] sm:$0xff]  }
 0x5bd   : > { %9653 = vst [vmem:[%s14449_s24 + $0x80] sm:$0xff] %v9576_v35   ;;  %v8660_v39 = vadd.f32 %v15820_v48, %v8612_v62  ;;  %v8481_v41 = vsel %vm15821_vm1, %v8478_v46, %v8480_v40  ;;  %v8487_v9 = vsel %vm15822_vm9, %v8484_v18, %v8486_v32  ;;  %v8483_v19 = vsel %vm15823_vm4, %v8480_v40, %v8482_v8 }
 0x5be   : > { %v15824_v6 = vunpack.c.h.bf16 %v14945_v15  ;;  %v15825_v5 = vunpack.c.l.bf16 %v14948_v28  ;;  %v8541_v23 = vadd.f32 %v8481_v41, %v14874_v49  ;;  %v8705_v38 = vsel %vm15726_vm8, %v8681_v30, 0.0  ;;  %v10376_v17 = vpop.f32.mrb[160].mxu1  ;;  %v15075_v28 = vld [vmem:[%s15257_s3 + $0x2] ss:$0 sm:$0xff] }
 0x5bf   : > { %v8684_v24 = vmax.f32 %v8660_v39, 0.0  ;;  %v8544_v63 = vadd.f32 %v8487_v9, %v14898_v57  ;;  %v8485_v46 = vsel %vm15826_vm13, %v8482_v8, %v8484_v18  ;;  %v8542_v29 = vadd.f32 %v8483_v19, %v14879_v14  ;;  %v8209_v49 = vpop.f32.mrb[161].mxu1  ;;  %v15110_v30 = vld [vmem:[%s11841_s10 + $0xc8] sm:$0xf]  ;;  %vm15843_vm13 = vmmov %vm15807_vm0  ;;  %s11009_s10 = smul.u32 3456, %s11684_s19 }
 0x5c0   : > { %v8658_v7 = vadd.f32 %v15824_v6, %v8610_v37  ;;  %v8659_v55 = vadd.f32 %v15825_v5, %v8611_v44  ;;  %vm15827_vm5 = vnez %v15607_v4  ;;  %v8589_v11 = vmul.f32 %v15075_v28, %v8541_v23  ;;  %v15081_v4 = vpop.f32.mrb[162].mxu1 }
 0x5c1   : > { %v8708_v54 = vsel %vm15827_vm5, %v8684_v24, 0.0  ;;  %v8592_v57 = vmul.f32 %v15075_v28, %v8544_v63  ;;  %v8543_v47 = vadd.f32 %v8485_v46, %v14886_v33  ;;  %v8590_v14 = vmul.f32 %v15075_v28, %v8542_v29  ;;  %v8212_v43 = vpop.f32.mrb[163].mxu1  ;;  %vm15845_vm5 = vmmov %vm15807_vm0  ;;  %s15206_s5 = scalar_lea.hbm %s15258_s4, %s11009_s10 }
 0x5c2   : > { %v8682_v15 = vmax.f32 %v8658_v7, 0.0  ;;  %v8683_v45 = vmax.f32 %v8659_v55, 0.0  ;;  %v8492_v50 = vrot.slane %v10376_v17, 1  ;;  %vm15828_vm8 = vnez %v15731_v0 }
 0x5c3   : > { %vm15829_vm12 = vnez %v15733_v59  ;;  %v8613_v33 = vadd.f32 %v15090_v2, %v8589_v11  ;;  %v8488_v18 = vrot.slane %v8209_v49, 1  ;;  %v8616_v0 = vadd.f32 %v15090_v2, %v8592_v57 }
 0x5c4   : > { %v8706_v53 = vsel %vm15828_vm8, %v8682_v15, 0.0  ;;  %v8707_v21 = vsel %vm15829_vm12, %v8683_v45, 0.0  ;;  %v8591_v13 = vmul.f32 %v15075_v28, %v8543_v47  ;;  %v15830_v59 = vunpack.c.l.bf16 %v14955_v20  ;;  %v15840_v47 = vld [vmem:[#allocation24_spill] sm:$0xff]  ;;  %vm15848_vm8 = vmmov %vm15807_vm0 }
 0x5c5   : > { %v9581_v35 = vpack.c.bf16 %v8706_v53, %v8705_v38  ;;  %v9586_v62 = vpack.c.bf16 %v8708_v54, %v8707_v21  ;;  %v8614_v1 = vadd.f32 %v15090_v2, %v8590_v14  ;;  %v8489_v12 = vsel %vm15807_vm0, %v8486_v32, %v8488_v18  ;;  %vm15852_vm12 = vmmov %vm15807_vm0 }
 0x5c6   : > { %v8661_v61 = vadd.f32 %v15830_v59, %v8613_v33  ;;  %v8494_v40 = vrot.slane %v15081_v4, 1  ;;  %v15831_v8 = vunpack.c.h.bf16 %v14964_v51  ;;  %v8615_v39 = vadd.f32 %v15090_v2, %v8591_v13 }
 0x5c7   : > { %9654 = vst [vmem:[%s14449_s24 + $0x88] sm:$0xff] %v9581_v35   ;;  %9655 = vst [vmem:[%s14449_s24 + $0x90] sm:$0xff] %v9586_v62   ;;  %v8545_v37 = vadd.f32 %v8489_v12, %v14903_v34  ;;  %v8490_v44 = vrot.slane %v8212_v43, 1  ;;  %v15832_v9 = vunpack.c.h.bf16 %v14955_v20  ;;  %v9562_v24 = vunpack.c.h.bf16 %v15096_v3  ;;  %v10380_v34 = vpop.f32.mrb[164].mxu1  ;;  %v15844_v12 = vld [vmem:[#allocation14_spill] sm:$0xff] }
 0x5c8   : > { %v8664_v48 = vadd.f32 %v15831_v8, %v8616_v0  ;;  %v8685_v41 = vmax.f32 %v8661_v61, 0.0  ;;  %v8495_v32 = vsel %vm15833_vm14, %v8492_v50, %v8494_v40  ;;  %v15834_v7 = vunpack.c.l.bf16 %v14964_v51  ;;  %v8225_v20 = vpop.f32.mrb[165].mxu1 }
 0x5c9   : > { %v8662_v19 = vadd.f32 %v15832_v9, %v8614_v1  ;;  %v8593_v55 = vmul.f32 %v15075_v28, %v8545_v37  ;;  %v8548_v23 = vadd.f32 %v8495_v32, %v14912_v56  ;;  %v8491_v63 = vsel %vm15835_vm10, %v8488_v18, %v8490_v44  ;;  %v10381_v45 = vpop.f32.mrb[166].mxu1  ;;  %v15846_v37 = vld [vmem:[#allocation37_spill] sm:$0xff]  ;;  %v15849_v9 = vld [vmem:[#allocation32_spill] sm:$0xff] }
 0x5ca   : > { %v8688_v6 = vmax.f32 %v8664_v48, 0.0  ;;  %v8663_v5 = vadd.f32 %v15834_v7, %v8615_v39  ;;  %v8493_v46 = vsel %vm15836_vm11, %v8490_v44, %v8492_v50  ;;  %v8649_v29 = vunpack.c.l.bf16 %v15110_v30  ;;  %v15851_v7 = vld [vmem:[#allocation34_spill] sm:$0xff] }
 0x5cb   : > { %v8686_v38 = vmax.f32 %v8662_v19, 0.0  ;;  %vm15837_vm2 = vnez %v15454_v60  ;;  %v8617_v51 = vadd.f32 %v15090_v2, %v8593_v55  ;;  %v8596_v15 = vmul.f32 %v15075_v28, %v8548_v23  ;;  %v8228_v60 = vpop.f32.mrb[167].mxu1 }
 0x5cc   : > { %v8712_v17 = vsel %vm15837_vm2, %v8688_v6, 0.0  ;;  %v8687_v54 = vmax.f32 %v8663_v5, 0.0  ;;  %vm15838_vm1 = vnez %v15609_v26  ;;  %vm15839_vm9 = vnez %v15616_v10 }
 0x5cd   : > { %v8709_v56 = vsel %vm15838_vm1, %v8685_v41, 0.0  ;;  %v8710_v11 = vsel %vm15839_vm9, %v8686_v38, 0.0  ;;  %v8546_v49 = vadd.f32 %v8491_v63, %v14906_v22  ;;  %v8547_v57 = vadd.f32 %v8493_v46, %v14909_v36  ;;  %v15853_v38 = vld [vmem:[#allocation45_spill] sm:$0xff]  ;;  %v15854_v46 = vld [vmem:[#allocation36_spill] sm:$0xff] }
 0x5ce   : > { %vm15841_vm4 = vnez %v15840_v47  ;;  %v9591_v50 = vpack.c.bf16 %v8710_v11, %v8709_v56  ;;  %v15842_v4 = vunpack.c.l.bf16 %v14970_v52  ;;  %v8620_v21 = vadd.f32 %v15090_v2, %v8596_v15 }
 0x5cf   : > { %v8711_v14 = vsel %vm15841_vm4, %v8687_v54, 0.0  ;;  %v8594_v33 = vmul.f32 %v15075_v28, %v8546_v49  ;;  %v8595_v10 = vmul.f32 %v15075_v28, %v8547_v57  ;;  %v8496_v18 = vrot.slane %v8225_v20, 1 }
 0x5d0   : > { %v8665_v53 = vadd.f32 %v15842_v4, %v8617_v51  ;;  %v9596_v26 = vpack.c.bf16 %v8712_v17, %v8711_v14  ;;  %9656 = vst [vmem:[%s14449_s24 + $0x98] sm:$0xff] %v9591_v50   ;;  %v8668_v22 = vadd.f32 %v9554_v58, %v8620_v21  ;;  %v8500_v36 = vrot.slane %v10380_v34, 1 }
 0x5d1   : > { %v8502_v43 = vrot.slane %v10381_v45, 1  ;;  %v8498_v35 = vrot.slane %v8228_v60, 1  ;;  %v8618_v62 = vadd.f32 %v15090_v2, %v8594_v33  ;;  %v8619_v0 = vadd.f32 %v15090_v2, %v8595_v10  ;;  %v15857_v45 = vld [vmem:[#allocation27_spill] sm:$0xff] }
 0x5d2   : > { %9657 = vst [vmem:[%s14449_s24 + $0xa0] sm:$0xff] %v9596_v26   ;;  %v8497_v13 = vsel %vm15843_vm13, %v8494_v40, %v8496_v18  ;;  %v9558_v59 = vunpack.c.h.bf16 %v15043_v31  ;;  %v8689_v61 = vmax.f32 %v8665_v53, 0.0  ;;  %v8692_v1 = vmax.f32 %v8668_v22, 0.0  ;;  %v15861_v22 = vld [vmem:[#allocation33_spill] sm:$0xff] }
 0x5d3   : > { %v8549_v8 = vadd.f32 %v8497_v13, %v15844_v12  ;;  %v8503_v48 = vsel %vm15845_vm5, %v8500_v36, %v8502_v43  ;;  %v8666_v58 = vadd.f32 %v9550_v27, %v8618_v62  ;;  %v8667_v39 = vadd.f32 %v9553_v25, %v8619_v0  ;;  %v15864_v62 = vld [vmem:[#allocation30_spill] sm:$0xff]  ;;  %v15866_v13 = vld [vmem:[#allocation31_spill] sm:$0xff] }
 0x5d4   : > { %v15847_v44 = vrot.slane %v15846_v37, 1  ;;  %v8552_v40 = vadd.f32 %v8503_v48, %v15849_v9  ;;  %v8716_v32 = vsel %vm13411_vm3, %v8692_v1, 0.0  ;;  %v8499_v55 = vsel %vm15852_vm12, %v8496_v18, %v8498_v35  ;;  %v15859_v18 = vld [vmem:[#allocation35_spill] sm:$0xff] }
 0x5d5   : > { %v8597_v6 = vmul.f32 %v15075_v28, %v8549_v8  ;;  %v8690_v52 = vmax.f32 %v8666_v58, 0.0  ;;  %v8691_v27 = vmax.f32 %v8667_v39, 0.0  ;;  %v8501_v25 = vsel %vm15807_vm0, %v8498_v35, %v8500_v36 }
 0x5d6   : > { %v8529_v41 = vsel %vm15848_vm8, %v8502_v43, %v15847_v44  ;;  %v8600_v42 = vmul.f32 %v15075_v28, %v8552_v40  ;;  %v8550_v63 = vadd.f32 %v8499_v55, %v15853_v38  ;;  %v8551_v20 = vadd.f32 %v8501_v25, %v15854_v46 }
 0x5d7   : > { %v8553_v5 = vadd.f32 %v8529_v41, %v15851_v7  ;;  %v8621_v23 = vadd.f32 %v15090_v2, %v8597_v6  ;;  %v8713_v54 = vsel %vm15755_vm6, %v8689_v61, 0.0  ;;  %v8714_v15 = vsel %vm15634_vm15, %v8690_v52, 0.0 }
 0x5d8   : > { %vm15858_vm3 = vnez %v15857_v45  ;;  %v8624_v11 = vadd.f32 %v15090_v2, %v8600_v42  ;;  %v9601_v49 = vpack.c.bf16 %v8714_v15, %v8713_v54  ;;  %v9561_v47 = vunpack.c.l.bf16 %v15096_v3 }
 0x5d9   : > { %v8601_v34 = vmul.f32 %v15075_v28, %v8553_v5  ;;  %v8715_v56 = vsel %vm15858_vm3, %v8691_v27, 0.0  ;;  %v8669_v14 = vadd.f32 %v9557_v16, %v8621_v23  ;;  %v8598_v4 = vmul.f32 %v15075_v28, %v8550_v63 }
 0x5da   : > { %v9606_v57 = vpack.c.bf16 %v8716_v32, %v8715_v56  ;;  %v8672_v50 = vadd.f32 %v9562_v24, %v8624_v11  ;;  %v8599_v53 = vmul.f32 %v15075_v28, %v8551_v20  ;;  %9658 = vst [vmem:[%s14449_s24 + $0xa8] sm:$0xff] %v9601_v49   ;;  %vm15860_vm15 = vnez %v15859_v18 }
 0x5db   : > { %v8625_v60 = vadd.f32 %v15090_v2, %v8601_v34  ;;  %v8622_v33 = vadd.f32 %v15090_v2, %v8598_v4  ;;  %v8693_v10 = vmax.f32 %v8669_v14, 0.0  ;;  %vm15862_vm6 = vnez %v15861_v22 }
 0x5dc   : > { %9659 = vst [vmem:[%s14449_s24 + $0xb0] sm:$0xff] %v9606_v57   ;;  %v8696_v26 = vmax.f32 %v8672_v50, 0.0  ;;  %v8623_v31 = vadd.f32 %v15090_v2, %v8599_v53  ;;  %vm15865_vm14 = vnez %v15864_v62  ;;  %vm15867_vm10 = vnez %v15866_v13 }
 0x5dd   : > { %v8673_v21 = vadd.f32 %v8649_v29, %v8625_v60  ;;  %v8670_v3 = vadd.f32 %v9558_v59, %v8622_v33  ;;  %v8717_v35 = vsel %vm15783_vm7, %v8693_v10, 0.0 }
 0x5de   : > { %v8671_v24 = vadd.f32 %v9561_v47, %v8623_v31  ;;  %v8720_v30 = vsel %vm15862_vm6, %v8696_v26, 0.0 }
 0x5df   : > { %v8697_v16 = vmax.f32 %v8673_v21, 0.0  ;;  %v8694_v36 = vmax.f32 %v8670_v3, 0.0 }
 0x5e0   : > { %v8695_v43 = vmax.f32 %v8671_v24, 0.0 }
 0x5e1   : > { %v8721_v28 = vsel %vm15860_vm15, %v8697_v16, 0.0  ;;  %v8718_v0 = vsel %vm15865_vm14, %v8694_v36, 0.0 }
 0x5e2   : > { %v9419_v29 = vpack.c.bf16 %v8721_v28, %v8721_v28  ;;  %v8719_v59 = vsel %vm15867_vm10, %v8695_v43, 0.0  ;;  %v9611_v61 = vpack.c.bf16 %v8718_v0, %v8717_v35 }
 0x5e3   : > { %v9616_v1 = vpack.c.bf16 %v8720_v30, %v8719_v59 }
 0x5e4   : > { %8841 = vst [vmem:[%s14449_s24 + $0xc8] sm:$0xf] %v9419_v29  ;;  %9660 = vst [vmem:[%s14449_s24 + $0xb8] sm:$0xff] %v9611_v61  }
 0x5e5   : > { %9661 = vst [vmem:[%s14449_s24 + $0xc0] sm:$0xff] %v9616_v1  }
 0x5e6   : > { %11568 = shalt.err (!%p11565_p2)
}
 0x5e7   : > { %s11569_s24 = scalar_lea.hbm %s15206_s5, 3456  ;;  %s11573_s8 = scalar_lea.hbm %s15258_s4, 6912 }
 0x5e8   : > { %p11570_p13 = scmp.ne.s32.totalorder %s15206_s5, %s11569_s24  ;;  %p11574_p4 = scmp.lt.u32.totalorder %s15206_s5, %s15258_s4 }
 0x5e9   : > { %p11575_p5 = scmp.lt.u32.totalorder %s11573_s8, %s11569_s24  ;;  %p11577_p11 = scmp.lt.u32.totalorder %s11569_s24, %s15206_s5 }
 0x5ea   : > { %p11571_p6 = pnand %p11570_p13, %p15868_p0 }
 0x5eb   : > { %p11576_p8 = por %p11575_p5, %p11574_p4 }
 0x5ec   : > { %p11572_p10 = pneg %p11571_p6 }
 0x5ed   : > { %p11578_p1 = por %p11577_p11, %p11576_p8 }
 0x5ef   : > { %p11579_p3 = pnand %p11578_p1, %p11572_p10 }
 0x5f1   : > { %11582 = shalt.err (!%p11579_p3)
}
 0x5f2   : > { %s11636_s23 = smov 64   ;;  %s11637_s10 = smov 4  }
 0x5f3   : > { %11020 = dma.vmem_to_hbm [thread:$0]  (%p15868_p0), %s15208_s11, 3456, %s15206_s5, %s8843_s6, %s11636_s23, %s11636_s23, %s11637_s10  }
 0x5f4 PF: > { %s8871_s19 = sand.u32 1, %s11613_s15   ;;  %p15869_p7 = scmp.ne.s32.totalorder %s15361_s22, 0 }
 0x5f5   : > { %p15870_p9 = scmp.ge.s32.totalorder %s11625_s18, 2  ;;  %s8872_s29 = scalar_lea.sflag [#allocation5], %s8871_s19 }
 0x5f7   : > { %p11034_p12 = pnand %p15870_p9, %p15869_p7 }
 0x5f9   : > { %11608 = dma.done.wait (!%p11034_p12), %s8872_s29, 3456  }
 0x5fa   : > { %11610 = vsyncadd (!%p11034_p12), %s8872_s29, 4294963840  ;;  %p18_p2 = scmp.ge.s32.totalorder %s11773_s9, 4   ;;  %s15871_s15 = smov %s11617_s16 }
 0x5fb   : > { %s15872_s16 = smov %s11621_s17  ;;  %s15873_s17 = smov %s11789_s14 }
 0x5fc   : > { %s15874_s18 = smov %s11773_s9  ;;  %20 = sbr.rel (!%p18_p2) target bundleno = 6 (0x6), region = 93 }
 0x603   :  { %8877 = vsyncpa [#allocation4], 1 }
 0x604   :  { %8879 = vsyncpa [#allocation4 + $0x1], 1 }
 0x605   :  { %8880 = vsyncpa [#allocation7], 1 }
 0x606   :  { %8881 = vsyncpa [#allocation5], 1 }
 0x607   :  { %8883 = vsyncpa [#allocation5 + $0x1], 1 }

</bundles_post_ra>
